<compile_context>
chip_gen: v7x
topology: tpu7x:2x2x1
jax: 0.10.0
libtpu: 0.0.40
codegen_flags: <defaults>
</compile_context>

<pallas_src>
import functools
import math

import jax
import jax.numpy as jnp
from jax.experimental import pallas as pl
from jax.experimental.pallas import tpu as pltpu

EPS = 1e-5
_VMEM_LIMIT = 32 * 1024 * 1024


def _round_up(x, m):
    return ((x + m - 1) // m) * m


# ---------------------------------------------------------------------------
# Pallas kernels
# ---------------------------------------------------------------------------
def _gemm_kernel(w_ref, x_ref, s_ref, b_ref, o_ref, *, act):
    # out(N, TM) = act(scale * (W(N,K) @ X(K,TM)) + bias)   (lane-dense output)
    y = jnp.dot(w_ref[...], x_ref[...], preferred_element_type=jnp.float32)
    y = y * s_ref[...] + b_ref[...]
    if act == "relu":
        y = jnp.maximum(y, 0.0)
    elif act == "sigmoid":
        y = jax.nn.sigmoid(y)
    o_ref[...] = y.astype(o_ref.dtype)


def gemm_nm(w, x, scale, bias, act="relu"):
    """y(N, M) = act(scale * (w @ x) + bias);  w:(N,K) bf16, x:(K,M) f32."""
    N, K = w.shape
    M = x.shape[1]
    if M >= 1024:                      # big GEMMs: 2 parallel tiles (v7x 2 TCs)
        Mp = _round_up(M, 256)
        ntiles = 2
    else:                              # tiny GEMMs: single tile, no step overhead
        Mp = _round_up(M, 128)
        ntiles = 1
    TM = Mp // ntiles
    xq = jnp.pad(x, ((0, 0), (0, Mp - M))).astype(jnp.bfloat16)
    cost = pl.CostEstimate(
        flops=2 * N * K * Mp,
        transcendentals=(N * Mp if act == "sigmoid" else 0),
        bytes_accessed=2 * (N * K + K * Mp) + 4 * N * Mp + 8 * N)
    out = pl.pallas_call(
        functools.partial(_gemm_kernel, act=act),
        out_shape=jax.ShapeDtypeStruct((N, Mp), jnp.float32),
        grid=(ntiles,),
        in_specs=[
            pl.BlockSpec((N, K), lambda i: (0, 0)),
            pl.BlockSpec((K, TM), lambda i: (0, i)),
            pl.BlockSpec((N, 1), lambda i: (0, 0)),
            pl.BlockSpec((N, 1), lambda i: (0, 0)),
        ],
        out_specs=pl.BlockSpec((N, TM), lambda i: (0, i)),
        compiler_params=pltpu.CompilerParams(
            dimension_semantics=("parallel",),
            vmem_limit_bytes=_VMEM_LIMIT),
        cost_estimate=cost,
    )(w, xq, scale, bias)
    return out[:, :M]


def _cma_attn_kernel(w1_ref, s1_ref, b1_ref, w23_ref, b23_ref, x_ref, o_ref):
    # relu(bn(conv1(y)))  then  sigmoid(conv2‖conv3) — fused in one kernel.
    z = jnp.dot(w1_ref[...], x_ref[...], preferred_element_type=jnp.float32)
    z = jnp.maximum(z * s1_ref[...] + b1_ref[...], 0.0)
    a = jnp.dot(w23_ref[...], z.astype(jnp.bfloat16),
                preferred_element_type=jnp.float32)
    o_ref[...] = jax.nn.sigmoid(a + b23_ref[...])


def cma_attention(y2d, p):
    """y2d:(CC, M) -> (2*oup, M) sigmoid attention (conv2 rows then conv3 rows)."""
    CC, M = y2d.shape
    mip = p["w1"].shape[0]
    n2 = p["w23"].shape[0]
    Mp = _round_up(M, 128)
    xq = jnp.pad(y2d, ((0, 0), (0, Mp - M))).astype(jnp.bfloat16)
    cost = pl.CostEstimate(
        flops=2 * Mp * (mip * CC + n2 * mip),
        transcendentals=n2 * Mp,
        bytes_accessed=2 * (mip * CC + n2 * mip + CC * Mp) + 4 * n2 * Mp)
    out = pl.pallas_call(
        _cma_attn_kernel,
        out_shape=jax.ShapeDtypeStruct((n2, Mp), jnp.float32),
        grid=(1,),
        in_specs=[
            pl.BlockSpec((mip, CC), lambda i: (0, 0)),
            pl.BlockSpec((mip, 1), lambda i: (0, 0)),
            pl.BlockSpec((mip, 1), lambda i: (0, 0)),
            pl.BlockSpec((n2, mip), lambda i: (0, 0)),
            pl.BlockSpec((n2, 1), lambda i: (0, 0)),
            pl.BlockSpec((CC, Mp), lambda i: (0, 0)),
        ],
        out_specs=pl.BlockSpec((n2, Mp), lambda i: (0, 0)),
        compiler_params=pltpu.CompilerParams(
            dimension_semantics=("arbitrary",),
            vmem_limit_bytes=_VMEM_LIMIT),
        cost_estimate=cost,
    )(p["w1"], p["s1"], p["b1"], p["w23"], p["b23"], xq)
    return out[:, :M]


def _out_head_kernel(w1_ref, s1_ref, b1_ref, w2_ref, s2_ref, b2_ref,
                     w3_ref, b3_ref, x_ref, o_ref):
    # BasicConv2d (conv+BN, no act) x2, then Conv2d+sigmoid — all fused.
    y = jnp.dot(w1_ref[...], x_ref[...], preferred_element_type=jnp.float32)
    y = y * s1_ref[...] + b1_ref[...]
    y = jnp.dot(w2_ref[...], y.astype(jnp.bfloat16),
                preferred_element_type=jnp.float32)
    y = y * s2_ref[...] + b2_ref[...]
    y = jnp.dot(w3_ref[...], y.astype(jnp.bfloat16),
                preferred_element_type=jnp.float32)
    o_ref[...] = jax.nn.sigmoid(y + b3_ref[...])


def out_head(y_cm, p):
    """y_cm:(C, B, H, W) -> (1, B, H, W); whole `out` head in one kernel."""
    C, B, H, W = y_cm.shape
    M = B * H * W
    Mp = _round_up(M, 128)
    x = jnp.pad(y_cm.reshape(C, M), ((0, 0), (0, Mp - M))).astype(jnp.bfloat16)
    c2 = p["w1"].shape[0]
    n3 = p["w3"].shape[0]          # final conv rows padded 1 -> 8 (row 0 is real)
    cost = pl.CostEstimate(
        flops=2 * Mp * (c2 * C + C * c2 + n3 * C),
        transcendentals=n3 * Mp,
        bytes_accessed=2 * C * Mp + 4 * n3 * Mp + 2 * (2 * c2 * C + n3 * C))
    out = pl.pallas_call(
        _out_head_kernel,
        out_shape=jax.ShapeDtypeStruct((n3, Mp), jnp.float32),
        grid=(1,),
        in_specs=[
            pl.BlockSpec((c2, C), lambda i: (0, 0)),
            pl.BlockSpec((c2, 1), lambda i: (0, 0)),
            pl.BlockSpec((c2, 1), lambda i: (0, 0)),
            pl.BlockSpec((C, c2), lambda i: (0, 0)),
            pl.BlockSpec((C, 1), lambda i: (0, 0)),
            pl.BlockSpec((C, 1), lambda i: (0, 0)),
            pl.BlockSpec((n3, C), lambda i: (0, 0)),
            pl.BlockSpec((n3, 1), lambda i: (0, 0)),
            pl.BlockSpec((C, Mp), lambda i: (0, 0)),
        ],
        out_specs=pl.BlockSpec((n3, Mp), lambda i: (0, 0)),
        compiler_params=pltpu.CompilerParams(
            dimension_semantics=("arbitrary",),
            vmem_limit_bytes=_VMEM_LIMIT),
        cost_estimate=cost,
    )(p["w1"], p["s1"], p["b1"], p["w2"], p["s2"], p["b2"],
      p["w3"], p["b3"], x)
    return out[:1, :M].reshape(1, B, H, W)


def _residual_rescale_kernel(r_ref, i_ref, s_ref, o_ref):
    o_ref[...] = r_ref[...] + i_ref[...] * s_ref[...]


def fused_residual_rescale(res, ident, scale):
    """out = res + ident * scale, flattened to (rows, 128) (dense 128 lanes)."""
    shape = res.shape
    L = res.size
    Lp = _round_up(L, 8 * 128)
    rows = Lp // 128

    def flat(a):
        return jnp.pad(a.reshape(-1), (0, Lp - L)).reshape(rows, 128)

    cost = pl.CostEstimate(flops=2 * Lp, transcendentals=0,
                           bytes_accessed=4 * 4 * Lp)
    out = pl.pallas_call(
        _residual_rescale_kernel,
        out_shape=jax.ShapeDtypeStruct((rows, 128), jnp.float32),
        grid=(1,),
        in_specs=[pl.BlockSpec((rows, 128), lambda i: (0, 0))] * 3,
        out_specs=pl.BlockSpec((rows, 128), lambda i: (0, 0)),
        compiler_params=pltpu.CompilerParams(
            dimension_semantics=("arbitrary",),
            vmem_limit_bytes=_VMEM_LIMIT),
        cost_estimate=cost,
    )(flat(res), flat(ident), flat(scale))
    return out.reshape(-1)[:L].reshape(shape)


# ---------------------------------------------------------------------------
# Conv helpers (channel-major im2col is a pure reshape; GEMM is Pallas)
# ---------------------------------------------------------------------------
def _im2col_cm(x, ksize, stride, pad):
    """x:(C, B, T, H, W) -> Xcol:(C*kT*kH*kW, B*To*Ho*Wo), plus output meta."""
    C, B, T, H, W = x.shape
    kT, kH, kW = ksize
    sT, sH, sW = stride
    pT, pH, pW = pad
    xp = jnp.pad(x, ((0, 0), (0, 0), (pT, pT), (pH, pH), (pW, pW)))
    To = (T + 2 * pT - kT) // sT + 1
    Ho = (H + 2 * pH - kH) // sH + 1
    Wo = (W + 2 * pW - kW) // sW + 1
    cols = []
    for dt in range(kT):
        for dh in range(kH):
            for dw in range(kW):
                cols.append(xp[:, :,
                               dt:dt + sT * To:sT,
                               dh:dh + sH * Ho:sH,
                               dw:dw + sW * Wo:sW])
    xc = jnp.stack(cols, axis=1)            # (C, k, B, To, Ho, Wo) -> reshape only
    K = C * kT * kH * kW
    # TODO(synk): im2col window extraction stays in plain JAX; an in-kernel
    # im2col (VMEM-resident padded tile + pl.ds offset loop) would cut X-operand
    # HBM traffic by ~k times if the tensors ever get large.
    return xc.reshape(K, B * To * Ho * Wo), (B, To, Ho, Wo)


def conv3d_bn_relu_multi(xs, layer, ksize, stride, pad):
    """One shared BasicConv3d (conv+BN+ReLU) applied to several inputs with a
    single batched GEMM (im2col matrices concatenated along M)."""
    cols, metas = [], []
    for x in xs:
        xm, meta = _im2col_cm(x, ksize, stride, pad)
        cols.append(xm)
        metas.append(meta)
    xcat = cols[0] if len(cols) == 1 else jnp.concatenate(cols, axis=1)
    y = gemm_nm(layer["w"], xcat, layer["s"], layer["b"], act="relu")
    Cout = layer["w"].shape[0]
    outs, off = [], 0
    for xm, (B, To, Ho, Wo) in zip(cols, metas):
        m = xm.shape[1]
        outs.append(y[:, off:off + m].reshape(Cout, B, To, Ho, Wo))
        off += m
    return outs


# ---------------------------------------------------------------------------
# Bilinear 2x upsample, align_corners=True (plain-JAX gather + lerp glue)
# ---------------------------------------------------------------------------
def upsample2x_bilinear_ac(x):
    H, W = x.shape[-2], x.shape[-1]

    def axis_coords(n_in, n_out):
        if n_in == 1:
            z = jnp.zeros((n_out,), jnp.int32)
            return z, z, jnp.zeros((n_out,), jnp.float32)
        src = jnp.arange(n_out, dtype=jnp.float32) * (n_in - 1) / (n_out - 1)
        i0 = jnp.floor(src).astype(jnp.int32)
        i1 = jnp.minimum(i0 + 1, n_in - 1)
        return i0, i1, src - i0.astype(jnp.float32)

    h0, h1, fh = axis_coords(H, 2 * H)
    w0, w1, fw = axis_coords(W, 2 * W)
    top = jnp.take(x, h0, axis=-2)
    bot = jnp.take(x, h1, axis=-2)
    rows = top * (1.0 - fh)[:, None] + bot * fh[:, None]
    left = jnp.take(rows, w0, axis=-1)
    right = jnp.take(rows, w1, axis=-1)
    return left * (1.0 - fw) + right * fw


# ---------------------------------------------------------------------------
# CMA_variant block (attention + residual) and Decoder forward
# ---------------------------------------------------------------------------
def cma_block(residual, xcat, p):
    """Returns residual + CMA_variant(flatten_CT(xcat)) in (C,B,T,H,W) layout."""
    C, B, T, H, W = xcat.shape
    CC = C * T
    ident = jnp.transpose(xcat, (0, 2, 1, 3, 4)).reshape(CC, B, H, W)
    res_cc = jnp.transpose(residual, (0, 2, 1, 3, 4)).reshape(CC, B, H, W)
    x_h = jnp.mean(ident, axis=3)                         # pool over W: (CC,B,H)
    x_w = jnp.mean(ident, axis=2)                         # pool over H: (CC,B,W)
    y = jnp.concatenate([x_h, x_w], axis=2).reshape(CC, B * (H + W))
    att = cma_attention(y, p)                             # (2*oup, B*(H+W))
    oup = att.shape[0] // 2
    att = att.reshape(2 * oup, B, H + W)
    xh = att[:oup, :, :H]                                 # conv2 on the H part
    xw = att[oup:, :, H:]                                 # conv3 on the W part
    scale = xh[:, :, :, None] * xw[:, :, None, :]         # (oup, B, H, W)
    out = fused_residual_rescale(res_cc, ident, scale)    # res + ident*xh*xw
    return out.reshape(C, T, B, H, W).transpose(0, 2, 1, 3, 4)


def decoder_forward(prep, x0, x1, x2, x3, x4):
    # convert NCTHW -> channel-major (C, B, T, H, W)
    to_cm = lambda x: jnp.transpose(x, (1, 0, 2, 3, 4))
    x0, x1, x2, x3, x4 = map(to_cm, (x0, x1, x2, x3, x4))

    def down_multi(xs):
        return conv3d_bn_relu_multi(xs, prep["down"], (1, 3, 3), (1, 2, 2), (0, 1, 1))

    def up_multi(xs):
        ups = [upsample2x_bilinear_ac(x) for x in xs]
        return conv3d_bn_relu_multi(ups, prep["up"], (3, 3, 3), (1, 1, 1), (1, 1, 1))

    def cat_seq(x, p):
        y = conv3d_bn_relu_multi([x], p[0], (3, 3, 3), (1, 1, 1), (1, 1, 1))[0]
        return conv3d_bn_relu_multi([y], p[1], (1, 1, 1), (1, 1, 1), (0, 0, 0))[0]

    def down_seq(x, p, last_k):
        y = conv3d_bn_relu_multi([x], p[0], (3, 3, 3), (1, 1, 1), (1, 1, 1))[0]
        y = conv3d_bn_relu_multi([y], p[1], (4, 3, 3), (2, 1, 1), (0, 1, 1))[0]
        return conv3d_bn_relu_multi([y], p[2], last_k, (1, 1, 1), (0, 0, 0))[0]

    # shared-weight downsample fan-out: 6 convs -> 3 batched GEMMs
    x0_down1, x1_down2, x2_down3 = down_multi([x0, x1, x2])
    x0_down2, x1_down3 = down_multi([x0_down1, x1_down2])
    (x0_down3,) = down_multi([x0_down2])

    # ---- level 3 ----
    (x4_upconv,) = up_multi([x4])
    residual3 = jnp.concatenate([x4_upconv, x3, x2_down3, x1_down3, x0_down3], axis=2)
    x3c = cat_seq(residual3, prep["conv_cat_3"])
    x3n = down_seq(cma_block(residual3, x3c, prep["SE_3"]), prep["downT3"], (3, 1, 1))

    # ---- level 2 ----
    x3_upconv, x4_upconv = up_multi([x3n, x4_upconv])
    residual2 = jnp.concatenate([x4_upconv, x3_upconv, x2, x1_down2, x0_down2], axis=2)
    x2c = cat_seq(residual2, prep["conv_cat_2"])
    x2n = down_seq(cma_block(residual2, x2c, prep["SE_2"]), prep["downT2"], (3, 1, 1))

    # ---- level 1 ----
    x2_upconv, x3_upconv, x4_upconv = up_multi([x2n, x3_upconv, x4_upconv])
    residual1 = jnp.concatenate([x4_upconv, x3_upconv, x2_upconv, x1, x0_down1], axis=2)
    x1c = cat_seq(residual1, prep["conv_cat_1"])
    x1n = down_seq(cma_block(residual1, x1c, prep["SE_1"]), prep["downT1"], (3, 1, 1))

    # ---- level 0 ----
    x1_upconv, x2_upconv, x3_upconv, x4_upconv = up_multi(
        [x1n, x2_upconv, x3_upconv, x4_upconv])
    residual0 = jnp.concatenate([x0, x4_upconv, x3_upconv, x2_upconv, x1_upconv], axis=2)
    x0c = cat_seq(residual0, prep["conv_cat_0"])
    x0n = down_seq(cma_block(residual0, x0c, prep["SE_0"]), prep["downfinal"], (4, 1, 1))

    y = x0n[:, :, 0, :, :]                    # squeeze(2): downfinal leaves T == 1
    out = out_head(y, prep["out"])            # (1, B, H, W), final sigmoid fused
    return jnp.transpose(out, (1, 0, 2, 3))   # back to (B, 1, H, W)


# ---------------------------------------------------------------------------
# Parameter preparation (hoisted out of the jitted forward)
# ---------------------------------------------------------------------------
def prepare_decoder_params(params):
    """Fold BN (inference stats 0/1), reshape weights to (Cout, K) GEMM form,
    pre-concat CMA conv2/conv3 weights, cast MXU operands to bf16."""
    bf = jnp.bfloat16

    def prep3d(p):
        w = p["w"]
        cout = w.shape[0]
        s = p["g"] / jnp.sqrt(1.0 + EPS)            # BN: mean=0, var=1
        b = p["b"] * s + p["be"]
        return {"w": w.reshape(cout, -1).astype(bf),
                "s": s.reshape(cout, 1).astype(jnp.float32),
                "b": b.reshape(cout, 1).astype(jnp.float32)}

    prep = {
        "down": prep3d(params["conv_downsample"]),
        "up": prep3d(params["conv_upsample"]),
    }
    for name in ["conv_cat_3", "conv_cat_2", "conv_cat_1", "conv_cat_0",
                 "downT3", "downT2", "downT1", "downfinal"]:
        prep[name] = [prep3d(q) for q in params[name]]

    for name in ["SE_3", "SE_2", "SE_1", "SE_0"]:
        q = params[name]
        mip, inp = q["conv1_w"].shape[:2]
        oup = q["conv2_w"].shape[0]
        s1 = q["bn1_g"] / jnp.sqrt(1.0 + EPS)
        prep[name] = {
            "w1": q["conv1_w"].reshape(mip, inp).astype(bf),
            "s1": s1.reshape(mip, 1),
            "b1": (q["conv1_b"] * s1 + q["bn1_b"]).reshape(mip, 1),
            "w23": jnp.concatenate([q["conv2_w"].reshape(oup, mip),
                                    q["conv3_w"].reshape(oup, mip)],
                                   axis=0).astype(bf),
            "b23": jnp.concatenate([q["conv2_b"], q["conv3_b"]],
                                   axis=0).reshape(2 * oup, 1),
        }

    q = params["out"]
    c2, c = q["w1"].shape[:2]
    w3 = jnp.pad(q["w3"].reshape(1, c), ((0, 7), (0, 0)))   # sublane-pad N 1 -> 8
    b3 = jnp.pad(q["b3"], (0, 7))
    prep["out"] = {
        "w1": q["w1"].reshape(c2, c).astype(bf),
        "s1": (q["bn1_g"] / jnp.sqrt(1.0 + EPS)).reshape(c2, 1),
        "b1": q["bn1_b"].reshape(c2, 1),
        "w2": q["w2"].reshape(c, c2).astype(bf),
        "s2": (q["bn2_g"] / jnp.sqrt(1.0 + EPS)).reshape(c, 1),
        "b2": q["bn2_b"].reshape(c, 1),
        "w3": w3.astype(bf),
        "b3": b3.reshape(8, 1),
    }
    return prep


# ---------------------------------------------------------------------------
# Deterministic parameter init (synthetic; superD*/superout*/downT0 unused)
# ---------------------------------------------------------------------------
class KeyGen:
    def __init__(self, seed):
        self.key = jax.random.PRNGKey(seed)

    def __call__(self):
        self.key, sub = jax.random.split(self.key)
        return sub


def init_bconv3d(kg, cin, cout, ks):
    fan_in = cin * ks[0] * ks[1] * ks[2]
    return {
        "w": jax.random.normal(kg(), (cout, cin, *ks), jnp.float32) / math.sqrt(fan_in),
        "b": jnp.full((cout,), 0.01, jnp.float32),
        "g": jnp.ones((cout,), jnp.float32),
        "be": jnp.zeros((cout,), jnp.float32),
    }


def init_cma(kg, inp, oup):
    mip = max(8, inp)
    return {
        "conv1_w": jax.random.normal(kg(), (mip, inp, 1, 1), jnp.float32) / math.sqrt(inp),
        "conv1_b": jnp.zeros((mip,), jnp.float32),
        "bn1_g": jnp.ones((mip,), jnp.float32),
        "bn1_b": jnp.zeros((mip,), jnp.float32),
        "conv2_w": jax.random.normal(kg(), (oup, mip, 1, 1), jnp.float32) / math.sqrt(mip),
        "conv2_b": jnp.zeros((oup,), jnp.float32),
        "conv3_w": jax.random.normal(kg(), (oup, mip, 1, 1), jnp.float32) / math.sqrt(mip),
        "conv3_b": jnp.zeros((oup,), jnp.float32),
    }


def init_out_head(kg, c):
    return {
        "w1": jax.random.normal(kg(), (2 * c, c, 1, 1), jnp.float32) / math.sqrt(c),
        "bn1_g": jnp.ones((2 * c,), jnp.float32),
        "bn1_b": jnp.zeros((2 * c,), jnp.float32),
        "w2": jax.random.normal(kg(), (c, 2 * c, 1, 1), jnp.float32) / math.sqrt(2 * c),
        "bn2_g": jnp.ones((c,), jnp.float32),
        "bn2_b": jnp.zeros((c,), jnp.float32),
        "w3": jax.random.normal(kg(), (1, c, 1, 1), jnp.float32) / math.sqrt(c),
        "b3": jnp.zeros((1,), jnp.float32),
    }


def init_decoder_params(channel, seed=0):
    kg = KeyGen(seed)
    C = channel
    p = {
        "conv_upsample": init_bconv3d(kg, C, C, (3, 3, 3)),
        "conv_downsample": init_bconv3d(kg, C, C, (1, 3, 3)),
    }
    for name in ["conv_cat_3", "conv_cat_2", "conv_cat_1", "conv_cat_0"]:
        p[name] = [init_bconv3d(kg, C, C, (3, 3, 3)), init_bconv3d(kg, C, C, (1, 1, 1))]
    for name in ["downT3", "downT2", "downT1"]:
        p[name] = [init_bconv3d(kg, C, C, (3, 3, 3)),
                   init_bconv3d(kg, C, C, (4, 3, 3)),
                   init_bconv3d(kg, C, C, (3, 1, 1))]
    p["downfinal"] = [init_bconv3d(kg, C, C, (3, 3, 3)),
                      init_bconv3d(kg, C, C, (4, 3, 3)),
                      init_bconv3d(kg, C, C, (4, 1, 1))]
    for name in ["SE_3", "SE_2", "SE_1", "SE_0"]:
        p[name] = init_cma(kg, 10 * C, 10 * C)
    p["out"] = init_out_head(kg, C)
    return p


# ---------------------------------------------------------------------------
if __name__ == "__main__":
    channel = 4
    B = 2
    params = init_decoder_params(channel, seed=0)
    prep = prepare_decoder_params(params)

    key = jax.random.PRNGKey(0)
    k0, k1, k2, k3, k4 = jax.random.split(key, 5)
    # temporal dim T must be 2 (forward concatenates 5 streams -> 10*channel for SE)
    x0 = jax.random.normal(k0, (B, channel, 2, 16, 16), jnp.float32)
    x1 = jax.random.normal(k1, (B, channel, 2, 8, 8), jnp.float32)
    x2 = jax.random.normal(k2, (B, channel, 2, 4, 4), jnp.float32)
    x3 = jax.random.normal(k3, (B, channel, 2, 2, 2), jnp.float32)
    x4 = jax.random.normal(k4, (B, channel, 2, 1, 1), jnp.float32)

    fwd = jax.jit(decoder_forward)
    out = fwd(prep, x0, x1, x2, x3, x4)
    jax.block_until_ready(out)
    assert out.shape == (B, 1, 16, 16), out.shape
    assert bool(jnp.all(jnp.isfinite(out)))
    print("KERNEL_OK")
</pallas_src>

<mosaic_0001>
module attributes {stable_mosaic.version = 11 : i64} {
  func.func @_gemm_kernel(%arg0: i32, %arg1: memref<4x36xbf16, #tpu.memory_space<vmem>>, %arg2: memref<36x384xbf16, #tpu.memory_space<vmem>>, %arg3: memref<4x1xf32, #tpu.memory_space<vmem>>, %arg4: memref<4x1xf32, #tpu.memory_space<vmem>>, %arg5: memref<4x384xf32, #tpu.memory_space<vmem>>) attributes {dimension_semantics = [#tpu.dimension_semantics<parallel>], iteration_bounds = array<i64: 1>, scalar_prefetch = 0 : i64, scratch_operands = 0 : i64, tpu.core_type = #tpu.core_type<tc>, window_params = [{pipeline_mode = #tpu.pipeline_mode<synchronous>, transform_indices = @transform_0, window_bounds = array<i64: 4, 36>}, {transform_indices = @transform_1, window_bounds = array<i64: 36, 384>}, {pipeline_mode = #tpu.pipeline_mode<synchronous>, transform_indices = @transform_2, window_bounds = array<i64: 4, 1>}, {pipeline_mode = #tpu.pipeline_mode<synchronous>, transform_indices = @transform_3, window_bounds = array<i64: 4, 1>}, {transform_indices = @transform_4, window_bounds = array<i64: 4, 384>}]} {
    %c0 = arith.constant 0 : index
    %c0_0 = arith.constant 0 : index
    %0 = vector.load %arg1[%c0, %c0_0] : memref<4x36xbf16, #tpu.memory_space<vmem>>, vector<4x36xbf16>
    %c0_1 = arith.constant 0 : index
    %c0_2 = arith.constant 0 : index
    %1 = vector.load %arg2[%c0_1, %c0_2] : memref<36x384xbf16, #tpu.memory_space<vmem>>, vector<36x384xbf16>
    %cst = arith.constant dense<0.000000e+00> : vector<4x384xf32>
    %2 = tpu.matmul %0, %1, %cst {dimension_numbers = #tpu.dot_dimension_numbers<[1], [0], [0], [1], [0, 0, 1, 1], [], []>} : vector<4x36xbf16>, vector<36x384xbf16>, vector<4x384xf32> -> vector<4x384xf32>
    %c0_3 = arith.constant 0 : index
    %c0_4 = arith.constant 0 : index
    %3 = vector.load %arg3[%c0_3, %c0_4] : memref<4x1xf32, #tpu.memory_space<vmem>>, vector<4x1xf32>
    %4 = vector.broadcast %3 : vector<4x1xf32> to vector<4x384xf32>
    %5 = arith.mulf %2, %4 : vector<4x384xf32>
    %c0_5 = arith.constant 0 : index
    %c0_6 = arith.constant 0 : index
    %6 = vector.load %arg4[%c0_5, %c0_6] : memref<4x1xf32, #tpu.memory_space<vmem>>, vector<4x1xf32>
    %7 = vector.broadcast %6 : vector<4x1xf32> to vector<4x384xf32>
    %8 = arith.addf %5, %7 : vector<4x384xf32>
    %cst_7 = arith.constant 0.000000e+00 : f32
    %9 = vector.broadcast %cst_7 : f32 to vector<4x384xf32>
    %10 = arith.maximumf %8, %9 : vector<4x384xf32>
    %c0_8 = arith.constant 0 : index
    %c0_9 = arith.constant 0 : index
    %11 = vector.load %arg5[%c0_8, %c0_9] : memref<4x384xf32, #tpu.memory_space<vmem>>, vector<4x384xf32>
    tpu.vector_store %arg5[%c0_8, %c0_9], %10 {strides = array<i32>} : memref<4x384xf32, #tpu.memory_space<vmem>>, vector<4x384xf32>,
    return
  }
  func.func @transform_0(%arg0: i32) -> (i32, i32) {
    %c0_i32 = arith.constant 0 : i32
    %c0_i32_0 = arith.constant 0 : i32
    %c0_i32_1 = arith.constant 0 : i32
    return %c0_i32, %c0_i32_0 : i32, i32
  }
  func.func @transform_1(%arg0: i32) -> (i32, i32) {
    %c0_i32 = arith.constant 0 : i32
    %c0_i32_0 = arith.constant 0 : i32
    return %c0_i32, %arg0 : i32, i32
  }
  func.func @transform_2(%arg0: i32) -> (i32, i32) {
    %c0_i32 = arith.constant 0 : i32
    %c0_i32_0 = arith.constant 0 : i32
    %c0_i32_1 = arith.constant 0 : i32
    return %c0_i32, %c0_i32_0 : i32, i32
  }
  func.func @transform_3(%arg0: i32) -> (i32, i32) {
    %c0_i32 = arith.constant 0 : i32
    %c0_i32_0 = arith.constant 0 : i32
    %c0_i32_1 = arith.constant 0 : i32
    return %c0_i32, %c0_i32_0 : i32, i32
  }
  func.func @transform_4(%arg0: i32) -> (i32, i32) {
    %c0_i32 = arith.constant 0 : i32
    %c0_i32_0 = arith.constant 0 : i32
    return %c0_i32, %arg0 : i32, i32
  }
}

module attributes {stable_mosaic.version = 11 : i64} {
  func.func @_gemm_kernel(%arg0: i32, %arg1: memref<4x36xbf16, #tpu.memory_space<vmem>>, %arg2: memref<36x128xbf16, #tpu.memory_space<vmem>>, %arg3: memref<4x1xf32, #tpu.memory_space<vmem>>, %arg4: memref<4x1xf32, #tpu.memory_space<vmem>>, %arg5: memref<4x128xf32, #tpu.memory_space<vmem>>) attributes {dimension_semantics = [#tpu.dimension_semantics<parallel>], iteration_bounds = array<i64: 1>, scalar_prefetch = 0 : i64, scratch_operands = 0 : i64, tpu.core_type = #tpu.core_type<tc>, window_params = [{pipeline_mode = #tpu.pipeline_mode<synchronous>, transform_indices = @transform_0, window_bounds = array<i64: 4, 36>}, {transform_indices = @transform_1, window_bounds = array<i64: 36, 128>}, {pipeline_mode = #tpu.pipeline_mode<synchronous>, transform_indices = @transform_2, window_bounds = array<i64: 4, 1>}, {pipeline_mode = #tpu.pipeline_mode<synchronous>, transform_indices = @transform_3, window_bounds = array<i64: 4, 1>}, {transform_indices = @transform_4, window_bounds = array<i64: 4, 128>}]} {
    %c0 = arith.constant 0 : index
    %c0_0 = arith.constant 0 : index
    %0 = vector.load %arg1[%c0, %c0_0] : memref<4x36xbf16, #tpu.memory_space<vmem>>, vector<4x36xbf16>
    %c0_1 = arith.constant 0 : index
    %c0_2 = arith.constant 0 : index
    %1 = vector.load %arg2[%c0_1, %c0_2] : memref<36x128xbf16, #tpu.memory_space<vmem>>, vector<36x128xbf16>
    %cst = arith.constant dense<0.000000e+00> : vector<4x128xf32>
    %2 = tpu.matmul %0, %1, %cst {dimension_numbers = #tpu.dot_dimension_numbers<[1], [0], [0], [1], [0, 0, 1, 1], [], []>} : vector<4x36xbf16>, vector<36x128xbf16>, vector<4x128xf32> -> vector<4x128xf32>
    %c0_3 = arith.constant 0 : index
    %c0_4 = arith.constant 0 : index
    %3 = vector.load %arg3[%c0_3, %c0_4] : memref<4x1xf32, #tpu.memory_space<vmem>>, vector<4x1xf32>
    %4 = vector.broadcast %3 : vector<4x1xf32> to vector<4x128xf32>
    %5 = arith.mulf %2, %4 : vector<4x128xf32>
    %c0_5 = arith.constant 0 : index
    %c0_6 = arith.constant 0 : index
    %6 = vector.load %arg4[%c0_5, %c0_6] : memref<4x1xf32, #tpu.memory_space<vmem>>, vector<4x1xf32>
    %7 = vector.broadcast %6 : vector<4x1xf32> to vector<4x128xf32>
    %8 = arith.addf %5, %7 : vector<4x128xf32>
    %cst_7 = arith.constant 0.000000e+00 : f32
    %9 = vector.broadcast %cst_7 : f32 to vector<4x128xf32>
    %10 = arith.maximumf %8, %9 : vector<4x128xf32>
    %c0_8 = arith.constant 0 : index
    %c0_9 = arith.constant 0 : index
    %11 = vector.load %arg5[%c0_8, %c0_9] : memref<4x128xf32, #tpu.memory_space<vmem>>, vector<4x128xf32>
    tpu.vector_store %arg5[%c0_8, %c0_9], %10 {strides = array<i32>} : memref<4x128xf32, #tpu.memory_space<vmem>>, vector<4x128xf32>,
    return
  }
  func.func @transform_0(%arg0: i32) -> (i32, i32) {
    %c0_i32 = arith.constant 0 : i32
    %c0_i32_0 = arith.constant 0 : i32
    %c0_i32_1 = arith.constant 0 : i32
    return %c0_i32, %c0_i32_0 : i32, i32
  }
  func.func @transform_1(%arg0: i32) -> (i32, i32) {
    %c0_i32 = arith.constant 0 : i32
    %c0_i32_0 = arith.constant 0 : i32
    return %c0_i32, %arg0 : i32, i32
  }
  func.func @transform_2(%arg0: i32) -> (i32, i32) {
    %c0_i32 = arith.constant 0 : i32
    %c0_i32_0 = arith.constant 0 : i32
    %c0_i32_1 = arith.constant 0 : i32
    return %c0_i32, %c0_i32_0 : i32, i32
  }
  func.func @transform_3(%arg0: i32) -> (i32, i32) {
    %c0_i32 = arith.constant 0 : i32
    %c0_i32_0 = arith.constant 0 : i32
    %c0_i32_1 = arith.constant 0 : i32
    return %c0_i32, %c0_i32_0 : i32, i32
  }
  func.func @transform_4(%arg0: i32) -> (i32, i32) {
    %c0_i32 = arith.constant 0 : i32
    %c0_i32_0 = arith.constant 0 : i32
    return %c0_i32, %arg0 : i32, i32
  }
}

module attributes {stable_mosaic.version = 11 : i64} {
  func.func @_gemm_kernel(%arg0: i32, %arg1: memref<4x108xbf16, #tpu.memory_space<vmem>>, %arg2: memref<108x128xbf16, #tpu.memory_space<vmem>>, %arg3: memref<4x1xf32, #tpu.memory_space<vmem>>, %arg4: memref<4x1xf32, #tpu.memory_space<vmem>>, %arg5: memref<4x128xf32, #tpu.memory_space<vmem>>) attributes {dimension_semantics = [#tpu.dimension_semantics<parallel>], iteration_bounds = array<i64: 1>, scalar_prefetch = 0 : i64, scratch_operands = 0 : i64, tpu.core_type = #tpu.core_type<tc>, window_params = [{pipeline_mode = #tpu.pipeline_mode<synchronous>, transform_indices = @transform_0, window_bounds = array<i64: 4, 108>}, {transform_indices = @transform_1, window_bounds = array<i64: 108, 128>}, {pipeline_mode = #tpu.pipeline_mode<synchronous>, transform_indices = @transform_2, window_bounds = array<i64: 4, 1>}, {pipeline_mode = #tpu.pipeline_mode<synchronous>, transform_indices = @transform_3, window_bounds = array<i64: 4, 1>}, {transform_indices = @transform_4, window_bounds = array<i64: 4, 128>}]} {
    %c0 = arith.constant 0 : index
    %c0_0 = arith.constant 0 : index
    %0 = vector.load %arg1[%c0, %c0_0] : memref<4x108xbf16, #tpu.memory_space<vmem>>, vector<4x108xbf16>
    %c0_1 = arith.constant 0 : index
    %c0_2 = arith.constant 0 : index
    %1 = vector.load %arg2[%c0_1, %c0_2] : memref<108x128xbf16, #tpu.memory_space<vmem>>, vector<108x128xbf16>
    %cst = arith.constant dense<0.000000e+00> : vector<4x128xf32>
    %2 = tpu.matmul %0, %1, %cst {dimension_numbers = #tpu.dot_dimension_numbers<[1], [0], [0], [1], [0, 0, 1, 1], [], []>} : vector<4x108xbf16>, vector<108x128xbf16>, vector<4x128xf32> -> vector<4x128xf32>
    %c0_3 = arith.constant 0 : index
    %c0_4 = arith.constant 0 : index
    %3 = vector.load %arg3[%c0_3, %c0_4] : memref<4x1xf32, #tpu.memory_space<vmem>>, vector<4x1xf32>
    %4 = vector.broadcast %3 : vector<4x1xf32> to vector<4x128xf32>
    %5 = arith.mulf %2, %4 : vector<4x128xf32>
    %c0_5 = arith.constant 0 : index
    %c0_6 = arith.constant 0 : index
    %6 = vector.load %arg4[%c0_5, %c0_6] : memref<4x1xf32, #tpu.memory_space<vmem>>, vector<4x1xf32>
    %7 = vector.broadcast %6 : vector<4x1xf32> to vector<4x128xf32>
    %8 = arith.addf %5, %7 : vector<4x128xf32>
    %cst_7 = arith.constant 0.000000e+00 : f32
    %9 = vector.broadcast %cst_7 : f32 to vector<4x128xf32>
    %10 = arith.maximumf %8, %9 : vector<4x128xf32>
    %c0_8 = arith.constant 0 : index
    %c0_9 = arith.constant 0 : index
    %11 = vector.load %arg5[%c0_8, %c0_9] : memref<4x128xf32, #tpu.memory_space<vmem>>, vector<4x128xf32>
    tpu.vector_store %arg5[%c0_8, %c0_9], %10 {strides = array<i32>} : memref<4x128xf32, #tpu.memory_space<vmem>>, vector<4x128xf32>,
    return
  }
  func.func @transform_0(%arg0: i32) -> (i32, i32) {
    %c0_i32 = arith.constant 0 : i32
    %c0_i32_0 = arith.constant 0 : i32
    %c0_i32_1 = arith.constant 0 : i32
    return %c0_i32, %c0_i32_0 : i32, i32
  }
  func.func @transform_1(%arg0: i32) -> (i32, i32) {
    %c0_i32 = arith.constant 0 : i32
    %c0_i32_0 = arith.constant 0 : i32
    return %c0_i32, %arg0 : i32, i32
  }
  func.func @transform_2(%arg0: i32) -> (i32, i32) {
    %c0_i32 = arith.constant 0 : i32
    %c0_i32_0 = arith.constant 0 : i32
    %c0_i32_1 = arith.constant 0 : i32
    return %c0_i32, %c0_i32_0 : i32, i32
  }
  func.func @transform_3(%arg0: i32) -> (i32, i32) {
    %c0_i32 = arith.constant 0 : i32
    %c0_i32_0 = arith.constant 0 : i32
    %c0_i32_1 = arith.constant 0 : i32
    return %c0_i32, %c0_i32_0 : i32, i32
  }
  func.func @transform_4(%arg0: i32) -> (i32, i32) {
    %c0_i32 = arith.constant 0 : i32
    %c0_i32_0 = arith.constant 0 : i32
    return %c0_i32, %arg0 : i32, i32
  }
}

module attributes {stable_mosaic.version = 11 : i64} {
  func.func @_gemm_kernel(%arg0: i32, %arg1: memref<4x4xbf16, #tpu.memory_space<vmem>>, %arg2: memref<4x128xbf16, #tpu.memory_space<vmem>>, %arg3: memref<4x1xf32, #tpu.memory_space<vmem>>, %arg4: memref<4x1xf32, #tpu.memory_space<vmem>>, %arg5: memref<4x128xf32, #tpu.memory_space<vmem>>) attributes {dimension_semantics = [#tpu.dimension_semantics<parallel>], iteration_bounds = array<i64: 1>, scalar_prefetch = 0 : i64, scratch_operands = 0 : i64, tpu.core_type = #tpu.core_type<tc>, window_params = [{pipeline_mode = #tpu.pipeline_mode<synchronous>, transform_indices = @transform_0, window_bounds = array<i64: 4, 4>}, {transform_indices = @transform_1, window_bounds = array<i64: 4, 128>}, {pipeline_mode = #tpu.pipeline_mode<synchronous>, transform_indices = @transform_2, window_bounds = array<i64: 4, 1>}, {pipeline_mode = #tpu.pipeline_mode<synchronous>, transform_indices = @transform_3, window_bounds = array<i64: 4, 1>}, {transform_indices = @transform_4, window_bounds = array<i64: 4, 128>}]} {
    %c0 = arith.constant 0 : index
    %c0_0 = arith.constant 0 : index
    %0 = vector.load %arg1[%c0, %c0_0] : memref<4x4xbf16, #tpu.memory_space<vmem>>, vector<4x4xbf16>
    %c0_1 = arith.constant 0 : index
    %c0_2 = arith.constant 0 : index
    %1 = vector.load %arg2[%c0_1, %c0_2] : memref<4x128xbf16, #tpu.memory_space<vmem>>, vector<4x128xbf16>
    %cst = arith.constant dense<0.000000e+00> : vector<4x128xf32>
    %2 = tpu.matmul %0, %1, %cst {dimension_numbers = #tpu.dot_dimension_numbers<[1], [0], [0], [1], [0, 0, 1, 1], [], []>} : vector<4x4xbf16>, vector<4x128xbf16>, vector<4x128xf32> -> vector<4x128xf32>
    %c0_3 = arith.constant 0 : index
    %c0_4 = arith.constant 0 : index
    %3 = vector.load %arg3[%c0_3, %c0_4] : memref<4x1xf32, #tpu.memory_space<vmem>>, vector<4x1xf32>
    %4 = vector.broadcast %3 : vector<4x1xf32> to vector<4x128xf32>
    %5 = arith.mulf %2, %4 : vector<4x128xf32>
    %c0_5 = arith.constant 0 : index
    %c0_6 = arith.constant 0 : index
    %6 = vector.load %arg4[%c0_5, %c0_6] : memref<4x1xf32, #tpu.memory_space<vmem>>, vector<4x1xf32>
    %7 = vector.broadcast %6 : vector<4x1xf32> to vector<4x128xf32>
    %8 = arith.addf %5, %7 : vector<4x128xf32>
    %cst_7 = arith.constant 0.000000e+00 : f32
    %9 = vector.broadcast %cst_7 : f32 to vector<4x128xf32>
    %10 = arith.maximumf %8, %9 : vector<4x128xf32>
    %c0_8 = arith.constant 0 : index
    %c0_9 = arith.constant 0 : index
    %11 = vector.load %arg5[%c0_8, %c0_9] : memref<4x128xf32, #tpu.memory_space<vmem>>, vector<4x128xf32>
    tpu.vector_store %arg5[%c0_8, %c0_9], %10 {strides = array<i32>} : memref<4x128xf32, #tpu.memory_space<vmem>>, vector<4x128xf32>,
    return
  }
  func.func @transform_0(%arg0: i32) -> (i32, i32) {
    %c0_i32 = arith.constant 0 : i32
    %c0_i32_0 = arith.constant 0 : i32
    %c0_i32_1 = arith.constant 0 : i32
    return %c0_i32, %c0_i32_0 : i32, i32
  }
  func.func @transform_1(%arg0: i32) -> (i32, i32) {
    %c0_i32 = arith.constant 0 : i32
    %c0_i32_0 = arith.constant 0 : i32
    return %c0_i32, %arg0 : i32, i32
  }
  func.func @transform_2(%arg0: i32) -> (i32, i32) {
    %c0_i32 = arith.constant 0 : i32
    %c0_i32_0 = arith.constant 0 : i32
    %c0_i32_1 = arith.constant 0 : i32
    return %c0_i32, %c0_i32_0 : i32, i32
  }
  func.func @transform_3(%arg0: i32) -> (i32, i32) {
    %c0_i32 = arith.constant 0 : i32
    %c0_i32_0 = arith.constant 0 : i32
    %c0_i32_1 = arith.constant 0 : i32
    return %c0_i32, %c0_i32_0 : i32, i32
  }
  func.func @transform_4(%arg0: i32) -> (i32, i32) {
    %c0_i32 = arith.constant 0 : i32
    %c0_i32_0 = arith.constant 0 : i32
    return %c0_i32, %arg0 : i32, i32
  }
}

module attributes {stable_mosaic.version = 11 : i64} {
  func.func @_cma_attn_kernel(%arg0: i32, %arg1: memref<40x40xbf16, #tpu.memory_space<vmem>>, %arg2: memref<40x1xf32, #tpu.memory_space<vmem>>, %arg3: memref<40x1xf32, #tpu.memory_space<vmem>>, %arg4: memref<80x40xbf16, #tpu.memory_space<vmem>>, %arg5: memref<80x1xf32, #tpu.memory_space<vmem>>, %arg6: memref<40x128xbf16, #tpu.memory_space<vmem>>, %arg7: memref<80x128xf32, #tpu.memory_space<vmem>>) attributes {dimension_semantics = [#tpu.dimension_semantics<arbitrary>], iteration_bounds = array<i64: 1>, scalar_prefetch = 0 : i64, scratch_operands = 0 : i64, tpu.core_type = #tpu.core_type<tc>, window_params = [{pipeline_mode = #tpu.pipeline_mode<synchronous>, transform_indices = @transform_0, window_bounds = array<i64: 40, 40>}, {pipeline_mode = #tpu.pipeline_mode<synchronous>, transform_indices = @transform_1, window_bounds = array<i64: 40, 1>}, {pipeline_mode = #tpu.pipeline_mode<synchronous>, transform_indices = @transform_2, window_bounds = array<i64: 40, 1>}, {pipeline_mode = #tpu.pipeline_mode<synchronous>, transform_indices = @transform_3, window_bounds = array<i64: 80, 40>}, {pipeline_mode = #tpu.pipeline_mode<synchronous>, transform_indices = @transform_4, window_bounds = array<i64: 80, 1>}, {pipeline_mode = #tpu.pipeline_mode<synchronous>, transform_indices = @transform_5, window_bounds = array<i64: 40, 128>}, {pipeline_mode = #tpu.pipeline_mode<synchronous>, transform_indices = @transform_6, window_bounds = array<i64: 80, 128>}]} {
    %c0 = arith.constant 0 : index
    %c0_0 = arith.constant 0 : index
    %0 = vector.load %arg1[%c0, %c0_0] : memref<40x40xbf16, #tpu.memory_space<vmem>>, vector<40x40xbf16>
    %c0_1 = arith.constant 0 : index
    %c0_2 = arith.constant 0 : index
    %1 = vector.load %arg6[%c0_1, %c0_2] : memref<40x128xbf16, #tpu.memory_space<vmem>>, vector<40x128xbf16>
    %cst = arith.constant dense<0.000000e+00> : vector<40x128xf32>
    %2 = tpu.matmul %0, %1, %cst {dimension_numbers = #tpu.dot_dimension_numbers<[1], [0], [0], [1], [0, 0, 1, 1], [], []>} : vector<40x40xbf16>, vector<40x128xbf16>, vector<40x128xf32> -> vector<40x128xf32>
    %c0_3 = arith.constant 0 : index
    %c0_4 = arith.constant 0 : index
    %3 = vector.load %arg2[%c0_3, %c0_4] : memref<40x1xf32, #tpu.memory_space<vmem>>, vector<40x1xf32>
    %4 = vector.broadcast %3 : vector<40x1xf32> to vector<40x128xf32>
    %5 = arith.mulf %2, %4 : vector<40x128xf32>
    %c0_5 = arith.constant 0 : index
    %c0_6 = arith.constant 0 : index
    %6 = vector.load %arg3[%c0_5, %c0_6] : memref<40x1xf32, #tpu.memory_space<vmem>>, vector<40x1xf32>
    %7 = vector.broadcast %6 : vector<40x1xf32> to vector<40x128xf32>
    %8 = arith.addf %5, %7 : vector<40x128xf32>
    %cst_7 = arith.constant 0.000000e+00 : f32
    %9 = vector.broadcast %cst_7 : f32 to vector<40x128xf32>
    %10 = arith.maximumf %8, %9 : vector<40x128xf32>
    %c0_8 = arith.constant 0 : index
    %c0_9 = arith.constant 0 : index
    %11 = vector.load %arg4[%c0_8, %c0_9] : memref<80x40xbf16, #tpu.memory_space<vmem>>, vector<80x40xbf16>
    %12 = arith.truncf %10 : vector<40x128xf32> to vector<40x128xbf16>
    %cst_10 = arith.constant dense<0.000000e+00> : vector<80x128xf32>
    %13 = tpu.matmul %11, %12, %cst_10 {dimension_numbers = #tpu.dot_dimension_numbers<[1], [0], [0], [1], [0, 0, 1, 1], [], []>} : vector<80x40xbf16>, vector<40x128xbf16>, vector<80x128xf32> -> vector<80x128xf32>
    %c0_11 = arith.constant 0 : index
    %c0_12 = arith.constant 0 : index
    %14 = vector.load %arg5[%c0_11, %c0_12] : memref<80x1xf32, #tpu.memory_space<vmem>>, vector<80x1xf32>
    %15 = vector.broadcast %14 : vector<80x1xf32> to vector<80x128xf32>
    %16 = arith.addf %13, %15 : vector<80x128xf32>
    %17 = arith.negf %16 : vector<80x128xf32>
    %18 = math.exp %17 : vector<80x128xf32>
    %cst_13 = arith.constant 1.000000e+00 : f32
    %19 = vector.broadcast %cst_13 : f32 to vector<80x128xf32>
    %20 = arith.addf %19, %18 : vector<80x128xf32>
    %21 = arith.divf %19, %20 : vector<80x128xf32>
    %c0_14 = arith.constant 0 : index
    %c0_15 = arith.constant 0 : index
    %22 = vector.load %arg7[%c0_14, %c0_15] : memref<80x128xf32, #tpu.memory_space<vmem>>, vector<80x128xf32>
    tpu.vector_store %arg7[%c0_14, %c0_15], %21 {strides = array<i32>} : memref<80x128xf32, #tpu.memory_space<vmem>>, vector<80x128xf32>,
    return
  }
  func.func @transform_0(%arg0: i32) -> (i32, i32) {
    %c0_i32 = arith.constant 0 : i32
    %c0_i32_0 = arith.constant 0 : i32
    %c0_i32_1 = arith.constant 0 : i32
    return %c0_i32, %c0_i32_0 : i32, i32
  }
  func.func @transform_1(%arg0: i32) -> (i32, i32) {
    %c0_i32 = arith.constant 0 : i32
    %c0_i32_0 = arith.constant 0 : i32
    %c0_i32_1 = arith.constant 0 : i32
    return %c0_i32, %c0_i32_0 : i32, i32
  }
  func.func @transform_2(%arg0: i32) -> (i32, i32) {
    %c0_i32 = arith.constant 0 : i32
    %c0_i32_0 = arith.constant 0 : i32
    %c0_i32_1 = arith.constant 0 : i32
    return %c0_i32, %c0_i32_0 : i32, i32
  }
  func.func @transform_3(%arg0: i32) -> (i32, i32) {
    %c0_i32 = arith.constant 0 : i32
    %c0_i32_0 = arith.constant 0 : i32
    %c0_i32_1 = arith.constant 0 : i32
    return %c0_i32, %c0_i32_0 : i32, i32
  }
  func.func @transform_4(%arg0: i32) -> (i32, i32) {
    %c0_i32 = arith.constant 0 : i32
    %c0_i32_0 = arith.constant 0 : i32
    %c0_i32_1 = arith.constant 0 : i32
    return %c0_i32, %c0_i32_0 : i32, i32
  }
  func.func @transform_5(%arg0: i32) -> (i32, i32) {
    %c0_i32 = arith.constant 0 : i32
    %c0_i32_0 = arith.constant 0 : i32
    %c0_i32_1 = arith.constant 0 : i32
    return %c0_i32, %c0_i32_0 : i32, i32
  }
  func.func @transform_6(%arg0: i32) -> (i32, i32) {
    %c0_i32 = arith.constant 0 : i32
    %c0_i32_0 = arith.constant 0 : i32
    %c0_i32_1 = arith.constant 0 : i32
    return %c0_i32, %c0_i32_0 : i32, i32
  }
}

module attributes {stable_mosaic.version = 11 : i64} {
  func.func @_residual_rescale_kernel(%arg0: i32, %arg1: memref<8x128xf32, #tpu.memory_space<vmem>>, %arg2: memref<8x128xf32, #tpu.memory_space<vmem>>, %arg3: memref<8x128xf32, #tpu.memory_space<vmem>>, %arg4: memref<8x128xf32, #tpu.memory_space<vmem>>) attributes {dimension_semantics = [#tpu.dimension_semantics<arbitrary>], iteration_bounds = array<i64: 1>, scalar_prefetch = 0 : i64, scratch_operands = 0 : i64, tpu.core_type = #tpu.core_type<tc>, window_params = [{pipeline_mode = #tpu.pipeline_mode<synchronous>, transform_indices = @transform_0, window_bounds = array<i64: 8, 128>}, {pipeline_mode = #tpu.pipeline_mode<synchronous>, transform_indices = @transform_1, window_bounds = array<i64: 8, 128>}, {pipeline_mode = #tpu.pipeline_mode<synchronous>, transform_indices = @transform_2, window_bounds = array<i64: 8, 128>}, {pipeline_mode = #tpu.pipeline_mode<synchronous>, transform_indices = @transform_3, window_bounds = array<i64: 8, 128>}]} {
    %c0 = arith.constant 0 : index
    %c0_0 = arith.constant 0 : index
    %0 = vector.load %arg1[%c0, %c0_0] : memref<8x128xf32, #tpu.memory_space<vmem>>, vector<8x128xf32>
    %c0_1 = arith.constant 0 : index
    %c0_2 = arith.constant 0 : index
    %1 = vector.load %arg2[%c0_1, %c0_2] : memref<8x128xf32, #tpu.memory_space<vmem>>, vector<8x128xf32>
    %c0_3 = arith.constant 0 : index
    %c0_4 = arith.constant 0 : index
    %2 = vector.load %arg3[%c0_3, %c0_4] : memref<8x128xf32, #tpu.memory_space<vmem>>, vector<8x128xf32>
    %3 = arith.mulf %1, %2 : vector<8x128xf32>
    %4 = arith.addf %0, %3 : vector<8x128xf32>
    %c0_5 = arith.constant 0 : index
    %c0_6 = arith.constant 0 : index
    %5 = vector.load %arg4[%c0_5, %c0_6] : memref<8x128xf32, #tpu.memory_space<vmem>>, vector<8x128xf32>
    tpu.vector_store %arg4[%c0_5, %c0_6], %4 {strides = array<i32>} : memref<8x128xf32, #tpu.memory_space<vmem>>, vector<8x128xf32>,
    return
  }
  func.func @transform_0(%arg0: i32) -> (i32, i32) {
    %c0_i32 = arith.constant 0 : i32
    %c0_i32_0 = arith.constant 0 : i32
    %c0_i32_1 = arith.constant 0 : i32
    return %c0_i32, %c0_i32_0 : i32, i32
  }
  func.func @transform_1(%arg0: i32) -> (i32, i32) {
    %c0_i32 = arith.constant 0 : i32
    %c0_i32_0 = arith.constant 0 : i32
    %c0_i32_1 = arith.constant 0 : i32
    return %c0_i32, %c0_i32_0 : i32, i32
  }
  func.func @transform_2(%arg0: i32) -> (i32, i32) {
    %c0_i32 = arith.constant 0 : i32
    %c0_i32_0 = arith.constant 0 : i32
    %c0_i32_1 = arith.constant 0 : i32
    return %c0_i32, %c0_i32_0 : i32, i32
  }
  func.func @transform_3(%arg0: i32) -> (i32, i32) {
    %c0_i32 = arith.constant 0 : i32
    %c0_i32_0 = arith.constant 0 : i32
    %c0_i32_1 = arith.constant 0 : i32
    return %c0_i32, %c0_i32_0 : i32, i32
  }
}

module attributes {stable_mosaic.version = 11 : i64} {
  func.func @_gemm_kernel(%arg0: i32, %arg1: memref<4x144xbf16, #tpu.memory_space<vmem>>, %arg2: memref<144x128xbf16, #tpu.memory_space<vmem>>, %arg3: memref<4x1xf32, #tpu.memory_space<vmem>>, %arg4: memref<4x1xf32, #tpu.memory_space<vmem>>, %arg5: memref<4x128xf32, #tpu.memory_space<vmem>>) attributes {dimension_semantics = [#tpu.dimension_semantics<parallel>], iteration_bounds = array<i64: 1>, scalar_prefetch = 0 : i64, scratch_operands = 0 : i64, tpu.core_type = #tpu.core_type<tc>, window_params = [{pipeline_mode = #tpu.pipeline_mode<synchronous>, transform_indices = @transform_0, window_bounds = array<i64: 4, 144>}, {transform_indices = @transform_1, window_bounds = array<i64: 144, 128>}, {pipeline_mode = #tpu.pipeline_mode<synchronous>, transform_indices = @transform_2, window_bounds = array<i64: 4, 1>}, {pipeline_mode = #tpu.pipeline_mode<synchronous>, transform_indices = @transform_3, window_bounds = array<i64: 4, 1>}, {transform_indices = @transform_4, window_bounds = array<i64: 4, 128>}]} {
    %c0 = arith.constant 0 : index
    %c0_0 = arith.constant 0 : index
    %0 = vector.load %arg1[%c0, %c0_0] : memref<4x144xbf16, #tpu.memory_space<vmem>>, vector<4x144xbf16>
    %c0_1 = arith.constant 0 : index
    %c0_2 = arith.constant 0 : index
    %1 = vector.load %arg2[%c0_1, %c0_2] : memref<144x128xbf16, #tpu.memory_space<vmem>>, vector<144x128xbf16>
    %cst = arith.constant dense<0.000000e+00> : vector<4x128xf32>
    %2 = tpu.matmul %0, %1, %cst {dimension_numbers = #tpu.dot_dimension_numbers<[1], [0], [0], [1], [0, 0, 1, 1], [], []>} : vector<4x144xbf16>, vector<144x128xbf16>, vector<4x128xf32> -> vector<4x128xf32>
    %c0_3 = arith.constant 0 : index
    %c0_4 = arith.constant 0 : index
    %3 = vector.load %arg3[%c0_3, %c0_4] : memref<4x1xf32, #tpu.memory_space<vmem>>, vector<4x1xf32>
    %4 = vector.broadcast %3 : vector<4x1xf32> to vector<4x128xf32>
    %5 = arith.mulf %2, %4 : vector<4x128xf32>
    %c0_5 = arith.constant 0 : index
    %c0_6 = arith.constant 0 : index
    %6 = vector.load %arg4[%c0_5, %c0_6] : memref<4x1xf32, #tpu.memory_space<vmem>>, vector<4x1xf32>
    %7 = vector.broadcast %6 : vector<4x1xf32> to vector<4x128xf32>
    %8 = arith.addf %5, %7 : vector<4x128xf32>
    %cst_7 = arith.constant 0.000000e+00 : f32
    %9 = vector.broadcast %cst_7 : f32 to vector<4x128xf32>
    %10 = arith.maximumf %8, %9 : vector<4x128xf32>
    %c0_8 = arith.constant 0 : index
    %c0_9 = arith.constant 0 : index
    %11 = vector.load %arg5[%c0_8, %c0_9] : memref<4x128xf32, #tpu.memory_space<vmem>>, vector<4x128xf32>
    tpu.vector_store %arg5[%c0_8, %c0_9], %10 {strides = array<i32>} : memref<4x128xf32, #tpu.memory_space<vmem>>, vector<4x128xf32>,
    return
  }
  func.func @transform_0(%arg0: i32) -> (i32, i32) {
    %c0_i32 = arith.constant 0 : i32
    %c0_i32_0 = arith.constant 0 : i32
    %c0_i32_1 = arith.constant 0 : i32
    return %c0_i32, %c0_i32_0 : i32, i32
  }
  func.func @transform_1(%arg0: i32) -> (i32, i32) {
    %c0_i32 = arith.constant 0 : i32
    %c0_i32_0 = arith.constant 0 : i32
    return %c0_i32, %arg0 : i32, i32
  }
  func.func @transform_2(%arg0: i32) -> (i32, i32) {
    %c0_i32 = arith.constant 0 : i32
    %c0_i32_0 = arith.constant 0 : i32
    %c0_i32_1 = arith.constant 0 : i32
    return %c0_i32, %c0_i32_0 : i32, i32
  }
  func.func @transform_3(%arg0: i32) -> (i32, i32) {
    %c0_i32 = arith.constant 0 : i32
    %c0_i32_0 = arith.constant 0 : i32
    %c0_i32_1 = arith.constant 0 : i32
    return %c0_i32, %c0_i32_0 : i32, i32
  }
  func.func @transform_4(%arg0: i32) -> (i32, i32) {
    %c0_i32 = arith.constant 0 : i32
    %c0_i32_0 = arith.constant 0 : i32
    return %c0_i32, %arg0 : i32, i32
  }
}

module attributes {stable_mosaic.version = 11 : i64} {
  func.func @_gemm_kernel(%arg0: i32, %arg1: memref<4x12xbf16, #tpu.memory_space<vmem>>, %arg2: memref<12x128xbf16, #tpu.memory_space<vmem>>, %arg3: memref<4x1xf32, #tpu.memory_space<vmem>>, %arg4: memref<4x1xf32, #tpu.memory_space<vmem>>, %arg5: memref<4x128xf32, #tpu.memory_space<vmem>>) attributes {dimension_semantics = [#tpu.dimension_semantics<parallel>], iteration_bounds = array<i64: 1>, scalar_prefetch = 0 : i64, scratch_operands = 0 : i64, tpu.core_type = #tpu.core_type<tc>, window_params = [{pipeline_mode = #tpu.pipeline_mode<synchronous>, transform_indices = @transform_0, window_bounds = array<i64: 4, 12>}, {transform_indices = @transform_1, window_bounds = array<i64: 12, 128>}, {pipeline_mode = #tpu.pipeline_mode<synchronous>, transform_indices = @transform_2, window_bounds = array<i64: 4, 1>}, {pipeline_mode = #tpu.pipeline_mode<synchronous>, transform_indices = @transform_3, window_bounds = array<i64: 4, 1>}, {transform_indices = @transform_4, window_bounds = array<i64: 4, 128>}]} {
    %c0 = arith.constant 0 : index
    %c0_0 = arith.constant 0 : index
    %0 = vector.load %arg1[%c0, %c0_0] : memref<4x12xbf16, #tpu.memory_space<vmem>>, vector<4x12xbf16>
    %c0_1 = arith.constant 0 : index
    %c0_2 = arith.constant 0 : index
    %1 = vector.load %arg2[%c0_1, %c0_2] : memref<12x128xbf16, #tpu.memory_space<vmem>>, vector<12x128xbf16>
    %cst = arith.constant dense<0.000000e+00> : vector<4x128xf32>
    %2 = tpu.matmul %0, %1, %cst {dimension_numbers = #tpu.dot_dimension_numbers<[1], [0], [0], [1], [0, 0, 1, 1], [], []>} : vector<4x12xbf16>, vector<12x128xbf16>, vector<4x128xf32> -> vector<4x128xf32>
    %c0_3 = arith.constant 0 : index
    %c0_4 = arith.constant 0 : index
    %3 = vector.load %arg3[%c0_3, %c0_4] : memref<4x1xf32, #tpu.memory_space<vmem>>, vector<4x1xf32>
    %4 = vector.broadcast %3 : vector<4x1xf32> to vector<4x128xf32>
    %5 = arith.mulf %2, %4 : vector<4x128xf32>
    %c0_5 = arith.constant 0 : index
    %c0_6 = arith.constant 0 : index
    %6 = vector.load %arg4[%c0_5, %c0_6] : memref<4x1xf32, #tpu.memory_space<vmem>>, vector<4x1xf32>
    %7 = vector.broadcast %6 : vector<4x1xf32> to vector<4x128xf32>
    %8 = arith.addf %5, %7 : vector<4x128xf32>
    %cst_7 = arith.constant 0.000000e+00 : f32
    %9 = vector.broadcast %cst_7 : f32 to vector<4x128xf32>
    %10 = arith.maximumf %8, %9 : vector<4x128xf32>
    %c0_8 = arith.constant 0 : index
    %c0_9 = arith.constant 0 : index
    %11 = vector.load %arg5[%c0_8, %c0_9] : memref<4x128xf32, #tpu.memory_space<vmem>>, vector<4x128xf32>
    tpu.vector_store %arg5[%c0_8, %c0_9], %10 {strides = array<i32>} : memref<4x128xf32, #tpu.memory_space<vmem>>, vector<4x128xf32>,
    return
  }
  func.func @transform_0(%arg0: i32) -> (i32, i32) {
    %c0_i32 = arith.constant 0 : i32
    %c0_i32_0 = arith.constant 0 : i32
    %c0_i32_1 = arith.constant 0 : i32
    return %c0_i32, %c0_i32_0 : i32, i32
  }
  func.func @transform_1(%arg0: i32) -> (i32, i32) {
    %c0_i32 = arith.constant 0 : i32
    %c0_i32_0 = arith.constant 0 : i32
    return %c0_i32, %arg0 : i32, i32
  }
  func.func @transform_2(%arg0: i32) -> (i32, i32) {
    %c0_i32 = arith.constant 0 : i32
    %c0_i32_0 = arith.constant 0 : i32
    %c0_i32_1 = arith.constant 0 : i32
    return %c0_i32, %c0_i32_0 : i32, i32
  }
  func.func @transform_3(%arg0: i32) -> (i32, i32) {
    %c0_i32 = arith.constant 0 : i32
    %c0_i32_0 = arith.constant 0 : i32
    %c0_i32_1 = arith.constant 0 : i32
    return %c0_i32, %c0_i32_0 : i32, i32
  }
  func.func @transform_4(%arg0: i32) -> (i32, i32) {
    %c0_i32 = arith.constant 0 : i32
    %c0_i32_0 = arith.constant 0 : i32
    return %c0_i32, %arg0 : i32, i32
  }
}

module attributes {stable_mosaic.version = 11 : i64} {
  func.func @_gemm_kernel(%arg0: i32, %arg1: memref<4x108xbf16, #tpu.memory_space<vmem>>, %arg2: memref<108x384xbf16, #tpu.memory_space<vmem>>, %arg3: memref<4x1xf32, #tpu.memory_space<vmem>>, %arg4: memref<4x1xf32, #tpu.memory_space<vmem>>, %arg5: memref<4x384xf32, #tpu.memory_space<vmem>>) attributes {dimension_semantics = [#tpu.dimension_semantics<parallel>], iteration_bounds = array<i64: 1>, scalar_prefetch = 0 : i64, scratch_operands = 0 : i64, tpu.core_type = #tpu.core_type<tc>, window_params = [{pipeline_mode = #tpu.pipeline_mode<synchronous>, transform_indices = @transform_0, window_bounds = array<i64: 4, 108>}, {transform_indices = @transform_1, window_bounds = array<i64: 108, 384>}, {pipeline_mode = #tpu.pipeline_mode<synchronous>, transform_indices = @transform_2, window_bounds = array<i64: 4, 1>}, {pipeline_mode = #tpu.pipeline_mode<synchronous>, transform_indices = @transform_3, window_bounds = array<i64: 4, 1>}, {transform_indices = @transform_4, window_bounds = array<i64: 4, 384>}]} {
    %c0 = arith.constant 0 : index
    %c0_0 = arith.constant 0 : index
    %0 = vector.load %arg1[%c0, %c0_0] : memref<4x108xbf16, #tpu.memory_space<vmem>>, vector<4x108xbf16>
    %c0_1 = arith.constant 0 : index
    %c0_2 = arith.constant 0 : index
    %1 = vector.load %arg2[%c0_1, %c0_2] : memref<108x384xbf16, #tpu.memory_space<vmem>>, vector<108x384xbf16>
    %cst = arith.constant dense<0.000000e+00> : vector<4x384xf32>
    %2 = tpu.matmul %0, %1, %cst {dimension_numbers = #tpu.dot_dimension_numbers<[1], [0], [0], [1], [0, 0, 1, 1], [], []>} : vector<4x108xbf16>, vector<108x384xbf16>, vector<4x384xf32> -> vector<4x384xf32>
    %c0_3 = arith.constant 0 : index
    %c0_4 = arith.constant 0 : index
    %3 = vector.load %arg3[%c0_3, %c0_4] : memref<4x1xf32, #tpu.memory_space<vmem>>, vector<4x1xf32>
    %4 = vector.broadcast %3 : vector<4x1xf32> to vector<4x384xf32>
    %5 = arith.mulf %2, %4 : vector<4x384xf32>
    %c0_5 = arith.constant 0 : index
    %c0_6 = arith.constant 0 : index
    %6 = vector.load %arg4[%c0_5, %c0_6] : memref<4x1xf32, #tpu.memory_space<vmem>>, vector<4x1xf32>
    %7 = vector.broadcast %6 : vector<4x1xf32> to vector<4x384xf32>
    %8 = arith.addf %5, %7 : vector<4x384xf32>
    %cst_7 = arith.constant 0.000000e+00 : f32
    %9 = vector.broadcast %cst_7 : f32 to vector<4x384xf32>
    %10 = arith.maximumf %8, %9 : vector<4x384xf32>
    %c0_8 = arith.constant 0 : index
    %c0_9 = arith.constant 0 : index
    %11 = vector.load %arg5[%c0_8, %c0_9] : memref<4x384xf32, #tpu.memory_space<vmem>>, vector<4x384xf32>
    tpu.vector_store %arg5[%c0_8, %c0_9], %10 {strides = array<i32>} : memref<4x384xf32, #tpu.memory_space<vmem>>, vector<4x384xf32>,
    return
  }
  func.func @transform_0(%arg0: i32) -> (i32, i32) {
    %c0_i32 = arith.constant 0 : i32
    %c0_i32_0 = arith.constant 0 : i32
    %c0_i32_1 = arith.constant 0 : i32
    return %c0_i32, %c0_i32_0 : i32, i32
  }
  func.func @transform_1(%arg0: i32) -> (i32, i32) {
    %c0_i32 = arith.constant 0 : i32
    %c0_i32_0 = arith.constant 0 : i32
    return %c0_i32, %arg0 : i32, i32
  }
  func.func @transform_2(%arg0: i32) -> (i32, i32) {
    %c0_i32 = arith.constant 0 : i32
    %c0_i32_0 = arith.constant 0 : i32
    %c0_i32_1 = arith.constant 0 : i32
    return %c0_i32, %c0_i32_0 : i32, i32
  }
  func.func @transform_3(%arg0: i32) -> (i32, i32) {
    %c0_i32 = arith.constant 0 : i32
    %c0_i32_0 = arith.constant 0 : i32
    %c0_i32_1 = arith.constant 0 : i32
    return %c0_i32, %c0_i32_0 : i32, i32
  }
  func.func @transform_4(%arg0: i32) -> (i32, i32) {
    %c0_i32 = arith.constant 0 : i32
    %c0_i32_0 = arith.constant 0 : i32
    return %c0_i32, %arg0 : i32, i32
  }
}

module attributes {stable_mosaic.version = 11 : i64} {
  func.func @_gemm_kernel(%arg0: i32, %arg1: memref<4x4xbf16, #tpu.memory_space<vmem>>, %arg2: memref<4x384xbf16, #tpu.memory_space<vmem>>, %arg3: memref<4x1xf32, #tpu.memory_space<vmem>>, %arg4: memref<4x1xf32, #tpu.memory_space<vmem>>, %arg5: memref<4x384xf32, #tpu.memory_space<vmem>>) attributes {dimension_semantics = [#tpu.dimension_semantics<parallel>], iteration_bounds = array<i64: 1>, scalar_prefetch = 0 : i64, scratch_operands = 0 : i64, tpu.core_type = #tpu.core_type<tc>, window_params = [{pipeline_mode = #tpu.pipeline_mode<synchronous>, transform_indices = @transform_0, window_bounds = array<i64: 4, 4>}, {transform_indices = @transform_1, window_bounds = array<i64: 4, 384>}, {pipeline_mode = #tpu.pipeline_mode<synchronous>, transform_indices = @transform_2, window_bounds = array<i64: 4, 1>}, {pipeline_mode = #tpu.pipeline_mode<synchronous>, transform_indices = @transform_3, window_bounds = array<i64: 4, 1>}, {transform_indices = @transform_4, window_bounds = array<i64: 4, 384>}]} {
    %c0 = arith.constant 0 : index
    %c0_0 = arith.constant 0 : index
    %0 = vector.load %arg1[%c0, %c0_0] : memref<4x4xbf16, #tpu.memory_space<vmem>>, vector<4x4xbf16>
    %c0_1 = arith.constant 0 : index
    %c0_2 = arith.constant 0 : index
    %1 = vector.load %arg2[%c0_1, %c0_2] : memref<4x384xbf16, #tpu.memory_space<vmem>>, vector<4x384xbf16>
    %cst = arith.constant dense<0.000000e+00> : vector<4x384xf32>
    %2 = tpu.matmul %0, %1, %cst {dimension_numbers = #tpu.dot_dimension_numbers<[1], [0], [0], [1], [0, 0, 1, 1], [], []>} : vector<4x4xbf16>, vector<4x384xbf16>, vector<4x384xf32> -> vector<4x384xf32>
    %c0_3 = arith.constant 0 : index
    %c0_4 = arith.constant 0 : index
    %3 = vector.load %arg3[%c0_3, %c0_4] : memref<4x1xf32, #tpu.memory_space<vmem>>, vector<4x1xf32>
    %4 = vector.broadcast %3 : vector<4x1xf32> to vector<4x384xf32>
    %5 = arith.mulf %2, %4 : vector<4x384xf32>
    %c0_5 = arith.constant 0 : index
    %c0_6 = arith.constant 0 : index
    %6 = vector.load %arg4[%c0_5, %c0_6] : memref<4x1xf32, #tpu.memory_space<vmem>>, vector<4x1xf32>
    %7 = vector.broadcast %6 : vector<4x1xf32> to vector<4x384xf32>
    %8 = arith.addf %5, %7 : vector<4x384xf32>
    %cst_7 = arith.constant 0.000000e+00 : f32
    %9 = vector.broadcast %cst_7 : f32 to vector<4x384xf32>
    %10 = arith.maximumf %8, %9 : vector<4x384xf32>
    %c0_8 = arith.constant 0 : index
    %c0_9 = arith.constant 0 : index
    %11 = vector.load %arg5[%c0_8, %c0_9] : memref<4x384xf32, #tpu.memory_space<vmem>>, vector<4x384xf32>
    tpu.vector_store %arg5[%c0_8, %c0_9], %10 {strides = array<i32>} : memref<4x384xf32, #tpu.memory_space<vmem>>, vector<4x384xf32>,
    return
  }
  func.func @transform_0(%arg0: i32) -> (i32, i32) {
    %c0_i32 = arith.constant 0 : i32
    %c0_i32_0 = arith.constant 0 : i32
    %c0_i32_1 = arith.constant 0 : i32
    return %c0_i32, %c0_i32_0 : i32, i32
  }
  func.func @transform_1(%arg0: i32) -> (i32, i32) {
    %c0_i32 = arith.constant 0 : i32
    %c0_i32_0 = arith.constant 0 : i32
    return %c0_i32, %arg0 : i32, i32
  }
  func.func @transform_2(%arg0: i32) -> (i32, i32) {
    %c0_i32 = arith.constant 0 : i32
    %c0_i32_0 = arith.constant 0 : i32
    %c0_i32_1 = arith.constant 0 : i32
    return %c0_i32, %c0_i32_0 : i32, i32
  }
  func.func @transform_3(%arg0: i32) -> (i32, i32) {
    %c0_i32 = arith.constant 0 : i32
    %c0_i32_0 = arith.constant 0 : i32
    %c0_i32_1 = arith.constant 0 : i32
    return %c0_i32, %c0_i32_0 : i32, i32
  }
  func.func @transform_4(%arg0: i32) -> (i32, i32) {
    %c0_i32 = arith.constant 0 : i32
    %c0_i32_0 = arith.constant 0 : i32
    return %c0_i32, %arg0 : i32, i32
  }
}

module attributes {stable_mosaic.version = 11 : i64} {
  func.func @_residual_rescale_kernel(%arg0: i32, %arg1: memref<16x128xf32, #tpu.memory_space<vmem>>, %arg2: memref<16x128xf32, #tpu.memory_space<vmem>>, %arg3: memref<16x128xf32, #tpu.memory_space<vmem>>, %arg4: memref<16x128xf32, #tpu.memory_space<vmem>>) attributes {dimension_semantics = [#tpu.dimension_semantics<arbitrary>], iteration_bounds = array<i64: 1>, scalar_prefetch = 0 : i64, scratch_operands = 0 : i64, tpu.core_type = #tpu.core_type<tc>, window_params = [{pipeline_mode = #tpu.pipeline_mode<synchronous>, transform_indices = @transform_0, window_bounds = array<i64: 16, 128>}, {pipeline_mode = #tpu.pipeline_mode<synchronous>, transform_indices = @transform_1, window_bounds = array<i64: 16, 128>}, {pipeline_mode = #tpu.pipeline_mode<synchronous>, transform_indices = @transform_2, window_bounds = array<i64: 16, 128>}, {pipeline_mode = #tpu.pipeline_mode<synchronous>, transform_indices = @transform_3, window_bounds = array<i64: 16, 128>}]} {
    %c0 = arith.constant 0 : index
    %c0_0 = arith.constant 0 : index
    %0 = vector.load %arg1[%c0, %c0_0] : memref<16x128xf32, #tpu.memory_space<vmem>>, vector<16x128xf32>
    %c0_1 = arith.constant 0 : index
    %c0_2 = arith.constant 0 : index
    %1 = vector.load %arg2[%c0_1, %c0_2] : memref<16x128xf32, #tpu.memory_space<vmem>>, vector<16x128xf32>
    %c0_3 = arith.constant 0 : index
    %c0_4 = arith.constant 0 : index
    %2 = vector.load %arg3[%c0_3, %c0_4] : memref<16x128xf32, #tpu.memory_space<vmem>>, vector<16x128xf32>
    %3 = arith.mulf %1, %2 : vector<16x128xf32>
    %4 = arith.addf %0, %3 : vector<16x128xf32>
    %c0_5 = arith.constant 0 : index
    %c0_6 = arith.constant 0 : index
    %5 = vector.load %arg4[%c0_5, %c0_6] : memref<16x128xf32, #tpu.memory_space<vmem>>, vector<16x128xf32>
    tpu.vector_store %arg4[%c0_5, %c0_6], %4 {strides = array<i32>} : memref<16x128xf32, #tpu.memory_space<vmem>>, vector<16x128xf32>,
    return
  }
  func.func @transform_0(%arg0: i32) -> (i32, i32) {
    %c0_i32 = arith.constant 0 : i32
    %c0_i32_0 = arith.constant 0 : i32
    %c0_i32_1 = arith.constant 0 : i32
    return %c0_i32, %c0_i32_0 : i32, i32
  }
  func.func @transform_1(%arg0: i32) -> (i32, i32) {
    %c0_i32 = arith.constant 0 : i32
    %c0_i32_0 = arith.constant 0 : i32
    %c0_i32_1 = arith.constant 0 : i32
    return %c0_i32, %c0_i32_0 : i32, i32
  }
  func.func @transform_2(%arg0: i32) -> (i32, i32) {
    %c0_i32 = arith.constant 0 : i32
    %c0_i32_0 = arith.constant 0 : i32
    %c0_i32_1 = arith.constant 0 : i32
    return %c0_i32, %c0_i32_0 : i32, i32
  }
  func.func @transform_3(%arg0: i32) -> (i32, i32) {
    %c0_i32 = arith.constant 0 : i32
    %c0_i32_0 = arith.constant 0 : i32
    %c0_i32_1 = arith.constant 0 : i32
    return %c0_i32, %c0_i32_0 : i32, i32
  }
}

module attributes {stable_mosaic.version = 11 : i64} {
  func.func @_gemm_kernel(%arg0: i32, %arg1: memref<4x108xbf16, #tpu.memory_space<vmem>>, %arg2: memref<108x768xbf16, #tpu.memory_space<vmem>>, %arg3: memref<4x1xf32, #tpu.memory_space<vmem>>, %arg4: memref<4x1xf32, #tpu.memory_space<vmem>>, %arg5: memref<4x768xf32, #tpu.memory_space<vmem>>) attributes {dimension_semantics = [#tpu.dimension_semantics<parallel>], iteration_bounds = array<i64: 1>, scalar_prefetch = 0 : i64, scratch_operands = 0 : i64, tpu.core_type = #tpu.core_type<tc>, window_params = [{pipeline_mode = #tpu.pipeline_mode<synchronous>, transform_indices = @transform_0, window_bounds = array<i64: 4, 108>}, {transform_indices = @transform_1, window_bounds = array<i64: 108, 768>}, {pipeline_mode = #tpu.pipeline_mode<synchronous>, transform_indices = @transform_2, window_bounds = array<i64: 4, 1>}, {pipeline_mode = #tpu.pipeline_mode<synchronous>, transform_indices = @transform_3, window_bounds = array<i64: 4, 1>}, {transform_indices = @transform_4, window_bounds = array<i64: 4, 768>}]} {
    %c0 = arith.constant 0 : index
    %c0_0 = arith.constant 0 : index
    %0 = vector.load %arg1[%c0, %c0_0] : memref<4x108xbf16, #tpu.memory_space<vmem>>, vector<4x108xbf16>
    %c0_1 = arith.constant 0 : index
    %c0_2 = arith.constant 0 : index
    %1 = vector.load %arg2[%c0_1, %c0_2] : memref<108x768xbf16, #tpu.memory_space<vmem>>, vector<108x768xbf16>
    %cst = arith.constant dense<0.000000e+00> : vector<4x768xf32>
    %2 = tpu.matmul %0, %1, %cst {dimension_numbers = #tpu.dot_dimension_numbers<[1], [0], [0], [1], [0, 0, 1, 1], [], []>} : vector<4x108xbf16>, vector<108x768xbf16>, vector<4x768xf32> -> vector<4x768xf32>
    %c0_3 = arith.constant 0 : index
    %c0_4 = arith.constant 0 : index
    %3 = vector.load %arg3[%c0_3, %c0_4] : memref<4x1xf32, #tpu.memory_space<vmem>>, vector<4x1xf32>
    %4 = vector.broadcast %3 : vector<4x1xf32> to vector<4x768xf32>
    %5 = arith.mulf %2, %4 : vector<4x768xf32>
    %c0_5 = arith.constant 0 : index
    %c0_6 = arith.constant 0 : index
    %6 = vector.load %arg4[%c0_5, %c0_6] : memref<4x1xf32, #tpu.memory_space<vmem>>, vector<4x1xf32>
    %7 = vector.broadcast %6 : vector<4x1xf32> to vector<4x768xf32>
    %8 = arith.addf %5, %7 : vector<4x768xf32>
    %cst_7 = arith.constant 0.000000e+00 : f32
    %9 = vector.broadcast %cst_7 : f32 to vector<4x768xf32>
    %10 = arith.maximumf %8, %9 : vector<4x768xf32>
    %c0_8 = arith.constant 0 : index
    %c0_9 = arith.constant 0 : index
    %11 = vector.load %arg5[%c0_8, %c0_9] : memref<4x768xf32, #tpu.memory_space<vmem>>, vector<4x768xf32>
    tpu.vector_store %arg5[%c0_8, %c0_9], %10 {strides = array<i32>} : memref<4x768xf32, #tpu.memory_space<vmem>>, vector<4x768xf32>,
    return
  }
  func.func @transform_0(%arg0: i32) -> (i32, i32) {
    %c0_i32 = arith.constant 0 : i32
    %c0_i32_0 = arith.constant 0 : i32
    %c0_i32_1 = arith.constant 0 : i32
    return %c0_i32, %c0_i32_0 : i32, i32
  }
  func.func @transform_1(%arg0: i32) -> (i32, i32) {
    %c0_i32 = arith.constant 0 : i32
    %c0_i32_0 = arith.constant 0 : i32
    return %c0_i32, %arg0 : i32, i32
  }
  func.func @transform_2(%arg0: i32) -> (i32, i32) {
    %c0_i32 = arith.constant 0 : i32
    %c0_i32_0 = arith.constant 0 : i32
    %c0_i32_1 = arith.constant 0 : i32
    return %c0_i32, %c0_i32_0 : i32, i32
  }
  func.func @transform_3(%arg0: i32) -> (i32, i32) {
    %c0_i32 = arith.constant 0 : i32
    %c0_i32_0 = arith.constant 0 : i32
    %c0_i32_1 = arith.constant 0 : i32
    return %c0_i32, %c0_i32_0 : i32, i32
  }
  func.func @transform_4(%arg0: i32) -> (i32, i32) {
    %c0_i32 = arith.constant 0 : i32
    %c0_i32_0 = arith.constant 0 : i32
    return %c0_i32, %arg0 : i32, i32
  }
}

module attributes {stable_mosaic.version = 11 : i64} {
  func.func @_gemm_kernel(%arg0: i32, %arg1: memref<4x108xbf16, #tpu.memory_space<vmem>>, %arg2: memref<108x640xbf16, #tpu.memory_space<vmem>>, %arg3: memref<4x1xf32, #tpu.memory_space<vmem>>, %arg4: memref<4x1xf32, #tpu.memory_space<vmem>>, %arg5: memref<4x640xf32, #tpu.memory_space<vmem>>) attributes {dimension_semantics = [#tpu.dimension_semantics<parallel>], iteration_bounds = array<i64: 2>, scalar_prefetch = 0 : i64, scratch_operands = 0 : i64, tpu.core_type = #tpu.core_type<tc>, window_params = [{pipeline_mode = #tpu.pipeline_mode<synchronous>, transform_indices = @transform_0, window_bounds = array<i64: 4, 108>}, {transform_indices = @transform_1, window_bounds = array<i64: 108, 640>}, {pipeline_mode = #tpu.pipeline_mode<synchronous>, transform_indices = @transform_2, window_bounds = array<i64: 4, 1>}, {pipeline_mode = #tpu.pipeline_mode<synchronous>, transform_indices = @transform_3, window_bounds = array<i64: 4, 1>}, {transform_indices = @transform_4, window_bounds = array<i64: 4, 640>}]} {
    %c0 = arith.constant 0 : index
    %c0_0 = arith.constant 0 : index
    %0 = vector.load %arg1[%c0, %c0_0] : memref<4x108xbf16, #tpu.memory_space<vmem>>, vector<4x108xbf16>
    %c0_1 = arith.constant 0 : index
    %c0_2 = arith.constant 0 : index
    %1 = vector.load %arg2[%c0_1, %c0_2] : memref<108x640xbf16, #tpu.memory_space<vmem>>, vector<108x640xbf16>
    %cst = arith.constant dense<0.000000e+00> : vector<4x640xf32>
    %2 = tpu.matmul %0, %1, %cst {dimension_numbers = #tpu.dot_dimension_numbers<[1], [0], [0], [1], [0, 0, 1, 1], [], []>} : vector<4x108xbf16>, vector<108x640xbf16>, vector<4x640xf32> -> vector<4x640xf32>
    %c0_3 = arith.constant 0 : index
    %c0_4 = arith.constant 0 : index
    %3 = vector.load %arg3[%c0_3, %c0_4] : memref<4x1xf32, #tpu.memory_space<vmem>>, vector<4x1xf32>
    %4 = vector.broadcast %3 : vector<4x1xf32> to vector<4x640xf32>
    %5 = arith.mulf %2, %4 : vector<4x640xf32>
    %c0_5 = arith.constant 0 : index
    %c0_6 = arith.constant 0 : index
    %6 = vector.load %arg4[%c0_5, %c0_6] : memref<4x1xf32, #tpu.memory_space<vmem>>, vector<4x1xf32>
    %7 = vector.broadcast %6 : vector<4x1xf32> to vector<4x640xf32>
    %8 = arith.addf %5, %7 : vector<4x640xf32>
    %cst_7 = arith.constant 0.000000e+00 : f32
    %9 = vector.broadcast %cst_7 : f32 to vector<4x640xf32>
    %10 = arith.maximumf %8, %9 : vector<4x640xf32>
    %c0_8 = arith.constant 0 : index
    %c0_9 = arith.constant 0 : index
    %11 = vector.load %arg5[%c0_8, %c0_9] : memref<4x640xf32, #tpu.memory_space<vmem>>, vector<4x640xf32>
    tpu.vector_store %arg5[%c0_8, %c0_9], %10 {strides = array<i32>} : memref<4x640xf32, #tpu.memory_space<vmem>>, vector<4x640xf32>,
    return
  }
  func.func @transform_0(%arg0: i32) -> (i32, i32) {
    %c0_i32 = arith.constant 0 : i32
    %c0_i32_0 = arith.constant 0 : i32
    %c0_i32_1 = arith.constant 0 : i32
    return %c0_i32, %c0_i32_0 : i32, i32
  }
  func.func @transform_1(%arg0: i32) -> (i32, i32) {
    %c0_i32 = arith.constant 0 : i32
    %c0_i32_0 = arith.constant 0 : i32
    return %c0_i32, %arg0 : i32, i32
  }
  func.func @transform_2(%arg0: i32) -> (i32, i32) {
    %c0_i32 = arith.constant 0 : i32
    %c0_i32_0 = arith.constant 0 : i32
    %c0_i32_1 = arith.constant 0 : i32
    return %c0_i32, %c0_i32_0 : i32, i32
  }
  func.func @transform_3(%arg0: i32) -> (i32, i32) {
    %c0_i32 = arith.constant 0 : i32
    %c0_i32_0 = arith.constant 0 : i32
    %c0_i32_1 = arith.constant 0 : i32
    return %c0_i32, %c0_i32_0 : i32, i32
  }
  func.func @transform_4(%arg0: i32) -> (i32, i32) {
    %c0_i32 = arith.constant 0 : i32
    %c0_i32_0 = arith.constant 0 : i32
    return %c0_i32, %arg0 : i32, i32
  }
}

module attributes {stable_mosaic.version = 11 : i64} {
  func.func @_gemm_kernel(%arg0: i32, %arg1: memref<4x4xbf16, #tpu.memory_space<vmem>>, %arg2: memref<4x640xbf16, #tpu.memory_space<vmem>>, %arg3: memref<4x1xf32, #tpu.memory_space<vmem>>, %arg4: memref<4x1xf32, #tpu.memory_space<vmem>>, %arg5: memref<4x640xf32, #tpu.memory_space<vmem>>) attributes {dimension_semantics = [#tpu.dimension_semantics<parallel>], iteration_bounds = array<i64: 2>, scalar_prefetch = 0 : i64, scratch_operands = 0 : i64, tpu.core_type = #tpu.core_type<tc>, window_params = [{pipeline_mode = #tpu.pipeline_mode<synchronous>, transform_indices = @transform_0, window_bounds = array<i64: 4, 4>}, {transform_indices = @transform_1, window_bounds = array<i64: 4, 640>}, {pipeline_mode = #tpu.pipeline_mode<synchronous>, transform_indices = @transform_2, window_bounds = array<i64: 4, 1>}, {pipeline_mode = #tpu.pipeline_mode<synchronous>, transform_indices = @transform_3, window_bounds = array<i64: 4, 1>}, {transform_indices = @transform_4, window_bounds = array<i64: 4, 640>}]} {
    %c0 = arith.constant 0 : index
    %c0_0 = arith.constant 0 : index
    %0 = vector.load %arg1[%c0, %c0_0] : memref<4x4xbf16, #tpu.memory_space<vmem>>, vector<4x4xbf16>
    %c0_1 = arith.constant 0 : index
    %c0_2 = arith.constant 0 : index
    %1 = vector.load %arg2[%c0_1, %c0_2] : memref<4x640xbf16, #tpu.memory_space<vmem>>, vector<4x640xbf16>
    %cst = arith.constant dense<0.000000e+00> : vector<4x640xf32>
    %2 = tpu.matmul %0, %1, %cst {dimension_numbers = #tpu.dot_dimension_numbers<[1], [0], [0], [1], [0, 0, 1, 1], [], []>} : vector<4x4xbf16>, vector<4x640xbf16>, vector<4x640xf32> -> vector<4x640xf32>
    %c0_3 = arith.constant 0 : index
    %c0_4 = arith.constant 0 : index
    %3 = vector.load %arg3[%c0_3, %c0_4] : memref<4x1xf32, #tpu.memory_space<vmem>>, vector<4x1xf32>
    %4 = vector.broadcast %3 : vector<4x1xf32> to vector<4x640xf32>
    %5 = arith.mulf %2, %4 : vector<4x640xf32>
    %c0_5 = arith.constant 0 : index
    %c0_6 = arith.constant 0 : index
    %6 = vector.load %arg4[%c0_5, %c0_6] : memref<4x1xf32, #tpu.memory_space<vmem>>, vector<4x1xf32>
    %7 = vector.broadcast %6 : vector<4x1xf32> to vector<4x640xf32>
    %8 = arith.addf %5, %7 : vector<4x640xf32>
    %cst_7 = arith.constant 0.000000e+00 : f32
    %9 = vector.broadcast %cst_7 : f32 to vector<4x640xf32>
    %10 = arith.maximumf %8, %9 : vector<4x640xf32>
    %c0_8 = arith.constant 0 : index
    %c0_9 = arith.constant 0 : index
    %11 = vector.load %arg5[%c0_8, %c0_9] : memref<4x640xf32, #tpu.memory_space<vmem>>, vector<4x640xf32>
    tpu.vector_store %arg5[%c0_8, %c0_9], %10 {strides = array<i32>} : memref<4x640xf32, #tpu.memory_space<vmem>>, vector<4x640xf32>,
    return
  }
  func.func @transform_0(%arg0: i32) -> (i32, i32) {
    %c0_i32 = arith.constant 0 : i32
    %c0_i32_0 = arith.constant 0 : i32
    %c0_i32_1 = arith.constant 0 : i32
    return %c0_i32, %c0_i32_0 : i32, i32
  }
  func.func @transform_1(%arg0: i32) -> (i32, i32) {
    %c0_i32 = arith.constant 0 : i32
    %c0_i32_0 = arith.constant 0 : i32
    return %c0_i32, %arg0 : i32, i32
  }
  func.func @transform_2(%arg0: i32) -> (i32, i32) {
    %c0_i32 = arith.constant 0 : i32
    %c0_i32_0 = arith.constant 0 : i32
    %c0_i32_1 = arith.constant 0 : i32
    return %c0_i32, %c0_i32_0 : i32, i32
  }
  func.func @transform_3(%arg0: i32) -> (i32, i32) {
    %c0_i32 = arith.constant 0 : i32
    %c0_i32_0 = arith.constant 0 : i32
    %c0_i32_1 = arith.constant 0 : i32
    return %c0_i32, %c0_i32_0 : i32, i32
  }
  func.func @transform_4(%arg0: i32) -> (i32, i32) {
    %c0_i32 = arith.constant 0 : i32
    %c0_i32_0 = arith.constant 0 : i32
    return %c0_i32, %arg0 : i32, i32
  }
}

module attributes {stable_mosaic.version = 11 : i64} {
  func.func @_residual_rescale_kernel(%arg0: i32, %arg1: memref<40x128xf32, #tpu.memory_space<vmem>>, %arg2: memref<40x128xf32, #tpu.memory_space<vmem>>, %arg3: memref<40x128xf32, #tpu.memory_space<vmem>>, %arg4: memref<40x128xf32, #tpu.memory_space<vmem>>) attributes {dimension_semantics = [#tpu.dimension_semantics<arbitrary>], iteration_bounds = array<i64: 1>, scalar_prefetch = 0 : i64, scratch_operands = 0 : i64, tpu.core_type = #tpu.core_type<tc>, window_params = [{pipeline_mode = #tpu.pipeline_mode<synchronous>, transform_indices = @transform_0, window_bounds = array<i64: 40, 128>}, {pipeline_mode = #tpu.pipeline_mode<synchronous>, transform_indices = @transform_1, window_bounds = array<i64: 40, 128>}, {pipeline_mode = #tpu.pipeline_mode<synchronous>, transform_indices = @transform_2, window_bounds = array<i64: 40, 128>}, {pipeline_mode = #tpu.pipeline_mode<synchronous>, transform_indices = @transform_3, window_bounds = array<i64: 40, 128>}]} {
    %c0 = arith.constant 0 : index
    %c0_0 = arith.constant 0 : index
    %0 = vector.load %arg1[%c0, %c0_0] : memref<40x128xf32, #tpu.memory_space<vmem>>, vector<40x128xf32>
    %c0_1 = arith.constant 0 : index
    %c0_2 = arith.constant 0 : index
    %1 = vector.load %arg2[%c0_1, %c0_2] : memref<40x128xf32, #tpu.memory_space<vmem>>, vector<40x128xf32>
    %c0_3 = arith.constant 0 : index
    %c0_4 = arith.constant 0 : index
    %2 = vector.load %arg3[%c0_3, %c0_4] : memref<40x128xf32, #tpu.memory_space<vmem>>, vector<40x128xf32>
    %3 = arith.mulf %1, %2 : vector<40x128xf32>
    %4 = arith.addf %0, %3 : vector<40x128xf32>
    %c0_5 = arith.constant 0 : index
    %c0_6 = arith.constant 0 : index
    %5 = vector.load %arg4[%c0_5, %c0_6] : memref<40x128xf32, #tpu.memory_space<vmem>>, vector<40x128xf32>
    tpu.vector_store %arg4[%c0_5, %c0_6], %4 {strides = array<i32>} : memref<40x128xf32, #tpu.memory_space<vmem>>, vector<40x128xf32>,
    return
  }
  func.func @transform_0(%arg0: i32) -> (i32, i32) {
    %c0_i32 = arith.constant 0 : i32
    %c0_i32_0 = arith.constant 0 : i32
    %c0_i32_1 = arith.constant 0 : i32
    return %c0_i32, %c0_i32_0 : i32, i32
  }
  func.func @transform_1(%arg0: i32) -> (i32, i32) {
    %c0_i32 = arith.constant 0 : i32
    %c0_i32_0 = arith.constant 0 : i32
    %c0_i32_1 = arith.constant 0 : i32
    return %c0_i32, %c0_i32_0 : i32, i32
  }
  func.func @transform_2(%arg0: i32) -> (i32, i32) {
    %c0_i32 = arith.constant 0 : i32
    %c0_i32_0 = arith.constant 0 : i32
    %c0_i32_1 = arith.constant 0 : i32
    return %c0_i32, %c0_i32_0 : i32, i32
  }
  func.func @transform_3(%arg0: i32) -> (i32, i32) {
    %c0_i32 = arith.constant 0 : i32
    %c0_i32_0 = arith.constant 0 : i32
    %c0_i32_1 = arith.constant 0 : i32
    return %c0_i32, %c0_i32_0 : i32, i32
  }
}

module attributes {stable_mosaic.version = 11 : i64} {
  func.func @_gemm_kernel(%arg0: i32, %arg1: memref<4x144xbf16, #tpu.memory_space<vmem>>, %arg2: memref<144x512xbf16, #tpu.memory_space<vmem>>, %arg3: memref<4x1xf32, #tpu.memory_space<vmem>>, %arg4: memref<4x1xf32, #tpu.memory_space<vmem>>, %arg5: memref<4x512xf32, #tpu.memory_space<vmem>>) attributes {dimension_semantics = [#tpu.dimension_semantics<parallel>], iteration_bounds = array<i64: 1>, scalar_prefetch = 0 : i64, scratch_operands = 0 : i64, tpu.core_type = #tpu.core_type<tc>, window_params = [{pipeline_mode = #tpu.pipeline_mode<synchronous>, transform_indices = @transform_0, window_bounds = array<i64: 4, 144>}, {transform_indices = @transform_1, window_bounds = array<i64: 144, 512>}, {pipeline_mode = #tpu.pipeline_mode<synchronous>, transform_indices = @transform_2, window_bounds = array<i64: 4, 1>}, {pipeline_mode = #tpu.pipeline_mode<synchronous>, transform_indices = @transform_3, window_bounds = array<i64: 4, 1>}, {transform_indices = @transform_4, window_bounds = array<i64: 4, 512>}]} {
    %c0 = arith.constant 0 : index
    %c0_0 = arith.constant 0 : index
    %0 = vector.load %arg1[%c0, %c0_0] : memref<4x144xbf16, #tpu.memory_space<vmem>>, vector<4x144xbf16>
    %c0_1 = arith.constant 0 : index
    %c0_2 = arith.constant 0 : index
    %1 = vector.load %arg2[%c0_1, %c0_2] : memref<144x512xbf16, #tpu.memory_space<vmem>>, vector<144x512xbf16>
    %cst = arith.constant dense<0.000000e+00> : vector<4x512xf32>
    %2 = tpu.matmul %0, %1, %cst {dimension_numbers = #tpu.dot_dimension_numbers<[1], [0], [0], [1], [0, 0, 1, 1], [], []>} : vector<4x144xbf16>, vector<144x512xbf16>, vector<4x512xf32> -> vector<4x512xf32>
    %c0_3 = arith.constant 0 : index
    %c0_4 = arith.constant 0 : index
    %3 = vector.load %arg3[%c0_3, %c0_4] : memref<4x1xf32, #tpu.memory_space<vmem>>, vector<4x1xf32>
    %4 = vector.broadcast %3 : vector<4x1xf32> to vector<4x512xf32>
    %5 = arith.mulf %2, %4 : vector<4x512xf32>
    %c0_5 = arith.constant 0 : index
    %c0_6 = arith.constant 0 : index
    %6 = vector.load %arg4[%c0_5, %c0_6] : memref<4x1xf32, #tpu.memory_space<vmem>>, vector<4x1xf32>
    %7 = vector.broadcast %6 : vector<4x1xf32> to vector<4x512xf32>
    %8 = arith.addf %5, %7 : vector<4x512xf32>
    %cst_7 = arith.constant 0.000000e+00 : f32
    %9 = vector.broadcast %cst_7 : f32 to vector<4x512xf32>
    %10 = arith.maximumf %8, %9 : vector<4x512xf32>
    %c0_8 = arith.constant 0 : index
    %c0_9 = arith.constant 0 : index
    %11 = vector.load %arg5[%c0_8, %c0_9] : memref<4x512xf32, #tpu.memory_space<vmem>>, vector<4x512xf32>
    tpu.vector_store %arg5[%c0_8, %c0_9], %10 {strides = array<i32>} : memref<4x512xf32, #tpu.memory_space<vmem>>, vector<4x512xf32>,
    return
  }
  func.func @transform_0(%arg0: i32) -> (i32, i32) {
    %c0_i32 = arith.constant 0 : i32
    %c0_i32_0 = arith.constant 0 : i32
    %c0_i32_1 = arith.constant 0 : i32
    return %c0_i32, %c0_i32_0 : i32, i32
  }
  func.func @transform_1(%arg0: i32) -> (i32, i32) {
    %c0_i32 = arith.constant 0 : i32
    %c0_i32_0 = arith.constant 0 : i32
    return %c0_i32, %arg0 : i32, i32
  }
  func.func @transform_2(%arg0: i32) -> (i32, i32) {
    %c0_i32 = arith.constant 0 : i32
    %c0_i32_0 = arith.constant 0 : i32
    %c0_i32_1 = arith.constant 0 : i32
    return %c0_i32, %c0_i32_0 : i32, i32
  }
  func.func @transform_3(%arg0: i32) -> (i32, i32) {
    %c0_i32 = arith.constant 0 : i32
    %c0_i32_0 = arith.constant 0 : i32
    %c0_i32_1 = arith.constant 0 : i32
    return %c0_i32, %c0_i32_0 : i32, i32
  }
  func.func @transform_4(%arg0: i32) -> (i32, i32) {
    %c0_i32 = arith.constant 0 : i32
    %c0_i32_0 = arith.constant 0 : i32
    return %c0_i32, %arg0 : i32, i32
  }
}

module attributes {stable_mosaic.version = 11 : i64} {
  func.func @_gemm_kernel(%arg0: i32, %arg1: memref<4x12xbf16, #tpu.memory_space<vmem>>, %arg2: memref<12x256xbf16, #tpu.memory_space<vmem>>, %arg3: memref<4x1xf32, #tpu.memory_space<vmem>>, %arg4: memref<4x1xf32, #tpu.memory_space<vmem>>, %arg5: memref<4x256xf32, #tpu.memory_space<vmem>>) attributes {dimension_semantics = [#tpu.dimension_semantics<parallel>], iteration_bounds = array<i64: 1>, scalar_prefetch = 0 : i64, scratch_operands = 0 : i64, tpu.core_type = #tpu.core_type<tc>, window_params = [{pipeline_mode = #tpu.pipeline_mode<synchronous>, transform_indices = @transform_0, window_bounds = array<i64: 4, 12>}, {transform_indices = @transform_1, window_bounds = array<i64: 12, 256>}, {pipeline_mode = #tpu.pipeline_mode<synchronous>, transform_indices = @transform_2, window_bounds = array<i64: 4, 1>}, {pipeline_mode = #tpu.pipeline_mode<synchronous>, transform_indices = @transform_3, window_bounds = array<i64: 4, 1>}, {transform_indices = @transform_4, window_bounds = array<i64: 4, 256>}]} {
    %c0 = arith.constant 0 : index
    %c0_0 = arith.constant 0 : index
    %0 = vector.load %arg1[%c0, %c0_0] : memref<4x12xbf16, #tpu.memory_space<vmem>>, vector<4x12xbf16>
    %c0_1 = arith.constant 0 : index
    %c0_2 = arith.constant 0 : index
    %1 = vector.load %arg2[%c0_1, %c0_2] : memref<12x256xbf16, #tpu.memory_space<vmem>>, vector<12x256xbf16>
    %cst = arith.constant dense<0.000000e+00> : vector<4x256xf32>
    %2 = tpu.matmul %0, %1, %cst {dimension_numbers = #tpu.dot_dimension_numbers<[1], [0], [0], [1], [0, 0, 1, 1], [], []>} : vector<4x12xbf16>, vector<12x256xbf16>, vector<4x256xf32> -> vector<4x256xf32>
    %c0_3 = arith.constant 0 : index
    %c0_4 = arith.constant 0 : index
    %3 = vector.load %arg3[%c0_3, %c0_4] : memref<4x1xf32, #tpu.memory_space<vmem>>, vector<4x1xf32>
    %4 = vector.broadcast %3 : vector<4x1xf32> to vector<4x256xf32>
    %5 = arith.mulf %2, %4 : vector<4x256xf32>
    %c0_5 = arith.constant 0 : index
    %c0_6 = arith.constant 0 : index
    %6 = vector.load %arg4[%c0_5, %c0_6] : memref<4x1xf32, #tpu.memory_space<vmem>>, vector<4x1xf32>
    %7 = vector.broadcast %6 : vector<4x1xf32> to vector<4x256xf32>
    %8 = arith.addf %5, %7 : vector<4x256xf32>
    %cst_7 = arith.constant 0.000000e+00 : f32
    %9 = vector.broadcast %cst_7 : f32 to vector<4x256xf32>
    %10 = arith.maximumf %8, %9 : vector<4x256xf32>
    %c0_8 = arith.constant 0 : index
    %c0_9 = arith.constant 0 : index
    %11 = vector.load %arg5[%c0_8, %c0_9] : memref<4x256xf32, #tpu.memory_space<vmem>>, vector<4x256xf32>
    tpu.vector_store %arg5[%c0_8, %c0_9], %10 {strides = array<i32>} : memref<4x256xf32, #tpu.memory_space<vmem>>, vector<4x256xf32>,
    return
  }
  func.func @transform_0(%arg0: i32) -> (i32, i32) {
    %c0_i32 = arith.constant 0 : i32
    %c0_i32_0 = arith.constant 0 : i32
    %c0_i32_1 = arith.constant 0 : i32
    return %c0_i32, %c0_i32_0 : i32, i32
  }
  func.func @transform_1(%arg0: i32) -> (i32, i32) {
    %c0_i32 = arith.constant 0 : i32
    %c0_i32_0 = arith.constant 0 : i32
    return %c0_i32, %arg0 : i32, i32
  }
  func.func @transform_2(%arg0: i32) -> (i32, i32) {
    %c0_i32 = arith.constant 0 : i32
    %c0_i32_0 = arith.constant 0 : i32
    %c0_i32_1 = arith.constant 0 : i32
    return %c0_i32, %c0_i32_0 : i32, i32
  }
  func.func @transform_3(%arg0: i32) -> (i32, i32) {
    %c0_i32 = arith.constant 0 : i32
    %c0_i32_0 = arith.constant 0 : i32
    %c0_i32_1 = arith.constant 0 : i32
    return %c0_i32, %c0_i32_0 : i32, i32
  }
  func.func @transform_4(%arg0: i32) -> (i32, i32) {
    %c0_i32 = arith.constant 0 : i32
    %c0_i32_0 = arith.constant 0 : i32
    return %c0_i32, %arg0 : i32, i32
  }
}

module attributes {stable_mosaic.version = 11 : i64} {
  func.func @_gemm_kernel(%arg0: i32, %arg1: memref<4x108xbf16, #tpu.memory_space<vmem>>, %arg2: memref<108x2048xbf16, #tpu.memory_space<vmem>>, %arg3: memref<4x1xf32, #tpu.memory_space<vmem>>, %arg4: memref<4x1xf32, #tpu.memory_space<vmem>>, %arg5: memref<4x2048xf32, #tpu.memory_space<vmem>>) attributes {dimension_semantics = [#tpu.dimension_semantics<parallel>], iteration_bounds = array<i64: 2>, scalar_prefetch = 0 : i64, scratch_operands = 0 : i64, tpu.core_type = #tpu.core_type<tc>, window_params = [{pipeline_mode = #tpu.pipeline_mode<synchronous>, transform_indices = @transform_0, window_bounds = array<i64: 4, 108>}, {transform_indices = @transform_1, window_bounds = array<i64: 108, 2048>}, {pipeline_mode = #tpu.pipeline_mode<synchronous>, transform_indices = @transform_2, window_bounds = array<i64: 4, 1>}, {pipeline_mode = #tpu.pipeline_mode<synchronous>, transform_indices = @transform_3, window_bounds = array<i64: 4, 1>}, {transform_indices = @transform_4, window_bounds = array<i64: 4, 2048>}]} {
    %c0 = arith.constant 0 : index
    %c0_0 = arith.constant 0 : index
    %0 = vector.load %arg1[%c0, %c0_0] : memref<4x108xbf16, #tpu.memory_space<vmem>>, vector<4x108xbf16>
    %c0_1 = arith.constant 0 : index
    %c0_2 = arith.constant 0 : index
    %1 = vector.load %arg2[%c0_1, %c0_2] : memref<108x2048xbf16, #tpu.memory_space<vmem>>, vector<108x2048xbf16>
    %cst = arith.constant dense<0.000000e+00> : vector<4x2048xf32>
    %2 = tpu.matmul %0, %1, %cst {dimension_numbers = #tpu.dot_dimension_numbers<[1], [0], [0], [1], [0, 0, 1, 1], [], []>} : vector<4x108xbf16>, vector<108x2048xbf16>, vector<4x2048xf32> -> vector<4x2048xf32>
    %c0_3 = arith.constant 0 : index
    %c0_4 = arith.constant 0 : index
    %3 = vector.load %arg3[%c0_3, %c0_4] : memref<4x1xf32, #tpu.memory_space<vmem>>, vector<4x1xf32>
    %4 = vector.broadcast %3 : vector<4x1xf32> to vector<4x2048xf32>
    %5 = arith.mulf %2, %4 : vector<4x2048xf32>
    %c0_5 = arith.constant 0 : index
    %c0_6 = arith.constant 0 : index
    %6 = vector.load %arg4[%c0_5, %c0_6] : memref<4x1xf32, #tpu.memory_space<vmem>>, vector<4x1xf32>
    %7 = vector.broadcast %6 : vector<4x1xf32> to vector<4x2048xf32>
    %8 = arith.addf %5, %7 : vector<4x2048xf32>
    %cst_7 = arith.constant 0.000000e+00 : f32
    %9 = vector.broadcast %cst_7 : f32 to vector<4x2048xf32>
    %10 = arith.maximumf %8, %9 : vector<4x2048xf32>
    %c0_8 = arith.constant 0 : index
    %c0_9 = arith.constant 0 : index
    %11 = vector.load %arg5[%c0_8, %c0_9] : memref<4x2048xf32, #tpu.memory_space<vmem>>, vector<4x2048xf32>
    tpu.vector_store %arg5[%c0_8, %c0_9], %10 {strides = array<i32>} : memref<4x2048xf32, #tpu.memory_space<vmem>>, vector<4x2048xf32>,
    return
  }
  func.func @transform_0(%arg0: i32) -> (i32, i32) {
    %c0_i32 = arith.constant 0 : i32
    %c0_i32_0 = arith.constant 0 : i32
    %c0_i32_1 = arith.constant 0 : i32
    return %c0_i32, %c0_i32_0 : i32, i32
  }
  func.func @transform_1(%arg0: i32) -> (i32, i32) {
    %c0_i32 = arith.constant 0 : i32
    %c0_i32_0 = arith.constant 0 : i32
    return %c0_i32, %arg0 : i32, i32
  }
  func.func @transform_2(%arg0: i32) -> (i32, i32) {
    %c0_i32 = arith.constant 0 : i32
    %c0_i32_0 = arith.constant 0 : i32
    %c0_i32_1 = arith.constant 0 : i32
    return %c0_i32, %c0_i32_0 : i32, i32
  }
  func.func @transform_3(%arg0: i32) -> (i32, i32) {
    %c0_i32 = arith.constant 0 : i32
    %c0_i32_0 = arith.constant 0 : i32
    %c0_i32_1 = arith.constant 0 : i32
    return %c0_i32, %c0_i32_0 : i32, i32
  }
  func.func @transform_4(%arg0: i32) -> (i32, i32) {
    %c0_i32 = arith.constant 0 : i32
    %c0_i32_0 = arith.constant 0 : i32
    return %c0_i32, %arg0 : i32, i32
  }
}

module attributes {stable_mosaic.version = 11 : i64} {
  func.func @_gemm_kernel(%arg0: i32, %arg1: memref<4x108xbf16, #tpu.memory_space<vmem>>, %arg2: memref<108x2560xbf16, #tpu.memory_space<vmem>>, %arg3: memref<4x1xf32, #tpu.memory_space<vmem>>, %arg4: memref<4x1xf32, #tpu.memory_space<vmem>>, %arg5: memref<4x2560xf32, #tpu.memory_space<vmem>>) attributes {dimension_semantics = [#tpu.dimension_semantics<parallel>], iteration_bounds = array<i64: 2>, scalar_prefetch = 0 : i64, scratch_operands = 0 : i64, tpu.core_type = #tpu.core_type<tc>, window_params = [{pipeline_mode = #tpu.pipeline_mode<synchronous>, transform_indices = @transform_0, window_bounds = array<i64: 4, 108>}, {transform_indices = @transform_1, window_bounds = array<i64: 108, 2560>}, {pipeline_mode = #tpu.pipeline_mode<synchronous>, transform_indices = @transform_2, window_bounds = array<i64: 4, 1>}, {pipeline_mode = #tpu.pipeline_mode<synchronous>, transform_indices = @transform_3, window_bounds = array<i64: 4, 1>}, {transform_indices = @transform_4, window_bounds = array<i64: 4, 2560>}]} {
    %c0 = arith.constant 0 : index
    %c0_0 = arith.constant 0 : index
    %0 = vector.load %arg1[%c0, %c0_0] : memref<4x108xbf16, #tpu.memory_space<vmem>>, vector<4x108xbf16>
    %c0_1 = arith.constant 0 : index
    %c0_2 = arith.constant 0 : index
    %1 = vector.load %arg2[%c0_1, %c0_2] : memref<108x2560xbf16, #tpu.memory_space<vmem>>, vector<108x2560xbf16>
    %cst = arith.constant dense<0.000000e+00> : vector<4x2560xf32>
    %2 = tpu.matmul %0, %1, %cst {dimension_numbers = #tpu.dot_dimension_numbers<[1], [0], [0], [1], [0, 0, 1, 1], [], []>} : vector<4x108xbf16>, vector<108x2560xbf16>, vector<4x2560xf32> -> vector<4x2560xf32>
    %c0_3 = arith.constant 0 : index
    %c0_4 = arith.constant 0 : index
    %3 = vector.load %arg3[%c0_3, %c0_4] : memref<4x1xf32, #tpu.memory_space<vmem>>, vector<4x1xf32>
    %4 = vector.broadcast %3 : vector<4x1xf32> to vector<4x2560xf32>
    %5 = arith.mulf %2, %4 : vector<4x2560xf32>
    %c0_5 = arith.constant 0 : index
    %c0_6 = arith.constant 0 : index
    %6 = vector.load %arg4[%c0_5, %c0_6] : memref<4x1xf32, #tpu.memory_space<vmem>>, vector<4x1xf32>
    %7 = vector.broadcast %6 : vector<4x1xf32> to vector<4x2560xf32>
    %8 = arith.addf %5, %7 : vector<4x2560xf32>
    %cst_7 = arith.constant 0.000000e+00 : f32
    %9 = vector.broadcast %cst_7 : f32 to vector<4x2560xf32>
    %10 = arith.maximumf %8, %9 : vector<4x2560xf32>
    %c0_8 = arith.constant 0 : index
    %c0_9 = arith.constant 0 : index
    %11 = vector.load %arg5[%c0_8, %c0_9] : memref<4x2560xf32, #tpu.memory_space<vmem>>, vector<4x2560xf32>
    tpu.vector_store %arg5[%c0_8, %c0_9], %10 {strides = array<i32>} : memref<4x2560xf32, #tpu.memory_space<vmem>>, vector<4x2560xf32>,
    return
  }
  func.func @transform_0(%arg0: i32) -> (i32, i32) {
    %c0_i32 = arith.constant 0 : i32
    %c0_i32_0 = arith.constant 0 : i32
    %c0_i32_1 = arith.constant 0 : i32
    return %c0_i32, %c0_i32_0 : i32, i32
  }
  func.func @transform_1(%arg0: i32) -> (i32, i32) {
    %c0_i32 = arith.constant 0 : i32
    %c0_i32_0 = arith.constant 0 : i32
    return %c0_i32, %arg0 : i32, i32
  }
  func.func @transform_2(%arg0: i32) -> (i32, i32) {
    %c0_i32 = arith.constant 0 : i32
    %c0_i32_0 = arith.constant 0 : i32
    %c0_i32_1 = arith.constant 0 : i32
    return %c0_i32, %c0_i32_0 : i32, i32
  }
  func.func @transform_3(%arg0: i32) -> (i32, i32) {
    %c0_i32 = arith.constant 0 : i32
    %c0_i32_0 = arith.constant 0 : i32
    %c0_i32_1 = arith.constant 0 : i32
    return %c0_i32, %c0_i32_0 : i32, i32
  }
  func.func @transform_4(%arg0: i32) -> (i32, i32) {
    %c0_i32 = arith.constant 0 : i32
    %c0_i32_0 = arith.constant 0 : i32
    return %c0_i32, %arg0 : i32, i32
  }
}

module attributes {stable_mosaic.version = 11 : i64} {
  func.func @_gemm_kernel(%arg0: i32, %arg1: memref<4x4xbf16, #tpu.memory_space<vmem>>, %arg2: memref<4x2560xbf16, #tpu.memory_space<vmem>>, %arg3: memref<4x1xf32, #tpu.memory_space<vmem>>, %arg4: memref<4x1xf32, #tpu.memory_space<vmem>>, %arg5: memref<4x2560xf32, #tpu.memory_space<vmem>>) attributes {dimension_semantics = [#tpu.dimension_semantics<parallel>], iteration_bounds = array<i64: 2>, scalar_prefetch = 0 : i64, scratch_operands = 0 : i64, tpu.core_type = #tpu.core_type<tc>, window_params = [{pipeline_mode = #tpu.pipeline_mode<synchronous>, transform_indices = @transform_0, window_bounds = array<i64: 4, 4>}, {transform_indices = @transform_1, window_bounds = array<i64: 4, 2560>}, {pipeline_mode = #tpu.pipeline_mode<synchronous>, transform_indices = @transform_2, window_bounds = array<i64: 4, 1>}, {pipeline_mode = #tpu.pipeline_mode<synchronous>, transform_indices = @transform_3, window_bounds = array<i64: 4, 1>}, {transform_indices = @transform_4, window_bounds = array<i64: 4, 2560>}]} {
    %c0 = arith.constant 0 : index
    %c0_0 = arith.constant 0 : index
    %0 = vector.load %arg1[%c0, %c0_0] : memref<4x4xbf16, #tpu.memory_space<vmem>>, vector<4x4xbf16>
    %c0_1 = arith.constant 0 : index
    %c0_2 = arith.constant 0 : index
    %1 = vector.load %arg2[%c0_1, %c0_2] : memref<4x2560xbf16, #tpu.memory_space<vmem>>, vector<4x2560xbf16>
    %cst = arith.constant dense<0.000000e+00> : vector<4x2560xf32>
    %2 = tpu.matmul %0, %1, %cst {dimension_numbers = #tpu.dot_dimension_numbers<[1], [0], [0], [1], [0, 0, 1, 1], [], []>} : vector<4x4xbf16>, vector<4x2560xbf16>, vector<4x2560xf32> -> vector<4x2560xf32>
    %c0_3 = arith.constant 0 : index
    %c0_4 = arith.constant 0 : index
    %3 = vector.load %arg3[%c0_3, %c0_4] : memref<4x1xf32, #tpu.memory_space<vmem>>, vector<4x1xf32>
    %4 = vector.broadcast %3 : vector<4x1xf32> to vector<4x2560xf32>
    %5 = arith.mulf %2, %4 : vector<4x2560xf32>
    %c0_5 = arith.constant 0 : index
    %c0_6 = arith.constant 0 : index
    %6 = vector.load %arg4[%c0_5, %c0_6] : memref<4x1xf32, #tpu.memory_space<vmem>>, vector<4x1xf32>
    %7 = vector.broadcast %6 : vector<4x1xf32> to vector<4x2560xf32>
    %8 = arith.addf %5, %7 : vector<4x2560xf32>
    %cst_7 = arith.constant 0.000000e+00 : f32
    %9 = vector.broadcast %cst_7 : f32 to vector<4x2560xf32>
    %10 = arith.maximumf %8, %9 : vector<4x2560xf32>
    %c0_8 = arith.constant 0 : index
    %c0_9 = arith.constant 0 : index
    %11 = vector.load %arg5[%c0_8, %c0_9] : memref<4x2560xf32, #tpu.memory_space<vmem>>, vector<4x2560xf32>
    tpu.vector_store %arg5[%c0_8, %c0_9], %10 {strides = array<i32>} : memref<4x2560xf32, #tpu.memory_space<vmem>>, vector<4x2560xf32>,
    return
  }
  func.func @transform_0(%arg0: i32) -> (i32, i32) {
    %c0_i32 = arith.constant 0 : i32
    %c0_i32_0 = arith.constant 0 : i32
    %c0_i32_1 = arith.constant 0 : i32
    return %c0_i32, %c0_i32_0 : i32, i32
  }
  func.func @transform_1(%arg0: i32) -> (i32, i32) {
    %c0_i32 = arith.constant 0 : i32
    %c0_i32_0 = arith.constant 0 : i32
    return %c0_i32, %arg0 : i32, i32
  }
  func.func @transform_2(%arg0: i32) -> (i32, i32) {
    %c0_i32 = arith.constant 0 : i32
    %c0_i32_0 = arith.constant 0 : i32
    %c0_i32_1 = arith.constant 0 : i32
    return %c0_i32, %c0_i32_0 : i32, i32
  }
  func.func @transform_3(%arg0: i32) -> (i32, i32) {
    %c0_i32 = arith.constant 0 : i32
    %c0_i32_0 = arith.constant 0 : i32
    %c0_i32_1 = arith.constant 0 : i32
    return %c0_i32, %c0_i32_0 : i32, i32
  }
  func.func @transform_4(%arg0: i32) -> (i32, i32) {
    %c0_i32 = arith.constant 0 : i32
    %c0_i32_0 = arith.constant 0 : i32
    return %c0_i32, %arg0 : i32, i32
  }
}

module attributes {stable_mosaic.version = 11 : i64} {
  func.func @_residual_rescale_kernel(%arg0: i32, %arg1: memref<160x128xf32, #tpu.memory_space<vmem>>, %arg2: memref<160x128xf32, #tpu.memory_space<vmem>>, %arg3: memref<160x128xf32, #tpu.memory_space<vmem>>, %arg4: memref<160x128xf32, #tpu.memory_space<vmem>>) attributes {dimension_semantics = [#tpu.dimension_semantics<arbitrary>], iteration_bounds = array<i64: 1>, scalar_prefetch = 0 : i64, scratch_operands = 0 : i64, tpu.core_type = #tpu.core_type<tc>, window_params = [{pipeline_mode = #tpu.pipeline_mode<synchronous>, transform_indices = @transform_0, window_bounds = array<i64: 160, 128>}, {pipeline_mode = #tpu.pipeline_mode<synchronous>, transform_indices = @transform_1, window_bounds = array<i64: 160, 128>}, {pipeline_mode = #tpu.pipeline_mode<synchronous>, transform_indices = @transform_2, window_bounds = array<i64: 160, 128>}, {pipeline_mode = #tpu.pipeline_mode<synchronous>, transform_indices = @transform_3, window_bounds = array<i64: 160, 128>}]} {
    %c0 = arith.constant 0 : index
    %c0_0 = arith.constant 0 : index
    %0 = vector.load %arg1[%c0, %c0_0] : memref<160x128xf32, #tpu.memory_space<vmem>>, vector<160x128xf32>
    %c0_1 = arith.constant 0 : index
    %c0_2 = arith.constant 0 : index
    %1 = vector.load %arg2[%c0_1, %c0_2] : memref<160x128xf32, #tpu.memory_space<vmem>>, vector<160x128xf32>
    %c0_3 = arith.constant 0 : index
    %c0_4 = arith.constant 0 : index
    %2 = vector.load %arg3[%c0_3, %c0_4] : memref<160x128xf32, #tpu.memory_space<vmem>>, vector<160x128xf32>
    %3 = arith.mulf %1, %2 : vector<160x128xf32>
    %4 = arith.addf %0, %3 : vector<160x128xf32>
    %c0_5 = arith.constant 0 : index
    %c0_6 = arith.constant 0 : index
    %5 = vector.load %arg4[%c0_5, %c0_6] : memref<160x128xf32, #tpu.memory_space<vmem>>, vector<160x128xf32>
    tpu.vector_store %arg4[%c0_5, %c0_6], %4 {strides = array<i32>} : memref<160x128xf32, #tpu.memory_space<vmem>>, vector<160x128xf32>,
    return
  }
  func.func @transform_0(%arg0: i32) -> (i32, i32) {
    %c0_i32 = arith.constant 0 : i32
    %c0_i32_0 = arith.constant 0 : i32
    %c0_i32_1 = arith.constant 0 : i32
    return %c0_i32, %c0_i32_0 : i32, i32
  }
  func.func @transform_1(%arg0: i32) -> (i32, i32) {
    %c0_i32 = arith.constant 0 : i32
    %c0_i32_0 = arith.constant 0 : i32
    %c0_i32_1 = arith.constant 0 : i32
    return %c0_i32, %c0_i32_0 : i32, i32
  }
  func.func @transform_2(%arg0: i32) -> (i32, i32) {
    %c0_i32 = arith.constant 0 : i32
    %c0_i32_0 = arith.constant 0 : i32
    %c0_i32_1 = arith.constant 0 : i32
    return %c0_i32, %c0_i32_0 : i32, i32
  }
  func.func @transform_3(%arg0: i32) -> (i32, i32) {
    %c0_i32 = arith.constant 0 : i32
    %c0_i32_0 = arith.constant 0 : i32
    %c0_i32_1 = arith.constant 0 : i32
    return %c0_i32, %c0_i32_0 : i32, i32
  }
}

module attributes {stable_mosaic.version = 11 : i64} {
  func.func @_gemm_kernel(%arg0: i32, %arg1: memref<4x144xbf16, #tpu.memory_space<vmem>>, %arg2: memref<144x1024xbf16, #tpu.memory_space<vmem>>, %arg3: memref<4x1xf32, #tpu.memory_space<vmem>>, %arg4: memref<4x1xf32, #tpu.memory_space<vmem>>, %arg5: memref<4x1024xf32, #tpu.memory_space<vmem>>) attributes {dimension_semantics = [#tpu.dimension_semantics<parallel>], iteration_bounds = array<i64: 2>, scalar_prefetch = 0 : i64, scratch_operands = 0 : i64, tpu.core_type = #tpu.core_type<tc>, window_params = [{pipeline_mode = #tpu.pipeline_mode<synchronous>, transform_indices = @transform_0, window_bounds = array<i64: 4, 144>}, {transform_indices = @transform_1, window_bounds = array<i64: 144, 1024>}, {pipeline_mode = #tpu.pipeline_mode<synchronous>, transform_indices = @transform_2, window_bounds = array<i64: 4, 1>}, {pipeline_mode = #tpu.pipeline_mode<synchronous>, transform_indices = @transform_3, window_bounds = array<i64: 4, 1>}, {transform_indices = @transform_4, window_bounds = array<i64: 4, 1024>}]} {
    %c0 = arith.constant 0 : index
    %c0_0 = arith.constant 0 : index
    %0 = vector.load %arg1[%c0, %c0_0] : memref<4x144xbf16, #tpu.memory_space<vmem>>, vector<4x144xbf16>
    %c0_1 = arith.constant 0 : index
    %c0_2 = arith.constant 0 : index
    %1 = vector.load %arg2[%c0_1, %c0_2] : memref<144x1024xbf16, #tpu.memory_space<vmem>>, vector<144x1024xbf16>
    %cst = arith.constant dense<0.000000e+00> : vector<4x1024xf32>
    %2 = tpu.matmul %0, %1, %cst {dimension_numbers = #tpu.dot_dimension_numbers<[1], [0], [0], [1], [0, 0, 1, 1], [], []>} : vector<4x144xbf16>, vector<144x1024xbf16>, vector<4x1024xf32> -> vector<4x1024xf32>
    %c0_3 = arith.constant 0 : index
    %c0_4 = arith.constant 0 : index
    %3 = vector.load %arg3[%c0_3, %c0_4] : memref<4x1xf32, #tpu.memory_space<vmem>>, vector<4x1xf32>
    %4 = vector.broadcast %3 : vector<4x1xf32> to vector<4x1024xf32>
    %5 = arith.mulf %2, %4 : vector<4x1024xf32>
    %c0_5 = arith.constant 0 : index
    %c0_6 = arith.constant 0 : index
    %6 = vector.load %arg4[%c0_5, %c0_6] : memref<4x1xf32, #tpu.memory_space<vmem>>, vector<4x1xf32>
    %7 = vector.broadcast %6 : vector<4x1xf32> to vector<4x1024xf32>
    %8 = arith.addf %5, %7 : vector<4x1024xf32>
    %cst_7 = arith.constant 0.000000e+00 : f32
    %9 = vector.broadcast %cst_7 : f32 to vector<4x1024xf32>
    %10 = arith.maximumf %8, %9 : vector<4x1024xf32>
    %c0_8 = arith.constant 0 : index
    %c0_9 = arith.constant 0 : index
    %11 = vector.load %arg5[%c0_8, %c0_9] : memref<4x1024xf32, #tpu.memory_space<vmem>>, vector<4x1024xf32>
    tpu.vector_store %arg5[%c0_8, %c0_9], %10 {strides = array<i32>} : memref<4x1024xf32, #tpu.memory_space<vmem>>, vector<4x1024xf32>,
    return
  }
  func.func @transform_0(%arg0: i32) -> (i32, i32) {
    %c0_i32 = arith.constant 0 : i32
    %c0_i32_0 = arith.constant 0 : i32
    %c0_i32_1 = arith.constant 0 : i32
    return %c0_i32, %c0_i32_0 : i32, i32
  }
  func.func @transform_1(%arg0: i32) -> (i32, i32) {
    %c0_i32 = arith.constant 0 : i32
    %c0_i32_0 = arith.constant 0 : i32
    return %c0_i32, %arg0 : i32, i32
  }
  func.func @transform_2(%arg0: i32) -> (i32, i32) {
    %c0_i32 = arith.constant 0 : i32
    %c0_i32_0 = arith.constant 0 : i32
    %c0_i32_1 = arith.constant 0 : i32
    return %c0_i32, %c0_i32_0 : i32, i32
  }
  func.func @transform_3(%arg0: i32) -> (i32, i32) {
    %c0_i32 = arith.constant 0 : i32
    %c0_i32_0 = arith.constant 0 : i32
    %c0_i32_1 = arith.constant 0 : i32
    return %c0_i32, %c0_i32_0 : i32, i32
  }
  func.func @transform_4(%arg0: i32) -> (i32, i32) {
    %c0_i32 = arith.constant 0 : i32
    %c0_i32_0 = arith.constant 0 : i32
    return %c0_i32, %arg0 : i32, i32
  }
}

module attributes {stable_mosaic.version = 11 : i64} {
  func.func @_gemm_kernel(%arg0: i32, %arg1: memref<4x16xbf16, #tpu.memory_space<vmem>>, %arg2: memref<16x512xbf16, #tpu.memory_space<vmem>>, %arg3: memref<4x1xf32, #tpu.memory_space<vmem>>, %arg4: memref<4x1xf32, #tpu.memory_space<vmem>>, %arg5: memref<4x512xf32, #tpu.memory_space<vmem>>) attributes {dimension_semantics = [#tpu.dimension_semantics<parallel>], iteration_bounds = array<i64: 1>, scalar_prefetch = 0 : i64, scratch_operands = 0 : i64, tpu.core_type = #tpu.core_type<tc>, window_params = [{pipeline_mode = #tpu.pipeline_mode<synchronous>, transform_indices = @transform_0, window_bounds = array<i64: 4, 16>}, {transform_indices = @transform_1, window_bounds = array<i64: 16, 512>}, {pipeline_mode = #tpu.pipeline_mode<synchronous>, transform_indices = @transform_2, window_bounds = array<i64: 4, 1>}, {pipeline_mode = #tpu.pipeline_mode<synchronous>, transform_indices = @transform_3, window_bounds = array<i64: 4, 1>}, {transform_indices = @transform_4, window_bounds = array<i64: 4, 512>}]} {
    %c0 = arith.constant 0 : index
    %c0_0 = arith.constant 0 : index
    %0 = vector.load %arg1[%c0, %c0_0] : memref<4x16xbf16, #tpu.memory_space<vmem>>, vector<4x16xbf16>
    %c0_1 = arith.constant 0 : index
    %c0_2 = arith.constant 0 : index
    %1 = vector.load %arg2[%c0_1, %c0_2] : memref<16x512xbf16, #tpu.memory_space<vmem>>, vector<16x512xbf16>
    %cst = arith.constant dense<0.000000e+00> : vector<4x512xf32>
    %2 = tpu.matmul %0, %1, %cst {dimension_numbers = #tpu.dot_dimension_numbers<[1], [0], [0], [1], [0, 0, 1, 1], [], []>} : vector<4x16xbf16>, vector<16x512xbf16>, vector<4x512xf32> -> vector<4x512xf32>
    %c0_3 = arith.constant 0 : index
    %c0_4 = arith.constant 0 : index
    %3 = vector.load %arg3[%c0_3, %c0_4] : memref<4x1xf32, #tpu.memory_space<vmem>>, vector<4x1xf32>
    %4 = vector.broadcast %3 : vector<4x1xf32> to vector<4x512xf32>
    %5 = arith.mulf %2, %4 : vector<4x512xf32>
    %c0_5 = arith.constant 0 : index
    %c0_6 = arith.constant 0 : index
    %6 = vector.load %arg4[%c0_5, %c0_6] : memref<4x1xf32, #tpu.memory_space<vmem>>, vector<4x1xf32>
    %7 = vector.broadcast %6 : vector<4x1xf32> to vector<4x512xf32>
    %8 = arith.addf %5, %7 : vector<4x512xf32>
    %cst_7 = arith.constant 0.000000e+00 : f32
    %9 = vector.broadcast %cst_7 : f32 to vector<4x512xf32>
    %10 = arith.maximumf %8, %9 : vector<4x512xf32>
    %c0_8 = arith.constant 0 : index
    %c0_9 = arith.constant 0 : index
    %11 = vector.load %arg5[%c0_8, %c0_9] : memref<4x512xf32, #tpu.memory_space<vmem>>, vector<4x512xf32>
    tpu.vector_store %arg5[%c0_8, %c0_9], %10 {strides = array<i32>} : memref<4x512xf32, #tpu.memory_space<vmem>>, vector<4x512xf32>,
    return
  }
  func.func @transform_0(%arg0: i32) -> (i32, i32) {
    %c0_i32 = arith.constant 0 : i32
    %c0_i32_0 = arith.constant 0 : i32
    %c0_i32_1 = arith.constant 0 : i32
    return %c0_i32, %c0_i32_0 : i32, i32
  }
  func.func @transform_1(%arg0: i32) -> (i32, i32) {
    %c0_i32 = arith.constant 0 : i32
    %c0_i32_0 = arith.constant 0 : i32
    return %c0_i32, %arg0 : i32, i32
  }
  func.func @transform_2(%arg0: i32) -> (i32, i32) {
    %c0_i32 = arith.constant 0 : i32
    %c0_i32_0 = arith.constant 0 : i32
    %c0_i32_1 = arith.constant 0 : i32
    return %c0_i32, %c0_i32_0 : i32, i32
  }
  func.func @transform_3(%arg0: i32) -> (i32, i32) {
    %c0_i32 = arith.constant 0 : i32
    %c0_i32_0 = arith.constant 0 : i32
    %c0_i32_1 = arith.constant 0 : i32
    return %c0_i32, %c0_i32_0 : i32, i32
  }
  func.func @transform_4(%arg0: i32) -> (i32, i32) {
    %c0_i32 = arith.constant 0 : i32
    %c0_i32_0 = arith.constant 0 : i32
    return %c0_i32, %arg0 : i32, i32
  }
}

module attributes {stable_mosaic.version = 11 : i64} {
  func.func @_out_head_kernel(%arg0: i32, %arg1: memref<8x4xbf16, #tpu.memory_space<vmem>>, %arg2: memref<8x1xf32, #tpu.memory_space<vmem>>, %arg3: memref<8x1xf32, #tpu.memory_space<vmem>>, %arg4: memref<4x8xbf16, #tpu.memory_space<vmem>>, %arg5: memref<4x1xf32, #tpu.memory_space<vmem>>, %arg6: memref<4x1xf32, #tpu.memory_space<vmem>>, %arg7: memref<8x4xbf16, #tpu.memory_space<vmem>>, %arg8: memref<8x1xf32, #tpu.memory_space<vmem>>, %arg9: memref<4x512xbf16, #tpu.memory_space<vmem>>, %arg10: memref<8x512xf32, #tpu.memory_space<vmem>>) attributes {dimension_semantics = [#tpu.dimension_semantics<arbitrary>], iteration_bounds = array<i64: 1>, scalar_prefetch = 0 : i64, scratch_operands = 0 : i64, tpu.core_type = #tpu.core_type<tc>, window_params = [{pipeline_mode = #tpu.pipeline_mode<synchronous>, transform_indices = @transform_0, window_bounds = array<i64: 8, 4>}, {pipeline_mode = #tpu.pipeline_mode<synchronous>, transform_indices = @transform_1, window_bounds = array<i64: 8, 1>}, {pipeline_mode = #tpu.pipeline_mode<synchronous>, transform_indices = @transform_2, window_bounds = array<i64: 8, 1>}, {pipeline_mode = #tpu.pipeline_mode<synchronous>, transform_indices = @transform_3, window_bounds = array<i64: 4, 8>}, {pipeline_mode = #tpu.pipeline_mode<synchronous>, transform_indices = @transform_4, window_bounds = array<i64: 4, 1>}, {pipeline_mode = #tpu.pipeline_mode<synchronous>, transform_indices = @transform_5, window_bounds = array<i64: 4, 1>}, {pipeline_mode = #tpu.pipeline_mode<synchronous>, transform_indices = @transform_6, window_bounds = array<i64: 8, 4>}, {pipeline_mode = #tpu.pipeline_mode<synchronous>, transform_indices = @transform_7, window_bounds = array<i64: 8, 1>}, {pipeline_mode = #tpu.pipeline_mode<synchronous>, transform_indices = @transform_8, window_bounds = array<i64: 4, 512>}, {pipeline_mode = #tpu.pipeline_mode<synchronous>, transform_indices = @transform_9, window_bounds = array<i64: 8, 512>}]} {
    %c0 = arith.constant 0 : index
    %c0_0 = arith.constant 0 : index
    %0 = vector.load %arg1[%c0, %c0_0] : memref<8x4xbf16, #tpu.memory_space<vmem>>, vector<8x4xbf16>
    %c0_1 = arith.constant 0 : index
    %c0_2 = arith.constant 0 : index
    %1 = vector.load %arg9[%c0_1, %c0_2] : memref<4x512xbf16, #tpu.memory_space<vmem>>, vector<4x512xbf16>
    %cst = arith.constant dense<0.000000e+00> : vector<8x512xf32>
    %2 = tpu.matmul %0, %1, %cst {dimension_numbers = #tpu.dot_dimension_numbers<[1], [0], [0], [1], [0, 0, 1, 1], [], []>} : vector<8x4xbf16>, vector<4x512xbf16>, vector<8x512xf32> -> vector<8x512xf32>
    %c0_3 = arith.constant 0 : index
    %c0_4 = arith.constant 0 : index
    %3 = vector.load %arg2[%c0_3, %c0_4] : memref<8x1xf32, #tpu.memory_space<vmem>>, vector<8x1xf32>
    %4 = vector.broadcast %3 : vector<8x1xf32> to vector<8x512xf32>
    %5 = arith.mulf %2, %4 : vector<8x512xf32>
    %c0_5 = arith.constant 0 : index
    %c0_6 = arith.constant 0 : index
    %6 = vector.load %arg3[%c0_5, %c0_6] : memref<8x1xf32, #tpu.memory_space<vmem>>, vector<8x1xf32>
    %7 = vector.broadcast %6 : vector<8x1xf32> to vector<8x512xf32>
    %8 = arith.addf %5, %7 : vector<8x512xf32>
    %c0_7 = arith.constant 0 : index
    %c0_8 = arith.constant 0 : index
    %9 = vector.load %arg4[%c0_7, %c0_8] : memref<4x8xbf16, #tpu.memory_space<vmem>>, vector<4x8xbf16>
    %10 = arith.truncf %8 : vector<8x512xf32> to vector<8x512xbf16>
    %cst_9 = arith.constant dense<0.000000e+00> : vector<4x512xf32>
    %11 = tpu.matmul %9, %10, %cst_9 {dimension_numbers = #tpu.dot_dimension_numbers<[1], [0], [0], [1], [0, 0, 1, 1], [], []>} : vector<4x8xbf16>, vector<8x512xbf16>, vector<4x512xf32> -> vector<4x512xf32>
    %c0_10 = arith.constant 0 : index
    %c0_11 = arith.constant 0 : index
    %12 = vector.load %arg5[%c0_10, %c0_11] : memref<4x1xf32, #tpu.memory_space<vmem>>, vector<4x1xf32>
    %13 = vector.broadcast %12 : vector<4x1xf32> to vector<4x512xf32>
    %14 = arith.mulf %11, %13 : vector<4x512xf32>
    %c0_12 = arith.constant 0 : index
    %c0_13 = arith.constant 0 : index
    %15 = vector.load %arg6[%c0_12, %c0_13] : memref<4x1xf32, #tpu.memory_space<vmem>>, vector<4x1xf32>
    %16 = vector.broadcast %15 : vector<4x1xf32> to vector<4x512xf32>
    %17 = arith.addf %14, %16 : vector<4x512xf32>
    %c0_14 = arith.constant 0 : index
    %c0_15 = arith.constant 0 : index
    %18 = vector.load %arg7[%c0_14, %c0_15] : memref<8x4xbf16, #tpu.memory_space<vmem>>, vector<8x4xbf16>
    %19 = arith.truncf %17 : vector<4x512xf32> to vector<4x512xbf16>
    %cst_16 = arith.constant dense<0.000000e+00> : vector<8x512xf32>
    %20 = tpu.matmul %18, %19, %cst_16 {dimension_numbers = #tpu.dot_dimension_numbers<[1], [0], [0], [1], [0, 0, 1, 1], [], []>} : vector<8x4xbf16>, vector<4x512xbf16>, vector<8x512xf32> -> vector<8x512xf32>
    %c0_17 = arith.constant 0 : index
    %c0_18 = arith.constant 0 : index
    %21 = vector.load %arg8[%c0_17, %c0_18] : memref<8x1xf32, #tpu.memory_space<vmem>>, vector<8x1xf32>
    %22 = vector.broadcast %21 : vector<8x1xf32> to vector<8x512xf32>
    %23 = arith.addf %20, %22 : vector<8x512xf32>
    %24 = arith.negf %23 : vector<8x512xf32>
    %25 = math.exp %24 : vector<8x512xf32>
    %cst_19 = arith.constant 1.000000e+00 : f32
    %26 = vector.broadcast %cst_19 : f32 to vector<8x512xf32>
    %27 = arith.addf %26, %25 : vector<8x512xf32>
    %28 = arith.divf %26, %27 : vector<8x512xf32>
    %c0_20 = arith.constant 0 : index
    %c0_21 = arith.constant 0 : index
    %29 = vector.load %arg10[%c0_20, %c0_21] : memref<8x512xf32, #tpu.memory_space<vmem>>, vector<8x512xf32>
    tpu.vector_store %arg10[%c0_20, %c0_21], %28 {strides = array<i32>} : memref<8x512xf32, #tpu.memory_space<vmem>>, vector<8x512xf32>,
    return
  }
  func.func @transform_0(%arg0: i32) -> (i32, i32) {
    %c0_i32 = arith.constant 0 : i32
    %c0_i32_0 = arith.constant 0 : i32
    %c0_i32_1 = arith.constant 0 : i32
    return %c0_i32, %c0_i32_0 : i32, i32
  }
  func.func @transform_1(%arg0: i32) -> (i32, i32) {
    %c0_i32 = arith.constant 0 : i32
    %c0_i32_0 = arith.constant 0 : i32
    %c0_i32_1 = arith.constant 0 : i32
    return %c0_i32, %c0_i32_0 : i32, i32
  }
  func.func @transform_2(%arg0: i32) -> (i32, i32) {
    %c0_i32 = arith.constant 0 : i32
    %c0_i32_0 = arith.constant 0 : i32
    %c0_i32_1 = arith.constant 0 : i32
    return %c0_i32, %c0_i32_0 : i32, i32
  }
  func.func @transform_3(%arg0: i32) -> (i32, i32) {
    %c0_i32 = arith.constant 0 : i32
    %c0_i32_0 = arith.constant 0 : i32
    %c0_i32_1 = arith.constant 0 : i32
    return %c0_i32, %c0_i32_0 : i32, i32
  }
  func.func @transform_4(%arg0: i32) -> (i32, i32) {
    %c0_i32 = arith.constant 0 : i32
    %c0_i32_0 = arith.constant 0 : i32
    %c0_i32_1 = arith.constant 0 : i32
    return %c0_i32, %c0_i32_0 : i32, i32
  }
  func.func @transform_5(%arg0: i32) -> (i32, i32) {
    %c0_i32 = arith.constant 0 : i32
    %c0_i32_0 = arith.constant 0 : i32
    %c0_i32_1 = arith.constant 0 : i32
    return %c0_i32, %c0_i32_0 : i32, i32
  }
  func.func @transform_6(%arg0: i32) -> (i32, i32) {
    %c0_i32 = arith.constant 0 : i32
    %c0_i32_0 = arith.constant 0 : i32
    %c0_i32_1 = arith.constant 0 : i32
    return %c0_i32, %c0_i32_0 : i32, i32
  }
  func.func @transform_7(%arg0: i32) -> (i32, i32) {
    %c0_i32 = arith.constant 0 : i32
    %c0_i32_0 = arith.constant 0 : i32
    %c0_i32_1 = arith.constant 0 : i32
    return %c0_i32, %c0_i32_0 : i32, i32
  }
  func.func @transform_8(%arg0: i32) -> (i32, i32) {
    %c0_i32 = arith.constant 0 : i32
    %c0_i32_0 = arith.constant 0 : i32
    %c0_i32_1 = arith.constant 0 : i32
    return %c0_i32, %c0_i32_0 : i32, i32
  }
  func.func @transform_9(%arg0: i32) -> (i32, i32) {
    %c0_i32 = arith.constant 0 : i32
    %c0_i32_0 = arith.constant 0 : i32
    %c0_i32_1 = arith.constant 0 : i32
    return %c0_i32, %c0_i32_0 : i32, i32
  }
}

</mosaic_0001>

<bundles_post_ra>
// kernel: decoder_forward.36
= control target key start
LH: loop header
LB: loop body
LE: loop exit
PB: predicated region body
PF: predicated region fallthrough
CT: control target
= control target key end

     0   :  { %v236_v0 = vmov 0.0   ;;  %vm237_vm0 = vmmov 0   ;;  %v238_v3 = vmov 0   ;;  %vm73_vm1 = vcmask 1041408   ;;  %s303_s1 = inlined_call_operand.vmem [shape: bf16[36,384], index: 1, kind: input, shape index: {}]   ;;  %s304_s2 = inlined_call_operand.vmem [shape: f32[4,1], index: 2, kind: input, shape index: {}]   ;;  %s305_s3 = inlined_call_operand.vmem [shape: f32[4,1], index: 3, kind: input, shape index: {}]   ;;  %s306_s0 = inlined_call_operand.vmem [shape: bf16[4,36], index: 0, kind: input, shape index: {}]   ;;  %s307_s4 = inlined_call_operand.vmem [shape: f32[4,384], index: 4, kind: output, shape index: {}]  }
   0x1   :  { %211 = vmatprep.subr.bf16.mxu1 %v236_v0  ;;  %v225_v1 = vld [vmem:[%s303_s1 + $0x4] ss:$12 sps:$4 sm:$0xff]   ;;  %217 = vmatprep.mubr.msk.bf16.mxu1 %vm237_vm0, %v236_v0  ;;  %v227_v2 = vld [vmem:[%s303_s1 + $0x8] ss:$12 sps:$4 sm:$0xff]   ;;  %v228_v4 = vld [vmem:[%s303_s1] ss:$12 sps:$4 sm:$0xff]  }
   0x2   :  { %115 = vmatprep.mubr.bf16.mxu0 %v238_v3  ;;  %224 = vset.pattern.permute.xlu0 %v238_v3  ;;  %v229_v5 = vld [vmem:[%s303_s1 + $0x1c] ss:$12 sps:$4 sm:$0xff]   ;;  %v231_v6 = vld [vmem:[%s303_s1 + $0x20] ss:$12 sps:$4 sm:$0xff]   ;;  %v232_v7 = vld [vmem:[%s303_s1 + $0x18] ss:$12 sps:$4 sm:$0xff]  }
   0x3   :  { %83 = vmatprep.subr.bf16.mxu0 %v225_v1  ;;  %212 = vmatpush3.bf16.msra.mxu1 %v227_v2  ;;  %v27_v8 = vld [vmem:[%s303_s1 + $0x30] sm:$0x33]  ;;  %v234_v10 = vld [vmem:[%s303_s1 + $0x38] ss:$0 sps:$4 sm:$0x33]   ;;  %vm69_vm2 = vcmask 293888  }
   0x4   :  { %84 = vmatpush1.bf16.msra.mxu0 %v228_v4  ;;  %213 = vmatprep.subr.bf16.mxu1 %v236_v0  ;;  %v202_v9 = vcombine.high %v27_v8, %v27_v8  ;;  %v201_v11 = vcombine.low %v27_v8, %v27_v8  ;;  %v164_v12 = vld [vmem:[%s304_s2] sm:$0xf]  ;;  %v81_v13 = vsel %vm73_vm1, %v234_v10, 0 }
   0x5   :  { %85 = vmatprep.subr.bf16.mxu0 %v229_v5  ;;  %167 = vperm.xlu0 %224, %v164_v12   ;;  %v173_v14 = vld [vmem:[%s305_s3] sm:$0xf] }
   0x6   :  { %v75_v15 = vsel %vm73_vm1, %v201_v11, 0  ;;  %v18_v16 = vld [vmem:[%s306_s0] sm:$0x3] }
   0x7   :  { %214 = vmatpush3.bf16.msra.mxu1 %v231_v6 }
   0x8   :  { %86 = vmatpush1.bf16.msra.mxu0 %v232_v7  ;;  %215 = vmatprep.subr.bf16.mxu1 %v236_v0 }
   0x9   :  { %204 = vmatprep.subr.msk.bf16.mxu0 %vm73_vm1, %v202_v9  ;;  %176 = vperm.xlu0 %224, %v173_v14  }
   0xb   :  { %216 = vmatpush3.bf16.msra.mxu1 %v81_v13 }
   0xc   :  { %88 = vmatpush1.bf16.msra.mxu0 %v75_v15 }
   0xe   :  { %218 = vmatmul.mubr.msk.bf16.vlgmr.msra.gmra.mrb[0].mxu1 %vm69_vm2, %v18_v16 }
   0xf   :  { %205 = vmatmul.mubr.msk.bf16.vlgmr.msra.gmra.mrb[0].mxu0 %vm69_vm2, %v18_v16 }
  0x84   :  { %v168_v17 = vpop.permute.xlu0 %167 }
  0x88   :  { %v177_v18 = vpop.permute.xlu0 %176 }
  0xe1   :  { %v158_v19 = vpop.f32.mrb[0].mxu1 }
  0xe2   :  { %v172_v20 = vmul.f32 %v168_v17, %v158_v19  ;;  %v117_v21 = vpop.f32.mrb[0].mxu0  ;;  %v219_v22 = vpop.f32.mrb[1].mxu1 }
  0xe3   :  { %v170_v23 = vmul.f32 %v168_v17, %v117_v21  ;;  %v119_v24 = vpop.f32.mrb[1].mxu0  ;;  %v161_v25 = vpop.f32.mrb[2].mxu1 }
  0xe4   :  { %v181_v26 = vadd.f32 %v177_v18, %v172_v20  ;;  %v171_v27 = vmul.f32 %v168_v17, %v119_v24  ;;  %v121_v28 = vpop.f32.mrb[2].mxu0  ;;  %v220_v29 = vpop.f32.mrb[3].mxu1 }
  0xe5   :  { %v179_v30 = vadd.f32 %v177_v18, %v170_v23  ;;  %v122_v31 = vpop.f32.mrb[3].mxu0 }
  0xe6   :  { %v184_v32 = vmax.f32 %v181_v26, 0.0  ;;  %v180_v33 = vadd.f32 %v177_v18, %v171_v27 }
  0xe7   :  { %v182_v34 = vmax.f32 %v179_v30, 0.0 }
  0xe8   :  { %190 = vst [vmem:[%s307_s4 + $0x8] sm:$0xf] %v184_v32  ;;  %v183_v35 = vmax.f32 %v180_v33, 0.0 }
  0xea   :  { %v187_v36 = vcombine.low %v182_v34, %v183_v35 }
  0xec   :  { %189 = vst [vmem:[%s307_s4] sm:$0xff] %v187_v36 }

// kernel: decoder_forward.37
= control target key start
LH: loop header
LB: loop body
LE: loop exit
PB: predicated region body
PF: predicated region fallthrough
CT: control target
= control target key end

     0   :  { %v132_v0 = vmov 0.0   ;;  %vm133_vm0 = vmmov 0   ;;  %v134_v2 = vmov 0   ;;  %vm43_vm1 = vcmask 1041408   ;;  %s181_s1 = inlined_call_operand.vmem [shape: bf16[36,128], index: 1, kind: input, shape index: {}]   ;;  %s182_s2 = inlined_call_operand.vmem [shape: f32[4,1], index: 2, kind: input, shape index: {}]   ;;  %s183_s3 = inlined_call_operand.vmem [shape: f32[4,1], index: 3, kind: input, shape index: {}]   ;;  %s184_s0 = inlined_call_operand.vmem [shape: bf16[4,36], index: 0, kind: input, shape index: {}]   ;;  %s185_s4 = inlined_call_operand.vmem [shape: f32[4,128], index: 4, kind: output, shape index: {}]  }
   0x1   :  { %115 = vmatprep.subr.bf16.mxu0 %v132_v0  ;;  %v129_v1 = vld [vmem:[%s181_s1] sm:$0xff]   ;;  %121 = vmatprep.mubr.msk.bf16.mxu0 %vm133_vm0, %v132_v0  ;;  %v130_v3 = vld [vmem:[%s181_s1 + $0x8] sm:$0xff]   ;;  %v131_v4 = vld [vmem:[%s181_s1 + $0x10] ss:$0 sps:$4 sm:$0x33]   ;;  %vm39_vm2 = vcmask 293888  }
   0x2   :  { %128 = vset.pattern.permute.xlu0 %v134_v2  ;;  %116 = vmatpush3.bf16.msra.mxu0 %v129_v1  ;;  %v87_v5 = vld [vmem:[%s182_s2] sm:$0xf]  ;;  %v45_v7 = vsel %vm43_vm1, %v131_v4, 0 }
   0x3   :  { %117 = vmatprep.subr.bf16.mxu0 %v132_v0  ;;  %90 = vperm.xlu0 %128, %v87_v5   ;;  %v94_v6 = vld [vmem:[%s183_s3] sm:$0xf] }
   0x4   :  { %v18_v8 = vld [vmem:[%s184_s0] sm:$0x3] }
   0x6   :  { %118 = vmatpush3.bf16.msra.mxu0 %v130_v3 }
   0x7   :  { %119 = vmatprep.subr.bf16.mxu0 %v132_v0  ;;  %97 = vperm.xlu0 %128, %v94_v6  }
   0xa   :  { %120 = vmatpush3.bf16.msra.mxu0 %v45_v7 }
   0xd   :  { %122 = vmatmul.mubr.msk.bf16.vlgmr.msra.gmra.mrb[0].mxu0 %vm39_vm2, %v18_v8 }
  0x82   :  { %v91_v9 = vpop.permute.xlu0 %90 }
  0x86   :  { %v98_v13 = vpop.permute.xlu0 %97 }
  0xe0   :  { %v81_v10 = vpop.f32.mrb[0].mxu0 }
  0xe1   :  { %v93_v11 = vmul.f32 %v91_v9, %v81_v10  ;;  %v123_v12 = vpop.f32.mrb[1].mxu0 }
  0xe2   :  { %v84_v14 = vpop.f32.mrb[2].mxu0 }
  0xe3   :  { %v100_v15 = vadd.f32 %v98_v13, %v93_v11  ;;  %v124_v16 = vpop.f32.mrb[3].mxu0 }
  0xe5   :  { %v101_v17 = vmax.f32 %v100_v15, 0.0 }
  0xe7   :  { %102 = vst [vmem:[%s185_s4] sm:$0xf] %v101_v17 }

// kernel: decoder_forward.39
= control target key start
LH: loop header
LB: loop body
LE: loop exit
PB: predicated region body
PF: predicated region fallthrough
CT: control target
= control target key end

     0   :  { %v187_v0 = vmov 0.0   ;;  %vm188_vm0 = vmmov 0   ;;  %v189_v2 = vmov 0   ;;  %vm78_vm1 = vcmask 1045504   ;;  %s248_s1 = inlined_call_operand.vmem [shape: bf16[108,128], index: 1, kind: input, shape index: {}]   ;;  %s249_s2 = inlined_call_operand.vmem [shape: f32[4,1], index: 2, kind: input, shape index: {}]   ;;  %s250_s3 = inlined_call_operand.vmem [shape: f32[4,1], index: 3, kind: input, shape index: {}]   ;;  %s251_s0 = inlined_call_operand.vmem [shape: bf16[4,108], index: 0, kind: input, shape index: {}]   ;;  %s252_s4 = inlined_call_operand.vmem [shape: f32[4,128], index: 4, kind: output, shape index: {}]  }
   0x1   :  { %158 = vmatprep.subr.bf16.mxu0 %v187_v0  ;;  %v180_v1 = vld [vmem:[%s248_s1] sm:$0xff]   ;;  %172 = vmatprep.mubr.msk.bf16.mxu0 %vm188_vm0, %v187_v0  ;;  %v181_v3 = vld [vmem:[%s248_s1 + $0x8] sm:$0xff]   ;;  %v182_v4 = vld [vmem:[%s248_s1 + $0x10] sm:$0xff]   ;;  %vm74_vm2 = vcmask 883712  }
   0x2   :  { %179 = vset.pattern.permute.xlu0 %v189_v2  ;;  %159 = vmatpush3.bf16.msra.mxu0 %v180_v1  ;;  %v122_v5 = vld [vmem:[%s249_s2] sm:$0xf]  ;;  %v183_v7 = vld [vmem:[%s248_s1 + $0x18] sm:$0xff]   ;;  %v185_v9 = vld [vmem:[%s248_s1 + $0x28] sm:$0xff]  }
   0x3   :  { %160 = vmatprep.subr.bf16.mxu0 %v187_v0  ;;  %125 = vperm.xlu0 %179, %v122_v5   ;;  %v129_v6 = vld [vmem:[%s250_s3] sm:$0xf]  ;;  %v186_v10 = vld [vmem:[%s248_s1 + $0x30] sm:$0x3f]  }
   0x4   :  { %v184_v8 = vld [vmem:[%s248_s1 + $0x20] sm:$0xff]   ;;  %v80_v11 = vsel %vm78_vm1, %v186_v10, 0 }
   0x5   :  { %v18_v12 = vld [vmem:[%s251_s0] sm:$0x3] }
   0x6   :  { %161 = vmatpush3.bf16.msra.mxu0 %v181_v3 }
   0x7   :  { %162 = vmatprep.subr.bf16.mxu0 %v187_v0  ;;  %132 = vperm.xlu0 %179, %v129_v6  }
   0xa   :  { %163 = vmatpush3.bf16.msra.mxu0 %v182_v4 }
   0xb   :  { %164 = vmatprep.subr.bf16.mxu0 %v187_v0 }
   0xe   :  { %165 = vmatpush3.bf16.msra.mxu0 %v183_v7 }
   0xf   :  { %166 = vmatprep.subr.bf16.mxu0 %v187_v0 }
  0x12   :  { %167 = vmatpush3.bf16.msra.mxu0 %v184_v8 }
  0x13   :  { %168 = vmatprep.subr.bf16.mxu0 %v187_v0 }
  0x16   :  { %169 = vmatpush3.bf16.msra.mxu0 %v185_v9 }
  0x17   :  { %170 = vmatprep.subr.bf16.mxu0 %v187_v0 }
  0x1a   :  { %171 = vmatpush3.bf16.msra.mxu0 %v80_v11 }
  0x1d   :  { %173 = vmatmul.mubr.msk.bf16.vlgmr.msra.gmra.mrb[0].mxu0 %vm74_vm2, %v18_v12 }
  0x82   :  { %v126_v13 = vpop.permute.xlu0 %125 }
  0x86   :  { %v133_v17 = vpop.permute.xlu0 %132 }
  0xf0   :  { %v116_v14 = vpop.f32.mrb[0].mxu0 }
  0xf1   :  { %v128_v15 = vmul.f32 %v126_v13, %v116_v14  ;;  %v174_v16 = vpop.f32.mrb[1].mxu0 }
  0xf2   :  { %v119_v18 = vpop.f32.mrb[2].mxu0 }
  0xf3   :  { %v135_v19 = vadd.f32 %v133_v17, %v128_v15  ;;  %v175_v20 = vpop.f32.mrb[3].mxu0 }
  0xf5   :  { %v136_v21 = vmax.f32 %v135_v19, 0.0 }
  0xf7   :  { %137 = vst [vmem:[%s252_s4] sm:$0xf] %v136_v21 }

// kernel: decoder_forward.41
= control target key start
LH: loop header
LB: loop body
LE: loop exit
PB: predicated region body
PF: predicated region fallthrough
CT: control target
= control target key end

     0   :  { %vm24_vm0 = vcmask 1041408   ;;  %v101_v0 = vmov 0.0   ;;  %vm102_vm1 = vmmov 0   ;;  %v103_v3 = vmov 0   ;;  %s144_s1 = inlined_call_operand.vmem [shape: bf16[4,128], index: 1, kind: input, shape index: {}]   ;;  %s145_s0 = inlined_call_operand.vmem [shape: bf16[4,4], index: 0, kind: input, shape index: {}]   ;;  %s146_s2 = inlined_call_operand.vmem [shape: f32[4,1], index: 2, kind: input, shape index: {}]   ;;  %s147_s3 = inlined_call_operand.vmem [shape: f32[4,1], index: 3, kind: input, shape index: {}]   ;;  %s148_s4 = inlined_call_operand.vmem [shape: f32[4,128], index: 4, kind: output, shape index: {}]  }
   0x1   :  { %91 = vmatprep.subr.bf16.mxu0 %v101_v0  ;;  %v19_v1 = vld [vmem:[%s144_s1] sm:$0x3]  ;;  %93 = vmatprep.mubr.msk.bf16.mxu0 %vm102_vm1, %v101_v0  ;;  %vm20_vm2 = vcmask 31744  }
   0x2   :  { %v26_v2 = vsel %vm24_vm0, %v19_v1, 0  ;;  %100 = vset.pattern.permute.xlu0 %v103_v3  ;;  %v68_v4 = vld [vmem:[%s146_s2] sm:$0xf] }
   0x3   :  { %92 = vmatpush3.bf16.msra.mxu0 %v26_v2  ;;  %v18_v5 = vld [vmem:[%s145_s0] sm:$0x3]  ;;  %71 = vperm.xlu0 %100, %v68_v4  }
   0x4   :  { %v75_v6 = vld [vmem:[%s147_s3] sm:$0xf] }
   0x6   :  { %94 = vmatmul.mubr.msk.bf16.vlgmr.msra.gmra.mrb[0].mxu0 %vm20_vm2, %v18_v5 }
   0x7   :  { %78 = vperm.xlu0 %100, %v75_v6  }
  0x82   :  { %v72_v7 = vpop.permute.xlu0 %71 }
  0x86   :  { %v79_v11 = vpop.permute.xlu0 %78 }
  0xd9   :  { %v62_v8 = vpop.f32.mrb[0].mxu0 }
  0xda   :  { %v74_v9 = vmul.f32 %v72_v7, %v62_v8  ;;  %v95_v10 = vpop.f32.mrb[1].mxu0 }
  0xdb   :  { %v65_v12 = vpop.f32.mrb[2].mxu0 }
  0xdc   :  { %v81_v13 = vadd.f32 %v79_v11, %v74_v9  ;;  %v96_v14 = vpop.f32.mrb[3].mxu0 }
  0xde   :  { %v82_v15 = vmax.f32 %v81_v13, 0.0 }
  0xe0   :  { %83 = vst [vmem:[%s148_s4] sm:$0xf] %v82_v15 }

// kernel: decoder_forward.42
= control target key start
LH: loop header
LB: loop body
LE: loop exit
PB: predicated region body
PF: predicated region fallthrough
CT: control target
= control target key end

     0   :  { %v619_v0 = vmov 0.0   ;;  %vm620_vm0 = vmmov 0   ;;  %v621_v2 = vmov 0   ;;  %vm72_vm1 = vcmask 1043456   ;;  %s815_s5 = inlined_call_operand.vmem [shape: bf16[40,128], index: 5, kind: input, shape index: {}]   ;;  %s816_s0 = inlined_call_operand.vmem [shape: bf16[40,40], index: 0, kind: input, shape index: {}]   ;;  %s817_s1 = inlined_call_operand.vmem [shape: f32[40,1], index: 1, kind: input, shape index: {}]   ;;  %s818_s2 = inlined_call_operand.vmem [shape: f32[40,1], index: 2, kind: input, shape index: {}]   ;;  %s819_s4 = inlined_call_operand.vmem [shape: f32[80,1], index: 4, kind: input, shape index: {}]   ;;  %s820_s3 = inlined_call_operand.vmem [shape: bf16[80,40], index: 3, kind: input, shape index: {}]   ;;  %s821_s6 = inlined_call_operand.vmem [shape: f32[80,128], index: 6, kind: output, shape index: {}]  }
   0x1   :  { %513 = vmatprep.subr.bf16.mxu0 %v619_v0  ;;  %v568_v1 = vld [vmem:[%s815_s5] sm:$0xff]   ;;  %519 = vmatprep.mubr.msk.bf16.mxu0 %vm620_vm0, %v619_v0  ;;  %v569_v3 = vld [vmem:[%s815_s5 + $0x8] sm:$0xff]   ;;  %v570_v4 = vld [vmem:[%s815_s5 + $0x10] ss:$0 sps:$4 sm:$0xff]   ;;  %vm62_vm2 = vcmask 326656  }
   0x2   :  { %566 = vset.pattern.permute.xlu0 %v621_v2  ;;  %567 = vset.pattern.permute.xlu1 %v621_v2  ;;  %v132_v5 = vld [vmem:[%s817_s1] sm:$0xff]  ;;  %v74_v7 = vsel %vm72_vm1, %v570_v4, 0  ;;  %v133_v8 = vld [vmem:[%s817_s1 + $0x8] sm:$0xff]  ;;  %v134_v11 = vld [vmem:[%s817_s1 + $0x10] sm:$0xff] }
   0x3   :  { %514 = vmatpush3.bf16.msra.mxu0 %v568_v1  ;;  %557 = vmatprep.subr.bf16.mxu1 %v619_v0  ;;  %v167_v6 = vld [vmem:[%s818_s2] sm:$0xff]  ;;  %v168_v9 = vld [vmem:[%s818_s2 + $0x8] sm:$0xff]  ;;  %v135_v12 = vld [vmem:[%s817_s1 + $0x18] sm:$0xff] }
   0x4   :  { %515 = vmatprep.subr.bf16.mxu0 %v619_v0  ;;  %541 = vmatprep.mubr.msk.bf16.mxu1 %vm620_vm0, %v619_v0  ;;  %v571_v10 = vld [vmem:[%s816_s0] sm:$0xff]   ;;  %v169_v13 = vld [vmem:[%s818_s2 + $0x10] sm:$0xff]  ;;  %v170_v14 = vld [vmem:[%s818_s2 + $0x18] sm:$0xff] }
   0x5   :  { %139 = vperm.xlu0 %566, %v132_v5   ;;  %174 = vperm.xlu1 %567, %v167_v6   ;;  %v572_v15 = vld [vmem:[%s816_s0 + $0x8] sm:$0xff]   ;;  %v136_v16 = vld [vmem:[%s817_s1 + $0x20] sm:$0xff]  ;;  %v573_v20 = vld [vmem:[%s816_s0 + $0x10] ss:$0 sps:$4 sm:$0xff]  }
   0x6   :  { %v171_v17 = vld [vmem:[%s818_s2 + $0x20] sm:$0xff]  ;;  %v221_v19 = vld [vmem:[%s819_s4 + $0x8] sm:$0xff]  ;;  %v222_v21 = vld [vmem:[%s819_s4 + $0x10] sm:$0xff] }
   0x7   :  { %516 = vmatpush3.bf16.msra.mxu0 %v569_v3  ;;  %v220_v18 = vld [vmem:[%s819_s4] sm:$0xff]  ;;  %v223_v22 = vld [vmem:[%s819_s4 + $0x18] sm:$0xff]  ;;  %v225_v24 = vld [vmem:[%s819_s4 + $0x28] sm:$0xff] }
   0x8   :  { %517 = vmatprep.subr.bf16.mxu0 %v619_v0  ;;  %v224_v23 = vld [vmem:[%s819_s4 + $0x20] sm:$0xff]  ;;  %v226_v25 = vld [vmem:[%s819_s4 + $0x30] sm:$0xff]  ;;  %v227_v26 = vld [vmem:[%s819_s4 + $0x38] sm:$0xff] }
   0x9   :  { %144 = vperm.xlu0 %566, %v133_v8   ;;  %179 = vperm.xlu1 %567, %v168_v9   ;;  %v228_v27 = vld [vmem:[%s819_s4 + $0x40] sm:$0xff]  ;;  %v229_v28 = vld [vmem:[%s819_s4 + $0x48] sm:$0xff]  ;;  %v576_v9 = vld [vmem:[%s820_s3 + $0x10] sm:$0xff]  }
   0xa   :  { %v575_v8 = vld [vmem:[%s820_s3 + $0x8] sm:$0xff]  }
   0xb   :  { %518 = vmatpush3.bf16.msra.mxu0 %v74_v7  ;;  %v574_v7 = vld [vmem:[%s820_s3] sm:$0xff]  }
   0xc   :  { %531 = vmatprep.subr.bf16.mxu0 %v619_v0 }
   0xd   :  { %149 = vperm.xlu0 %566, %v134_v11   ;;  %154 = vperm.xlu1 %567, %v135_v12   ;;  %v578_v11 = vld [vmem:[%s820_s3 + $0x20] sm:$0xff]  }
   0xe   :  { %520 = vmatmul.mubr.msk.bf16.vlgmr.msra.gmra.mrb[0].mxu0 %vm62_vm2, %v571_v10  ;;  %v577_v10 = vld [vmem:[%s820_s3 + $0x18] sm:$0xff]  }
   0xf   :  { %523 = vmatprep.mubr.msk.bf16.mxu0 %vm620_vm0, %v619_v0 }
  0x11   :  { %184 = vperm.xlu0 %566, %v169_v13   ;;  %189 = vperm.xlu1 %567, %v170_v14  }
  0x15   :  { %159 = vperm.xlu0 %566, %v136_v16   ;;  %194 = vperm.xlu1 %567, %v171_v17  }
  0x16   :  { %524 = vmatmul.mubr.msk.bf16.gmra.mrb[4].mxu0 %vm62_vm2, %v572_v15 }
  0x17   :  { %527 = vmatprep.mubr.msk.bf16.mxu0 %vm620_vm0, %v619_v0 }
  0x19   :  { %232 = vperm.xlu0 %566, %v220_v18   ;;  %237 = vperm.xlu1 %567, %v221_v19  }
  0x1d   :  { %242 = vperm.xlu0 %566, %v222_v21   ;;  %247 = vperm.xlu1 %567, %v223_v22  }
  0x1e   :  { %528 = vmatmul.mubr.msk.bf16.gmra.mrb[8].mxu0 %vm62_vm2, %v573_v20 }
  0x1f   :  { %537 = vmatprep.mubr.msk.bf16.mxu0 %vm620_vm0, %v619_v0 }
  0x21   :  { %252 = vperm.xlu0 %566, %v224_v23   ;;  %257 = vperm.xlu1 %567, %v225_v24  }
  0x25   :  { %262 = vperm.xlu0 %566, %v226_v25   ;;  %267 = vperm.xlu1 %567, %v227_v26  }
  0x29   :  { %272 = vperm.xlu0 %566, %v228_v27   ;;  %277 = vperm.xlu1 %567, %v229_v28  }
  0x84   :  { %v140_v29 = vpop.permute.xlu0 %139  ;;  %v175_v30 = vpop.permute.xlu1 %174 }
  0x88   :  { %v145_v31 = vpop.permute.xlu0 %144  ;;  %v180_v32 = vpop.permute.xlu1 %179 }
  0x8c   :  { %v150_v40 = vpop.permute.xlu0 %149  ;;  %v155_v42 = vpop.permute.xlu1 %154 }
  0x90   :  { %v185_v49 = vpop.permute.xlu0 %184  ;;  %v190_v54 = vpop.permute.xlu1 %189 }
  0x94   :  { %v160_v58 = vpop.permute.xlu0 %159  ;;  %v195_v63 = vpop.permute.xlu1 %194 }
  0x98   :  { %v233_v12 = vpop.permute.xlu0 %232  ;;  %v238_v13 = vpop.permute.xlu1 %237 }
  0x9c   :  { %v243_v14 = vpop.permute.xlu0 %242  ;;  %v248_v15 = vpop.permute.xlu1 %247 }
  0xe1   :  { %v110_v33 = vpop.f32.mrb[0].mxu0 }
  0xe2   :  { %v162_v34 = vmul.f32 %v140_v29, %v110_v33  ;;  %v521_v35 = vpop.f32.mrb[1].mxu0 }
  0xe3   :  { %v113_v36 = vpop.f32.mrb[2].mxu0  ;;  %v258_v35 = vpop.permute.xlu1 %257 }
  0xe4   :  { %v197_v37 = vadd.f32 %v175_v30, %v162_v34  ;;  %v163_v38 = vmul.f32 %v145_v31, %v113_v36  ;;  %v522_v39 = vpop.f32.mrb[3].mxu0  ;;  %v253_v31 = vpop.permute.xlu0 %252 }
  0xe6   :  { %v198_v41 = vadd.f32 %v180_v32, %v163_v38  ;;  %v202_v43 = vmax.f32 %v197_v37, 0.0 }
  0xe8   :  { %v203_v44 = vmax.f32 %v198_v41, 0.0 }
  0xe9   :  { %v118_v45 = vpop.f32.mrb[4].mxu0 }
  0xea   :  { %v217_v46 = vpack.c.bf16 %v203_v44, %v202_v43  ;;  %v164_v47 = vmul.f32 %v150_v40, %v118_v45  ;;  %v525_v48 = vpop.f32.mrb[5].mxu0  ;;  %v263_v43 = vpop.permute.xlu0 %262 }
  0xeb   :  { %v121_v50 = vpop.f32.mrb[6].mxu0 }
  0xec   :  { %v199_v51 = vadd.f32 %v185_v49, %v164_v47  ;;  %v165_v52 = vmul.f32 %v155_v42, %v121_v50  ;;  %v526_v53 = vpop.f32.mrb[7].mxu0  ;;  %532 = vmatpush3.bf16.msra.mxu0 %v217_v46  ;;  %560 = vmatpush3.bf16.msra.mxu1 %v217_v46 }
  0xed   :  { %533 = vmatprep.subr.bf16.mxu0 %v619_v0  ;;  %558 = vmatprep.subr.bf16.mxu1 %v619_v0 }
  0xee   :  { %v200_v55 = vadd.f32 %v190_v54, %v165_v52  ;;  %v204_v56 = vmax.f32 %v199_v51, 0.0  ;;  %v268_v51 = vpop.permute.xlu1 %267 }
  0xf0   :  { %v205_v57 = vmax.f32 %v200_v55, 0.0 }
  0xf1   :  { %v126_v59 = vpop.f32.mrb[8].mxu0 }
  0xf2   :  { %v218_v60 = vpack.c.bf16 %v205_v57, %v204_v56  ;;  %v166_v61 = vmul.f32 %v160_v58, %v126_v59  ;;  %v529_v62 = vpop.f32.mrb[9].mxu0 }
  0xf3   :  { %v129_v1 = vpop.f32.mrb[10].mxu0 }
  0xf4   :  { %v201_v2 = vadd.f32 %v195_v63, %v166_v61  ;;  %v530_v3 = vpop.f32.mrb[11].mxu0  ;;  %534 = vmatpush3.bf16.msra.mxu0 %v218_v60  ;;  %561 = vmatpush3.bf16.msra.mxu1 %v218_v60  ;;  %v273_v60 = vpop.permute.xlu0 %272 }
  0xf5   :  { %535 = vmatprep.subr.bf16.mxu0 %v619_v0  ;;  %559 = vmatprep.subr.bf16.mxu1 %v619_v0  ;;  %v278_v3 = vpop.permute.xlu1 %277 }
  0xf6   :  { %v206_v4 = vmax.f32 %v201_v2, 0.0 }
  0xf8   :  { %v219_v5 = vpack.c.bf16 %v206_v4, %v206_v4 }
  0xfa   :  { %v321_v6 = vsel %vm72_vm1, %v219_v5, 0 }
  0xfb   :  { %536 = vmatpush3.bf16.msra.mxu0 %v321_v6  ;;  %562 = vmatpush3.bf16.msra.mxu1 %v321_v6 }
  0xfe   :  { %538 = vmatmul.mubr.msk.bf16.vlgmr.msra.gmra.mrb[12].mxu0 %vm62_vm2, %v574_v7  ;;  %542 = vmatmul.mubr.msk.bf16.vlgmr.msra.gmra.mrb[0].mxu1 %vm62_vm2, %v575_v8 }
  0xff   :  { %545 = vmatprep.mubr.msk.bf16.mxu1 %vm620_vm0, %v619_v0 }
 0x106   :  { %546 = vmatmul.mubr.msk.bf16.gmra.mrb[4].mxu1 %vm62_vm2, %v576_v9 }
 0x107   :  { %549 = vmatprep.mubr.msk.bf16.mxu1 %vm620_vm0, %v619_v0 }
 0x10e   :  { %550 = vmatmul.mubr.msk.bf16.gmra.mrb[8].mxu1 %vm62_vm2, %v577_v10 }
 0x10f   :  { %553 = vmatprep.mubr.msk.bf16.mxu1 %vm620_vm0, %v619_v0 }
 0x116   :  { %554 = vmatmul.mubr.msk.bf16.gmra.mrb[12].mxu1 %vm62_vm2, %v578_v11 }
 0x1d1   :  { %v357_v16 = vpop.f32.mrb[12].mxu0  ;;  %v365_v17 = vpop.f32.mrb[0].mxu1 }
 0x1d2   :  { %v358_v18 = vadd.f32 %v357_v16, %v233_v12  ;;  %v366_v19 = vadd.f32 %v365_v17, %v243_v14  ;;  %v539_v20 = vpop.f32.mrb[13].mxu0  ;;  %v543_v21 = vpop.f32.mrb[1].mxu1 }
 0x1d3   :  { %v360_v22 = vpop.f32.mrb[14].mxu0  ;;  %v368_v23 = vpop.f32.mrb[2].mxu1 }
 0x1d4   :  { %v489_v24 = vmul.f32 -1.442695, %v358_v18  ;;  %v491_v0 = vmul.f32 -1.442695, %v366_v19  ;;  %v361_v25 = vadd.f32 %v360_v22, %v238_v13  ;;  %v369_v26 = vadd.f32 %v368_v23, %v248_v15  ;;  %v544_v27 = vpop.f32.mrb[3].mxu1  ;;  %v540_v28 = vpop.f32.mrb[15].mxu0 }
 0x1d6   :  { %579 = vpow2.f32 %v489_v24  ;;  %v490_v29 = vmul.f32 -1.442695, %v361_v25  ;;  %v492_v30 = vmul.f32 -1.442695, %v369_v26 }
 0x1d7   :  { %581 = vpow2.f32 %v491_v0 }
 0x1d8   :  { %583 = vpow2.f32 %v490_v29 }
 0x1d9   :  { %585 = vpow2.f32 %v492_v30  ;;  %v373_v32 = vpop.f32.mrb[4].mxu1 }
 0x1da   :  { %v374_v33 = vadd.f32 %v373_v32, %v253_v31  ;;  %v547_v34 = vpop.f32.mrb[5].mxu1 }
 0x1db   :  { %v376_v36 = vpop.f32.mrb[6].mxu1 }
 0x1dc   :  { %v493_v37 = vmul.f32 -1.442695, %v374_v33  ;;  %v377_v38 = vadd.f32 %v376_v36, %v258_v35  ;;  %v548_v39 = vpop.f32.mrb[7].mxu1 }
 0x1de   :  { %587 = vpow2.f32 %v493_v37  ;;  %v494_v40 = vmul.f32 -1.442695, %v377_v38 }
 0x1e0   :  { %v580_v41 = vpop.eup %579  ;;  %589 = vpow2.f32 %v494_v40 }
 0x1e1   :  { %v582_v42 = vpop.eup %581  ;;  %v426_v44 = vadd.f32 1.0, %v580_v41  ;;  %v381_v45 = vpop.f32.mrb[8].mxu1 }
 0x1e2   :  { %v584_v46 = vpop.eup %583  ;;  %v428_v47 = vadd.f32 1.0, %v582_v42  ;;  %v382_v48 = vadd.f32 %v381_v45, %v263_v43  ;;  %v551_v49 = vpop.f32.mrb[9].mxu1 }
 0x1e3   :  { %v586_v50 = vpop.eup %585  ;;  %591 = vrcp.f32 %v426_v44  ;;  %v427_v52 = vadd.f32 1.0, %v584_v46  ;;  %v384_v53 = vpop.f32.mrb[10].mxu1 }
 0x1e4   :  { %593 = vrcp.f32 %v428_v47  ;;  %v429_v54 = vadd.f32 1.0, %v586_v50  ;;  %v495_v55 = vmul.f32 -1.442695, %v382_v48  ;;  %v385_v56 = vadd.f32 %v384_v53, %v268_v51  ;;  %v552_v57 = vpop.f32.mrb[11].mxu1 }
 0x1e5   :  { %595 = vrcp.f32 %v427_v52 }
 0x1e6   :  { %597 = vrcp.f32 %v429_v54  ;;  %v496_v58 = vmul.f32 -1.442695, %v385_v56 }
 0x1e7   :  { %599 = vpow2.f32 %v495_v55 }
 0x1e8   :  { %v588_v59 = vpop.eup %587  ;;  %601 = vpow2.f32 %v496_v58 }
 0x1e9   :  { %v430_v61 = vadd.f32 1.0, %v588_v59  ;;  %v389_v62 = vpop.f32.mrb[12].mxu1 }
 0x1ea   :  { %v590_v63 = vpop.eup %589  ;;  %v390_v1 = vadd.f32 %v389_v62, %v273_v60  ;;  %v555_v2 = vpop.f32.mrb[13].mxu1 }
 0x1eb   :  { %603 = vrcp.f32 %v430_v61  ;;  %v431_v4 = vadd.f32 1.0, %v590_v63  ;;  %v392_v5 = vpop.f32.mrb[14].mxu1 }
 0x1ec   :  { %v497_v6 = vmul.f32 -1.442695, %v390_v1  ;;  %v393_v7 = vadd.f32 %v392_v5, %v278_v3  ;;  %v556_v8 = vpop.f32.mrb[15].mxu1 }
 0x1ed   :  { %v592_v9 = vpop.eup %591  ;;  %605 = vrcp.f32 %v431_v4 }
 0x1ee   :  { %v594_v10 = vpop.eup %593  ;;  %456 = vst [vmem:[%s821_s6] sm:$0xff] %v592_v9  ;;  %607 = vpow2.f32 %v497_v6  ;;  %v498_v11 = vmul.f32 -1.442695, %v393_v7 }
 0x1ef   :  { %v596_v12 = vpop.eup %595  ;;  %458 = vst [vmem:[%s821_s6 + $0x10] sm:$0xff] %v594_v10 }
 0x1f0   :  { %v598_v13 = vpop.eup %597  ;;  %457 = vst [vmem:[%s821_s6 + $0x8] sm:$0xff] %v596_v12  ;;  %609 = vpow2.f32 %v498_v11 }
 0x1f1   :  { %v600_v14 = vpop.eup %599  ;;  %459 = vst [vmem:[%s821_s6 + $0x18] sm:$0xff] %v598_v13 }
 0x1f2   :  { %v602_v15 = vpop.eup %601  ;;  %v432_v16 = vadd.f32 1.0, %v600_v14 }
 0x1f3   :  { %v433_v17 = vadd.f32 1.0, %v602_v15 }
 0x1f4   :  { %611 = vrcp.f32 %v432_v16 }
 0x1f5   :  { %v604_v18 = vpop.eup %603  ;;  %613 = vrcp.f32 %v433_v17 }
 0x1f6   :  { %460 = vst [vmem:[%s821_s6 + $0x20] sm:$0xff] %v604_v18 }
 0x1f7   :  { %v606_v19 = vpop.eup %605 }
 0x1f8   :  { %v608_v20 = vpop.eup %607  ;;  %461 = vst [vmem:[%s821_s6 + $0x28] sm:$0xff] %v606_v19 }
 0x1f9   :  { %v434_v21 = vadd.f32 1.0, %v608_v20 }
 0x1fa   :  { %v610_v22 = vpop.eup %609 }
 0x1fb   :  { %615 = vrcp.f32 %v434_v21  ;;  %v435_v23 = vadd.f32 1.0, %v610_v22 }
 0x1fd   :  { %617 = vrcp.f32 %v435_v23 }
 0x1fe   :  { %v612_v24 = vpop.eup %611 }
 0x1ff   :  { %v614_v0 = vpop.eup %613  ;;  %462 = vst [vmem:[%s821_s6 + $0x30] sm:$0xff] %v612_v24 }
 0x200   :  { %463 = vst [vmem:[%s821_s6 + $0x38] sm:$0xff] %v614_v0 }
 0x205   :  { %v616_v25 = vpop.eup %615 }
 0x206   :  { %464 = vst [vmem:[%s821_s6 + $0x40] sm:$0xff] %v616_v25 }
 0x207   :  { %v618_v26 = vpop.eup %617 }
 0x208   :  { %465 = vst [vmem:[%s821_s6 + $0x48] sm:$0xff] %v618_v26 }

// kernel: decoder_forward.43
= control target key start
LH: loop header
LB: loop body
LE: loop exit
PB: predicated region body
PF: predicated region fallthrough
CT: control target
= control target key end

     0   :  { %s56_s0 = inlined_call_operand.vmem [shape: f32[8,128], index: 0, kind: input, shape index: {}]   ;;  %s57_s1 = inlined_call_operand.vmem [shape: f32[8,128], index: 1, kind: input, shape index: {}]   ;;  %s58_s2 = inlined_call_operand.vmem [shape: f32[8,128], index: 2, kind: input, shape index: {}]   ;;  %s59_s3 = inlined_call_operand.vmem [shape: f32[8,128], index: 3, kind: output, shape index: {}]  }
   0x1   :  { %v14_v0 = vld [vmem:[%s56_s0] sm:$0xff] }
   0x2   :  { %v15_v1 = vld [vmem:[%s57_s1] sm:$0xff] }
   0x3   :  { %v16_v2 = vld [vmem:[%s58_s2] sm:$0xff] }
   0x4   :  { %v17_v3 = vmul.f32 %v16_v2, %v15_v1 }
   0x6   :  { %v18_v4 = vadd.f32 %v17_v3, %v14_v0 }
   0x8   :  { %19 = vst [vmem:[%s59_s3] sm:$0xff] %v18_v4 }

// kernel: decoder_forward.45
= control target key start
LH: loop header
LB: loop body
LE: loop exit
PB: predicated region body
PF: predicated region fallthrough
CT: control target
= control target key end

     0   :  { %v187_v0 = vmov 0   ;;  %vm101_vm0 = vcmask 130048   ;;  %s252_s1 = inlined_call_operand.vmem [shape: bf16[144,128], index: 1, kind: input, shape index: {}]   ;;  %s253_s0 = inlined_call_operand.vmem [shape: bf16[4,144], index: 0, kind: input, shape index: {}]   ;;  %s254_s2 = inlined_call_operand.vmem [shape: f32[4,1], index: 2, kind: input, shape index: {}]   ;;  %s255_s3 = inlined_call_operand.vmem [shape: f32[4,1], index: 3, kind: input, shape index: {}]   ;;  %s256_s4 = inlined_call_operand.vmem [shape: f32[4,128], index: 4, kind: output, shape index: {}]  }
   0x1   :  { %105 = vmatprep.subr.bf16.mxu0 %v187_v0  ;;  %v178_v1 = vld [vmem:[%s252_s1] sm:$0xff]   ;;  %177 = vset.pattern.permute.xlu0 %v187_v0  ;;  %v179_v2 = vld [vmem:[%s252_s1 + $0x8] sm:$0xff]   ;;  %v180_v3 = vld [vmem:[%s252_s1 + $0x10] sm:$0xff]  }
   0x2   :  { %106 = vmatpush1.bf16.msra.mxu0 %v178_v1  ;;  %v165_v4 = vld.sshfl [vmem:[%s253_s0] sm:$0x33 pattern:$0x76325410]  ;;  %v181_v6 = vld [vmem:[%s252_s1 + $0x18] sm:$0xff]   ;;  %v183_v10 = vld [vmem:[%s252_s1 + $0x28] sm:$0xff]  }
   0x3   :  { %107 = vmatprep.subr.bf16.mxu0 %v187_v0  ;;  %v145_v5 = vld [vmem:[%s254_s2] sm:$0xf]  ;;  %v45_v7 = vcombine.high %v165_v4, %v165_v4  ;;  %v184_v11 = vld [vmem:[%s252_s1 + $0x30] sm:$0xff]   ;;  %v185_v12 = vld [vmem:[%s252_s1 + $0x38] sm:$0xff]  }
   0x4   :  { %148 = vperm.xlu0 %177, %v145_v5   ;;  %v152_v8 = vld [vmem:[%s255_s3] sm:$0xf] }
   0x5   :  { %175 = vmatprep.mubr.msk.bf16.mxu0 %vm101_vm0, %v45_v7  ;;  %v182_v9 = vld [vmem:[%s252_s1 + $0x20] sm:$0xff]  }
   0x6   :  { %108 = vmatpush1.bf16.msra.mxu0 %v179_v2  ;;  %v186_v13 = vld [vmem:[%s252_s1 + $0x40] sm:$0xff]  }
   0x7   :  { %109 = vmatprep.subr.bf16.mxu0 %v187_v0 }
   0x8   :  { %155 = vperm.xlu0 %177, %v152_v8  }
   0xa   :  { %110 = vmatpush1.bf16.msra.mxu0 %v180_v3 }
   0xb   :  { %111 = vmatprep.subr.bf16.mxu0 %v187_v0 }
   0xe   :  { %112 = vmatpush1.bf16.msra.mxu0 %v181_v6 }
   0xf   :  { %113 = vmatprep.subr.bf16.mxu0 %v187_v0 }
  0x12   :  { %114 = vmatpush1.bf16.msra.mxu0 %v182_v9 }
  0x13   :  { %115 = vmatprep.subr.bf16.mxu0 %v187_v0 }
  0x16   :  { %116 = vmatpush1.bf16.msra.mxu0 %v183_v10 }
  0x17   :  { %117 = vmatprep.subr.bf16.mxu0 %v187_v0 }
  0x1a   :  { %118 = vmatpush1.bf16.msra.mxu0 %v184_v11 }
  0x1b   :  { %119 = vmatprep.subr.bf16.mxu0 %v187_v0 }
  0x1e   :  { %120 = vmatpush1.bf16.msra.mxu0 %v185_v12 }
  0x1f   :  { %121 = vmatprep.subr.bf16.mxu0 %v187_v0 }
  0x22   :  { %122 = vmatpush1.bf16.msra.mxu0 %v186_v13 }
  0x25   :  { %138 = vmatmul.mubr.bf16.vlgmr.msra.gmra.mrb[0].mxu0 %v165_v4 }
  0x83   :  { %v149_v14 = vpop.permute.xlu0 %148 }
  0x87   :  { %v156_v18 = vpop.permute.xlu0 %155 }
  0xf8   :  { %v139_v15 = vpop.f32.mrb[0].mxu0 }
  0xf9   :  { %v151_v16 = vmul.f32 %v149_v14, %v139_v15  ;;  %v141_v17 = vpop.f32.mrb[1].mxu0 }
  0xfa   :  { %v142_v19 = vpop.f32.mrb[2].mxu0 }
  0xfb   :  { %v158_v20 = vadd.f32 %v156_v18, %v151_v16  ;;  %v143_v21 = vpop.f32.mrb[3].mxu0 }
  0xfd   :  { %v159_v22 = vmax.f32 %v158_v20, 0.0 }
  0xff   :  { %160 = vst [vmem:[%s256_s4] sm:$0xf] %v159_v22 }

// kernel: decoder_forward.46
= control target key start
LH: loop header
LB: loop body
LE: loop exit
PB: predicated region body
PF: predicated region fallthrough
CT: control target
= control target key end

     0   :  { %vm30_vm0 = vcmask 1045504   ;;  %v109_v0 = vmov 0.0   ;;  %vm110_vm1 = vmmov 0   ;;  %v111_v4 = vmov 0   ;;  %s152_s1 = inlined_call_operand.vmem [shape: bf16[12,128], index: 1, kind: input, shape index: {}]   ;;  %s153_s2 = inlined_call_operand.vmem [shape: f32[4,1], index: 2, kind: input, shape index: {}]   ;;  %s154_s0 = inlined_call_operand.vmem [shape: bf16[4,12], index: 0, kind: input, shape index: {}]   ;;  %s155_s3 = inlined_call_operand.vmem [shape: f32[4,1], index: 3, kind: input, shape index: {}]   ;;  %s156_s4 = inlined_call_operand.vmem [shape: f32[4,128], index: 4, kind: output, shape index: {}]  }
   0x1   :  { %98 = vmatprep.subr.bf16.mxu0 %v109_v0  ;;  %v108_v1 = vld [vmem:[%s152_s1] sm:$0x3f]   ;;  %100 = vmatprep.mubr.msk.bf16.mxu0 %vm110_vm1, %v109_v0  ;;  %vm26_vm2 = vcmask 97280  }
   0x2   :  { %v74_v2 = vld [vmem:[%s153_s2] sm:$0xf]  ;;  %v32_v3 = vsel %vm30_vm0, %v108_v1, 0  ;;  %107 = vset.pattern.permute.xlu0 %v111_v4 }
   0x3   :  { %99 = vmatpush3.bf16.msra.mxu0 %v32_v3  ;;  %v18_v5 = vld [vmem:[%s154_s0] sm:$0x3]  ;;  %77 = vperm.xlu0 %107, %v74_v2  }
   0x4   :  { %v81_v6 = vld [vmem:[%s155_s3] sm:$0xf] }
   0x6   :  { %101 = vmatmul.mubr.msk.bf16.vlgmr.msra.gmra.mrb[0].mxu0 %vm26_vm2, %v18_v5 }
   0x7   :  { %84 = vperm.xlu0 %107, %v81_v6  }
  0x82   :  { %v78_v7 = vpop.permute.xlu0 %77 }
  0x86   :  { %v85_v11 = vpop.permute.xlu0 %84 }
  0xd9   :  { %v68_v8 = vpop.f32.mrb[0].mxu0 }
  0xda   :  { %v80_v9 = vmul.f32 %v78_v7, %v68_v8  ;;  %v102_v10 = vpop.f32.mrb[1].mxu0 }
  0xdb   :  { %v71_v12 = vpop.f32.mrb[2].mxu0 }
  0xdc   :  { %v87_v13 = vadd.f32 %v85_v11, %v80_v9  ;;  %v103_v14 = vpop.f32.mrb[3].mxu0 }
  0xde   :  { %v88_v15 = vmax.f32 %v87_v13, 0.0 }
  0xe0   :  { %89 = vst [vmem:[%s156_s4] sm:$0xf] %v88_v15 }

// kernel: decoder_forward.48
= control target key start
LH: loop header
LB: loop body
LE: loop exit
PB: predicated region body
PF: predicated region fallthrough
CT: control target
= control target key end

     0   :  { %v364_v0 = vmov 0.0   ;;  %vm365_vm0 = vmmov 0   ;;  %v366_v3 = vmov 0   ;;  %vm160_vm1 = vcmask 1045504   ;;  %s470_s1 = inlined_call_operand.vmem [shape: bf16[108,384], index: 1, kind: input, shape index: {}]   ;;  %s471_s2 = inlined_call_operand.vmem [shape: f32[4,1], index: 2, kind: input, shape index: {}]   ;;  %s472_s3 = inlined_call_operand.vmem [shape: f32[4,1], index: 3, kind: input, shape index: {}]   ;;  %s473_s0 = inlined_call_operand.vmem [shape: bf16[4,108], index: 0, kind: input, shape index: {}]   ;;  %s474_s4 = inlined_call_operand.vmem [shape: f32[4,384], index: 4, kind: output, shape index: {}]  }
   0x1   :  { %314 = vmatprep.subr.bf16.mxu1 %v364_v0  ;;  %v336_v1 = vld [vmem:[%s470_s1 + $0x4] ss:$12 sps:$4 sm:$0xff]   ;;  %328 = vmatprep.mubr.msk.bf16.mxu1 %vm365_vm0, %v364_v0  ;;  %v338_v2 = vld [vmem:[%s470_s1 + $0x8] ss:$12 sps:$4 sm:$0xff]   ;;  %v339_v4 = vld [vmem:[%s470_s1] ss:$12 sps:$4 sm:$0xff]  }
   0x2   :  { %202 = vmatprep.mubr.bf16.mxu0 %v366_v3  ;;  %335 = vset.pattern.permute.xlu0 %v366_v3  ;;  %v340_v5 = vld [vmem:[%s470_s1 + $0x1c] ss:$12 sps:$4 sm:$0xff]   ;;  %v342_v6 = vld [vmem:[%s470_s1 + $0x20] ss:$12 sps:$4 sm:$0xff]   ;;  %v343_v7 = vld [vmem:[%s470_s1 + $0x18] ss:$12 sps:$4 sm:$0xff]  }
   0x3   :  { %170 = vmatprep.subr.bf16.mxu0 %v336_v1  ;;  %315 = vmatpush3.bf16.msra.mxu1 %v338_v2  ;;  %v344_v8 = vld [vmem:[%s470_s1 + $0x34] ss:$12 sps:$4 sm:$0xff]   ;;  %v346_v9 = vld [vmem:[%s470_s1 + $0x38] ss:$12 sps:$4 sm:$0xff]   ;;  %v347_v10 = vld [vmem:[%s470_s1 + $0x30] ss:$12 sps:$4 sm:$0xff]  }
   0x4   :  { %171 = vmatpush1.bf16.msra.mxu0 %v339_v4  ;;  %316 = vmatprep.subr.bf16.mxu1 %v364_v0  ;;  %v348_v11 = vld [vmem:[%s470_s1 + $0x4c] ss:$12 sps:$4 sm:$0xff]   ;;  %v350_v12 = vld [vmem:[%s470_s1 + $0x50] ss:$12 sps:$4 sm:$0xff]   ;;  %v351_v13 = vld [vmem:[%s470_s1 + $0x48] ss:$12 sps:$4 sm:$0xff]  }
   0x5   :  { %172 = vmatprep.subr.bf16.mxu0 %v340_v5  ;;  %v352_v14 = vld [vmem:[%s470_s1 + $0x64] ss:$12 sps:$4 sm:$0xff]   ;;  %v354_v15 = vld [vmem:[%s470_s1 + $0x68] ss:$12 sps:$4 sm:$0xff]   ;;  %v355_v16 = vld [vmem:[%s470_s1 + $0x60] ss:$12 sps:$4 sm:$0xff]  }
   0x6   :  { %v356_v17 = vld [vmem:[%s470_s1 + $0x7c] ss:$12 sps:$4 sm:$0xff]   ;;  %v251_v18 = vld [vmem:[%s471_s2] sm:$0xf]  ;;  %v359_v21 = vld [vmem:[%s470_s1 + $0x78] ss:$12 sps:$4 sm:$0xff]  }
   0x7   :  { %317 = vmatpush3.bf16.msra.mxu1 %v342_v6  ;;  %254 = vperm.xlu0 %335, %v251_v18   ;;  %v358_v19 = vld [vmem:[%s470_s1 + $0x80] ss:$12 sps:$4 sm:$0xff]   ;;  %v362_v22 = vld [vmem:[%s470_s1 + $0x98] ss:$12 sps:$4 sm:$0x3f]   ;;  %vm156_vm2 = vcmask 883712  }
   0x8   :  { %173 = vmatpush1.bf16.msra.mxu0 %v343_v7  ;;  %318 = vmatprep.subr.bf16.mxu1 %v364_v0  ;;  %v260_v20 = vld [vmem:[%s472_s3] sm:$0xf]  ;;  %v363_v24 = vld [vmem:[%s470_s1 + $0x90] ss:$12 sps:$4 sm:$0x3f]   ;;  %v168_v25 = vsel %vm160_vm1, %v362_v22, 0 }
   0x9   :  { %174 = vmatprep.subr.bf16.mxu0 %v344_v8  ;;  %v360_v23 = vld [vmem:[%s470_s1 + $0x94] ss:$12 sps:$4 sm:$0x3f]   ;;  %v162_v26 = vsel %vm160_vm1, %v363_v24, 0 }
   0xa   :  { %v18_v27 = vld [vmem:[%s473_s0] sm:$0x3] }
   0xb   :  { %319 = vmatpush3.bf16.msra.mxu1 %v346_v9  ;;  %263 = vperm.xlu0 %335, %v260_v20  }
   0xc   :  { %175 = vmatpush1.bf16.msra.mxu0 %v347_v10  ;;  %320 = vmatprep.subr.bf16.mxu1 %v364_v0 }
   0xd   :  { %176 = vmatprep.subr.bf16.mxu0 %v348_v11 }
   0xf   :  { %321 = vmatpush3.bf16.msra.mxu1 %v350_v12 }
  0x10   :  { %177 = vmatpush1.bf16.msra.mxu0 %v351_v13  ;;  %322 = vmatprep.subr.bf16.mxu1 %v364_v0 }
  0x11   :  { %178 = vmatprep.subr.bf16.mxu0 %v352_v14 }
  0x13   :  { %323 = vmatpush3.bf16.msra.mxu1 %v354_v15 }
  0x14   :  { %179 = vmatpush1.bf16.msra.mxu0 %v355_v16  ;;  %324 = vmatprep.subr.bf16.mxu1 %v364_v0 }
  0x15   :  { %180 = vmatprep.subr.bf16.mxu0 %v356_v17 }
  0x17   :  { %325 = vmatpush3.bf16.msra.mxu1 %v358_v19 }
  0x18   :  { %181 = vmatpush1.bf16.msra.mxu0 %v359_v21  ;;  %326 = vmatprep.subr.bf16.mxu1 %v364_v0 }
  0x19   :  { %303 = vmatprep.subr.msk.bf16.mxu0 %vm160_vm1, %v360_v23 }
  0x1b   :  { %327 = vmatpush3.bf16.msra.mxu1 %v168_v25 }
  0x1c   :  { %183 = vmatpush1.bf16.msra.mxu0 %v162_v26 }
  0x1e   :  { %329 = vmatmul.mubr.msk.bf16.vlgmr.msra.gmra.mrb[0].mxu1 %vm156_vm2, %v18_v27 }
  0x1f   :  { %304 = vmatmul.mubr.msk.bf16.vlgmr.msra.gmra.mrb[0].mxu0 %vm156_vm2, %v18_v27 }
  0x86   :  { %v255_v28 = vpop.permute.xlu0 %254 }
  0x8a   :  { %v264_v29 = vpop.permute.xlu0 %263 }
  0xf1   :  { %v245_v30 = vpop.f32.mrb[0].mxu1 }
  0xf2   :  { %v259_v31 = vmul.f32 %v255_v28, %v245_v30  ;;  %v204_v32 = vpop.f32.mrb[0].mxu0  ;;  %v330_v33 = vpop.f32.mrb[1].mxu1 }
  0xf3   :  { %v257_v34 = vmul.f32 %v255_v28, %v204_v32  ;;  %v206_v35 = vpop.f32.mrb[1].mxu0  ;;  %v248_v36 = vpop.f32.mrb[2].mxu1 }
  0xf4   :  { %v268_v37 = vadd.f32 %v264_v29, %v259_v31  ;;  %v258_v38 = vmul.f32 %v255_v28, %v206_v35  ;;  %v208_v39 = vpop.f32.mrb[2].mxu0  ;;  %v331_v40 = vpop.f32.mrb[3].mxu1 }
  0xf5   :  { %v266_v41 = vadd.f32 %v264_v29, %v257_v34  ;;  %v209_v42 = vpop.f32.mrb[3].mxu0 }
  0xf6   :  { %v271_v43 = vmax.f32 %v268_v37, 0.0  ;;  %v267_v44 = vadd.f32 %v264_v29, %v258_v38 }
  0xf7   :  { %v269_v45 = vmax.f32 %v266_v41, 0.0 }
  0xf8   :  { %277 = vst [vmem:[%s474_s4 + $0x8] sm:$0xf] %v271_v43  ;;  %v270_v46 = vmax.f32 %v267_v44, 0.0 }
  0xfa   :  { %v274_v47 = vcombine.low %v269_v45, %v270_v46 }
  0xfc   :  { %276 = vst [vmem:[%s474_s4] sm:$0xff] %v274_v47 }

// kernel: decoder_forward.49
= control target key start
LH: loop header
LB: loop body
LE: loop exit
PB: predicated region body
PF: predicated region fallthrough
CT: control target
= control target key end

     0   :  { %v25_v0 = vlaneseq  ;;  %v180_v1 = vmov 0.0   ;;  %v181_v3 = vmov 1983009808   ;;  %vm182_vm0 = vmmov 0   ;;  %s227_s1 = inlined_call_operand.vmem [shape: bf16[4,384], index: 1, kind: input, shape index: {}]   ;;  %s228_s2 = inlined_call_operand.vmem [shape: f32[4,1], index: 2, kind: input, shape index: {}]   ;;  %s229_s3 = inlined_call_operand.vmem [shape: f32[4,1], index: 3, kind: input, shape index: {}]   ;;  %s230_s0 = inlined_call_operand.vmem [shape: bf16[4,4], index: 0, kind: input, shape index: {}]   ;;  %s231_s4 = inlined_call_operand.vmem [shape: f32[4,384], index: 4, kind: output, shape index: {}]  }
   0x1   :  { %168 = vmatprep.subr.bf16.mxu1 %v180_v1  ;;  %v19_v2 = vld [vmem:[%s227_s1] sm:$0x3f]  ;;  %v23_v4 = vunpack.c.l.s4 %v181_v3  ;;  %170 = vmatprep.mubr.msk.bf16.mxu1 %vm182_vm0, %v180_v1  ;;  %v183_v9 = vmov 0   ;;  %vm41_vm1 = vcmask 1041408   ;;  %vm37_vm2 = vcmask 31744  }
   0x2   :  { %v26_v5 = vshrl.u32 %v25_v0, 7  ;;  %v132_v6 = vld [vmem:[%s228_s2] sm:$0xf]  ;;  %v21_v7 = vcombine.high %v19_v2, %v19_v2  ;;  %83 = vmatprep.mubr.bf16.mxu0 %v183_v9  ;;  %178 = vset.pattern.permute.xlu0 %v183_v9 }
   0x3   :  { %v24_v8 = vunpack.c.0.s8 %v23_v4  ;;  %135 = vperm.xlu0 %178, %v132_v6   ;;  %v141_v11 = vld [vmem:[%s229_s3] sm:$0xf] }
   0x4   :  { %v18_v17 = vld [vmem:[%s230_s0] sm:$0x3] }
   0x5   :  { %v27_v10 = vsub.s32 %v24_v8, %v26_v5 }
   0x7   :  { %v35_v12 = vrot.slane %v21_v7, %v27_v10  ;;  %v28_v13 = vrot.slane %v19_v2, %v27_v10  ;;  %144 = vperm.xlu0 %178, %v141_v11  }
   0x9   :  { %v49_v14 = vsel %vm41_vm1, %v35_v12, 0  ;;  %v36_v15 = vcombine.high %v28_v13, %v28_v13  ;;  %v43_v16 = vsel %vm41_vm1, %v28_v13, 0 }
   0xa   :  { %169 = vmatpush3.bf16.msra.mxu1 %v49_v14 }
   0xb   :  { %163 = vmatprep.subr.msk.bf16.mxu0 %vm41_vm1, %v36_v15 }
   0xc   :  { %52 = vmatpush1.bf16.msra.mxu0 %v43_v16 }
   0xd   :  { %171 = vmatmul.mubr.msk.bf16.vlgmr.msra.gmra.mrb[0].mxu1 %vm37_vm2, %v18_v17 }
   0xf   :  { %164 = vmatmul.mubr.msk.bf16.vlgmr.msra.gmra.mrb[0].mxu0 %vm37_vm2, %v18_v17 }
  0x82   :  { %v136_v18 = vpop.permute.xlu0 %135 }
  0x86   :  { %v145_v20 = vpop.permute.xlu0 %144 }
  0xe0   :  { %v126_v19 = vpop.f32.mrb[0].mxu1 }
  0xe1   :  { %v140_v21 = vmul.f32 %v136_v18, %v126_v19  ;;  %v172_v22 = vpop.f32.mrb[1].mxu1 }
  0xe2   :  { %v85_v23 = vpop.f32.mrb[0].mxu0  ;;  %v129_v24 = vpop.f32.mrb[2].mxu1 }
  0xe3   :  { %v149_v25 = vadd.f32 %v145_v20, %v140_v21  ;;  %v138_v26 = vmul.f32 %v136_v18, %v85_v23  ;;  %v87_v27 = vpop.f32.mrb[1].mxu0  ;;  %v173_v28 = vpop.f32.mrb[3].mxu1 }
  0xe4   :  { %v139_v29 = vmul.f32 %v136_v18, %v87_v27  ;;  %v89_v30 = vpop.f32.mrb[2].mxu0 }
  0xe5   :  { %v152_v31 = vmax.f32 %v149_v25, 0.0  ;;  %v147_v32 = vadd.f32 %v145_v20, %v138_v26  ;;  %v90_v33 = vpop.f32.mrb[3].mxu0 }
  0xe6   :  { %v148_v34 = vadd.f32 %v145_v20, %v139_v29 }
  0xe7   :  { %158 = vst [vmem:[%s231_s4 + $0x8] sm:$0xf] %v152_v31  ;;  %v150_v35 = vmax.f32 %v147_v32, 0.0 }
  0xe8   :  { %v151_v36 = vmax.f32 %v148_v34, 0.0 }
  0xea   :  { %v155_v37 = vcombine.low %v150_v35, %v151_v36 }
  0xec   :  { %157 = vst [vmem:[%s231_s4] sm:$0xff] %v155_v37 }

// kernel: decoder_forward.51
= control target key start
LH: loop header
LB: loop body
LE: loop exit
PB: predicated region body
PF: predicated region fallthrough
CT: control target
= control target key end

     0   :  { %s74_s0 = inlined_call_operand.vmem [shape: f32[16,128], index: 0, kind: input, shape index: {}]   ;;  %s75_s1 = inlined_call_operand.vmem [shape: f32[16,128], index: 1, kind: input, shape index: {}]   ;;  %s76_s2 = inlined_call_operand.vmem [shape: f32[16,128], index: 2, kind: input, shape index: {}]   ;;  %s77_s3 = inlined_call_operand.vmem [shape: f32[16,128], index: 3, kind: output, shape index: {}]  }
   0x1   :  { %v14_v0 = vld [vmem:[%s74_s0] sm:$0xff]  ;;  %v15_v4 = vld [vmem:[%s74_s0 + $0x8] sm:$0xff] }
   0x2   :  { %v16_v1 = vld [vmem:[%s75_s1] sm:$0xff]  ;;  %v17_v5 = vld [vmem:[%s75_s1 + $0x8] sm:$0xff] }
   0x3   :  { %v18_v2 = vld [vmem:[%s76_s2] sm:$0xff]  ;;  %v19_v6 = vld [vmem:[%s76_s2 + $0x8] sm:$0xff] }
   0x4   :  { %v20_v3 = vmul.f32 %v18_v2, %v16_v1  ;;  %v21_v7 = vmul.f32 %v19_v6, %v17_v5 }
   0x6   :  { %v22_v8 = vadd.f32 %v20_v3, %v14_v0  ;;  %v23_v9 = vadd.f32 %v21_v7, %v15_v4 }
   0x8   :  { %24 = vst [vmem:[%s77_s3] sm:$0xff] %v22_v8  ;;  %25 = vst [vmem:[%s77_s3 + $0x8] sm:$0xff] %v23_v9 }

// kernel: decoder_forward.55
= control target key start
LH: loop header
LB: loop body
LE: loop exit
PB: predicated region body
PF: predicated region fallthrough
CT: control target
= control target key end

     0   :  { %v573_v1 = vmov 0   ;;  %vm269_vm0 = vcmask 1045504   ;;  %vm265_vm1 = vcmask 883712   ;;  %s756_s1 = inlined_call_operand.vmem [shape: bf16[108,768], index: 1, kind: input, shape index: {}]   ;;  %s757_s0 = inlined_call_operand.vmem [shape: bf16[4,108], index: 0, kind: input, shape index: {}]   ;;  %s758_s2 = inlined_call_operand.vmem [shape: f32[4,1], index: 2, kind: input, shape index: {}]   ;;  %s759_s3 = inlined_call_operand.vmem [shape: f32[4,1], index: 3, kind: input, shape index: {}]   ;;  %s760_s4 = inlined_call_operand.vmem [shape: f32[4,768], index: 4, kind: output, shape index: {}]  }
   0x1   :  { %v510_v0 = vld [vmem:[%s756_s1 + $0x4] ss:$24 sps:$4 sm:$0xff]   ;;  %320 = vmatprep.mubr.bf16.mxu0 %v573_v1  ;;  %361 = vmatprep.mubr.bf16.mxu1 %v573_v1  ;;  %v512_v2 = vld [vmem:[%s756_s1] ss:$24 sps:$4 sm:$0xff]   ;;  %v513_v3 = vld [vmem:[%s756_s1 + $0x34] ss:$24 sps:$4 sm:$0xff]  }
   0x2   :  { %509 = vset.pattern.permute.xlu0 %v573_v1  ;;  %288 = vmatprep.subr.bf16.mxu0 %v510_v0  ;;  %v515_v4 = vld [vmem:[%s756_s1 + $0x30] ss:$24 sps:$4 sm:$0xff]   ;;  %v516_v5 = vld [vmem:[%s756_s1 + $0x64] ss:$24 sps:$4 sm:$0xff]   ;;  %v518_v6 = vld [vmem:[%s756_s1 + $0x60] ss:$24 sps:$4 sm:$0xff]  }
   0x3   :  { %289 = vmatpush1.bf16.msra.mxu0 %v512_v2  ;;  %v519_v7 = vld [vmem:[%s756_s1 + $0x94] ss:$24 sps:$4 sm:$0xff]   ;;  %v533_v9 = vld [vmem:[%s756_s1 + $0x8] ss:$24 sps:$4 sm:$0xff]   ;;  %v522_v12 = vld [vmem:[%s756_s1 + $0xc4] ss:$24 sps:$4 sm:$0xff]  }
   0x4   :  { %290 = vmatprep.subr.bf16.mxu0 %v513_v3  ;;  %v530_v8 = vld [vmem:[%s756_s1 + $0xc] ss:$24 sps:$4 sm:$0xff]   ;;  %v521_v10 = vld [vmem:[%s756_s1 + $0x90] ss:$24 sps:$4 sm:$0xff]   ;;  %v534_v11 = vld [vmem:[%s756_s1 + $0x3c] ss:$24 sps:$4 sm:$0xff]  }
   0x5   :  { %329 = vmatprep.subr.bf16.mxu1 %v530_v8  ;;  %v539_v13 = vld [vmem:[%s756_s1 + $0x38] ss:$24 sps:$4 sm:$0xff]   ;;  %v540_v14 = vld [vmem:[%s756_s1 + $0x6c] ss:$24 sps:$4 sm:$0xff]   ;;  %v545_v17 = vld [vmem:[%s756_s1 + $0x68] ss:$24 sps:$4 sm:$0xff]  }
   0x6   :  { %330 = vmatpush1.bf16.msra.mxu1 %v533_v9  ;;  %v524_v15 = vld [vmem:[%s756_s1 + $0xc0] ss:$24 sps:$4 sm:$0xff]   ;;  %v525_v16 = vld [vmem:[%s756_s1 + $0xf4] ss:$24 sps:$4 sm:$0xff]   ;;  %v527_v19 = vld [vmem:[%s756_s1 + $0xf0] ss:$24 sps:$4 sm:$0xff]  }
   0x7   :  { %291 = vmatpush1.bf16.msra.mxu0 %v515_v4  ;;  %331 = vmatprep.subr.bf16.mxu1 %v534_v11  ;;  %v546_v18 = vld [vmem:[%s756_s1 + $0x9c] ss:$24 sps:$4 sm:$0xff]   ;;  %v532_v21 = vld [vmem:[%s756_s1 + $0x120] ss:$24 sps:$4 sm:$0x3f]  }
   0x8   :  { %292 = vmatprep.subr.bf16.mxu0 %v516_v5  ;;  %v528_v20 = vld [vmem:[%s756_s1 + $0x124] ss:$24 sps:$4 sm:$0x3f]   ;;  %v551_v22 = vld [vmem:[%s756_s1 + $0x98] ss:$24 sps:$4 sm:$0xff]   ;;  %v271_v25 = vsel %vm269_vm0, %v532_v21, 0 }
   0x9   :  { %v552_v23 = vld [vmem:[%s756_s1 + $0xcc] ss:$24 sps:$4 sm:$0xff]   ;;  %v557_v26 = vld [vmem:[%s756_s1 + $0xc8] ss:$24 sps:$4 sm:$0xff]   ;;  %v558_v27 = vld [vmem:[%s756_s1 + $0xfc] ss:$24 sps:$4 sm:$0xff]  }
   0xa   :  { %332 = vmatpush1.bf16.msra.mxu1 %v539_v13  ;;  %v538_v24 = vld [vmem:[%s756_s1 + $0x14] ss:$24 sps:$4 sm:$0xff]   ;;  %v18_v28 = vld [vmem:[%s757_s0] sm:$0x3]  ;;  %v536_v29 = vld [vmem:[%s756_s1 + $0x10] ss:$24 sps:$4 sm:$0xff]  }
   0xb   :  { %293 = vmatpush1.bf16.msra.mxu0 %v518_v6  ;;  %333 = vmatprep.subr.bf16.mxu1 %v540_v14  ;;  %v544_v30 = vld [vmem:[%s756_s1 + $0x44] ss:$24 sps:$4 sm:$0xff]   ;;  %v563_v31 = vld [vmem:[%s756_s1 + $0xf8] ss:$24 sps:$4 sm:$0xff]   ;;  %v411_v34 = vld [vmem:[%s758_s2] sm:$0xf] }
   0xc   :  { %294 = vmatprep.subr.bf16.mxu0 %v519_v7  ;;  %v564_v32 = vld [vmem:[%s756_s1 + $0x12c] ss:$24 sps:$4 sm:$0x3f]   ;;  %v569_v33 = vld [vmem:[%s756_s1 + $0x128] ss:$24 sps:$4 sm:$0x3f]   ;;  %414 = vperm.xlu0 %509, %v411_v34  }
   0xd   :  { %v542_v35 = vld [vmem:[%s756_s1 + $0x40] ss:$24 sps:$4 sm:$0xff]   ;;  %v550_v37 = vld [vmem:[%s756_s1 + $0x74] ss:$24 sps:$4 sm:$0xff]   ;;  %v277_v38 = vsel %vm269_vm0, %v569_v33, 0 }
   0xe   :  { %334 = vmatpush1.bf16.msra.mxu1 %v545_v17  ;;  %v423_v36 = vld [vmem:[%s759_s3] sm:$0xf]  ;;  %v548_v39 = vld [vmem:[%s756_s1 + $0x70] ss:$24 sps:$4 sm:$0xff]   ;;  %v556_v40 = vld [vmem:[%s756_s1 + $0xa4] ss:$24 sps:$4 sm:$0xff]  }
   0xf   :  { %295 = vmatpush1.bf16.msra.mxu0 %v521_v10  ;;  %335 = vmatprep.subr.bf16.mxu1 %v546_v18  ;;  %v554_v41 = vld [vmem:[%s756_s1 + $0xa0] ss:$24 sps:$4 sm:$0xff]   ;;  %v562_v42 = vld [vmem:[%s756_s1 + $0xd4] ss:$24 sps:$4 sm:$0xff]   ;;  %v560_v43 = vld [vmem:[%s756_s1 + $0xd0] ss:$24 sps:$4 sm:$0xff]  }
  0x10   :  { %296 = vmatprep.subr.bf16.mxu0 %v522_v12  ;;  %426 = vperm.xlu0 %509, %v423_v36   ;;  %v568_v44 = vld [vmem:[%s756_s1 + $0x104] ss:$24 sps:$4 sm:$0xff]   ;;  %v566_v45 = vld [vmem:[%s756_s1 + $0x100] ss:$24 sps:$4 sm:$0xff]  }
  0x11   :  { %v570_v46 = vld [vmem:[%s756_s1 + $0x134] ss:$24 sps:$4 sm:$0x3f]   ;;  %v572_v47 = vld [vmem:[%s756_s1 + $0x130] ss:$24 sps:$4 sm:$0x3f]  }
  0x12   :  { %336 = vmatpush1.bf16.msra.mxu1 %v551_v22  ;;  %v283_v48 = vsel %vm269_vm0, %v572_v47, 0 }
  0x13   :  { %297 = vmatpush1.bf16.msra.mxu0 %v524_v15  ;;  %337 = vmatprep.subr.bf16.mxu1 %v552_v23 }
  0x14   :  { %298 = vmatprep.subr.bf16.mxu0 %v525_v16 }
  0x16   :  { %338 = vmatpush1.bf16.msra.mxu1 %v557_v26 }
  0x17   :  { %299 = vmatpush1.bf16.msra.mxu0 %v527_v19  ;;  %339 = vmatprep.subr.bf16.mxu1 %v558_v27 }
  0x18   :  { %502 = vmatprep.subr.msk.bf16.mxu0 %vm269_vm0, %v528_v20 }
  0x1a   :  { %340 = vmatpush1.bf16.msra.mxu1 %v563_v31 }
  0x1b   :  { %301 = vmatpush1.bf16.msra.mxu0 %v271_v25  ;;  %504 = vmatprep.subr.msk.bf16.mxu1 %vm269_vm0, %v564_v32 }
  0x1c   :  { %370 = vmatprep.subr.bf16.mxu0 %v538_v24 }
  0x1e   :  { %503 = vmatmul.mubr.msk.bf16.vlgmr.msra.gmra.mrb[0].mxu0 %vm265_vm1, %v18_v28  ;;  %342 = vmatpush1.bf16.msra.mxu1 %v277_v38 }
  0x1f   :  { %371 = vmatpush1.bf16.msra.mxu0 %v536_v29  ;;  %402 = vmatprep.mubr.bf16.mxu0 %v573_v1 }
  0x20   :  { %372 = vmatprep.subr.bf16.mxu0 %v544_v30 }
  0x21   :  { %505 = vmatmul.mubr.msk.bf16.vlgmr.msra.gmra.mrb[0].mxu1 %vm265_vm1, %v18_v28 }
  0x23   :  { %373 = vmatpush1.bf16.msra.mxu0 %v542_v35 }
  0x24   :  { %374 = vmatprep.subr.bf16.mxu0 %v550_v37 }
  0x27   :  { %375 = vmatpush1.bf16.msra.mxu0 %v548_v39 }
  0x28   :  { %376 = vmatprep.subr.bf16.mxu0 %v556_v40 }
  0x2b   :  { %377 = vmatpush1.bf16.msra.mxu0 %v554_v41 }
  0x2c   :  { %378 = vmatprep.subr.bf16.mxu0 %v562_v42 }
  0x2f   :  { %379 = vmatpush1.bf16.msra.mxu0 %v560_v43 }
  0x30   :  { %380 = vmatprep.subr.bf16.mxu0 %v568_v44 }
  0x33   :  { %381 = vmatpush1.bf16.msra.mxu0 %v566_v45 }
  0x34   :  { %506 = vmatprep.subr.msk.bf16.mxu0 %vm269_vm0, %v570_v46 }
  0x37   :  { %383 = vmatpush1.bf16.msra.mxu0 %v283_v48 }
  0x3a   :  { %507 = vmatmul.mubr.msk.bf16.vlgmr.msra.gmra.mrb[4].mxu0 %vm265_vm1, %v18_v28 }
  0x8b   :  { %v415_v49 = vpop.permute.xlu0 %414 }
  0x8f   :  { %v427_v51 = vpop.permute.xlu0 %426 }
  0xf1   :  { %v322_v50 = vpop.f32.mrb[0].mxu0 }
  0xf2   :  { %v417_v52 = vmul.f32 %v415_v49, %v322_v50  ;;  %v324_v53 = vpop.f32.mrb[1].mxu0 }
  0xf3   :  { %v418_v54 = vmul.f32 %v415_v49, %v324_v53  ;;  %v326_v55 = vpop.f32.mrb[2].mxu0 }
  0xf4   :  { %v429_v56 = vadd.f32 %v427_v51, %v417_v52  ;;  %v327_v57 = vpop.f32.mrb[3].mxu0  ;;  %v363_v62 = vpop.f32.mrb[0].mxu1 }
  0xf5   :  { %v430_v58 = vadd.f32 %v427_v51, %v418_v54  ;;  %v419_v63 = vmul.f32 %v415_v49, %v363_v62  ;;  %v365_v0 = vpop.f32.mrb[1].mxu1 }
  0xf6   :  { %v435_v59 = vmax.f32 %v429_v56, 0.0  ;;  %v420_v1 = vmul.f32 %v415_v49, %v365_v0  ;;  %v367_v2 = vpop.f32.mrb[2].mxu1 }
  0xf7   :  { %v436_v60 = vmax.f32 %v430_v58, 0.0  ;;  %v431_v3 = vadd.f32 %v427_v51, %v419_v63  ;;  %v368_v4 = vpop.f32.mrb[3].mxu1 }
  0xf8   :  { %v432_v5 = vadd.f32 %v427_v51, %v420_v1 }
  0xf9   :  { %v447_v61 = vcombine.low %v435_v59, %v436_v60  ;;  %v437_v6 = vmax.f32 %v431_v3, 0.0 }
  0xfa   :  { %v438_v7 = vmax.f32 %v432_v5, 0.0 }
  0xfb   :  { %453 = vst [vmem:[%s760_s4] sm:$0xff] %v447_v61 }
  0xfc   :  { %v448_v8 = vcombine.low %v437_v6, %v438_v7 }
  0xfe   :  { %454 = vst [vmem:[%s760_s4 + $0x8] sm:$0xff] %v448_v8 }
 0x10d   :  { %v404_v9 = vpop.f32.mrb[4].mxu0 }
 0x10e   :  { %v421_v10 = vmul.f32 %v415_v49, %v404_v9  ;;  %v406_v11 = vpop.f32.mrb[5].mxu0 }
 0x10f   :  { %v422_v12 = vmul.f32 %v415_v49, %v406_v11  ;;  %v408_v13 = vpop.f32.mrb[6].mxu0 }
 0x110   :  { %v433_v14 = vadd.f32 %v427_v51, %v421_v10  ;;  %v409_v15 = vpop.f32.mrb[7].mxu0 }
 0x111   :  { %v434_v16 = vadd.f32 %v427_v51, %v422_v12 }
 0x112   :  { %v439_v17 = vmax.f32 %v433_v14, 0.0 }
 0x113   :  { %v440_v18 = vmax.f32 %v434_v16, 0.0 }
 0x115   :  { %v449_v19 = vcombine.low %v439_v17, %v440_v18 }
 0x117   :  { %455 = vst [vmem:[%s760_s4 + $0x10] sm:$0xff] %v449_v19 }

// kernel: decoder_forward.56
= control target key start
LH: loop header
LB: loop body
LE: loop exit
PB: predicated region body
PF: predicated region fallthrough
CT: control target
= control target key end

     0   :  { %s1013_s15 = smov 0   ;;  %s1015_s16 = smov 0   ;;  %s1207_s0 = inlined_call_operand.vmem [shape: bf16[4,108], index: 0, kind: input, shape index: {}]   ;;  %s1208_s1 = inlined_call_operand.vmem [shape: bf16[108,1280], index: 1, kind: input, shape index: {}]   ;;  %s1209_s2 = inlined_call_operand.vmem [shape: f32[4,1], index: 2, kind: input, shape index: {}]   ;;  %s1210_s3 = inlined_call_operand.vmem [shape: f32[4,1], index: 3, kind: input, shape index: {}]   ;;  %s1211_s4 = inlined_call_operand.vmem [shape: f32[4,1280], index: 4, kind: output, shape index: {}]  }
   0x1   :  { %s1017_s17 = smov 0  }
   0x2 LB: > { %s778_s18 = sadd.s32 4294967295, %s983_s17   ;;  %s1030_s19 = sadd.s32 1, %s983_s17   ;;  %s983_s17 = sphi %s1017_s17, %s1214_s17   ;;  %s979_s16 = sphi %s1015_s16, %s1213_s16   ;;  %s975_s15 = sphi %s1013_s15, %s1212_s15  }
   0x3   : > { %s39_s20 = ssub.s32 %s983_s17, %s1030_s19  ;;  %s42_s21 = sadd.s32 1, %s979_s16 }
   0x4   : > { %p40_p0 = scmp.eq.s32.totalorder %s39_s20, 0  ;;  %p49_p1 = scmp.ne.s32.totalorder %s979_s16, %s975_s15 }
   0x5   : > { %p50_p2 = scmp.eq.s32.totalorder %s983_s17, 0  ;;  %p781_p4 = scmp.ge.s32.totalorder %s983_s17, 2 }
   0x6   : > { %s1039_s22 = scalar_select %p40_p0, %s979_s16, %s42_s21  }
   0x7   : > { %p51_p3 = por %p50_p2, %p49_p1  ;;  %152 = sbr.rel (%p781_p4) target bundleno = 42 (0x2a), region = 28 }
   0xe   : > { %155 = sbr.rel (!%p51_p3) target bundleno = 42 (0x2a), region = 32  ;;  %s157_s23 = sand.u32 (%p51_p3), 1, %s979_s16  }
   0xf   : > { %s855_s24 = smul.u32 (%p51_p3), 20, %s983_s17 }
  0x10   : > { %s882_s25 = smul.u32 (%p51_p3), 280, %s157_s23 }
  0x11   : > { %s1047_s28 = scalar_lea.vmem (%p51_p3), %s1208_s1, %s855_s24 }
  0x12   : > { %v177_v0 = vld [vmem:[%s1047_s28] sm:$0xff] (%p51_p3)  ;;  %v179_v1 = vld [vmem:[%s1047_s28 + $0x8] sm:$0xff] (%p51_p3)  ;;  %s1052_s29 = scalar_lea.vmem (%p51_p3), [#allocation2], %s882_s25  ;;  %v183_v3 = vld [vmem:[%s1047_s28 + $0x30] sm:$0xff] (%p51_p3) }
  0x13   : > { %v181_v2 = vld [vmem:[%s1047_s28 + $0x28] sm:$0xff] (%p51_p3)  ;;  %178 = vst [vmem:[%s1052_s29] sm:$0xff] (%p51_p3), %v177_v0  ;;  %180 = vst [vmem:[%s1052_s29 + $0x8] sm:$0xff] (%p51_p3), %v179_v1  ;;  %v185_v4 = vld [vmem:[%s1047_s28 + $0x50] sm:$0xff] (%p51_p3) }
  0x14   : > { %182 = vst [vmem:[%s1052_s29 + $0x14] sm:$0xff] (%p51_p3), %v181_v2  ;;  %v187_v5 = vld [vmem:[%s1047_s28 + $0x58] sm:$0xff] (%p51_p3)  ;;  %184 = vst [vmem:[%s1052_s29 + $0x1c] sm:$0xff] (%p51_p3), %v183_v3  ;;  %v191_v7 = vld [vmem:[%s1047_s28 + $0x80] sm:$0xff] (%p51_p3) }
  0x15   : > { %186 = vst [vmem:[%s1052_s29 + $0x28] sm:$0xff] %v185_v4  ;;  %188 = vst [vmem:[%s1052_s29 + $0x30] sm:$0xff] %v187_v5  ;;  %v189_v6 = vld [vmem:[%s1047_s28 + $0x78] sm:$0xff]  ;;  %v193_v8 = vld [vmem:[%s1047_s28 + $0xa0] sm:$0xff] }
  0x16   : > { %190 = vst [vmem:[%s1052_s29 + $0x3c] sm:$0xff] %v189_v6  ;;  %192 = vst [vmem:[%s1052_s29 + $0x44] sm:$0xff] %v191_v7  ;;  %v195_v9 = vld [vmem:[%s1047_s28 + $0xa8] sm:$0xff]  ;;  %v199_v11 = vld [vmem:[%s1047_s28 + $0xd0] sm:$0xff] }
  0x17   : > { %194 = vst [vmem:[%s1052_s29 + $0x50] sm:$0xff] %v193_v8  ;;  %v197_v10 = vld [vmem:[%s1047_s28 + $0xc8] sm:$0xff]  ;;  %196 = vst [vmem:[%s1052_s29 + $0x58] sm:$0xff] %v195_v9  ;;  %v201_v12 = vld [vmem:[%s1047_s28 + $0xf0] sm:$0xff] }
  0x18   : > { %198 = vst [vmem:[%s1052_s29 + $0x64] sm:$0xff] %v197_v10  ;;  %200 = vst [vmem:[%s1052_s29 + $0x6c] sm:$0xff] %v199_v11  ;;  %v203_v13 = vld [vmem:[%s1047_s28 + $0xf8] sm:$0xff]  ;;  %v207_v15 = vld [vmem:[%s1047_s28 + $0x120] sm:$0xff] }
  0x19   : > { %v205_v14 = vld [vmem:[%s1047_s28 + $0x118] sm:$0xff]  ;;  %202 = vst [vmem:[%s1052_s29 + $0x78] sm:$0xff] %v201_v12  ;;  %204 = vst [vmem:[%s1052_s29 + $0x80] sm:$0xff] %v203_v13  ;;  %v209_v16 = vld [vmem:[%s1047_s28 + $0x140] sm:$0xff] }
  0x1a   : > { %206 = vst [vmem:[%s1052_s29 + $0x8c] sm:$0xff] %v205_v14  ;;  %v211_v17 = vld [vmem:[%s1047_s28 + $0x148] sm:$0xff]  ;;  %208 = vst [vmem:[%s1052_s29 + $0x94] sm:$0xff] %v207_v15  ;;  %v215_v19 = vld [vmem:[%s1047_s28 + $0x170] sm:$0xff] }
  0x1b   : > { %210 = vst [vmem:[%s1052_s29 + $0xa0] sm:$0xff] %v209_v16  ;;  %212 = vst [vmem:[%s1052_s29 + $0xa8] sm:$0xff] %v211_v17  ;;  %v213_v18 = vld [vmem:[%s1047_s28 + $0x168] sm:$0xff]  ;;  %v217_v20 = vld [vmem:[%s1047_s28 + $0x190] sm:$0xff] }
  0x1c   : > { %214 = vst [vmem:[%s1052_s29 + $0xb4] sm:$0xff] %v213_v18  ;;  %216 = vst [vmem:[%s1052_s29 + $0xbc] sm:$0xff] %v215_v19  ;;  %v219_v21 = vld [vmem:[%s1047_s28 + $0x198] sm:$0xff]  ;;  %v223_v23 = vld [vmem:[%s1047_s28 + $0x1c0] sm:$0xff] }
  0x1d   : > { %218 = vst [vmem:[%s1052_s29 + $0xc8] sm:$0xff] %v217_v20  ;;  %v221_v22 = vld [vmem:[%s1047_s28 + $0x1b8] sm:$0xff]  ;;  %220 = vst [vmem:[%s1052_s29 + $0xd0] sm:$0xff] %v219_v21  ;;  %v225_v24 = vld [vmem:[%s1047_s28 + $0x1e0] sm:$0xff] }
  0x1e   : > { %222 = vst [vmem:[%s1052_s29 + $0xdc] sm:$0xff] %v221_v22  ;;  %224 = vst [vmem:[%s1052_s29 + $0xe4] sm:$0xff] %v223_v23  ;;  %v227_v25 = vld [vmem:[%s1047_s28 + $0x1e8] sm:$0xff]  ;;  %v231_v27 = vld [vmem:[%s1047_s28 + $0x210] sm:$0xff] }
  0x1f   : > { %v229_v26 = vld [vmem:[%s1047_s28 + $0x208] sm:$0xff]  ;;  %226 = vst [vmem:[%s1052_s29 + $0xf0] sm:$0xff] %v225_v24  ;;  %228 = vst [vmem:[%s1052_s29 + $0xf8] sm:$0xff] %v227_v25  ;;  %v783_v28 = vld [vmem:[%s1047_s28 + $0x10] sm:$0xf] }
  0x20   : > { %230 = vst [vmem:[%s1052_s29 + $0x104] sm:$0xff] %v229_v26  ;;  %v785_v29 = vld [vmem:[%s1047_s28 + $0x38] sm:$0xf]  ;;  %232 = vst [vmem:[%s1052_s29 + $0x10c] sm:$0xff] %v231_v27  ;;  %v787_v30 = vld [vmem:[%s1047_s28 + $0x60] sm:$0xf] }
  0x21   : > { %784 = vst [vmem:[%s1052_s29 + $0x10] sm:$0xf] %v783_v28  ;;  %786 = vst [vmem:[%s1052_s29 + $0x24] sm:$0xf] %v785_v29  ;;  %v789_v31 = vld [vmem:[%s1047_s28 + $0x88] sm:$0xf] }
  0x22   : > { %v791_v32 = vld [vmem:[%s1047_s28 + $0xb0] sm:$0xf]  ;;  %788 = vst [vmem:[%s1052_s29 + $0x38] sm:$0xf] %v787_v30  ;;  %790 = vst [vmem:[%s1052_s29 + $0x4c] sm:$0xf] %v789_v31 }
  0x23   : > { %792 = vst [vmem:[%s1052_s29 + $0x60] sm:$0xf] %v791_v32  ;;  %v793_v33 = vld [vmem:[%s1047_s28 + $0xd8] sm:$0xf]  ;;  %v795_v34 = vld [vmem:[%s1047_s28 + $0x100] sm:$0xf] }
  0x24   : > { %v797_v35 = vld [vmem:[%s1047_s28 + $0x128] sm:$0xf]  ;;  %794 = vst [vmem:[%s1052_s29 + $0x74] sm:$0xf] %v793_v33  ;;  %796 = vst [vmem:[%s1052_s29 + $0x88] sm:$0xf] %v795_v34 }
  0x25   : > { %798 = vst [vmem:[%s1052_s29 + $0x9c] sm:$0xf] %v797_v35  ;;  %v799_v36 = vld [vmem:[%s1047_s28 + $0x150] sm:$0xf]  ;;  %v801_v37 = vld [vmem:[%s1047_s28 + $0x178] sm:$0xf] }
  0x26   : > { %v803_v38 = vld [vmem:[%s1047_s28 + $0x1a0] sm:$0xf]  ;;  %800 = vst [vmem:[%s1052_s29 + $0xb0] sm:$0xf] %v799_v36  ;;  %802 = vst [vmem:[%s1052_s29 + $0xc4] sm:$0xf] %v801_v37 }
  0x27   : > { %804 = vst [vmem:[%s1052_s29 + $0xd8] sm:$0xf] %v803_v38  ;;  %v805_v39 = vld [vmem:[%s1047_s28 + $0x1c8] sm:$0xf]  ;;  %v807_v40 = vld [vmem:[%s1047_s28 + $0x1f0] sm:$0xf] }
  0x28   : > { %v809_v41 = vld [vmem:[%s1047_s28 + $0x218] sm:$0xf]  ;;  %806 = vst [vmem:[%s1052_s29 + $0xec] sm:$0xf] %v805_v39  ;;  %808 = vst [vmem:[%s1052_s29 + $0x100] sm:$0xf] %v807_v40 }
  0x29   : > { %810 = vst [vmem:[%s1052_s29 + $0x114] sm:$0xf] %v809_v41 }
  0x2a PF: > { %p811_p5 = scmp.ge.s32.totalorder %s983_s17, 1  ;;  %p272_p6 = scmp.lt.s32.totalorder %s983_s17, 3 }
  0x2c   : > { %p273_p7 = pnand %p811_p5, %p272_p6 }
  0x2d   : > { %s279_s30 = sand.u32 (!%p273_p7), 1, %s975_s15   ;;  %v985_v42 = vmov (!%p273_p7), 0   ;;  %v674_v43 = vld [vmem:[%s1209_s2] sm:$0xf] (!%p273_p7)  ;;  %vm536_vm0 = vcmask (!%p273_p7), 1045504   ;;  %vm532_vm1 = vcmask (!%p273_p7), 883712  }
  0x2e   : > { %276 = sbr.rel (%p273_p7) target bundleno = 326 (0x146), region = 58  ;;  %584 = vmatprep.mubr.bf16.mxu0 (!%p273_p7), %v985_v42  ;;  %625 = vmatprep.mubr.bf16.mxu1 (!%p273_p7), %v985_v42  ;;  %v685_v44 = vld [vmem:[%s1210_s3] sm:$0xf] (!%p273_p7)  ;;  %v986_v10 = vmov (!%p273_p7), 0.0   ;;  %vm987_vm2 = vmmov (!%p273_p7), 0  }
  0x2f   : > { %s883_s5 = smul.u32 (!%p273_p7), 280, %s279_s30  ;;  %911 = vset.pattern.permute.xlu0 (!%p273_p7), %v985_v42  ;;  %v312_v7 = vld [vmem:[%s1207_s0] sm:$0x3] (!%p273_p7) }
  0x30   : > { %677 = vperm.xlu0 (!%p273_p7), %911, %v674_v43   ;;  %s305_s13 = smul.u32 (!%p273_p7), 5, %s778_s18 }
  0x31   : > { %s1144_s10 = scalar_lea.vmem (!%p273_p7), [#allocation2], %s883_s5 }
  0x32   : > { %v912_v45 = vld [vmem:[%s1144_s10 + $0x4] ss:$20 sps:$4 sm:$0xff] (!%p273_p7)   ;;  %v914_v46 = vld [vmem:[%s1144_s10] ss:$20 sps:$4 sm:$0xff] (!%p273_p7)   ;;  %v917_v48 = vld [vmem:[%s1144_s10 + $0x28] ss:$20 sps:$4 sm:$0xff] (!%p273_p7)  }
  0x33   : > { %552 = vmatprep.subr.bf16.mxu0 (!%p273_p7), %v912_v45  ;;  %v915_v47 = vld [vmem:[%s1144_s10 + $0x2c] ss:$20 sps:$4 sm:$0xff] (!%p273_p7)   ;;  %v918_v49 = vld [vmem:[%s1144_s10 + $0x54] ss:$20 sps:$4 sm:$0xff] (!%p273_p7)   ;;  %v920_v50 = vld [vmem:[%s1144_s10 + $0x50] ss:$20 sps:$4 sm:$0xff] (!%p273_p7)  }
  0x34   : > { %553 = vmatpush1.bf16.msra.mxu0 (!%p273_p7), %v914_v46  ;;  %688 = vperm.xlu0 (!%p273_p7), %911, %v685_v44   ;;  %v921_v51 = vld [vmem:[%s1144_s10 + $0x7c] ss:$20 sps:$4 sm:$0xff] (!%p273_p7)   ;;  %v930_v52 = vld [vmem:[%s1144_s10 + $0xc] ss:$20 sps:$4 sm:$0xff] (!%p273_p7)   ;;  %v924_v55 = vld [vmem:[%s1144_s10 + $0xa4] ss:$20 sps:$4 sm:$0xff] (!%p273_p7)  }
  0x35   : > { %554 = vmatprep.subr.bf16.mxu0 %v915_v47  ;;  %v932_v53 = vld [vmem:[%s1144_s10 + $0x8] ss:$20 sps:$4 sm:$0xff]   ;;  %v923_v54 = vld [vmem:[%s1144_s10 + $0x78] ss:$20 sps:$4 sm:$0xff]   ;;  %593 = vmatprep.subr.bf16.mxu1 %v930_v52  ;;  %v938_v57 = vld [vmem:[%s1144_s10 + $0x30] ss:$20 sps:$4 sm:$0xff]  }
  0x36   : > { %594 = vmatpush1.bf16.msra.mxu1 %v932_v53  ;;  %v936_v56 = vld [vmem:[%s1144_s10 + $0x34] ss:$20 sps:$4 sm:$0xff]   ;;  %v939_v58 = vld [vmem:[%s1144_s10 + $0x5c] ss:$20 sps:$4 sm:$0xff]   ;;  %v942_v60 = vld [vmem:[%s1144_s10 + $0x58] ss:$20 sps:$4 sm:$0xff]  }
  0x37   : > { %595 = vmatprep.subr.bf16.mxu1 %v936_v56  ;;  %v926_v59 = vld [vmem:[%s1144_s10 + $0xa0] ss:$20 sps:$4 sm:$0xff]   ;;  %v943_v62 = vld [vmem:[%s1144_s10 + $0x84] ss:$20 sps:$4 sm:$0xff]   ;;  %v929_v63 = vld [vmem:[%s1144_s10 + $0xc8] ss:$20 sps:$4 sm:$0xff]  }
  0x38   : > { %555 = vmatpush1.bf16.msra.mxu0 %v917_v48  ;;  %v927_v61 = vld [vmem:[%s1144_s10 + $0xcc] ss:$20 sps:$4 sm:$0xff]   ;;  %v933_v0 = vld [vmem:[%s1144_s10 + $0xf4] ss:$20 sps:$4 sm:$0x3f]   ;;  %p306_p8 = scmp.lt.s32.totalorder %s305_s13, 9 }
  0x39   : > { %556 = vmatprep.subr.bf16.mxu0 %v918_v49  ;;  %v935_v1 = vld [vmem:[%s1144_s10 + $0xf0] ss:$20 sps:$4 sm:$0x3f]   ;;  %v946_v2 = vld [vmem:[%s1144_s10 + $0x80] ss:$20 sps:$4 sm:$0xff]  }
  0x3a   : > { %596 = vmatpush1.bf16.msra.mxu1 %v938_v57  ;;  %v947_v3 = vld [vmem:[%s1144_s10 + $0xac] ss:$20 sps:$4 sm:$0xff]   ;;  %v950_v4 = vld [vmem:[%s1144_s10 + $0xa8] ss:$20 sps:$4 sm:$0xff]   ;;  %v538_v5 = vsel %vm536_vm0, %v935_v1, 0  ;;  %s1216_s13 = smov (!%p306_p8, %s305_s13), 9 }
  0x3b   : > { %597 = vmatprep.subr.bf16.mxu1 %v939_v58  ;;  %v951_v6 = vld [vmem:[%s1144_s10 + $0xd4] ss:$20 sps:$4 sm:$0xff]   ;;  %v941_v8 = vld [vmem:[%s1144_s10 + $0x10] ss:$20 sps:$4 sm:$0xff]   ;;  %v945_v13 = vld [vmem:[%s1144_s10 + $0x38] ss:$20 sps:$4 sm:$0xff]  }
  0x3c   : > { %557 = vmatpush1.bf16.msra.mxu0 %v920_v50  ;;  %v954_v9 = vld [vmem:[%s1144_s10 + $0xd0] ss:$20 sps:$4 sm:$0xff]   ;;  %v958_v12 = vld [vmem:[%s1144_s10 + $0xf8] ss:$20 sps:$4 sm:$0x3f]   ;;  %s812_s14 = sshll.u32 %s1216_s13, 2 }
  0x3d   : > { %558 = vmatprep.subr.bf16.mxu0 %v921_v51  ;;  %v955_v11 = vld [vmem:[%s1144_s10 + $0xfc] ss:$20 sps:$4 sm:$0x3f]   ;;  %v544_v14 = vsel %vm536_vm0, %v958_v12, 0  ;;  %v949_v15 = vld [vmem:[%s1144_s10 + $0x60] ss:$20 sps:$4 sm:$0xff]   ;;  %s309_s17 = scalar_lea.vmem %s1211_s4, %s812_s14 }
  0x3e   : > { %598 = vmatpush1.bf16.msra.mxu1 %v942_v60  ;;  %v953_v16 = vld [vmem:[%s1144_s10 + $0x88] ss:$20 sps:$4 sm:$0xff]   ;;  %v957_v17 = vld [vmem:[%s1144_s10 + $0xb0] ss:$20 sps:$4 sm:$0xff]   ;;  %v959_v18 = vld [vmem:[%s1144_s10 + $0xd8] ss:$20 sps:$4 sm:$0xff]  }
  0x3f   : > { %599 = vmatprep.subr.bf16.mxu1 %v943_v62  ;;  %v960_v19 = vld [vmem:[%s1144_s10 + $0x100] ss:$20 sps:$4 sm:$0x3f]  }
  0x40   : > { %559 = vmatpush1.bf16.msra.mxu0 %v923_v54  ;;  %v550_v20 = vsel %vm536_vm0, %v960_v19, 0 }
  0x41   : > { %560 = vmatprep.subr.bf16.mxu0 %v924_v55 }
  0x42   : > { %600 = vmatpush1.bf16.msra.mxu1 %v946_v2 }
  0x43   : > { %601 = vmatprep.subr.bf16.mxu1 %v947_v3 }
  0x44   : > { %561 = vmatpush1.bf16.msra.mxu0 %v926_v59 }
  0x45   : > { %562 = vmatprep.subr.bf16.mxu0 %v927_v61 }
  0x46   : > { %602 = vmatpush1.bf16.msra.mxu1 %v950_v4 }
  0x47   : > { %603 = vmatprep.subr.bf16.mxu1 %v951_v6 }
  0x48   : > { %563 = vmatpush1.bf16.msra.mxu0 %v929_v63 }
  0x49   : > { %848 = vmatprep.subr.msk.bf16.mxu0 %vm536_vm0, %v933_v0 }
  0x4a   : > { %604 = vmatpush1.bf16.msra.mxu1 %v954_v9 }
  0x4b   : > { %850 = vmatprep.subr.msk.bf16.mxu1 %vm536_vm0, %v955_v11 }
  0x4c   : > { %565 = vmatpush1.bf16.msra.mxu0 %v538_v5 }
  0x4d   : > { %864 = vmatprep.subr.bf16.mxu0 %v986_v10 }
  0x4e   : > { %606 = vmatpush1.bf16.msra.mxu1 %v544_v14 }
  0x4f   : > { %849 = vmatmul.mubr.msk.bf16.vlgmr.msra.gmra.mrb[0].mxu0 %vm532_vm1, %v312_v7 }
  0x50   : > { %865 = vmatpush3.bf16.msra.mxu0 %v941_v8  ;;  %878 = vmatprep.mubr.msk.bf16.mxu0 %vm987_vm2, %v986_v10 }
  0x51   : > { %866 = vmatprep.subr.bf16.mxu0 %v986_v10  ;;  %851 = vmatmul.mubr.msk.bf16.vlgmr.msra.gmra.mrb[0].mxu1 %vm532_vm1, %v312_v7 }
  0x54   : > { %867 = vmatpush3.bf16.msra.mxu0 %v945_v13 }
  0x55   : > { %868 = vmatprep.subr.bf16.mxu0 %v986_v10 }
  0x58   : > { %869 = vmatpush3.bf16.msra.mxu0 %v949_v15 }
  0x59   : > { %870 = vmatprep.subr.bf16.mxu0 %v986_v10 }
  0x5c   : > { %871 = vmatpush3.bf16.msra.mxu0 %v953_v16 }
  0x5d   : > { %872 = vmatprep.subr.bf16.mxu0 %v986_v10 }
  0x60   : > { %873 = vmatpush3.bf16.msra.mxu0 %v957_v17 }
  0x61   : > { %874 = vmatprep.subr.bf16.mxu0 %v986_v10 }
  0x64   : > { %875 = vmatpush3.bf16.msra.mxu0 %v959_v18 }
  0x65   : > { %876 = vmatprep.subr.bf16.mxu0 %v986_v10 }
  0x68   : > { %877 = vmatpush3.bf16.msra.mxu0 %v550_v20 }
  0x6b   : > { %879 = vmatmul.mubr.msk.bf16.vlgmr.msra.gmra.mrb[4].mxu0 %vm532_vm1, %v312_v7 }
  0xaf   : > { %v678_v21 = vpop.permute.xlu0 %677 }
  0xb3   : > { %v689_v23 = vpop.permute.xlu0 %688 }
 0x122   : > { %v586_v22 = vpop.f32.mrb[0].mxu0 }
 0x123   : > { %v680_v24 = vmul.f32 %v678_v21, %v586_v22  ;;  %v588_v25 = vpop.f32.mrb[1].mxu0 }
 0x124   : > { %v681_v26 = vmul.f32 %v678_v21, %v588_v25  ;;  %v590_v27 = vpop.f32.mrb[2].mxu0  ;;  %v627_v34 = vpop.f32.mrb[0].mxu1 }
 0x125   : > { %v691_v28 = vadd.f32 %v689_v23, %v680_v24  ;;  %v591_v29 = vpop.f32.mrb[3].mxu0  ;;  %v682_v35 = vmul.f32 %v678_v21, %v627_v34  ;;  %v629_v36 = vpop.f32.mrb[1].mxu1 }
 0x126   : > { %v692_v30 = vadd.f32 %v689_v23, %v681_v26  ;;  %v683_v37 = vmul.f32 %v678_v21, %v629_v36  ;;  %v631_v38 = vpop.f32.mrb[2].mxu1 }
 0x127   : > { %v696_v31 = vmax.f32 %v691_v28, 0.0  ;;  %v693_v39 = vadd.f32 %v689_v23, %v682_v35  ;;  %v632_v40 = vpop.f32.mrb[3].mxu1 }
 0x128   : > { %v697_v32 = vmax.f32 %v692_v30, 0.0  ;;  %v694_v41 = vadd.f32 %v689_v23, %v683_v37 }
 0x129   : > { %v698_v42 = vmax.f32 %v693_v39, 0.0 }
 0x12a   : > { %v705_v33 = vcombine.low %v696_v31, %v697_v32  ;;  %v699_v43 = vmax.f32 %v694_v41, 0.0 }
 0x12c   : > { %709 = vst [vmem:[%s309_s17] sm:$0xff] %v705_v33  ;;  %v706_v44 = vcombine.low %v698_v42, %v699_v43 }
 0x12e   : > { %710 = vst [vmem:[%s309_s17 + $0x8] sm:$0xff] %v706_v44 }
 0x13e   : > { %v668_v45 = vpop.f32.mrb[4].mxu0 }
 0x13f   : > { %v684_v46 = vmul.f32 %v678_v21, %v668_v45  ;;  %v880_v47 = vpop.f32.mrb[5].mxu0 }
 0x140   : > { %v671_v48 = vpop.f32.mrb[6].mxu0 }
 0x141   : > { %v695_v49 = vadd.f32 %v689_v23, %v684_v46  ;;  %v881_v50 = vpop.f32.mrb[7].mxu0 }
 0x143   : > { %v700_v51 = vmax.f32 %v695_v49, 0.0 }
 0x145   : > { %711 = vst [vmem:[%s309_s17 + $0x10] sm:$0xf] %v700_v51 }
 0x146 PF: > { %p11_p9 = scmp.ge.s32.totalorder %s1030_s19, 4   ;;  %s1212_s15 = smov %s979_s16 }
 0x147   : > { %s1213_s16 = smov %s1039_s22  ;;  %s1214_s17 = smov %s1030_s19 }
 0x148   :  { %13 = sbr.rel (!%p11_p9) target bundleno = 2 (0x2), region = 103 }

// kernel: decoder_forward.57
= control target key start
LH: loop header
LB: loop body
LE: loop exit
PB: predicated region body
PF: predicated region fallthrough
CT: control target
= control target key end

     0   :  { %s541_s15 = smov 0   ;;  %s576_s0 = inlined_call_operand.vmem [shape: bf16[4,4], index: 0, kind: input, shape index: {}]   ;;  %s577_s1 = inlined_call_operand.vmem [shape: bf16[4,1280], index: 1, kind: input, shape index: {}]   ;;  %s578_s2 = inlined_call_operand.vmem [shape: f32[4,1], index: 2, kind: input, shape index: {}]   ;;  %s579_s3 = inlined_call_operand.vmem [shape: f32[4,1], index: 3, kind: input, shape index: {}]   ;;  %s580_s4 = inlined_call_operand.vmem [shape: f32[4,1280], index: 4, kind: output, shape index: {}]  }
   0x1 LB: > { %s467_s16 = sadd.s32 4294967295, %s510_s15   ;;  %p471_p0 = scmp.ge.s32.totalorder %s510_s15, 1  ;;  %s510_s15 = sphi %s541_s15, %s14_s15  }
   0x2   : > { %p163_p1 = scmp.lt.s32.totalorder %s510_s15, 3 }
   0x4   : > { %p164_p2 = pnand %p471_p0, %p163_p1 }
   0x5   : > { %s189_s17 = smul.u32 (!%p164_p2), 5, %s467_s16  ;;  %v211_v0 = vlaneseq (!%p164_p2)  ;;  %v512_v1 = vmov (!%p164_p2), 1983009808   ;;  %v513_v3 = vmov (!%p164_p2), 0   ;;  %v373_v5 = vld [vmem:[%s578_s2] sm:$0xf] (!%p164_p2) }
   0x6   : > { %167 = sbr.rel (%p164_p2) target bundleno = 252 (0xfc), region = 36  ;;  %v209_v2 = vunpack.c.l.s4 (!%p164_p2), %v512_v1  ;;  %283 = vmatprep.mubr.bf16.mxu0 (!%p164_p2), %v513_v3  ;;  %324 = vmatprep.mubr.bf16.mxu1 (!%p164_p2), %v513_v3  ;;  %v384_v7 = vld [vmem:[%s579_s3] sm:$0xf] (!%p164_p2)  ;;  %vm235_vm0 = vcmask (!%p164_p2), 1041408   ;;  %vm231_vm1 = vcmask (!%p164_p2), 31744   ;;  %v514_v19 = vmov (!%p164_p2), 0.0  }
   0x7   : > { %p190_p3 = scmp.lt.s32.totalorder (!%p164_p2), %s189_s17, 9  ;;  %v212_v4 = vshrl.u32 (!%p164_p2), %v211_v0, 7  ;;  %502 = vset.pattern.permute.xlu0 (!%p164_p2), %v513_v3  ;;  %v202_v18 = vld [vmem:[%s576_s0] sm:$0x3] (!%p164_p2)  ;;  %vm515_vm2 = vmmov (!%p164_p2), 0  }
   0x8   : > { %v210_v6 = vunpack.c.0.s8 (!%p164_p2), %v209_v2  ;;  %376 = vperm.xlu0 (!%p164_p2), %502, %v373_v5  }
   0xa   : > { %v213_v8 = vsub.s32 (!%p164_p2), %v210_v6, %v212_v4 }
   0xc   : > { %387 = vperm.xlu0 (!%p164_p2), %502, %v384_v7  }
   0xd   : > { %s582_s17 = smov (!%p190_p3, %s189_s17), 9 }
   0xe   : > { %s472_s22 = sshll.u32 %s582_s17, 1  ;;  %s473_s28 = sshll.u32 %s582_s17, 2 }
   0xf   : > { %s193_s25 = scalar_lea.vmem %s577_s1, %s472_s22  ;;  %s199_s5 = scalar_lea.vmem %s580_s4, %s473_s28 }
  0x10   : > { %v203_v9 = vld [vmem:[%s193_s25] sm:$0xff]  ;;  %v474_v15 = vld.sshfl [vmem:[%s193_s25 + $0x8] sm:$0x3 pattern:$0x76325410] }
  0x11   : > { %v214_v10 = vrot.slane %v203_v9, %v213_v8  ;;  %v207_v11 = vcombine.high %v203_v9, %v203_v9  ;;  %v249_v20 = vsel %vm235_vm0, %v474_v15, 0 }
  0x13   : > { %v222_v12 = vcombine.high %v214_v10, %v214_v10  ;;  %v237_v13 = vsel %vm235_vm0, %v214_v10, 0  ;;  %v221_v14 = vrot.slane %v207_v11, %v213_v8 }
  0x15   : > { %475 = vmatprep.subr.msk.bf16.mxu0 %vm235_vm0, %v222_v12  ;;  %v223_v16 = vcombine.high %v221_v14, %v221_v14  ;;  %v243_v17 = vsel %vm235_vm0, %v221_v14, 0 }
  0x16   : > { %252 = vmatpush1.bf16.msra.mxu0 %v237_v13 }
  0x17   : > { %477 = vmatprep.subr.msk.bf16.mxu1 %vm235_vm0, %v223_v16  ;;  %484 = vmatprep.subr.bf16.mxu0 %v514_v19 }
  0x18   : > { %293 = vmatpush1.bf16.msra.mxu1 %v243_v17 }
  0x19   : > { %476 = vmatmul.mubr.msk.bf16.vlgmr.msra.gmra.mrb[0].mxu0 %vm231_vm1, %v202_v18 }
  0x1a   : > { %485 = vmatpush3.bf16.msra.mxu0 %v249_v20  ;;  %486 = vmatprep.mubr.msk.bf16.mxu0 %vm515_vm2, %v514_v19 }
  0x1b   : > { %478 = vmatmul.mubr.msk.bf16.vlgmr.msra.gmra.mrb[0].mxu1 %vm231_vm1, %v202_v18 }
  0x21   : > { %487 = vmatmul.mubr.msk.bf16.vlgmr.msra.gmra.mrb[4].mxu0 %vm231_vm1, %v202_v18 }
  0x87   : > { %v377_v21 = vpop.permute.xlu0 %376 }
  0x8b   : > { %v388_v23 = vpop.permute.xlu0 %387 }
  0xec   : > { %v285_v22 = vpop.f32.mrb[0].mxu0 }
  0xed   : > { %v379_v24 = vmul.f32 %v377_v21, %v285_v22  ;;  %v287_v25 = vpop.f32.mrb[1].mxu0 }
  0xee   : > { %v380_v26 = vmul.f32 %v377_v21, %v287_v25  ;;  %v289_v27 = vpop.f32.mrb[2].mxu0  ;;  %v326_v28 = vpop.f32.mrb[0].mxu1 }
  0xef   : > { %v381_v29 = vmul.f32 %v377_v21, %v326_v28  ;;  %v390_v30 = vadd.f32 %v388_v23, %v379_v24  ;;  %v290_v31 = vpop.f32.mrb[3].mxu0  ;;  %v328_v32 = vpop.f32.mrb[1].mxu1 }
  0xf0   : > { %v391_v33 = vadd.f32 %v388_v23, %v380_v26  ;;  %v382_v34 = vmul.f32 %v377_v21, %v328_v32  ;;  %v330_v35 = vpop.f32.mrb[2].mxu1 }
  0xf1   : > { %v392_v36 = vadd.f32 %v388_v23, %v381_v29  ;;  %v395_v37 = vmax.f32 %v390_v30, 0.0  ;;  %v331_v38 = vpop.f32.mrb[3].mxu1 }
  0xf2   : > { %v396_v39 = vmax.f32 %v391_v33, 0.0  ;;  %v393_v40 = vadd.f32 %v388_v23, %v382_v34 }
  0xf3   : > { %v397_v41 = vmax.f32 %v392_v36, 0.0 }
  0xf4   : > { %v404_v42 = vcombine.low %v395_v37, %v396_v39  ;;  %v398_v43 = vmax.f32 %v393_v40, 0.0  ;;  %v367_v44 = vpop.f32.mrb[4].mxu0 }
  0xf5   : > { %v383_v45 = vmul.f32 %v377_v21, %v367_v44  ;;  %v488_v46 = vpop.f32.mrb[5].mxu0 }
  0xf6   : > { %v405_v47 = vcombine.low %v397_v41, %v398_v43  ;;  %408 = vst [vmem:[%s199_s5] sm:$0xff] %v404_v42  ;;  %v370_v48 = vpop.f32.mrb[6].mxu0 }
  0xf7   : > { %v394_v49 = vadd.f32 %v388_v23, %v383_v45  ;;  %v489_v50 = vpop.f32.mrb[7].mxu0 }
  0xf8   : > { %409 = vst [vmem:[%s199_s5 + $0x8] sm:$0xff] %v405_v47 }
  0xf9   : > { %v399_v51 = vmax.f32 %v394_v49, 0.0 }
  0xfb   : > { %410 = vst [vmem:[%s199_s5 + $0x10] sm:$0xf] %v399_v51 }
  0xfc PF: > { %s14_s15 = sadd.s32 1, %s510_s15  }
  0xfd   : > { %p11_p4 = scmp.ge.s32.totalorder %s14_s15, 4  }
  0xff   :  { %13 = sbr.rel (!%p11_p4) target bundleno = 1 (0x1), region = 66 }

// kernel: decoder_forward.59
= control target key start
LH: loop header
LB: loop body
LE: loop exit
PB: predicated region body
PF: predicated region fallthrough
CT: control target
= control target key end

     0   :  { %s128_s0 = inlined_call_operand.vmem [shape: f32[40,128], index: 0, kind: input, shape index: {}]   ;;  %s129_s1 = inlined_call_operand.vmem [shape: f32[40,128], index: 1, kind: input, shape index: {}]   ;;  %s130_s2 = inlined_call_operand.vmem [shape: f32[40,128], index: 2, kind: input, shape index: {}]   ;;  %s131_s3 = inlined_call_operand.vmem [shape: f32[40,128], index: 3, kind: output, shape index: {}]  }
   0x1   :  { %v14_v0 = vld [vmem:[%s128_s0] sm:$0xff]  ;;  %v15_v4 = vld [vmem:[%s128_s0 + $0x8] sm:$0xff]  ;;  %v16_v8 = vld [vmem:[%s128_s0 + $0x10] sm:$0xff] }
   0x2   :  { %v19_v1 = vld [vmem:[%s129_s1] sm:$0xff]  ;;  %v20_v5 = vld [vmem:[%s129_s1 + $0x8] sm:$0xff]  ;;  %v21_v9 = vld [vmem:[%s129_s1 + $0x10] sm:$0xff] }
   0x3   :  { %v24_v2 = vld [vmem:[%s130_s2] sm:$0xff]  ;;  %v25_v6 = vld [vmem:[%s130_s2 + $0x8] sm:$0xff]  ;;  %v26_v10 = vld [vmem:[%s130_s2 + $0x10] sm:$0xff] }
   0x4   :  { %v29_v3 = vmul.f32 %v24_v2, %v19_v1  ;;  %v30_v7 = vmul.f32 %v25_v6, %v20_v5  ;;  %v31_v12 = vmul.f32 %v26_v10, %v21_v9  ;;  %v17_v13 = vld [vmem:[%s128_s0 + $0x18] sm:$0xff]  ;;  %v18_v18 = vld [vmem:[%s128_s0 + $0x20] sm:$0xff] }
   0x5   :  { %v22_v14 = vld [vmem:[%s129_s1 + $0x18] sm:$0xff]  ;;  %v23_v19 = vld [vmem:[%s129_s1 + $0x20] sm:$0xff] }
   0x6   :  { %v34_v11 = vadd.f32 %v29_v3, %v14_v0  ;;  %v27_v15 = vld [vmem:[%s130_s2 + $0x18] sm:$0xff]  ;;  %v35_v16 = vadd.f32 %v30_v7, %v15_v4  ;;  %v28_v20 = vld [vmem:[%s130_s2 + $0x20] sm:$0xff]  ;;  %v36_v21 = vadd.f32 %v31_v12, %v16_v8 }
   0x7   :  { %v32_v17 = vmul.f32 %v27_v15, %v22_v14  ;;  %v33_v22 = vmul.f32 %v28_v20, %v23_v19 }
   0x8   :  { %39 = vst [vmem:[%s131_s3] sm:$0xff] %v34_v11  ;;  %40 = vst [vmem:[%s131_s3 + $0x8] sm:$0xff] %v35_v16 }
   0x9   :  { %v37_v23 = vadd.f32 %v32_v17, %v17_v13  ;;  %41 = vst [vmem:[%s131_s3 + $0x10] sm:$0xff] %v36_v21  ;;  %v38_v24 = vadd.f32 %v33_v22, %v18_v18 }
   0xb   :  { %42 = vst [vmem:[%s131_s3 + $0x18] sm:$0xff] %v37_v23  ;;  %43 = vst [vmem:[%s131_s3 + $0x20] sm:$0xff] %v38_v24 }

// kernel: decoder_forward.61
= control target key start
LH: loop header
LB: loop body
LE: loop exit
PB: predicated region body
PF: predicated region fallthrough
CT: control target
= control target key end

     0   :  { %v464_v1 = vmov 0   ;;  %vm245_vm0 = vcmask 130048   ;;  %s613_s1 = inlined_call_operand.vmem [shape: bf16[144,512], index: 1, kind: input, shape index: {}]   ;;  %s614_s0 = inlined_call_operand.vmem [shape: bf16[4,144], index: 0, kind: input, shape index: {}]   ;;  %s615_s2 = inlined_call_operand.vmem [shape: f32[4,1], index: 2, kind: input, shape index: {}]   ;;  %s616_s3 = inlined_call_operand.vmem [shape: f32[4,1], index: 3, kind: input, shape index: {}]   ;;  %s617_s4 = inlined_call_operand.vmem [shape: f32[4,512], index: 4, kind: output, shape index: {}]  }
   0x1   :  { %v410_v0 = vld [vmem:[%s613_s1 + $0x4] ss:$16 sps:$4 sm:$0xff]   ;;  %409 = vset.pattern.permute.xlu0 %v464_v1  ;;  %v412_v2 = vld [vmem:[%s613_s1 + $0xc] ss:$16 sps:$4 sm:$0xff]   ;;  %v414_v3 = vld [vmem:[%s613_s1] ss:$16 sps:$4 sm:$0xff]  }
   0x2   :  { %249 = vmatprep.subr.bf16.mxu0 %v410_v0  ;;  %v415_v4 = vld [vmem:[%s613_s1 + $0x8] ss:$16 sps:$4 sm:$0xff]   ;;  %290 = vmatprep.subr.bf16.mxu1 %v412_v2  ;;  %v416_v5 = vld [vmem:[%s613_s1 + $0x24] ss:$16 sps:$4 sm:$0xff]   ;;  %v418_v6 = vld [vmem:[%s613_s1 + $0x2c] ss:$16 sps:$4 sm:$0xff]  }
   0x3   :  { %250 = vmatpush1.bf16.msra.mxu0 %v414_v3  ;;  %291 = vmatpush1.bf16.msra.mxu1 %v415_v4  ;;  %v420_v7 = vld [vmem:[%s613_s1 + $0x20] ss:$16 sps:$4 sm:$0xff]   ;;  %v421_v8 = vld [vmem:[%s613_s1 + $0x28] ss:$16 sps:$4 sm:$0xff]   ;;  %v422_v9 = vld [vmem:[%s613_s1 + $0x44] ss:$16 sps:$4 sm:$0xff]  }
   0x4   :  { %251 = vmatprep.subr.bf16.mxu0 %v416_v5  ;;  %292 = vmatprep.subr.bf16.mxu1 %v418_v6  ;;  %v424_v10 = vld [vmem:[%s613_s1 + $0x4c] ss:$16 sps:$4 sm:$0xff]   ;;  %v426_v11 = vld [vmem:[%s613_s1 + $0x40] ss:$16 sps:$4 sm:$0xff]   ;;  %v427_v12 = vld [vmem:[%s613_s1 + $0x48] ss:$16 sps:$4 sm:$0xff]  }
   0x5   :  { %v428_v13 = vld [vmem:[%s613_s1 + $0x64] ss:$16 sps:$4 sm:$0xff]   ;;  %v430_v14 = vld [vmem:[%s613_s1 + $0x6c] ss:$16 sps:$4 sm:$0xff]   ;;  %v432_v15 = vld [vmem:[%s613_s1 + $0x60] ss:$16 sps:$4 sm:$0xff]  }
   0x6   :  { %v433_v16 = vld [vmem:[%s613_s1 + $0x68] ss:$16 sps:$4 sm:$0xff]   ;;  %v434_v17 = vld [vmem:[%s613_s1 + $0x84] ss:$16 sps:$4 sm:$0xff]   ;;  %v436_v18 = vld [vmem:[%s613_s1 + $0x8c] ss:$16 sps:$4 sm:$0xff]  }
   0x7   :  { %252 = vmatpush1.bf16.msra.mxu0 %v420_v7  ;;  %293 = vmatpush1.bf16.msra.mxu1 %v421_v8  ;;  %v438_v19 = vld [vmem:[%s613_s1 + $0x80] ss:$16 sps:$4 sm:$0xff]   ;;  %v439_v20 = vld [vmem:[%s613_s1 + $0x88] ss:$16 sps:$4 sm:$0xff]   ;;  %v440_v21 = vld [vmem:[%s613_s1 + $0xa4] ss:$16 sps:$4 sm:$0xff]  }
   0x8   :  { %253 = vmatprep.subr.bf16.mxu0 %v422_v9  ;;  %294 = vmatprep.subr.bf16.mxu1 %v424_v10  ;;  %v442_v22 = vld [vmem:[%s613_s1 + $0xac] ss:$16 sps:$4 sm:$0xff]   ;;  %v444_v23 = vld [vmem:[%s613_s1 + $0xa0] ss:$16 sps:$4 sm:$0xff]   ;;  %v445_v24 = vld [vmem:[%s613_s1 + $0xa8] ss:$16 sps:$4 sm:$0xff]  }
   0x9   :  { %v446_v25 = vld [vmem:[%s613_s1 + $0xc4] ss:$16 sps:$4 sm:$0xff]   ;;  %v448_v26 = vld [vmem:[%s613_s1 + $0xcc] ss:$16 sps:$4 sm:$0xff]   ;;  %v450_v27 = vld [vmem:[%s613_s1 + $0xc0] ss:$16 sps:$4 sm:$0xff]  }
   0xa   :  { %v451_v28 = vld [vmem:[%s613_s1 + $0xc8] ss:$16 sps:$4 sm:$0xff]   ;;  %v369_v29 = vld.sshfl [vmem:[%s614_s0] sm:$0x33 pattern:$0x76325410] }
   0xb   :  { %254 = vmatpush1.bf16.msra.mxu0 %v426_v11  ;;  %295 = vmatpush1.bf16.msra.mxu1 %v427_v12  ;;  %v331_v30 = vld [vmem:[%s615_s2] sm:$0xf]  ;;  %v452_v31 = vld [vmem:[%s613_s1 + $0xe4] ss:$16 sps:$4 sm:$0xff]   ;;  %v454_v32 = vld [vmem:[%s613_s1 + $0xec] ss:$16 sps:$4 sm:$0xff]   ;;  %v63_v33 = vcombine.high %v369_v29, %v369_v29 }
   0xc   :  { %255 = vmatprep.subr.bf16.mxu0 %v428_v13  ;;  %296 = vmatprep.subr.bf16.mxu1 %v430_v14  ;;  %v341_v34 = vld [vmem:[%s616_s3] sm:$0xf]  ;;  %v457_v36 = vld [vmem:[%s613_s1 + $0xe8] ss:$16 sps:$4 sm:$0xff]   ;;  %v458_v37 = vld [vmem:[%s613_s1 + $0x104] ss:$16 sps:$4 sm:$0xff]  }
   0xd   :  { %334 = vperm.xlu0 %409, %v331_v30   ;;  %406 = vmatprep.mubr.msk.bf16.mxu0 %vm245_vm0, %v63_v33  ;;  %v456_v35 = vld [vmem:[%s613_s1 + $0xe0] ss:$16 sps:$4 sm:$0xff]   ;;  %v460_v38 = vld [vmem:[%s613_s1 + $0x10c] ss:$16 sps:$4 sm:$0xff]   ;;  %v463_v40 = vld [vmem:[%s613_s1 + $0x108] ss:$16 sps:$4 sm:$0xff]  }
   0xe   :  { %407 = vmatprep.mubr.msk.bf16.mxu1 %vm245_vm0, %v63_v33  ;;  %v462_v39 = vld [vmem:[%s613_s1 + $0x100] ss:$16 sps:$4 sm:$0xff]  }
   0xf   :  { %256 = vmatpush1.bf16.msra.mxu0 %v432_v15  ;;  %297 = vmatpush1.bf16.msra.mxu1 %v433_v16 }
  0x10   :  { %257 = vmatprep.subr.bf16.mxu0 %v434_v17  ;;  %298 = vmatprep.subr.bf16.mxu1 %v436_v18 }
  0x11   :  { %344 = vperm.xlu0 %409, %v341_v34  }
  0x13   :  { %258 = vmatpush1.bf16.msra.mxu0 %v438_v19  ;;  %299 = vmatpush1.bf16.msra.mxu1 %v439_v20 }
  0x14   :  { %259 = vmatprep.subr.bf16.mxu0 %v440_v21  ;;  %300 = vmatprep.subr.bf16.mxu1 %v442_v22 }
  0x17   :  { %260 = vmatpush1.bf16.msra.mxu0 %v444_v23  ;;  %301 = vmatpush1.bf16.msra.mxu1 %v445_v24 }
  0x18   :  { %261 = vmatprep.subr.bf16.mxu0 %v446_v25  ;;  %302 = vmatprep.subr.bf16.mxu1 %v448_v26 }
  0x1b   :  { %262 = vmatpush1.bf16.msra.mxu0 %v450_v27  ;;  %303 = vmatpush1.bf16.msra.mxu1 %v451_v28 }
  0x1c   :  { %263 = vmatprep.subr.bf16.mxu0 %v452_v31  ;;  %304 = vmatprep.subr.bf16.mxu1 %v454_v32 }
  0x1f   :  { %264 = vmatpush1.bf16.msra.mxu0 %v456_v35  ;;  %305 = vmatpush1.bf16.msra.mxu1 %v457_v36 }
  0x20   :  { %265 = vmatprep.subr.bf16.mxu0 %v458_v37  ;;  %306 = vmatprep.subr.bf16.mxu1 %v460_v38 }
  0x23   :  { %266 = vmatpush1.bf16.msra.mxu0 %v462_v39  ;;  %307 = vmatpush1.bf16.msra.mxu1 %v463_v40 }
  0x26   :  { %282 = vmatmul.mubr.bf16.vlgmr.msra.gmra.mrb[0].mxu0 %v369_v29  ;;  %323 = vmatmul.mubr.bf16.vlgmr.msra.gmra.mrb[0].mxu1 %v369_v29 }
  0x8c   :  { %v335_v41 = vpop.permute.xlu0 %334 }
  0x90   :  { %v345_v42 = vpop.permute.xlu0 %344 }
  0xf9   :  { %v283_v43 = vpop.f32.mrb[0].mxu0  ;;  %v324_v44 = vpop.f32.mrb[0].mxu1 }
  0xfa   :  { %v337_v45 = vmul.f32 %v335_v41, %v283_v43  ;;  %v339_v46 = vmul.f32 %v335_v41, %v324_v44  ;;  %v285_v47 = vpop.f32.mrb[1].mxu0  ;;  %v326_v48 = vpop.f32.mrb[1].mxu1 }
  0xfb   :  { %v338_v49 = vmul.f32 %v335_v41, %v285_v47  ;;  %v340_v50 = vmul.f32 %v335_v41, %v326_v48  ;;  %v287_v51 = vpop.f32.mrb[2].mxu0  ;;  %v328_v52 = vpop.f32.mrb[2].mxu1 }
  0xfc   :  { %v347_v53 = vadd.f32 %v345_v42, %v337_v45  ;;  %v349_v54 = vadd.f32 %v345_v42, %v339_v46  ;;  %v288_v55 = vpop.f32.mrb[3].mxu0  ;;  %v329_v56 = vpop.f32.mrb[3].mxu1 }
  0xfd   :  { %v348_v57 = vadd.f32 %v345_v42, %v338_v49  ;;  %v350_v58 = vadd.f32 %v345_v42, %v340_v50 }
  0xfe   :  { %v351_v59 = vmax.f32 %v347_v53, 0.0  ;;  %v353_v60 = vmax.f32 %v349_v54, 0.0 }
  0xff   :  { %v352_v61 = vmax.f32 %v348_v57, 0.0  ;;  %v354_v62 = vmax.f32 %v350_v58, 0.0 }
 0x101   :  { %v359_v63 = vcombine.low %v351_v59, %v352_v61  ;;  %v360_v0 = vcombine.low %v353_v60, %v354_v62 }
 0x103   :  { %363 = vst [vmem:[%s617_s4] sm:$0xff] %v359_v63  ;;  %364 = vst [vmem:[%s617_s4 + $0x8] sm:$0xff] %v360_v0 }

// kernel: decoder_forward.62
= control target key start
LH: loop header
LB: loop body
LE: loop exit
PB: predicated region body
PF: predicated region fallthrough
CT: control target
= control target key end

     0   :  { %vm33_vm0 = vcmask 1045504   ;;  %v117_v1 = vmov 0   ;;  %vm29_vm1 = vcmask 97280   ;;  %s161_s1 = inlined_call_operand.vmem [shape: bf16[12,256], index: 1, kind: input, shape index: {}]   ;;  %s162_s2 = inlined_call_operand.vmem [shape: f32[4,1], index: 2, kind: input, shape index: {}]   ;;  %s163_s0 = inlined_call_operand.vmem [shape: bf16[4,12], index: 0, kind: input, shape index: {}]   ;;  %s164_s3 = inlined_call_operand.vmem [shape: f32[4,1], index: 3, kind: input, shape index: {}]   ;;  %s165_s4 = inlined_call_operand.vmem [shape: f32[4,256], index: 4, kind: output, shape index: {}]  }
   0x1   :  { %v114_v0 = vld [vmem:[%s161_s1 + $0x4] ss:$8 sps:$4 sm:$0x3f]   ;;  %72 = vmatprep.mubr.bf16.mxu0 %v117_v1  ;;  %113 = vset.pattern.permute.xlu0 %v117_v1  ;;  %v116_v2 = vld [vmem:[%s161_s1] ss:$8 sps:$4 sm:$0x3f]  }
   0x2   :  { %110 = vmatprep.subr.msk.bf16.mxu0 %vm33_vm0, %v114_v0  ;;  %v81_v3 = vld [vmem:[%s162_s2] sm:$0xf]  ;;  %v35_v4 = vsel %vm33_vm0, %v116_v2, 0 }
   0x3   :  { %84 = vperm.xlu0 %113, %v81_v3   ;;  %41 = vmatpush1.bf16.msra.mxu0 %v35_v4  ;;  %v18_v5 = vld [vmem:[%s163_s0] sm:$0x3] }
   0x4   :  { %v89_v6 = vld [vmem:[%s164_s3] sm:$0xf] }
   0x6   :  { %111 = vmatmul.mubr.msk.bf16.vlgmr.msra.gmra.mrb[0].mxu0 %vm29_vm1, %v18_v5 }
   0x7   :  { %92 = vperm.xlu0 %113, %v89_v6  }
  0x82   :  { %v85_v7 = vpop.permute.xlu0 %84 }
  0x86   :  { %v93_v11 = vpop.permute.xlu0 %92 }
  0xd9   :  { %v74_v8 = vpop.f32.mrb[0].mxu0 }
  0xda   :  { %v87_v9 = vmul.f32 %v85_v7, %v74_v8  ;;  %v76_v10 = vpop.f32.mrb[1].mxu0 }
  0xdb   :  { %v88_v12 = vmul.f32 %v85_v7, %v76_v10  ;;  %v78_v13 = vpop.f32.mrb[2].mxu0 }
  0xdc   :  { %v95_v14 = vadd.f32 %v93_v11, %v87_v9  ;;  %v79_v15 = vpop.f32.mrb[3].mxu0 }
  0xdd   :  { %v96_v16 = vadd.f32 %v93_v11, %v88_v12 }
  0xde   :  { %v97_v17 = vmax.f32 %v95_v14, 0.0 }
  0xdf   :  { %v98_v18 = vmax.f32 %v96_v16, 0.0 }
  0xe1   :  { %v101_v19 = vcombine.low %v97_v17, %v98_v18 }
  0xe3   :  { %103 = vst [vmem:[%s165_s4] sm:$0xff] %v101_v19 }

// kernel: decoder_forward.63
= control target key start
LH: loop header
LB: loop body
LE: loop exit
PB: predicated region body
PF: predicated region fallthrough
CT: control target
= control target key end

     0   :  { %s1861_s15 = smov 0   ;;  %s1863_s16 = smov 0   ;;  %s2353_s0 = inlined_call_operand.vmem [shape: bf16[4,108], index: 0, kind: input, shape index: {}]   ;;  %s2354_s1 = inlined_call_operand.vmem [shape: bf16[108,4096], index: 1, kind: input, shape index: {}]   ;;  %s2355_s2 = inlined_call_operand.vmem [shape: f32[4,1], index: 2, kind: input, shape index: {}]   ;;  %s2356_s3 = inlined_call_operand.vmem [shape: f32[4,1], index: 3, kind: input, shape index: {}]   ;;  %s2357_s4 = inlined_call_operand.vmem [shape: f32[4,4096], index: 4, kind: output, shape index: {}]  }
   0x1   :  { %s1865_s17 = smov 0  }
   0x2 LB: > { %s1643_s18 = sadd.s32 4294967295, %s1833_s17   ;;  %s1878_s19 = sadd.s32 1, %s1833_s17   ;;  %s1833_s17 = sphi %s1865_s17, %s2360_s17   ;;  %s1829_s16 = sphi %s1863_s16, %s2359_s16   ;;  %s1825_s15 = sphi %s1861_s15, %s2358_s15  }
   0x3   : > { %s39_s20 = ssub.s32 %s1833_s17, %s1878_s19  ;;  %s42_s21 = sadd.s32 1, %s1829_s16 }
   0x4   : > { %p40_p0 = scmp.eq.s32.totalorder %s39_s20, 0  ;;  %p49_p1 = scmp.ne.s32.totalorder %s1829_s16, %s1825_s15 }
   0x5   : > { %p50_p2 = scmp.eq.s32.totalorder %s1833_s17, 0  ;;  %p1646_p4 = scmp.ge.s32.totalorder %s1833_s17, 2 }
   0x6   : > { %s1887_s22 = scalar_select %p40_p0, %s1829_s16, %s42_s21  }
   0x7   : > { %p51_p3 = por %p50_p2, %p49_p1  ;;  %152 = sbr.rel (%p1646_p4) target bundleno = 75 (0x4b), region = 28 }
   0xe   : > { %155 = sbr.rel (!%p51_p3) target bundleno = 75 (0x4b), region = 32  ;;  %s157_s23 = sand.u32 (%p51_p3), 1, %s1829_s16  }
   0xf   : > { %s1782_s24 = sshll.u32 (%p51_p3), %s1833_s17, 6  ;;  %s1783_s25 = smul.u32 (%p51_p3), 896, %s157_s23 }
  0x10   : > { %s1895_s28 = scalar_lea.vmem (%p51_p3), %s2354_s1, %s1782_s24 }
  0x11   : > { %v175_v0 = vld [vmem:[%s1895_s28] sm:$0xff] (%p51_p3)  ;;  %v177_v1 = vld [vmem:[%s1895_s28 + $0x8] sm:$0xff] (%p51_p3)  ;;  %v179_v2 = vld [vmem:[%s1895_s28 + $0x10] sm:$0xff] (%p51_p3)  ;;  %s1903_s29 = scalar_lea.vmem (%p51_p3), [#allocation2], %s1783_s25 }
  0x12   : > { %v181_v3 = vld [vmem:[%s1895_s28 + $0x18] sm:$0xff] (%p51_p3)  ;;  %v183_v4 = vld [vmem:[%s1895_s28 + $0x20] sm:$0xff] (%p51_p3)  ;;  %v185_v5 = vld [vmem:[%s1895_s28 + $0x28] sm:$0xff] (%p51_p3)  ;;  %176 = vst [vmem:[%s1903_s29] sm:$0xff] (%p51_p3), %v175_v0 }
  0x13   : > { %178 = vst [vmem:[%s1903_s29 + $0x8] sm:$0xff] (%p51_p3), %v177_v1  ;;  %180 = vst [vmem:[%s1903_s29 + $0x10] sm:$0xff] (%p51_p3), %v179_v2  ;;  %v187_v6 = vld [vmem:[%s1895_s28 + $0x30] sm:$0xff] (%p51_p3)  ;;  %v189_v7 = vld [vmem:[%s1895_s28 + $0x38] sm:$0xff] (%p51_p3) }
  0x14   : > { %182 = vst [vmem:[%s1903_s29 + $0x18] sm:$0xff] (%p51_p3), %v181_v3  ;;  %184 = vst [vmem:[%s1903_s29 + $0x20] sm:$0xff] (%p51_p3), %v183_v4  ;;  %v191_v8 = vld [vmem:[%s1895_s28 + $0x80] sm:$0xff] (%p51_p3)  ;;  %v193_v9 = vld [vmem:[%s1895_s28 + $0x88] sm:$0xff] (%p51_p3) }
  0x15   : > { %186 = vst [vmem:[%s1903_s29 + $0x28] sm:$0xff] %v185_v5  ;;  %188 = vst [vmem:[%s1903_s29 + $0x30] sm:$0xff] %v187_v6  ;;  %v195_v10 = vld [vmem:[%s1895_s28 + $0x90] sm:$0xff]  ;;  %v197_v11 = vld [vmem:[%s1895_s28 + $0x98] sm:$0xff] }
  0x16   : > { %190 = vst [vmem:[%s1903_s29 + $0x38] sm:$0xff] %v189_v7  ;;  %192 = vst [vmem:[%s1903_s29 + $0x40] sm:$0xff] %v191_v8  ;;  %v199_v12 = vld [vmem:[%s1895_s28 + $0xa0] sm:$0xff]  ;;  %v201_v13 = vld [vmem:[%s1895_s28 + $0xa8] sm:$0xff] }
  0x17   : > { %194 = vst [vmem:[%s1903_s29 + $0x48] sm:$0xff] %v193_v9  ;;  %196 = vst [vmem:[%s1903_s29 + $0x50] sm:$0xff] %v195_v10  ;;  %v203_v14 = vld [vmem:[%s1895_s28 + $0xb0] sm:$0xff]  ;;  %v205_v15 = vld [vmem:[%s1895_s28 + $0xb8] sm:$0xff] }
  0x18   : > { %198 = vst [vmem:[%s1903_s29 + $0x58] sm:$0xff] %v197_v11  ;;  %200 = vst [vmem:[%s1903_s29 + $0x60] sm:$0xff] %v199_v12  ;;  %v207_v16 = vld [vmem:[%s1895_s28 + $0x100] sm:$0xff]  ;;  %v209_v17 = vld [vmem:[%s1895_s28 + $0x108] sm:$0xff] }
  0x19   : > { %202 = vst [vmem:[%s1903_s29 + $0x68] sm:$0xff] %v201_v13  ;;  %204 = vst [vmem:[%s1903_s29 + $0x70] sm:$0xff] %v203_v14  ;;  %v211_v18 = vld [vmem:[%s1895_s28 + $0x110] sm:$0xff]  ;;  %v213_v19 = vld [vmem:[%s1895_s28 + $0x118] sm:$0xff] }
  0x1a   : > { %206 = vst [vmem:[%s1903_s29 + $0x78] sm:$0xff] %v205_v15  ;;  %208 = vst [vmem:[%s1903_s29 + $0x80] sm:$0xff] %v207_v16  ;;  %v215_v20 = vld [vmem:[%s1895_s28 + $0x120] sm:$0xff]  ;;  %v217_v21 = vld [vmem:[%s1895_s28 + $0x128] sm:$0xff] }
  0x1b   : > { %210 = vst [vmem:[%s1903_s29 + $0x88] sm:$0xff] %v209_v17  ;;  %212 = vst [vmem:[%s1903_s29 + $0x90] sm:$0xff] %v211_v18  ;;  %v219_v22 = vld [vmem:[%s1895_s28 + $0x130] sm:$0xff]  ;;  %v221_v23 = vld [vmem:[%s1895_s28 + $0x138] sm:$0xff] }
  0x1c   : > { %214 = vst [vmem:[%s1903_s29 + $0x98] sm:$0xff] %v213_v19  ;;  %216 = vst [vmem:[%s1903_s29 + $0xa0] sm:$0xff] %v215_v20  ;;  %v223_v24 = vld [vmem:[%s1895_s28 + $0x180] sm:$0xff]  ;;  %v225_v25 = vld [vmem:[%s1895_s28 + $0x188] sm:$0xff] }
  0x1d   : > { %218 = vst [vmem:[%s1903_s29 + $0xa8] sm:$0xff] %v217_v21  ;;  %220 = vst [vmem:[%s1903_s29 + $0xb0] sm:$0xff] %v219_v22  ;;  %v227_v26 = vld [vmem:[%s1895_s28 + $0x190] sm:$0xff]  ;;  %v229_v27 = vld [vmem:[%s1895_s28 + $0x198] sm:$0xff] }
  0x1e   : > { %222 = vst [vmem:[%s1903_s29 + $0xb8] sm:$0xff] %v221_v23  ;;  %224 = vst [vmem:[%s1903_s29 + $0xc0] sm:$0xff] %v223_v24  ;;  %v231_v28 = vld [vmem:[%s1895_s28 + $0x1a0] sm:$0xff]  ;;  %v233_v29 = vld [vmem:[%s1895_s28 + $0x1a8] sm:$0xff] }
  0x1f   : > { %226 = vst [vmem:[%s1903_s29 + $0xc8] sm:$0xff] %v225_v25  ;;  %228 = vst [vmem:[%s1903_s29 + $0xd0] sm:$0xff] %v227_v26  ;;  %v235_v30 = vld [vmem:[%s1895_s28 + $0x1b0] sm:$0xff]  ;;  %v237_v31 = vld [vmem:[%s1895_s28 + $0x1b8] sm:$0xff] }
  0x20   : > { %230 = vst [vmem:[%s1903_s29 + $0xd8] sm:$0xff] %v229_v27  ;;  %232 = vst [vmem:[%s1903_s29 + $0xe0] sm:$0xff] %v231_v28  ;;  %v239_v32 = vld [vmem:[%s1895_s28 + $0x200] sm:$0xff]  ;;  %v241_v33 = vld [vmem:[%s1895_s28 + $0x208] sm:$0xff] }
  0x21   : > { %234 = vst [vmem:[%s1903_s29 + $0xe8] sm:$0xff] %v233_v29  ;;  %236 = vst [vmem:[%s1903_s29 + $0xf0] sm:$0xff] %v235_v30  ;;  %v243_v34 = vld [vmem:[%s1895_s28 + $0x210] sm:$0xff]  ;;  %v245_v35 = vld [vmem:[%s1895_s28 + $0x218] sm:$0xff] }
  0x22   : > { %238 = vst [vmem:[%s1903_s29 + $0xf8] sm:$0xff] %v237_v31  ;;  %240 = vst [vmem:[%s1903_s29 + $0x100] sm:$0xff] %v239_v32  ;;  %v247_v36 = vld [vmem:[%s1895_s28 + $0x220] sm:$0xff]  ;;  %v249_v37 = vld [vmem:[%s1895_s28 + $0x228] sm:$0xff] }
  0x23   : > { %242 = vst [vmem:[%s1903_s29 + $0x108] sm:$0xff] %v241_v33  ;;  %244 = vst [vmem:[%s1903_s29 + $0x110] sm:$0xff] %v243_v34  ;;  %v251_v38 = vld [vmem:[%s1895_s28 + $0x230] sm:$0xff]  ;;  %v253_v39 = vld [vmem:[%s1895_s28 + $0x238] sm:$0xff] }
  0x24   : > { %246 = vst [vmem:[%s1903_s29 + $0x118] sm:$0xff] %v245_v35  ;;  %248 = vst [vmem:[%s1903_s29 + $0x120] sm:$0xff] %v247_v36  ;;  %v255_v40 = vld [vmem:[%s1895_s28 + $0x280] sm:$0xff]  ;;  %v257_v41 = vld [vmem:[%s1895_s28 + $0x288] sm:$0xff] }
  0x25   : > { %250 = vst [vmem:[%s1903_s29 + $0x128] sm:$0xff] %v249_v37  ;;  %252 = vst [vmem:[%s1903_s29 + $0x130] sm:$0xff] %v251_v38  ;;  %v259_v42 = vld [vmem:[%s1895_s28 + $0x290] sm:$0xff]  ;;  %v261_v43 = vld [vmem:[%s1895_s28 + $0x298] sm:$0xff] }
  0x26   : > { %254 = vst [vmem:[%s1903_s29 + $0x138] sm:$0xff] %v253_v39  ;;  %256 = vst [vmem:[%s1903_s29 + $0x140] sm:$0xff] %v255_v40  ;;  %v263_v44 = vld [vmem:[%s1895_s28 + $0x2a0] sm:$0xff]  ;;  %v265_v45 = vld [vmem:[%s1895_s28 + $0x2a8] sm:$0xff] }
  0x27   : > { %258 = vst [vmem:[%s1903_s29 + $0x148] sm:$0xff] %v257_v41  ;;  %260 = vst [vmem:[%s1903_s29 + $0x150] sm:$0xff] %v259_v42  ;;  %v267_v46 = vld [vmem:[%s1895_s28 + $0x2b0] sm:$0xff]  ;;  %v269_v47 = vld [vmem:[%s1895_s28 + $0x2b8] sm:$0xff] }
  0x28   : > { %262 = vst [vmem:[%s1903_s29 + $0x158] sm:$0xff] %v261_v43  ;;  %264 = vst [vmem:[%s1903_s29 + $0x160] sm:$0xff] %v263_v44  ;;  %v271_v48 = vld [vmem:[%s1895_s28 + $0x300] sm:$0xff]  ;;  %v273_v49 = vld [vmem:[%s1895_s28 + $0x308] sm:$0xff] }
  0x29   : > { %266 = vst [vmem:[%s1903_s29 + $0x168] sm:$0xff] %v265_v45  ;;  %268 = vst [vmem:[%s1903_s29 + $0x170] sm:$0xff] %v267_v46  ;;  %v275_v50 = vld [vmem:[%s1895_s28 + $0x310] sm:$0xff]  ;;  %v277_v51 = vld [vmem:[%s1895_s28 + $0x318] sm:$0xff] }
  0x2a   : > { %270 = vst [vmem:[%s1903_s29 + $0x178] sm:$0xff] %v269_v47  ;;  %272 = vst [vmem:[%s1903_s29 + $0x180] sm:$0xff] %v271_v48  ;;  %v279_v52 = vld [vmem:[%s1895_s28 + $0x320] sm:$0xff]  ;;  %v281_v53 = vld [vmem:[%s1895_s28 + $0x328] sm:$0xff] }
  0x2b   : > { %274 = vst [vmem:[%s1903_s29 + $0x188] sm:$0xff] %v273_v49  ;;  %276 = vst [vmem:[%s1903_s29 + $0x190] sm:$0xff] %v275_v50  ;;  %v283_v54 = vld [vmem:[%s1895_s28 + $0x330] sm:$0xff]  ;;  %v285_v55 = vld [vmem:[%s1895_s28 + $0x338] sm:$0xff] }
  0x2c   : > { %278 = vst [vmem:[%s1903_s29 + $0x198] sm:$0xff] %v277_v51  ;;  %280 = vst [vmem:[%s1903_s29 + $0x1a0] sm:$0xff] %v279_v52  ;;  %v287_v56 = vld [vmem:[%s1895_s28 + $0x380] sm:$0xff]  ;;  %v289_v57 = vld [vmem:[%s1895_s28 + $0x388] sm:$0xff] }
  0x2d   : > { %282 = vst [vmem:[%s1903_s29 + $0x1a8] sm:$0xff] %v281_v53  ;;  %284 = vst [vmem:[%s1903_s29 + $0x1b0] sm:$0xff] %v283_v54  ;;  %v291_v58 = vld [vmem:[%s1895_s28 + $0x390] sm:$0xff]  ;;  %v293_v59 = vld [vmem:[%s1895_s28 + $0x398] sm:$0xff] }
  0x2e   : > { %286 = vst [vmem:[%s1903_s29 + $0x1b8] sm:$0xff] %v285_v55  ;;  %288 = vst [vmem:[%s1903_s29 + $0x1c0] sm:$0xff] %v287_v56  ;;  %v295_v60 = vld [vmem:[%s1895_s28 + $0x3a0] sm:$0xff]  ;;  %v297_v61 = vld [vmem:[%s1895_s28 + $0x3a8] sm:$0xff] }
  0x2f   : > { %290 = vst [vmem:[%s1903_s29 + $0x1c8] sm:$0xff] %v289_v57  ;;  %292 = vst [vmem:[%s1903_s29 + $0x1d0] sm:$0xff] %v291_v58  ;;  %v299_v62 = vld [vmem:[%s1895_s28 + $0x3b0] sm:$0xff]  ;;  %v301_v63 = vld [vmem:[%s1895_s28 + $0x3b8] sm:$0xff] }
  0x30   : > { %294 = vst [vmem:[%s1903_s29 + $0x1d8] sm:$0xff] %v293_v59  ;;  %296 = vst [vmem:[%s1903_s29 + $0x1e0] sm:$0xff] %v295_v60  ;;  %v303_v0 = vld [vmem:[%s1895_s28 + $0x400] sm:$0xff]  ;;  %v305_v1 = vld [vmem:[%s1895_s28 + $0x408] sm:$0xff] }
  0x31   : > { %298 = vst [vmem:[%s1903_s29 + $0x1e8] sm:$0xff] %v297_v61  ;;  %300 = vst [vmem:[%s1903_s29 + $0x1f0] sm:$0xff] %v299_v62  ;;  %v307_v2 = vld [vmem:[%s1895_s28 + $0x410] sm:$0xff]  ;;  %v309_v3 = vld [vmem:[%s1895_s28 + $0x418] sm:$0xff] }
  0x32   : > { %302 = vst [vmem:[%s1903_s29 + $0x1f8] sm:$0xff] %v301_v63  ;;  %304 = vst [vmem:[%s1903_s29 + $0x200] sm:$0xff] %v303_v0  ;;  %v311_v4 = vld [vmem:[%s1895_s28 + $0x420] sm:$0xff]  ;;  %v313_v5 = vld [vmem:[%s1895_s28 + $0x428] sm:$0xff] }
  0x33   : > { %306 = vst [vmem:[%s1903_s29 + $0x208] sm:$0xff] %v305_v1  ;;  %308 = vst [vmem:[%s1903_s29 + $0x210] sm:$0xff] %v307_v2  ;;  %v315_v6 = vld [vmem:[%s1895_s28 + $0x430] sm:$0xff]  ;;  %v317_v7 = vld [vmem:[%s1895_s28 + $0x438] sm:$0xff] }
  0x34   : > { %310 = vst [vmem:[%s1903_s29 + $0x218] sm:$0xff] %v309_v3  ;;  %312 = vst [vmem:[%s1903_s29 + $0x220] sm:$0xff] %v311_v4  ;;  %v319_v8 = vld [vmem:[%s1895_s28 + $0x480] sm:$0xff]  ;;  %v321_v9 = vld [vmem:[%s1895_s28 + $0x488] sm:$0xff] }
  0x35   : > { %314 = vst [vmem:[%s1903_s29 + $0x228] sm:$0xff] %v313_v5  ;;  %316 = vst [vmem:[%s1903_s29 + $0x230] sm:$0xff] %v315_v6  ;;  %v323_v10 = vld [vmem:[%s1895_s28 + $0x490] sm:$0xff]  ;;  %v325_v11 = vld [vmem:[%s1895_s28 + $0x498] sm:$0xff] }
  0x36   : > { %318 = vst [vmem:[%s1903_s29 + $0x238] sm:$0xff] %v317_v7  ;;  %320 = vst [vmem:[%s1903_s29 + $0x240] sm:$0xff] %v319_v8  ;;  %v327_v12 = vld [vmem:[%s1895_s28 + $0x4a0] sm:$0xff]  ;;  %v329_v13 = vld [vmem:[%s1895_s28 + $0x4a8] sm:$0xff] }
  0x37   : > { %322 = vst [vmem:[%s1903_s29 + $0x248] sm:$0xff] %v321_v9  ;;  %324 = vst [vmem:[%s1903_s29 + $0x250] sm:$0xff] %v323_v10  ;;  %v331_v14 = vld [vmem:[%s1895_s28 + $0x4b0] sm:$0xff]  ;;  %v333_v15 = vld [vmem:[%s1895_s28 + $0x4b8] sm:$0xff] }
  0x38   : > { %326 = vst [vmem:[%s1903_s29 + $0x258] sm:$0xff] %v325_v11  ;;  %328 = vst [vmem:[%s1903_s29 + $0x260] sm:$0xff] %v327_v12  ;;  %v335_v16 = vld [vmem:[%s1895_s28 + $0x500] sm:$0xff]  ;;  %v337_v17 = vld [vmem:[%s1895_s28 + $0x508] sm:$0xff] }
  0x39   : > { %330 = vst [vmem:[%s1903_s29 + $0x268] sm:$0xff] %v329_v13  ;;  %332 = vst [vmem:[%s1903_s29 + $0x270] sm:$0xff] %v331_v14  ;;  %v339_v18 = vld [vmem:[%s1895_s28 + $0x510] sm:$0xff]  ;;  %v341_v19 = vld [vmem:[%s1895_s28 + $0x518] sm:$0xff] }
  0x3a   : > { %334 = vst [vmem:[%s1903_s29 + $0x278] sm:$0xff] %v333_v15  ;;  %336 = vst [vmem:[%s1903_s29 + $0x280] sm:$0xff] %v335_v16  ;;  %v343_v20 = vld [vmem:[%s1895_s28 + $0x520] sm:$0xff]  ;;  %v345_v21 = vld [vmem:[%s1895_s28 + $0x528] sm:$0xff] }
  0x3b   : > { %338 = vst [vmem:[%s1903_s29 + $0x288] sm:$0xff] %v337_v17  ;;  %340 = vst [vmem:[%s1903_s29 + $0x290] sm:$0xff] %v339_v18  ;;  %v347_v22 = vld [vmem:[%s1895_s28 + $0x530] sm:$0xff]  ;;  %v349_v23 = vld [vmem:[%s1895_s28 + $0x538] sm:$0xff] }
  0x3c   : > { %342 = vst [vmem:[%s1903_s29 + $0x298] sm:$0xff] %v341_v19  ;;  %344 = vst [vmem:[%s1903_s29 + $0x2a0] sm:$0xff] %v343_v20  ;;  %v351_v24 = vld [vmem:[%s1895_s28 + $0x580] sm:$0xff]  ;;  %v353_v25 = vld [vmem:[%s1895_s28 + $0x588] sm:$0xff] }
  0x3d   : > { %346 = vst [vmem:[%s1903_s29 + $0x2a8] sm:$0xff] %v345_v21  ;;  %348 = vst [vmem:[%s1903_s29 + $0x2b0] sm:$0xff] %v347_v22  ;;  %v355_v26 = vld [vmem:[%s1895_s28 + $0x590] sm:$0xff]  ;;  %v357_v27 = vld [vmem:[%s1895_s28 + $0x598] sm:$0xff] }
  0x3e   : > { %350 = vst [vmem:[%s1903_s29 + $0x2b8] sm:$0xff] %v349_v23  ;;  %352 = vst [vmem:[%s1903_s29 + $0x2c0] sm:$0xff] %v351_v24  ;;  %v359_v28 = vld [vmem:[%s1895_s28 + $0x5a0] sm:$0xff]  ;;  %v361_v29 = vld [vmem:[%s1895_s28 + $0x5a8] sm:$0xff] }
  0x3f   : > { %354 = vst [vmem:[%s1903_s29 + $0x2c8] sm:$0xff] %v353_v25  ;;  %356 = vst [vmem:[%s1903_s29 + $0x2d0] sm:$0xff] %v355_v26  ;;  %v363_v30 = vld [vmem:[%s1895_s28 + $0x5b0] sm:$0xff]  ;;  %v365_v31 = vld [vmem:[%s1895_s28 + $0x5b8] sm:$0xff] }
  0x40   : > { %358 = vst [vmem:[%s1903_s29 + $0x2d8] sm:$0xff] %v357_v27  ;;  %360 = vst [vmem:[%s1903_s29 + $0x2e0] sm:$0xff] %v359_v28  ;;  %v367_v32 = vld [vmem:[%s1895_s28 + $0x600] sm:$0xff]  ;;  %v369_v33 = vld [vmem:[%s1895_s28 + $0x608] sm:$0xff] }
  0x41   : > { %362 = vst [vmem:[%s1903_s29 + $0x2e8] sm:$0xff] %v361_v29  ;;  %364 = vst [vmem:[%s1903_s29 + $0x2f0] sm:$0xff] %v363_v30  ;;  %v371_v34 = vld [vmem:[%s1895_s28 + $0x610] sm:$0xff]  ;;  %v373_v35 = vld [vmem:[%s1895_s28 + $0x618] sm:$0xff] }
  0x42   : > { %366 = vst [vmem:[%s1903_s29 + $0x2f8] sm:$0xff] %v365_v31  ;;  %368 = vst [vmem:[%s1903_s29 + $0x300] sm:$0xff] %v367_v32  ;;  %v375_v36 = vld [vmem:[%s1895_s28 + $0x620] sm:$0xff]  ;;  %v377_v37 = vld [vmem:[%s1895_s28 + $0x628] sm:$0xff] }
  0x43   : > { %370 = vst [vmem:[%s1903_s29 + $0x308] sm:$0xff] %v369_v33  ;;  %372 = vst [vmem:[%s1903_s29 + $0x310] sm:$0xff] %v371_v34  ;;  %v379_v38 = vld [vmem:[%s1895_s28 + $0x630] sm:$0xff]  ;;  %v381_v39 = vld [vmem:[%s1895_s28 + $0x638] sm:$0xff] }
  0x44   : > { %374 = vst [vmem:[%s1903_s29 + $0x318] sm:$0xff] %v373_v35  ;;  %376 = vst [vmem:[%s1903_s29 + $0x320] sm:$0xff] %v375_v36  ;;  %v383_v40 = vld [vmem:[%s1895_s28 + $0x680] sm:$0xff]  ;;  %v385_v41 = vld [vmem:[%s1895_s28 + $0x688] sm:$0xff] }
  0x45   : > { %378 = vst [vmem:[%s1903_s29 + $0x328] sm:$0xff] %v377_v37  ;;  %380 = vst [vmem:[%s1903_s29 + $0x330] sm:$0xff] %v379_v38  ;;  %v387_v42 = vld [vmem:[%s1895_s28 + $0x690] sm:$0xff]  ;;  %v389_v43 = vld [vmem:[%s1895_s28 + $0x698] sm:$0xff] }
  0x46   : > { %382 = vst [vmem:[%s1903_s29 + $0x338] sm:$0xff] %v381_v39  ;;  %384 = vst [vmem:[%s1903_s29 + $0x340] sm:$0xff] %v383_v40  ;;  %v391_v44 = vld [vmem:[%s1895_s28 + $0x6a0] sm:$0xff]  ;;  %v393_v45 = vld [vmem:[%s1895_s28 + $0x6a8] sm:$0xff] }
  0x47   : > { %386 = vst [vmem:[%s1903_s29 + $0x348] sm:$0xff] %v385_v41  ;;  %388 = vst [vmem:[%s1903_s29 + $0x350] sm:$0xff] %v387_v42  ;;  %v395_v46 = vld [vmem:[%s1895_s28 + $0x6b0] sm:$0xff]  ;;  %v397_v47 = vld [vmem:[%s1895_s28 + $0x6b8] sm:$0xff] }
  0x48   : > { %390 = vst [vmem:[%s1903_s29 + $0x358] sm:$0xff] %v389_v43  ;;  %392 = vst [vmem:[%s1903_s29 + $0x360] sm:$0xff] %v391_v44 }
  0x49   : > { %394 = vst [vmem:[%s1903_s29 + $0x368] sm:$0xff] %v393_v45  ;;  %396 = vst [vmem:[%s1903_s29 + $0x370] sm:$0xff] %v395_v46 }
  0x4a   : > { %398 = vst [vmem:[%s1903_s29 + $0x378] sm:$0xff] %v397_v47 }
  0x4b PF: > { %p1649_p5 = scmp.ge.s32.totalorder %s1833_s17, 1  ;;  %p403_p6 = scmp.lt.s32.totalorder %s1833_s17, 3 }
  0x4d   : > { %p404_p7 = pnand %p1649_p5, %p403_p6 }
  0x4e   : > { %s410_s30 = sand.u32 (!%p404_p7), 1, %s1825_s15   ;;  %v1835_v48 = vmov (!%p404_p7), 0   ;;  %v1481_v49 = vld [vmem:[%s2355_s2] sm:$0xf] (!%p404_p7)  ;;  %vm1104_vm0 = vcmask (!%p404_p7), 1045504   ;;  %vm1100_vm1 = vcmask (!%p404_p7), 883712  }
  0x4f   : > { %407 = sbr.rel (%p404_p7) target bundleno = 421 (0x1a5), region = 55  ;;  %1185 = vmatprep.mubr.bf16.mxu0 (!%p404_p7), %v1835_v48  ;;  %1226 = vmatprep.mubr.bf16.mxu1 (!%p404_p7), %v1835_v48  ;;  %v1503_v50 = vld [vmem:[%s2356_s3] sm:$0xf] (!%p404_p7)  ;;  %s1650_s13 = sshll.u32 (!%p404_p7), %s1643_s18, 4 }
  0x50   : > { %s1784_s5 = smul.u32 (!%p404_p7), 896, %s410_s30  ;;  %1810 = vset.pattern.permute.xlu0 (!%p404_p7), %v1835_v48  ;;  %p437_p8 = scmp.lt.s32.totalorder (!%p404_p7), %s1650_s13, 31 }
  0x51   : > { %1484 = vperm.xlu0 (!%p404_p7), %1810, %v1481_v49  }
  0x52   : > { %s2135_s10 = scalar_lea.vmem (!%p404_p7), [#allocation2], %s1784_s5 }
  0x53   : > { %v444_v51 = vld [vmem:[%s2135_s10] sm:$0xff] (!%p404_p7)  ;;  %v445_v53 = vld [vmem:[%s2135_s10 + $0x8] sm:$0xff] (!%p404_p7)  ;;  %v446_v43 = vld [vmem:[%s2135_s10 + $0x10] sm:$0xff] (!%p404_p7) }
  0x54   : > { %v452_v52 = vld [vmem:[%s2135_s10 + $0x40] sm:$0xff] (!%p404_p7)  ;;  %v453_v55 = vld [vmem:[%s2135_s10 + $0x48] sm:$0xff] (!%p404_p7)  ;;  %v454_v44 = vld [vmem:[%s2135_s10 + $0x50] sm:$0xff] (!%p404_p7) }
  0x55   : > { %v1653_v54 = vcombine.high (!%p404_p7), %v444_v51, %v452_v52  ;;  %v1652_v56 = vcombine.low (!%p404_p7), %v444_v51, %v452_v52  ;;  %v460_v57 = vld [vmem:[%s2135_s10 + $0x80] sm:$0xff] (!%p404_p7)  ;;  %v1655_v59 = vcombine.high (!%p404_p7), %v445_v53, %v453_v55  ;;  %v1654_v60 = vcombine.low (!%p404_p7), %v445_v53, %v453_v55  ;;  %v461_v62 = vld [vmem:[%s2135_s10 + $0x88] sm:$0xff] (!%p404_p7)  ;;  %1506 = vperm.xlu0 (!%p404_p7), %1810, %v1503_v50   ;;  %v447_v45 = vld [vmem:[%s2135_s10 + $0x18] sm:$0xff] (!%p404_p7) }
  0x56   : > { %v468_v58 = vld [vmem:[%s2135_s10 + $0xc0] sm:$0xff]  ;;  %v469_v63 = vld [vmem:[%s2135_s10 + $0xc8] sm:$0xff]  ;;  %v455_v46 = vld [vmem:[%s2135_s10 + $0x58] sm:$0xff]  ;;  %v1657_v49 = vcombine.high %v446_v43, %v454_v44  ;;  %s2362_s13 = smov (!%p437_p8, %s1650_s13), 31 }
  0x57   : > { %v1669_v61 = vcombine.high %v460_v57, %v468_v58  ;;  %v476_v0 = vld [vmem:[%s2135_s10 + $0x100] sm:$0xff]  ;;  %1153 = vmatprep.subr.bf16.mxu0 %v1653_v54  ;;  %v1671_v1 = vcombine.high %v461_v62, %v469_v63  ;;  %v477_v3 = vld [vmem:[%s2135_s10 + $0x108] sm:$0xff]  ;;  %1194 = vmatprep.subr.bf16.mxu1 %v1655_v59  ;;  %v1668_v5 = vcombine.low %v460_v57, %v468_v58  ;;  %v462_v52 = vld [vmem:[%s2135_s10 + $0x90] sm:$0xff]  ;;  %s1651_s14 = sshll.u32 %s2362_s13, 2 }
  0x58   : > { %v484_v2 = vld [vmem:[%s2135_s10 + $0x140] sm:$0xff]  ;;  %v485_v4 = vld [vmem:[%s2135_s10 + $0x148] sm:$0xff]  ;;  %1154 = vmatpush1.bf16.msra.mxu0 %v1652_v56  ;;  %1195 = vmatpush1.bf16.msra.mxu1 %v1654_v60  ;;  %v1670_v6 = vcombine.low %v461_v62, %v469_v63  ;;  %v1659_v51 = vcombine.high %v447_v45, %v455_v46  ;;  %v470_v53 = vld [vmem:[%s2135_s10 + $0xd0] sm:$0xff]  ;;  %v1656_v57 = vcombine.low %v446_v43, %v454_v44  ;;  %s2309_s18 = scalar_lea.vmem %s2357_s4, %s1651_s14 }
  0x59   : > { %1155 = vmatprep.subr.bf16.mxu0 %v1669_v61  ;;  %v1685_v7 = vcombine.high %v476_v0, %v484_v2  ;;  %1196 = vmatprep.subr.bf16.mxu1 %v1671_v1  ;;  %v1687_v8 = vcombine.high %v477_v3, %v485_v4  ;;  %v492_v9 = vld [vmem:[%s2135_s10 + $0x180] sm:$0xff]  ;;  %v493_v11 = vld [vmem:[%s2135_s10 + $0x188] sm:$0xff]  ;;  %v1684_v13 = vcombine.low %v476_v0, %v484_v2  ;;  %v463_v54 = vld [vmem:[%s2135_s10 + $0x98] sm:$0xff] }
  0x5a   : > { %v500_v10 = vld [vmem:[%s2135_s10 + $0x1c0] sm:$0xff]  ;;  %v501_v12 = vld [vmem:[%s2135_s10 + $0x1c8] sm:$0xff]  ;;  %v1686_v14 = vcombine.low %v477_v3, %v485_v4  ;;  %v471_v55 = vld [vmem:[%s2135_s10 + $0xd8] sm:$0xff]  ;;  %v1658_v58 = vcombine.low %v447_v45, %v455_v46  ;;  %v1673_v59 = vcombine.high %v462_v52, %v470_v53  ;;  %v1672_v1 = vcombine.low %v462_v52, %v470_v53 }
  0x5b   : > { %v1701_v15 = vcombine.high %v492_v9, %v500_v10  ;;  %v1703_v16 = vcombine.high %v493_v11, %v501_v12  ;;  %v508_v17 = vld [vmem:[%s2135_s10 + $0x200] sm:$0xff]  ;;  %v509_v19 = vld [vmem:[%s2135_s10 + $0x208] sm:$0xff]  ;;  %v1700_v21 = vcombine.low %v492_v9, %v500_v10  ;;  %v1702_v22 = vcombine.low %v493_v11, %v501_v12  ;;  %v478_v61 = vld [vmem:[%s2135_s10 + $0x110] sm:$0xff] }
  0x5c   : > { %1156 = vmatpush1.bf16.msra.mxu0 %v1668_v5  ;;  %1197 = vmatpush1.bf16.msra.mxu1 %v1670_v6  ;;  %v516_v18 = vld [vmem:[%s2135_s10 + $0x240] sm:$0xff]  ;;  %v517_v20 = vld [vmem:[%s2135_s10 + $0x248] sm:$0xff]  ;;  %v1675_v60 = vcombine.high %v463_v54, %v471_v55  ;;  %v486_v62 = vld [vmem:[%s2135_s10 + $0x150] sm:$0xff]  ;;  %v1674_v2 = vcombine.low %v463_v54, %v471_v55 }
  0x5d   : > { %1157 = vmatprep.subr.bf16.mxu0 %v1685_v7  ;;  %1198 = vmatprep.subr.bf16.mxu1 %v1687_v8  ;;  %v1717_v23 = vcombine.high %v508_v17, %v516_v18  ;;  %v1719_v24 = vcombine.high %v509_v19, %v517_v20  ;;  %v524_v25 = vld [vmem:[%s2135_s10 + $0x280] sm:$0xff]  ;;  %v525_v27 = vld [vmem:[%s2135_s10 + $0x288] sm:$0xff]  ;;  %v1716_v29 = vcombine.low %v508_v17, %v516_v18  ;;  %v479_v63 = vld [vmem:[%s2135_s10 + $0x118] sm:$0xff] }
  0x5e   : > { %v532_v26 = vld [vmem:[%s2135_s10 + $0x2c0] sm:$0xff]  ;;  %v533_v28 = vld [vmem:[%s2135_s10 + $0x2c8] sm:$0xff]  ;;  %v1718_v30 = vcombine.low %v509_v19, %v517_v20  ;;  %v487_v0 = vld [vmem:[%s2135_s10 + $0x158] sm:$0xff]  ;;  %v1689_v3 = vcombine.high %v478_v61, %v486_v62  ;;  %v1688_v9 = vcombine.low %v478_v61, %v486_v62 }
  0x5f   : > { %v1733_v31 = vcombine.high %v524_v25, %v532_v26  ;;  %v1735_v32 = vcombine.high %v525_v27, %v533_v28  ;;  %v540_v33 = vld [vmem:[%s2135_s10 + $0x300] sm:$0xff]  ;;  %v541_v35 = vld [vmem:[%s2135_s10 + $0x308] sm:$0xff]  ;;  %v1732_v37 = vcombine.low %v524_v25, %v532_v26  ;;  %v1734_v38 = vcombine.low %v525_v27, %v533_v28  ;;  %v494_v5 = vld [vmem:[%s2135_s10 + $0x190] sm:$0xff] }
  0x60   : > { %1158 = vmatpush1.bf16.msra.mxu0 %v1684_v13  ;;  %1199 = vmatpush1.bf16.msra.mxu1 %v1686_v14  ;;  %v548_v34 = vld [vmem:[%s2135_s10 + $0x340] sm:$0x33]  ;;  %v549_v36 = vld [vmem:[%s2135_s10 + $0x348] sm:$0x33]  ;;  %v1691_v4 = vcombine.high %v479_v63, %v487_v0  ;;  %v502_v6 = vld [vmem:[%s2135_s10 + $0x1d0] sm:$0xff]  ;;  %v1690_v10 = vcombine.low %v479_v63, %v487_v0 }
  0x61   : > { %1159 = vmatprep.subr.bf16.mxu0 %v1701_v15  ;;  %1200 = vmatprep.subr.bf16.mxu1 %v1703_v16  ;;  %v1749_v39 = vcombine.high %v540_v33, %v548_v34  ;;  %v1748_v40 = vcombine.low %v540_v33, %v548_v34  ;;  %v1751_v41 = vcombine.high %v541_v35, %v549_v36  ;;  %v2180_v56 = vld [vmem:[%s2353_s0] sm:$0x3]  ;;  %v495_v7 = vld [vmem:[%s2135_s10 + $0x198] sm:$0xff]  ;;  %v510_v13 = vld [vmem:[%s2135_s10 + $0x210] sm:$0xff] }
  0x62   : > { %v1750_v42 = vcombine.low %v541_v35, %v549_v36  ;;  %v503_v8 = vld [vmem:[%s2135_s10 + $0x1d8] sm:$0xff]  ;;  %v1705_v11 = vcombine.high %v494_v5, %v502_v6  ;;  %v518_v14 = vld [vmem:[%s2135_s10 + $0x250] sm:$0xff]  ;;  %v1704_v17 = vcombine.low %v494_v5, %v502_v6 }
  0x63   : > { %v1106_v47 = vsel %vm1104_vm0, %v1748_v40, 0  ;;  %v1707_v12 = vcombine.high %v495_v7, %v503_v8  ;;  %v511_v15 = vld [vmem:[%s2135_s10 + $0x218] sm:$0xff]  ;;  %v1706_v18 = vcombine.low %v495_v7, %v503_v8  ;;  %v1721_v19 = vcombine.high %v510_v13, %v518_v14  ;;  %v456_v40 = vld [vmem:[%s2135_s10 + $0x60] sm:$0xff] }
  0x64   : > { %1160 = vmatpush1.bf16.msra.mxu0 %v1700_v21  ;;  %1201 = vmatpush1.bf16.msra.mxu1 %v1702_v22  ;;  %v1112_v50 = vsel %vm1104_vm0, %v1750_v42, 0  ;;  %v519_v16 = vld [vmem:[%s2135_s10 + $0x258] sm:$0xff]  ;;  %v526_v21 = vld [vmem:[%s2135_s10 + $0x290] sm:$0xff]  ;;  %v1720_v25 = vcombine.low %v510_v13, %v518_v14  ;;  %v457_v42 = vld [vmem:[%s2135_s10 + $0x68] sm:$0xff] }
  0x65   : > { %1161 = vmatprep.subr.bf16.mxu0 %v1717_v23  ;;  %1202 = vmatprep.subr.bf16.mxu1 %v1719_v24  ;;  %v1723_v20 = vcombine.high %v511_v15, %v519_v16  ;;  %v534_v22 = vld [vmem:[%s2135_s10 + $0x2d0] sm:$0xff]  ;;  %v527_v23 = vld [vmem:[%s2135_s10 + $0x298] sm:$0xff]  ;;  %v1722_v26 = vcombine.low %v511_v15, %v519_v16 }
  0x66   : > { %v535_v24 = vld [vmem:[%s2135_s10 + $0x2d8] sm:$0xff]  ;;  %v1737_v27 = vcombine.high %v526_v21, %v534_v22  ;;  %v1736_v33 = vcombine.low %v526_v21, %v534_v22 }
  0x67   : > { %v1739_v28 = vcombine.high %v527_v23, %v535_v24  ;;  %v1738_v34 = vcombine.low %v527_v23, %v535_v24 }
  0x68   : > { %1162 = vmatpush1.bf16.msra.mxu0 %v1716_v29  ;;  %1203 = vmatpush1.bf16.msra.mxu1 %v1718_v30  ;;  %v542_v29 = vld [vmem:[%s2135_s10 + $0x310] sm:$0xff] }
  0x69   : > { %1163 = vmatprep.subr.bf16.mxu0 %v1733_v31  ;;  %1204 = vmatprep.subr.bf16.mxu1 %v1735_v32  ;;  %v550_v30 = vld [vmem:[%s2135_s10 + $0x350] sm:$0x33]  ;;  %v543_v31 = vld [vmem:[%s2135_s10 + $0x318] sm:$0xff] }
  0x6a   : > { %v551_v32 = vld [vmem:[%s2135_s10 + $0x358] sm:$0x33]  ;;  %v1753_v35 = vcombine.high %v542_v29, %v550_v30  ;;  %v1752_v36 = vcombine.low %v542_v29, %v550_v30 }
  0x6c   : > { %1164 = vmatpush1.bf16.msra.mxu0 %v1732_v37  ;;  %1205 = vmatpush1.bf16.msra.mxu1 %v1734_v38  ;;  %v1755_v37 = vcombine.high %v543_v31, %v551_v32  ;;  %v1754_v38 = vcombine.low %v543_v31, %v551_v32  ;;  %v1118_v43 = vsel %vm1104_vm0, %v1752_v36, 0  ;;  %v458_v36 = vld [vmem:[%s2135_s10 + $0x70] sm:$0xff] }
  0x6d   : > { %1764 = vmatprep.subr.msk.bf16.mxu0 %vm1104_vm0, %v1749_v39  ;;  %1766 = vmatprep.subr.msk.bf16.mxu1 %vm1104_vm0, %v1751_v41  ;;  %v448_v39 = vld [vmem:[%s2135_s10 + $0x20] sm:$0xff]  ;;  %v449_v41 = vld [vmem:[%s2135_s10 + $0x28] sm:$0xff] }
  0x6e   : > { %v1661_v44 = vcombine.high %v448_v39, %v456_v40  ;;  %v1124_v45 = vsel %vm1104_vm0, %v1754_v38, 0  ;;  %v1663_v46 = vcombine.high %v449_v41, %v457_v42  ;;  %v1660_v52 = vcombine.low %v448_v39, %v456_v40  ;;  %v459_v38 = vld [vmem:[%s2135_s10 + $0x78] sm:$0xff] }
  0x6f   : > { %v1662_v53 = vcombine.low %v449_v41, %v457_v42 }
  0x70   : > { %1166 = vmatpush1.bf16.msra.mxu0 %v1106_v47  ;;  %1207 = vmatpush1.bf16.msra.mxu1 %v1112_v50  ;;  %v464_v47 = vld [vmem:[%s2135_s10 + $0xa0] sm:$0xff]  ;;  %v465_v50 = vld [vmem:[%s2135_s10 + $0xa8] sm:$0xff] }
  0x71   : > { %1235 = vmatprep.subr.bf16.mxu0 %v1657_v49  ;;  %1276 = vmatprep.subr.bf16.mxu1 %v1659_v51  ;;  %v472_v49 = vld [vmem:[%s2135_s10 + $0xe0] sm:$0xff]  ;;  %v473_v51 = vld [vmem:[%s2135_s10 + $0xe8] sm:$0xff] }
  0x72   : > { %v1677_v54 = vcombine.high %v464_v47, %v472_v49  ;;  %v1679_v55 = vcombine.high %v465_v50, %v473_v51  ;;  %v1676_v61 = vcombine.low %v464_v47, %v472_v49  ;;  %v1678_v62 = vcombine.low %v465_v50, %v473_v51 }
  0x73   : > { %1765 = vmatmul.mubr.msk.bf16.vlgmr.msra.gmra.mrb[0].mxu0 %vm1100_vm1, %v2180_v56  ;;  %1767 = vmatmul.mubr.msk.bf16.vlgmr.msra.gmra.mrb[0].mxu1 %vm1100_vm1, %v2180_v56 }
  0x74   : > { %1236 = vmatpush1.bf16.msra.mxu0 %v1656_v57  ;;  %1277 = vmatpush1.bf16.msra.mxu1 %v1658_v58  ;;  %v480_v57 = vld [vmem:[%s2135_s10 + $0x120] sm:$0xff] }
  0x75   : > { %1237 = vmatprep.subr.bf16.mxu0 %v1673_v59  ;;  %1278 = vmatprep.subr.bf16.mxu1 %v1675_v60  ;;  %v488_v58 = vld [vmem:[%s2135_s10 + $0x160] sm:$0xff]  ;;  %v481_v59 = vld [vmem:[%s2135_s10 + $0x128] sm:$0xff] }
  0x76   : > { %1267 = vmatprep.mubr.bf16.mxu0 %v1835_v48  ;;  %1308 = vmatprep.mubr.bf16.mxu1 %v1835_v48  ;;  %v489_v60 = vld [vmem:[%s2135_s10 + $0x168] sm:$0xff]  ;;  %v1693_v63 = vcombine.high %v480_v57, %v488_v58  ;;  %v1692_v5 = vcombine.low %v480_v57, %v488_v58 }
  0x77   : > { %v1695_v0 = vcombine.high %v481_v59, %v489_v60  ;;  %v1694_v6 = vcombine.low %v481_v59, %v489_v60 }
  0x78   : > { %1238 = vmatpush1.bf16.msra.mxu0 %v1672_v1  ;;  %1279 = vmatpush1.bf16.msra.mxu1 %v1674_v2  ;;  %v496_v1 = vld [vmem:[%s2135_s10 + $0x1a0] sm:$0xff] }
  0x79   : > { %1239 = vmatprep.subr.bf16.mxu0 %v1689_v3  ;;  %1280 = vmatprep.subr.bf16.mxu1 %v1691_v4  ;;  %v504_v2 = vld [vmem:[%s2135_s10 + $0x1e0] sm:$0xff]  ;;  %v497_v3 = vld [vmem:[%s2135_s10 + $0x1a8] sm:$0xff] }
  0x7a   : > { %v505_v4 = vld [vmem:[%s2135_s10 + $0x1e8] sm:$0xff]  ;;  %v1709_v7 = vcombine.high %v496_v1, %v504_v2  ;;  %v1708_v13 = vcombine.low %v496_v1, %v504_v2 }
  0x7b   : > { %v1711_v8 = vcombine.high %v497_v3, %v505_v4  ;;  %v1710_v14 = vcombine.low %v497_v3, %v505_v4 }
  0x7c   : > { %1240 = vmatpush1.bf16.msra.mxu0 %v1688_v9  ;;  %1281 = vmatpush1.bf16.msra.mxu1 %v1690_v10  ;;  %v512_v9 = vld [vmem:[%s2135_s10 + $0x220] sm:$0xff] }
  0x7d   : > { %1241 = vmatprep.subr.bf16.mxu0 %v1705_v11  ;;  %1282 = vmatprep.subr.bf16.mxu1 %v1707_v12  ;;  %v520_v10 = vld [vmem:[%s2135_s10 + $0x260] sm:$0xff]  ;;  %v513_v11 = vld [vmem:[%s2135_s10 + $0x228] sm:$0xff] }
  0x7e   : > { %v521_v12 = vld [vmem:[%s2135_s10 + $0x268] sm:$0xff]  ;;  %v1725_v15 = vcombine.high %v512_v9, %v520_v10  ;;  %v1724_v21 = vcombine.low %v512_v9, %v520_v10 }
  0x7f   : > { %v1727_v16 = vcombine.high %v513_v11, %v521_v12  ;;  %v1726_v22 = vcombine.low %v513_v11, %v521_v12  ;;  %v530_v12 = vld [vmem:[%s2135_s10 + $0x2b0] sm:$0xff] }
  0x80   : > { %1242 = vmatpush1.bf16.msra.mxu0 %v1704_v17  ;;  %1283 = vmatpush1.bf16.msra.mxu1 %v1706_v18  ;;  %v528_v17 = vld [vmem:[%s2135_s10 + $0x2a0] sm:$0xff] }
  0x81   : > { %1243 = vmatprep.subr.bf16.mxu0 %v1721_v19  ;;  %1284 = vmatprep.subr.bf16.mxu1 %v1723_v20  ;;  %v536_v18 = vld [vmem:[%s2135_s10 + $0x2e0] sm:$0xff]  ;;  %v529_v19 = vld [vmem:[%s2135_s10 + $0x2a8] sm:$0xff] }
  0x82   : > { %v537_v20 = vld [vmem:[%s2135_s10 + $0x2e8] sm:$0xff]  ;;  %v1741_v23 = vcombine.high %v528_v17, %v536_v18  ;;  %v1740_v29 = vcombine.low %v528_v17, %v536_v18 }
  0x83   : > { %v1743_v24 = vcombine.high %v529_v19, %v537_v20  ;;  %v1742_v30 = vcombine.low %v529_v19, %v537_v20  ;;  %v546_v20 = vld [vmem:[%s2135_s10 + $0x330] sm:$0xff] }
  0x84   : > { %1244 = vmatpush1.bf16.msra.mxu0 %v1720_v25  ;;  %1285 = vmatpush1.bf16.msra.mxu1 %v1722_v26  ;;  %v544_v25 = vld [vmem:[%s2135_s10 + $0x320] sm:$0xff] }
  0x85   : > { %1245 = vmatprep.subr.bf16.mxu0 %v1737_v27  ;;  %1286 = vmatprep.subr.bf16.mxu1 %v1739_v28  ;;  %v552_v26 = vld [vmem:[%s2135_s10 + $0x360] sm:$0x33]  ;;  %v545_v27 = vld [vmem:[%s2135_s10 + $0x328] sm:$0xff] }
  0x86   : > { %v553_v28 = vld [vmem:[%s2135_s10 + $0x368] sm:$0x33]  ;;  %v1757_v31 = vcombine.high %v544_v25, %v552_v26  ;;  %v1756_v32 = vcombine.low %v544_v25, %v552_v26 }
  0x88   : > { %1246 = vmatpush1.bf16.msra.mxu0 %v1736_v33  ;;  %1287 = vmatpush1.bf16.msra.mxu1 %v1738_v34  ;;  %v1759_v33 = vcombine.high %v545_v27, %v553_v28  ;;  %v1758_v34 = vcombine.low %v545_v27, %v553_v28  ;;  %v1130_v39 = vsel %vm1104_vm0, %v1756_v32, 0 }
  0x89   : > { %1768 = vmatprep.subr.msk.bf16.mxu0 %vm1104_vm0, %v1753_v35  ;;  %1770 = vmatprep.subr.msk.bf16.mxu1 %vm1104_vm0, %v1755_v37  ;;  %v450_v35 = vld [vmem:[%s2135_s10 + $0x30] sm:$0xff]  ;;  %v451_v37 = vld [vmem:[%s2135_s10 + $0x38] sm:$0xff] }
  0x8a   : > { %v1665_v40 = vcombine.high %v450_v35, %v458_v36  ;;  %v1136_v41 = vsel %vm1104_vm0, %v1758_v34, 0  ;;  %v1667_v42 = vcombine.high %v451_v37, %v459_v38  ;;  %v1664_v47 = vcombine.low %v450_v35, %v458_v36 }
  0x8b   : > { %v1666_v49 = vcombine.low %v451_v37, %v459_v38 }
  0x8c   : > { %1248 = vmatpush1.bf16.msra.mxu0 %v1118_v43  ;;  %1289 = vmatpush1.bf16.msra.mxu1 %v1124_v45  ;;  %v466_v43 = vld [vmem:[%s2135_s10 + $0xb0] sm:$0xff]  ;;  %v467_v45 = vld [vmem:[%s2135_s10 + $0xb8] sm:$0xff] }
  0x8d   : > { %1317 = vmatprep.subr.bf16.mxu0 %v1661_v44  ;;  %1358 = vmatprep.subr.bf16.mxu1 %v1663_v46  ;;  %v474_v44 = vld [vmem:[%s2135_s10 + $0xf0] sm:$0xff]  ;;  %v475_v46 = vld [vmem:[%s2135_s10 + $0xf8] sm:$0xff] }
  0x8e   : > { %v1681_v50 = vcombine.high %v466_v43, %v474_v44  ;;  %v1683_v51 = vcombine.high %v467_v45, %v475_v46  ;;  %v1680_v57 = vcombine.low %v466_v43, %v474_v44  ;;  %v1682_v58 = vcombine.low %v467_v45, %v475_v46 }
  0x8f   : > { %1769 = vmatmul.mubr.msk.bf16.vlgmr.msra.gmra.mrb[4].mxu0 %vm1100_vm1, %v2180_v56  ;;  %1771 = vmatmul.mubr.msk.bf16.vlgmr.msra.gmra.mrb[4].mxu1 %vm1100_vm1, %v2180_v56 }
  0x90   : > { %1318 = vmatpush1.bf16.msra.mxu0 %v1660_v52  ;;  %1359 = vmatpush1.bf16.msra.mxu1 %v1662_v53  ;;  %v482_v52 = vld [vmem:[%s2135_s10 + $0x130] sm:$0xff] }
  0x91   : > { %1319 = vmatprep.subr.bf16.mxu0 %v1677_v54  ;;  %1360 = vmatprep.subr.bf16.mxu1 %v1679_v55  ;;  %v490_v53 = vld [vmem:[%s2135_s10 + $0x170] sm:$0xff]  ;;  %v483_v54 = vld [vmem:[%s2135_s10 + $0x138] sm:$0xff] }
  0x92   : > { %1349 = vmatprep.mubr.bf16.mxu0 %v1835_v48  ;;  %1390 = vmatprep.mubr.bf16.mxu1 %v1835_v48  ;;  %v491_v55 = vld [vmem:[%s2135_s10 + $0x178] sm:$0xff]  ;;  %v1697_v59 = vcombine.high %v482_v52, %v490_v53  ;;  %v1696_v1 = vcombine.low %v482_v52, %v490_v53 }
  0x93   : > { %v1699_v60 = vcombine.high %v483_v54, %v491_v55  ;;  %v1698_v2 = vcombine.low %v483_v54, %v491_v55 }
  0x94   : > { %1320 = vmatpush1.bf16.msra.mxu0 %v1676_v61  ;;  %1361 = vmatpush1.bf16.msra.mxu1 %v1678_v62  ;;  %v498_v61 = vld [vmem:[%s2135_s10 + $0x1b0] sm:$0xff] }
  0x95   : > { %1321 = vmatprep.subr.bf16.mxu0 %v1693_v63  ;;  %1362 = vmatprep.subr.bf16.mxu1 %v1695_v0  ;;  %v506_v62 = vld [vmem:[%s2135_s10 + $0x1f0] sm:$0xff]  ;;  %v499_v63 = vld [vmem:[%s2135_s10 + $0x1b8] sm:$0xff] }
  0x96   : > { %v507_v0 = vld [vmem:[%s2135_s10 + $0x1f8] sm:$0xff]  ;;  %v1713_v3 = vcombine.high %v498_v61, %v506_v62  ;;  %v1712_v9 = vcombine.low %v498_v61, %v506_v62 }
  0x97   : > { %v1715_v4 = vcombine.high %v499_v63, %v507_v0 }
  0x98   : > { %1322 = vmatpush1.bf16.msra.mxu0 %v1692_v5  ;;  %1363 = vmatpush1.bf16.msra.mxu1 %v1694_v6  ;;  %v514_v5 = vld [vmem:[%s2135_s10 + $0x230] sm:$0xff] }
  0x99   : > { %1323 = vmatprep.subr.bf16.mxu0 %v1709_v7  ;;  %1364 = vmatprep.subr.bf16.mxu1 %v1711_v8  ;;  %v522_v6 = vld [vmem:[%s2135_s10 + $0x270] sm:$0xff]  ;;  %v515_v7 = vld [vmem:[%s2135_s10 + $0x238] sm:$0xff] }
  0x9a   : > { %v523_v8 = vld [vmem:[%s2135_s10 + $0x278] sm:$0xff]  ;;  %v1729_v10 = vcombine.high %v514_v5, %v522_v6 }
  0x9b   : > { %v1731_v11 = vcombine.high %v515_v7, %v523_v8  ;;  %v1730_v17 = vcombine.low %v515_v7, %v523_v8 }
  0x9c   : > { %1324 = vmatpush1.bf16.msra.mxu0 %v1708_v13  ;;  %1365 = vmatpush1.bf16.msra.mxu1 %v1710_v14  ;;  %v538_v13 = vld [vmem:[%s2135_s10 + $0x2f0] sm:$0xff]  ;;  %v531_v14 = vld [vmem:[%s2135_s10 + $0x2b8] sm:$0xff] }
  0x9d   : > { %1325 = vmatprep.subr.bf16.mxu0 %v1725_v15  ;;  %1366 = vmatprep.subr.bf16.mxu1 %v1727_v16  ;;  %v539_v15 = vld [vmem:[%s2135_s10 + $0x2f8] sm:$0xff]  ;;  %v1728_v16 = vcombine.low %v514_v5, %v522_v6  ;;  %v1745_v18 = vcombine.high %v530_v12, %v538_v13 }
  0x9e   : > { %v1747_v19 = vcombine.high %v531_v14, %v539_v15  ;;  %v1746_v25 = vcombine.low %v531_v14, %v539_v15 }
  0xa0   : > { %1326 = vmatpush1.bf16.msra.mxu0 %v1724_v21  ;;  %1367 = vmatpush1.bf16.msra.mxu1 %v1726_v22  ;;  %v554_v21 = vld [vmem:[%s2135_s10 + $0x370] sm:$0x33]  ;;  %v547_v22 = vld [vmem:[%s2135_s10 + $0x338] sm:$0xff] }
  0xa1   : > { %1327 = vmatprep.subr.bf16.mxu0 %v1741_v23  ;;  %1368 = vmatprep.subr.bf16.mxu1 %v1743_v24  ;;  %v555_v23 = vld [vmem:[%s2135_s10 + $0x378] sm:$0x33]  ;;  %v1744_v24 = vcombine.low %v530_v12, %v538_v13  ;;  %v1761_v26 = vcombine.high %v546_v20, %v554_v21  ;;  %v1760_v27 = vcombine.low %v546_v20, %v554_v21 }
  0xa2   : > { %v1763_v28 = vcombine.high %v547_v22, %v555_v23 }
  0xa4   : > { %1328 = vmatpush1.bf16.msra.mxu0 %v1740_v29  ;;  %1369 = vmatpush1.bf16.msra.mxu1 %v1742_v30  ;;  %v1762_v29 = vcombine.low %v547_v22, %v555_v23  ;;  %v1142_v30 = vsel %vm1104_vm0, %v1760_v27, 0 }
  0xa5   : > { %1772 = vmatprep.subr.msk.bf16.mxu0 %vm1104_vm0, %v1757_v31  ;;  %1774 = vmatprep.subr.msk.bf16.mxu1 %vm1104_vm0, %v1759_v33 }
  0xa6   : > { %v1148_v31 = vsel %vm1104_vm0, %v1762_v29, 0 }
  0xa8   : > { %1330 = vmatpush1.bf16.msra.mxu0 %v1130_v39  ;;  %1371 = vmatpush1.bf16.msra.mxu1 %v1136_v41 }
  0xa9   : > { %1399 = vmatprep.subr.bf16.mxu0 %v1665_v40  ;;  %1440 = vmatprep.subr.bf16.mxu1 %v1667_v42 }
  0xab   : > { %1773 = vmatmul.mubr.msk.bf16.vlgmr.msra.gmra.mrb[8].mxu0 %vm1100_vm1, %v2180_v56  ;;  %1775 = vmatmul.mubr.msk.bf16.vlgmr.msra.gmra.mrb[8].mxu1 %vm1100_vm1, %v2180_v56 }
  0xac   : > { %1400 = vmatpush1.bf16.msra.mxu0 %v1664_v47  ;;  %1441 = vmatpush1.bf16.msra.mxu1 %v1666_v49 }
  0xad   : > { %1401 = vmatprep.subr.bf16.mxu0 %v1681_v50  ;;  %1442 = vmatprep.subr.bf16.mxu1 %v1683_v51 }
  0xae   : > { %1431 = vmatprep.mubr.bf16.mxu0 %v1835_v48  ;;  %1472 = vmatprep.mubr.bf16.mxu1 %v1835_v48  ;;  %v1714_v48 = vcombine.low %v499_v63, %v507_v0 }
  0xb0   : > { %1402 = vmatpush1.bf16.msra.mxu0 %v1680_v57  ;;  %1443 = vmatpush1.bf16.msra.mxu1 %v1682_v58 }
  0xb1   : > { %1403 = vmatprep.subr.bf16.mxu0 %v1697_v59  ;;  %1444 = vmatprep.subr.bf16.mxu1 %v1699_v60 }
  0xb4   : > { %1404 = vmatpush1.bf16.msra.mxu0 %v1696_v1  ;;  %1445 = vmatpush1.bf16.msra.mxu1 %v1698_v2 }
  0xb5   : > { %1405 = vmatprep.subr.bf16.mxu0 %v1713_v3  ;;  %1446 = vmatprep.subr.bf16.mxu1 %v1715_v4 }
  0xb8   : > { %1406 = vmatpush1.bf16.msra.mxu0 %v1712_v9  ;;  %1447 = vmatpush1.bf16.msra.mxu1 %v1714_v48 }
  0xb9   : > { %1407 = vmatprep.subr.bf16.mxu0 %v1729_v10  ;;  %1448 = vmatprep.subr.bf16.mxu1 %v1731_v11 }
  0xbc   : > { %1408 = vmatpush1.bf16.msra.mxu0 %v1728_v16  ;;  %1449 = vmatpush1.bf16.msra.mxu1 %v1730_v17 }
  0xbd   : > { %1409 = vmatprep.subr.bf16.mxu0 %v1745_v18  ;;  %1450 = vmatprep.subr.bf16.mxu1 %v1747_v19 }
  0xc0   : > { %1410 = vmatpush1.bf16.msra.mxu0 %v1744_v24  ;;  %1451 = vmatpush1.bf16.msra.mxu1 %v1746_v25 }
  0xc1   : > { %1776 = vmatprep.subr.msk.bf16.mxu0 %vm1104_vm0, %v1761_v26  ;;  %1778 = vmatprep.subr.msk.bf16.mxu1 %vm1104_vm0, %v1763_v28 }
  0xc4   : > { %1412 = vmatpush1.bf16.msra.mxu0 %v1142_v30  ;;  %1453 = vmatpush1.bf16.msra.mxu1 %v1148_v31 }
  0xc7   : > { %1777 = vmatmul.mubr.msk.bf16.vlgmr.msra.gmra.mrb[12].mxu0 %vm1100_vm1, %v2180_v56  ;;  %1779 = vmatmul.mubr.msk.bf16.vlgmr.msra.gmra.mrb[12].mxu1 %vm1100_vm1, %v2180_v56 }
  0xd0   : > { %v2294_v32 = vpop.permute.xlu0 %1484 }
  0xd4   : > { %v2296_v34 = vpop.permute.xlu0 %1506 }
 0x146   : > { %v1187_v33 = vpop.f32.mrb[0].mxu0  ;;  %v1228_v36 = vpop.f32.mrb[0].mxu1 }
 0x147   : > { %v1487_v35 = vmul.f32 %v2294_v32, %v1187_v33  ;;  %v1189_v37 = vpop.f32.mrb[1].mxu0  ;;  %v1489_v38 = vmul.f32 %v2294_v32, %v1228_v36  ;;  %v1230_v40 = vpop.f32.mrb[1].mxu1 }
 0x148   : > { %v1488_v39 = vmul.f32 %v2294_v32, %v1189_v37  ;;  %v1191_v41 = vpop.f32.mrb[2].mxu0  ;;  %v1490_v56 = vmul.f32 %v2294_v32, %v1230_v40  ;;  %v1232_v42 = vpop.f32.mrb[2].mxu1 }
 0x149   : > { %v1192_v43 = vpop.f32.mrb[3].mxu0  ;;  %v1509_v44 = vadd.f32 %v2296_v34, %v1487_v35  ;;  %v1233_v45 = vpop.f32.mrb[3].mxu1  ;;  %v1511_v47 = vadd.f32 %v2296_v34, %v1489_v38 }
 0x14a   : > { %v1510_v46 = vadd.f32 %v2296_v34, %v1488_v39  ;;  %v1512_v49 = vadd.f32 %v2296_v34, %v1490_v56 }
 0x14b   : > { %v1525_v50 = vmax.f32 %v1509_v44, 0.0  ;;  %v1527_v52 = vmax.f32 %v1511_v47, 0.0 }
 0x14c   : > { %v1526_v51 = vmax.f32 %v1510_v46, 0.0  ;;  %v1528_v53 = vmax.f32 %v1512_v49, 0.0 }
 0x14e   : > { %v1557_v54 = vcombine.low %v1525_v50, %v1526_v51  ;;  %v1558_v55 = vcombine.low %v1527_v52, %v1528_v53 }
 0x150   : > { %1573 = vst [vmem:[%s2309_s18] sm:$0xff] %v1557_v54  ;;  %1574 = vst [vmem:[%s2309_s18 + $0x8] sm:$0xff] %v1558_v55 }
 0x162   : > { %v1269_v57 = vpop.f32.mrb[4].mxu0  ;;  %v1310_v59 = vpop.f32.mrb[4].mxu1 }
 0x163   : > { %v1491_v58 = vmul.f32 %v2294_v32, %v1269_v57  ;;  %v1271_v60 = vpop.f32.mrb[5].mxu0  ;;  %v1493_v61 = vmul.f32 %v2294_v32, %v1310_v59  ;;  %v1312_v63 = vpop.f32.mrb[5].mxu1 }
 0x164   : > { %v1492_v62 = vmul.f32 %v2294_v32, %v1271_v60  ;;  %v1273_v0 = vpop.f32.mrb[6].mxu0  ;;  %v1494_v2 = vmul.f32 %v2294_v32, %v1312_v63  ;;  %v1314_v3 = vpop.f32.mrb[6].mxu1 }
 0x165   : > { %v1513_v1 = vadd.f32 %v2296_v34, %v1491_v58  ;;  %v1274_v4 = vpop.f32.mrb[7].mxu0  ;;  %v1515_v5 = vadd.f32 %v2296_v34, %v1493_v61  ;;  %v1315_v7 = vpop.f32.mrb[7].mxu1 }
 0x166   : > { %v1514_v6 = vadd.f32 %v2296_v34, %v1492_v62  ;;  %v1516_v9 = vadd.f32 %v2296_v34, %v1494_v2 }
 0x167   : > { %v1529_v8 = vmax.f32 %v1513_v1, 0.0  ;;  %v1531_v48 = vmax.f32 %v1515_v5, 0.0 }
 0x168   : > { %v1530_v10 = vmax.f32 %v1514_v6, 0.0  ;;  %v1532_v11 = vmax.f32 %v1516_v9, 0.0 }
 0x16a   : > { %v1559_v12 = vcombine.low %v1529_v8, %v1530_v10  ;;  %v1560_v13 = vcombine.low %v1531_v48, %v1532_v11 }
 0x16c   : > { %1575 = vst [vmem:[%s2309_s18 + $0x10] sm:$0xff] %v1559_v12  ;;  %1576 = vst [vmem:[%s2309_s18 + $0x18] sm:$0xff] %v1560_v13 }
 0x17e   : > { %v1351_v14 = vpop.f32.mrb[8].mxu0  ;;  %v1392_v16 = vpop.f32.mrb[8].mxu1 }
 0x17f   : > { %v1495_v15 = vmul.f32 %v2294_v32, %v1351_v14  ;;  %v1353_v17 = vpop.f32.mrb[9].mxu0  ;;  %v1497_v18 = vmul.f32 %v2294_v32, %v1392_v16  ;;  %v1394_v20 = vpop.f32.mrb[9].mxu1 }
 0x180   : > { %v1496_v19 = vmul.f32 %v2294_v32, %v1353_v17  ;;  %v1355_v21 = vpop.f32.mrb[10].mxu0  ;;  %v1498_v23 = vmul.f32 %v2294_v32, %v1394_v20  ;;  %v1396_v24 = vpop.f32.mrb[10].mxu1 }
 0x181   : > { %v1517_v22 = vadd.f32 %v2296_v34, %v1495_v15  ;;  %v1356_v25 = vpop.f32.mrb[11].mxu0  ;;  %v1519_v26 = vadd.f32 %v2296_v34, %v1497_v18  ;;  %v1397_v28 = vpop.f32.mrb[11].mxu1 }
 0x182   : > { %v1518_v27 = vadd.f32 %v2296_v34, %v1496_v19  ;;  %v1520_v30 = vadd.f32 %v2296_v34, %v1498_v23 }
 0x183   : > { %v1533_v29 = vmax.f32 %v1517_v22, 0.0  ;;  %v1535_v31 = vmax.f32 %v1519_v26, 0.0 }
 0x184   : > { %v1534_v33 = vmax.f32 %v1518_v27, 0.0  ;;  %v1536_v35 = vmax.f32 %v1520_v30, 0.0 }
 0x186   : > { %v1561_v36 = vcombine.low %v1533_v29, %v1534_v33  ;;  %v1562_v37 = vcombine.low %v1535_v31, %v1536_v35 }
 0x188   : > { %1577 = vst [vmem:[%s2309_s18 + $0x20] sm:$0xff] %v1561_v36  ;;  %1578 = vst [vmem:[%s2309_s18 + $0x28] sm:$0xff] %v1562_v37 }
 0x19a   : > { %v1433_v38 = vpop.f32.mrb[12].mxu0  ;;  %v1474_v40 = vpop.f32.mrb[12].mxu1 }
 0x19b   : > { %v1499_v39 = vmul.f32 %v2294_v32, %v1433_v38  ;;  %v1435_v41 = vpop.f32.mrb[13].mxu0  ;;  %v1501_v56 = vmul.f32 %v2294_v32, %v1474_v40  ;;  %v1476_v43 = vpop.f32.mrb[13].mxu1 }
 0x19c   : > { %v1500_v42 = vmul.f32 %v2294_v32, %v1435_v41  ;;  %v1437_v44 = vpop.f32.mrb[14].mxu0  ;;  %v1502_v46 = vmul.f32 %v2294_v32, %v1476_v43  ;;  %v1478_v47 = vpop.f32.mrb[14].mxu1 }
 0x19d   : > { %v1521_v45 = vadd.f32 %v2296_v34, %v1499_v39  ;;  %v1438_v49 = vpop.f32.mrb[15].mxu0  ;;  %v1523_v50 = vadd.f32 %v2296_v34, %v1501_v56  ;;  %v1479_v52 = vpop.f32.mrb[15].mxu1 }
 0x19e   : > { %v1522_v51 = vadd.f32 %v2296_v34, %v1500_v42  ;;  %v1524_v54 = vadd.f32 %v2296_v34, %v1502_v46 }
 0x19f   : > { %v1537_v53 = vmax.f32 %v1521_v45, 0.0  ;;  %v1539_v55 = vmax.f32 %v1523_v50, 0.0 }
 0x1a0   : > { %v1538_v57 = vmax.f32 %v1522_v51, 0.0  ;;  %v1540_v58 = vmax.f32 %v1524_v54, 0.0 }
 0x1a2   : > { %v1563_v59 = vcombine.low %v1537_v53, %v1538_v57  ;;  %v1564_v60 = vcombine.low %v1539_v55, %v1540_v58 }
 0x1a4   : > { %1579 = vst [vmem:[%s2309_s18 + $0x30] sm:$0xff] %v1563_v59  ;;  %1580 = vst [vmem:[%s2309_s18 + $0x38] sm:$0xff] %v1564_v60 }
 0x1a5 PF: > { %p11_p9 = scmp.ge.s32.totalorder %s1878_s19, 4   ;;  %s2358_s15 = smov %s1829_s16 }
 0x1a6   : > { %s2359_s16 = smov %s1887_s22  ;;  %s2360_s17 = smov %s1878_s19 }
 0x1a7   :  { %13 = sbr.rel (!%p11_p9) target bundleno = 2 (0x2), region = 94 }

// kernel: decoder_forward.64
= control target key start
LH: loop header
LB: loop body
LE: loop exit
PB: predicated region body
PF: predicated region fallthrough
CT: control target
= control target key end

     0   :  { %s2437_s15 = smov 0   ;;  %s2439_s16 = smov 0   ;;  %s3033_s0 = inlined_call_operand.vmem [shape: bf16[4,108], index: 0, kind: input, shape index: {}]   ;;  %s3034_s1 = inlined_call_operand.vmem [shape: bf16[108,5120], index: 1, kind: input, shape index: {}]   ;;  %s3035_s2 = inlined_call_operand.vmem [shape: f32[4,1], index: 2, kind: input, shape index: {}]   ;;  %s3036_s3 = inlined_call_operand.vmem [shape: f32[4,1], index: 3, kind: input, shape index: {}]   ;;  %s3037_s4 = inlined_call_operand.vmem [shape: f32[4,5120], index: 4, kind: output, shape index: {}]  }
   0x1   :  { %s2441_s17 = smov 0  }
   0x2 LB: > { %s1979_s18 = sadd.s32 4294967295, %s2409_s17   ;;  %s2454_s19 = sadd.s32 1, %s2409_s17   ;;  %s2409_s17 = sphi %s2441_s17, %s3040_s17   ;;  %s2405_s16 = sphi %s2439_s16, %s3039_s16   ;;  %s2401_s15 = sphi %s2437_s15, %s3038_s15  }
   0x3   : > { %s39_s20 = ssub.s32 %s2409_s17, %s2454_s19  ;;  %s42_s21 = sadd.s32 1, %s2405_s16 }
   0x4   : > { %p40_p0 = scmp.eq.s32.totalorder %s39_s20, 0  ;;  %p49_p1 = scmp.ne.s32.totalorder %s2405_s16, %s2401_s15 }
   0x5   : > { %p50_p2 = scmp.eq.s32.totalorder %s2409_s17, 0  ;;  %p1982_p4 = scmp.ge.s32.totalorder %s2409_s17, 2 }
   0x6   : > { %s2463_s22 = scalar_select %p40_p0, %s2405_s16, %s42_s21  }
   0x7   : > { %p51_p3 = por %p50_p2, %p49_p1  ;;  %152 = sbr.rel (%p1982_p4) target bundleno = 89 (0x59), region = 28 }
   0xe   : > { %155 = sbr.rel (!%p51_p3) target bundleno = 89 (0x59), region = 32  ;;  %s157_s23 = sand.u32 (%p51_p3), 1, %s2405_s16  }
   0xf   : > { %s2148_s24 = smul.u32 (%p51_p3), 80, %s2409_s17 }
  0x10   : > { %s2149_s25 = smul.u32 (%p51_p3), 1120, %s157_s23 }
  0x11   : > { %s2471_s28 = scalar_lea.vmem (%p51_p3), %s3034_s1, %s2148_s24 }
  0x12   : > { %v175_v0 = vld [vmem:[%s2471_s28] sm:$0xff] (%p51_p3)  ;;  %v177_v1 = vld [vmem:[%s2471_s28 + $0x8] sm:$0xff] (%p51_p3)  ;;  %v179_v2 = vld [vmem:[%s2471_s28 + $0x10] sm:$0xff] (%p51_p3)  ;;  %s2476_s29 = scalar_lea.vmem (%p51_p3), [#allocation2], %s2149_s25 }
  0x13   : > { %176 = vst [vmem:[%s2476_s29] sm:$0xff] (%p51_p3), %v175_v0  ;;  %178 = vst [vmem:[%s2476_s29 + $0x8] sm:$0xff] (%p51_p3), %v177_v1  ;;  %v181_v3 = vld [vmem:[%s2471_s28 + $0x18] sm:$0xff] (%p51_p3)  ;;  %v183_v4 = vld [vmem:[%s2471_s28 + $0x20] sm:$0xff] (%p51_p3) }
  0x14   : > { %180 = vst [vmem:[%s2476_s29 + $0x10] sm:$0xff] (%p51_p3), %v179_v2  ;;  %v185_v5 = vld [vmem:[%s2471_s28 + $0x28] sm:$0xff] (%p51_p3)  ;;  %182 = vst [vmem:[%s2476_s29 + $0x18] sm:$0xff] (%p51_p3), %v181_v3  ;;  %v187_v6 = vld [vmem:[%s2471_s28 + $0x30] sm:$0xff] (%p51_p3) }
  0x15   : > { %184 = vst [vmem:[%s2476_s29 + $0x20] sm:$0xff] %v183_v4  ;;  %186 = vst [vmem:[%s2476_s29 + $0x28] sm:$0xff] %v185_v5  ;;  %v189_v7 = vld [vmem:[%s2471_s28 + $0x38] sm:$0xff]  ;;  %v191_v8 = vld [vmem:[%s2471_s28 + $0x40] sm:$0xff] }
  0x16   : > { %188 = vst [vmem:[%s2476_s29 + $0x30] sm:$0xff] %v187_v6  ;;  %190 = vst [vmem:[%s2476_s29 + $0x38] sm:$0xff] %v189_v7  ;;  %v193_v9 = vld [vmem:[%s2471_s28 + $0x48] sm:$0xff]  ;;  %v195_v10 = vld [vmem:[%s2471_s28 + $0xa0] sm:$0xff] }
  0x17   : > { %192 = vst [vmem:[%s2476_s29 + $0x40] sm:$0xff] %v191_v8  ;;  %v197_v11 = vld [vmem:[%s2471_s28 + $0xa8] sm:$0xff]  ;;  %194 = vst [vmem:[%s2476_s29 + $0x48] sm:$0xff] %v193_v9  ;;  %v199_v12 = vld [vmem:[%s2471_s28 + $0xb0] sm:$0xff] }
  0x18   : > { %196 = vst [vmem:[%s2476_s29 + $0x50] sm:$0xff] %v195_v10  ;;  %198 = vst [vmem:[%s2476_s29 + $0x58] sm:$0xff] %v197_v11  ;;  %v201_v13 = vld [vmem:[%s2471_s28 + $0xb8] sm:$0xff]  ;;  %v203_v14 = vld [vmem:[%s2471_s28 + $0xc0] sm:$0xff] }
  0x19   : > { %200 = vst [vmem:[%s2476_s29 + $0x60] sm:$0xff] %v199_v12  ;;  %202 = vst [vmem:[%s2476_s29 + $0x68] sm:$0xff] %v201_v13  ;;  %v205_v15 = vld [vmem:[%s2471_s28 + $0xc8] sm:$0xff]  ;;  %v207_v16 = vld [vmem:[%s2471_s28 + $0xd0] sm:$0xff] }
  0x1a   : > { %204 = vst [vmem:[%s2476_s29 + $0x70] sm:$0xff] %v203_v14  ;;  %v209_v17 = vld [vmem:[%s2471_s28 + $0xd8] sm:$0xff]  ;;  %206 = vst [vmem:[%s2476_s29 + $0x78] sm:$0xff] %v205_v15  ;;  %v211_v18 = vld [vmem:[%s2471_s28 + $0xe0] sm:$0xff] }
  0x1b   : > { %208 = vst [vmem:[%s2476_s29 + $0x80] sm:$0xff] %v207_v16  ;;  %210 = vst [vmem:[%s2476_s29 + $0x88] sm:$0xff] %v209_v17  ;;  %v213_v19 = vld [vmem:[%s2471_s28 + $0xe8] sm:$0xff]  ;;  %v215_v20 = vld [vmem:[%s2471_s28 + $0x140] sm:$0xff] }
  0x1c   : > { %212 = vst [vmem:[%s2476_s29 + $0x90] sm:$0xff] %v211_v18  ;;  %214 = vst [vmem:[%s2476_s29 + $0x98] sm:$0xff] %v213_v19  ;;  %v217_v21 = vld [vmem:[%s2471_s28 + $0x148] sm:$0xff]  ;;  %v219_v22 = vld [vmem:[%s2471_s28 + $0x150] sm:$0xff] }
  0x1d   : > { %216 = vst [vmem:[%s2476_s29 + $0xa0] sm:$0xff] %v215_v20  ;;  %v221_v23 = vld [vmem:[%s2471_s28 + $0x158] sm:$0xff]  ;;  %218 = vst [vmem:[%s2476_s29 + $0xa8] sm:$0xff] %v217_v21  ;;  %v223_v24 = vld [vmem:[%s2471_s28 + $0x160] sm:$0xff] }
  0x1e   : > { %220 = vst [vmem:[%s2476_s29 + $0xb0] sm:$0xff] %v219_v22  ;;  %222 = vst [vmem:[%s2476_s29 + $0xb8] sm:$0xff] %v221_v23  ;;  %v225_v25 = vld [vmem:[%s2471_s28 + $0x168] sm:$0xff]  ;;  %v227_v26 = vld [vmem:[%s2471_s28 + $0x170] sm:$0xff] }
  0x1f   : > { %224 = vst [vmem:[%s2476_s29 + $0xc0] sm:$0xff] %v223_v24  ;;  %226 = vst [vmem:[%s2476_s29 + $0xc8] sm:$0xff] %v225_v25  ;;  %v229_v27 = vld [vmem:[%s2471_s28 + $0x178] sm:$0xff]  ;;  %v231_v28 = vld [vmem:[%s2471_s28 + $0x180] sm:$0xff] }
  0x20   : > { %228 = vst [vmem:[%s2476_s29 + $0xd0] sm:$0xff] %v227_v26  ;;  %v233_v29 = vld [vmem:[%s2471_s28 + $0x188] sm:$0xff]  ;;  %230 = vst [vmem:[%s2476_s29 + $0xd8] sm:$0xff] %v229_v27  ;;  %v235_v30 = vld [vmem:[%s2471_s28 + $0x1e0] sm:$0xff] }
  0x21   : > { %232 = vst [vmem:[%s2476_s29 + $0xe0] sm:$0xff] %v231_v28  ;;  %234 = vst [vmem:[%s2476_s29 + $0xe8] sm:$0xff] %v233_v29  ;;  %v237_v31 = vld [vmem:[%s2471_s28 + $0x1e8] sm:$0xff]  ;;  %v239_v32 = vld [vmem:[%s2471_s28 + $0x1f0] sm:$0xff] }
  0x22   : > { %236 = vst [vmem:[%s2476_s29 + $0xf0] sm:$0xff] %v235_v30  ;;  %238 = vst [vmem:[%s2476_s29 + $0xf8] sm:$0xff] %v237_v31  ;;  %v241_v33 = vld [vmem:[%s2471_s28 + $0x1f8] sm:$0xff]  ;;  %v243_v34 = vld [vmem:[%s2471_s28 + $0x200] sm:$0xff] }
  0x23   : > { %240 = vst [vmem:[%s2476_s29 + $0x100] sm:$0xff] %v239_v32  ;;  %v245_v35 = vld [vmem:[%s2471_s28 + $0x208] sm:$0xff]  ;;  %242 = vst [vmem:[%s2476_s29 + $0x108] sm:$0xff] %v241_v33  ;;  %v247_v36 = vld [vmem:[%s2471_s28 + $0x210] sm:$0xff] }
  0x24   : > { %244 = vst [vmem:[%s2476_s29 + $0x110] sm:$0xff] %v243_v34  ;;  %246 = vst [vmem:[%s2476_s29 + $0x118] sm:$0xff] %v245_v35  ;;  %v249_v37 = vld [vmem:[%s2471_s28 + $0x218] sm:$0xff]  ;;  %v251_v38 = vld [vmem:[%s2471_s28 + $0x220] sm:$0xff] }
  0x25   : > { %248 = vst [vmem:[%s2476_s29 + $0x120] sm:$0xff] %v247_v36  ;;  %250 = vst [vmem:[%s2476_s29 + $0x128] sm:$0xff] %v249_v37  ;;  %v253_v39 = vld [vmem:[%s2471_s28 + $0x228] sm:$0xff]  ;;  %v255_v40 = vld [vmem:[%s2471_s28 + $0x280] sm:$0xff] }
  0x26   : > { %252 = vst [vmem:[%s2476_s29 + $0x130] sm:$0xff] %v251_v38  ;;  %v257_v41 = vld [vmem:[%s2471_s28 + $0x288] sm:$0xff]  ;;  %254 = vst [vmem:[%s2476_s29 + $0x138] sm:$0xff] %v253_v39  ;;  %v259_v42 = vld [vmem:[%s2471_s28 + $0x290] sm:$0xff] }
  0x27   : > { %256 = vst [vmem:[%s2476_s29 + $0x140] sm:$0xff] %v255_v40  ;;  %258 = vst [vmem:[%s2476_s29 + $0x148] sm:$0xff] %v257_v41  ;;  %v261_v43 = vld [vmem:[%s2471_s28 + $0x298] sm:$0xff]  ;;  %v263_v44 = vld [vmem:[%s2471_s28 + $0x2a0] sm:$0xff] }
  0x28   : > { %260 = vst [vmem:[%s2476_s29 + $0x150] sm:$0xff] %v259_v42  ;;  %262 = vst [vmem:[%s2476_s29 + $0x158] sm:$0xff] %v261_v43  ;;  %v265_v45 = vld [vmem:[%s2471_s28 + $0x2a8] sm:$0xff]  ;;  %v267_v46 = vld [vmem:[%s2471_s28 + $0x2b0] sm:$0xff] }
  0x29   : > { %264 = vst [vmem:[%s2476_s29 + $0x160] sm:$0xff] %v263_v44  ;;  %v269_v47 = vld [vmem:[%s2471_s28 + $0x2b8] sm:$0xff]  ;;  %266 = vst [vmem:[%s2476_s29 + $0x168] sm:$0xff] %v265_v45  ;;  %v271_v48 = vld [vmem:[%s2471_s28 + $0x2c0] sm:$0xff] }
  0x2a   : > { %268 = vst [vmem:[%s2476_s29 + $0x170] sm:$0xff] %v267_v46  ;;  %270 = vst [vmem:[%s2476_s29 + $0x178] sm:$0xff] %v269_v47  ;;  %v273_v49 = vld [vmem:[%s2471_s28 + $0x2c8] sm:$0xff]  ;;  %v275_v50 = vld [vmem:[%s2471_s28 + $0x320] sm:$0xff] }
  0x2b   : > { %272 = vst [vmem:[%s2476_s29 + $0x180] sm:$0xff] %v271_v48  ;;  %274 = vst [vmem:[%s2476_s29 + $0x188] sm:$0xff] %v273_v49  ;;  %v277_v51 = vld [vmem:[%s2471_s28 + $0x328] sm:$0xff]  ;;  %v279_v52 = vld [vmem:[%s2471_s28 + $0x330] sm:$0xff] }
  0x2c   : > { %276 = vst [vmem:[%s2476_s29 + $0x190] sm:$0xff] %v275_v50  ;;  %v281_v53 = vld [vmem:[%s2471_s28 + $0x338] sm:$0xff]  ;;  %278 = vst [vmem:[%s2476_s29 + $0x198] sm:$0xff] %v277_v51  ;;  %v283_v54 = vld [vmem:[%s2471_s28 + $0x340] sm:$0xff] }
  0x2d   : > { %280 = vst [vmem:[%s2476_s29 + $0x1a0] sm:$0xff] %v279_v52  ;;  %282 = vst [vmem:[%s2476_s29 + $0x1a8] sm:$0xff] %v281_v53  ;;  %v285_v55 = vld [vmem:[%s2471_s28 + $0x348] sm:$0xff]  ;;  %v287_v56 = vld [vmem:[%s2471_s28 + $0x350] sm:$0xff] }
  0x2e   : > { %284 = vst [vmem:[%s2476_s29 + $0x1b0] sm:$0xff] %v283_v54  ;;  %286 = vst [vmem:[%s2476_s29 + $0x1b8] sm:$0xff] %v285_v55  ;;  %v289_v57 = vld [vmem:[%s2471_s28 + $0x358] sm:$0xff]  ;;  %v291_v58 = vld [vmem:[%s2471_s28 + $0x360] sm:$0xff] }
  0x2f   : > { %288 = vst [vmem:[%s2476_s29 + $0x1c0] sm:$0xff] %v287_v56  ;;  %v293_v59 = vld [vmem:[%s2471_s28 + $0x368] sm:$0xff]  ;;  %290 = vst [vmem:[%s2476_s29 + $0x1c8] sm:$0xff] %v289_v57  ;;  %v295_v60 = vld [vmem:[%s2471_s28 + $0x3c0] sm:$0xff] }
  0x30   : > { %292 = vst [vmem:[%s2476_s29 + $0x1d0] sm:$0xff] %v291_v58  ;;  %294 = vst [vmem:[%s2476_s29 + $0x1d8] sm:$0xff] %v293_v59  ;;  %v297_v61 = vld [vmem:[%s2471_s28 + $0x3c8] sm:$0xff]  ;;  %v299_v62 = vld [vmem:[%s2471_s28 + $0x3d0] sm:$0xff] }
  0x31   : > { %296 = vst [vmem:[%s2476_s29 + $0x1e0] sm:$0xff] %v295_v60  ;;  %298 = vst [vmem:[%s2476_s29 + $0x1e8] sm:$0xff] %v297_v61  ;;  %v301_v63 = vld [vmem:[%s2471_s28 + $0x3d8] sm:$0xff]  ;;  %v303_v0 = vld [vmem:[%s2471_s28 + $0x3e0] sm:$0xff] }
  0x32   : > { %300 = vst [vmem:[%s2476_s29 + $0x1f0] sm:$0xff] %v299_v62  ;;  %v305_v1 = vld [vmem:[%s2471_s28 + $0x3e8] sm:$0xff]  ;;  %302 = vst [vmem:[%s2476_s29 + $0x1f8] sm:$0xff] %v301_v63  ;;  %v307_v2 = vld [vmem:[%s2471_s28 + $0x3f0] sm:$0xff] }
  0x33   : > { %304 = vst [vmem:[%s2476_s29 + $0x200] sm:$0xff] %v303_v0  ;;  %306 = vst [vmem:[%s2476_s29 + $0x208] sm:$0xff] %v305_v1  ;;  %v309_v3 = vld [vmem:[%s2471_s28 + $0x3f8] sm:$0xff]  ;;  %v311_v4 = vld [vmem:[%s2471_s28 + $0x400] sm:$0xff] }
  0x34   : > { %308 = vst [vmem:[%s2476_s29 + $0x210] sm:$0xff] %v307_v2  ;;  %310 = vst [vmem:[%s2476_s29 + $0x218] sm:$0xff] %v309_v3  ;;  %v313_v5 = vld [vmem:[%s2471_s28 + $0x408] sm:$0xff]  ;;  %v315_v6 = vld [vmem:[%s2471_s28 + $0x460] sm:$0xff] }
  0x35   : > { %312 = vst [vmem:[%s2476_s29 + $0x220] sm:$0xff] %v311_v4  ;;  %v317_v7 = vld [vmem:[%s2471_s28 + $0x468] sm:$0xff]  ;;  %314 = vst [vmem:[%s2476_s29 + $0x228] sm:$0xff] %v313_v5  ;;  %v319_v8 = vld [vmem:[%s2471_s28 + $0x470] sm:$0xff] }
  0x36   : > { %316 = vst [vmem:[%s2476_s29 + $0x230] sm:$0xff] %v315_v6  ;;  %318 = vst [vmem:[%s2476_s29 + $0x238] sm:$0xff] %v317_v7  ;;  %v321_v9 = vld [vmem:[%s2471_s28 + $0x478] sm:$0xff]  ;;  %v323_v10 = vld [vmem:[%s2471_s28 + $0x480] sm:$0xff] }
  0x37   : > { %320 = vst [vmem:[%s2476_s29 + $0x240] sm:$0xff] %v319_v8  ;;  %322 = vst [vmem:[%s2476_s29 + $0x248] sm:$0xff] %v321_v9  ;;  %v325_v11 = vld [vmem:[%s2471_s28 + $0x488] sm:$0xff]  ;;  %v327_v12 = vld [vmem:[%s2471_s28 + $0x490] sm:$0xff] }
  0x38   : > { %324 = vst [vmem:[%s2476_s29 + $0x250] sm:$0xff] %v323_v10  ;;  %v329_v13 = vld [vmem:[%s2471_s28 + $0x498] sm:$0xff]  ;;  %326 = vst [vmem:[%s2476_s29 + $0x258] sm:$0xff] %v325_v11  ;;  %v331_v14 = vld [vmem:[%s2471_s28 + $0x4a0] sm:$0xff] }
  0x39   : > { %328 = vst [vmem:[%s2476_s29 + $0x260] sm:$0xff] %v327_v12  ;;  %330 = vst [vmem:[%s2476_s29 + $0x268] sm:$0xff] %v329_v13  ;;  %v333_v15 = vld [vmem:[%s2471_s28 + $0x4a8] sm:$0xff]  ;;  %v335_v16 = vld [vmem:[%s2471_s28 + $0x500] sm:$0xff] }
  0x3a   : > { %332 = vst [vmem:[%s2476_s29 + $0x270] sm:$0xff] %v331_v14  ;;  %334 = vst [vmem:[%s2476_s29 + $0x278] sm:$0xff] %v333_v15  ;;  %v337_v17 = vld [vmem:[%s2471_s28 + $0x508] sm:$0xff]  ;;  %v339_v18 = vld [vmem:[%s2471_s28 + $0x510] sm:$0xff] }
  0x3b   : > { %336 = vst [vmem:[%s2476_s29 + $0x280] sm:$0xff] %v335_v16  ;;  %v341_v19 = vld [vmem:[%s2471_s28 + $0x518] sm:$0xff]  ;;  %338 = vst [vmem:[%s2476_s29 + $0x288] sm:$0xff] %v337_v17  ;;  %v343_v20 = vld [vmem:[%s2471_s28 + $0x520] sm:$0xff] }
  0x3c   : > { %340 = vst [vmem:[%s2476_s29 + $0x290] sm:$0xff] %v339_v18  ;;  %342 = vst [vmem:[%s2476_s29 + $0x298] sm:$0xff] %v341_v19  ;;  %v345_v21 = vld [vmem:[%s2471_s28 + $0x528] sm:$0xff]  ;;  %v347_v22 = vld [vmem:[%s2471_s28 + $0x530] sm:$0xff] }
  0x3d   : > { %344 = vst [vmem:[%s2476_s29 + $0x2a0] sm:$0xff] %v343_v20  ;;  %346 = vst [vmem:[%s2476_s29 + $0x2a8] sm:$0xff] %v345_v21  ;;  %v349_v23 = vld [vmem:[%s2471_s28 + $0x538] sm:$0xff]  ;;  %v351_v24 = vld [vmem:[%s2471_s28 + $0x540] sm:$0xff] }
  0x3e   : > { %348 = vst [vmem:[%s2476_s29 + $0x2b0] sm:$0xff] %v347_v22  ;;  %v353_v25 = vld [vmem:[%s2471_s28 + $0x548] sm:$0xff]  ;;  %350 = vst [vmem:[%s2476_s29 + $0x2b8] sm:$0xff] %v349_v23  ;;  %v355_v26 = vld [vmem:[%s2471_s28 + $0x5a0] sm:$0xff] }
  0x3f   : > { %352 = vst [vmem:[%s2476_s29 + $0x2c0] sm:$0xff] %v351_v24  ;;  %354 = vst [vmem:[%s2476_s29 + $0x2c8] sm:$0xff] %v353_v25  ;;  %v357_v27 = vld [vmem:[%s2471_s28 + $0x5a8] sm:$0xff]  ;;  %v359_v28 = vld [vmem:[%s2471_s28 + $0x5b0] sm:$0xff] }
  0x40   : > { %356 = vst [vmem:[%s2476_s29 + $0x2d0] sm:$0xff] %v355_v26  ;;  %358 = vst [vmem:[%s2476_s29 + $0x2d8] sm:$0xff] %v357_v27  ;;  %v361_v29 = vld [vmem:[%s2471_s28 + $0x5b8] sm:$0xff]  ;;  %v363_v30 = vld [vmem:[%s2471_s28 + $0x5c0] sm:$0xff] }
  0x41   : > { %360 = vst [vmem:[%s2476_s29 + $0x2e0] sm:$0xff] %v359_v28  ;;  %v365_v31 = vld [vmem:[%s2471_s28 + $0x5c8] sm:$0xff]  ;;  %362 = vst [vmem:[%s2476_s29 + $0x2e8] sm:$0xff] %v361_v29  ;;  %v367_v32 = vld [vmem:[%s2471_s28 + $0x5d0] sm:$0xff] }
  0x42   : > { %364 = vst [vmem:[%s2476_s29 + $0x2f0] sm:$0xff] %v363_v30  ;;  %366 = vst [vmem:[%s2476_s29 + $0x2f8] sm:$0xff] %v365_v31  ;;  %v369_v33 = vld [vmem:[%s2471_s28 + $0x5d8] sm:$0xff]  ;;  %v371_v34 = vld [vmem:[%s2471_s28 + $0x5e0] sm:$0xff] }
  0x43   : > { %368 = vst [vmem:[%s2476_s29 + $0x300] sm:$0xff] %v367_v32  ;;  %370 = vst [vmem:[%s2476_s29 + $0x308] sm:$0xff] %v369_v33  ;;  %v373_v35 = vld [vmem:[%s2471_s28 + $0x5e8] sm:$0xff]  ;;  %v375_v36 = vld [vmem:[%s2471_s28 + $0x640] sm:$0xff] }
  0x44   : > { %372 = vst [vmem:[%s2476_s29 + $0x310] sm:$0xff] %v371_v34  ;;  %v377_v37 = vld [vmem:[%s2471_s28 + $0x648] sm:$0xff]  ;;  %374 = vst [vmem:[%s2476_s29 + $0x318] sm:$0xff] %v373_v35  ;;  %v379_v38 = vld [vmem:[%s2471_s28 + $0x650] sm:$0xff] }
  0x45   : > { %376 = vst [vmem:[%s2476_s29 + $0x320] sm:$0xff] %v375_v36  ;;  %378 = vst [vmem:[%s2476_s29 + $0x328] sm:$0xff] %v377_v37  ;;  %v381_v39 = vld [vmem:[%s2471_s28 + $0x658] sm:$0xff]  ;;  %v383_v40 = vld [vmem:[%s2471_s28 + $0x660] sm:$0xff] }
  0x46   : > { %380 = vst [vmem:[%s2476_s29 + $0x330] sm:$0xff] %v379_v38  ;;  %382 = vst [vmem:[%s2476_s29 + $0x338] sm:$0xff] %v381_v39  ;;  %v385_v41 = vld [vmem:[%s2471_s28 + $0x668] sm:$0xff]  ;;  %v387_v42 = vld [vmem:[%s2471_s28 + $0x670] sm:$0xff] }
  0x47   : > { %384 = vst [vmem:[%s2476_s29 + $0x340] sm:$0xff] %v383_v40  ;;  %v389_v43 = vld [vmem:[%s2471_s28 + $0x678] sm:$0xff]  ;;  %386 = vst [vmem:[%s2476_s29 + $0x348] sm:$0xff] %v385_v41  ;;  %v391_v44 = vld [vmem:[%s2471_s28 + $0x680] sm:$0xff] }
  0x48   : > { %388 = vst [vmem:[%s2476_s29 + $0x350] sm:$0xff] %v387_v42  ;;  %390 = vst [vmem:[%s2476_s29 + $0x358] sm:$0xff] %v389_v43  ;;  %v393_v45 = vld [vmem:[%s2471_s28 + $0x688] sm:$0xff]  ;;  %v395_v46 = vld [vmem:[%s2471_s28 + $0x6e0] sm:$0xff] }
  0x49   : > { %392 = vst [vmem:[%s2476_s29 + $0x360] sm:$0xff] %v391_v44  ;;  %394 = vst [vmem:[%s2476_s29 + $0x368] sm:$0xff] %v393_v45  ;;  %v397_v47 = vld [vmem:[%s2471_s28 + $0x6e8] sm:$0xff]  ;;  %v399_v48 = vld [vmem:[%s2471_s28 + $0x6f0] sm:$0xff] }
  0x4a   : > { %396 = vst [vmem:[%s2476_s29 + $0x370] sm:$0xff] %v395_v46  ;;  %v401_v49 = vld [vmem:[%s2471_s28 + $0x6f8] sm:$0xff]  ;;  %398 = vst [vmem:[%s2476_s29 + $0x378] sm:$0xff] %v397_v47  ;;  %v403_v50 = vld [vmem:[%s2471_s28 + $0x700] sm:$0xff] }
  0x4b   : > { %400 = vst [vmem:[%s2476_s29 + $0x380] sm:$0xff] %v399_v48  ;;  %402 = vst [vmem:[%s2476_s29 + $0x388] sm:$0xff] %v401_v49  ;;  %v405_v51 = vld [vmem:[%s2471_s28 + $0x708] sm:$0xff]  ;;  %v407_v52 = vld [vmem:[%s2471_s28 + $0x710] sm:$0xff] }
  0x4c   : > { %404 = vst [vmem:[%s2476_s29 + $0x390] sm:$0xff] %v403_v50  ;;  %406 = vst [vmem:[%s2476_s29 + $0x398] sm:$0xff] %v405_v51  ;;  %v409_v53 = vld [vmem:[%s2471_s28 + $0x718] sm:$0xff]  ;;  %v411_v54 = vld [vmem:[%s2471_s28 + $0x720] sm:$0xff] }
  0x4d   : > { %408 = vst [vmem:[%s2476_s29 + $0x3a0] sm:$0xff] %v407_v52  ;;  %v413_v55 = vld [vmem:[%s2471_s28 + $0x728] sm:$0xff]  ;;  %410 = vst [vmem:[%s2476_s29 + $0x3a8] sm:$0xff] %v409_v53  ;;  %v415_v56 = vld [vmem:[%s2471_s28 + $0x780] sm:$0xff] }
  0x4e   : > { %412 = vst [vmem:[%s2476_s29 + $0x3b0] sm:$0xff] %v411_v54  ;;  %414 = vst [vmem:[%s2476_s29 + $0x3b8] sm:$0xff] %v413_v55  ;;  %v417_v57 = vld [vmem:[%s2471_s28 + $0x788] sm:$0xff]  ;;  %v419_v58 = vld [vmem:[%s2471_s28 + $0x790] sm:$0xff] }
  0x4f   : > { %416 = vst [vmem:[%s2476_s29 + $0x3c0] sm:$0xff] %v415_v56  ;;  %418 = vst [vmem:[%s2476_s29 + $0x3c8] sm:$0xff] %v417_v57  ;;  %v421_v59 = vld [vmem:[%s2471_s28 + $0x798] sm:$0xff]  ;;  %v423_v60 = vld [vmem:[%s2471_s28 + $0x7a0] sm:$0xff] }
  0x50   : > { %420 = vst [vmem:[%s2476_s29 + $0x3d0] sm:$0xff] %v419_v58  ;;  %v425_v61 = vld [vmem:[%s2471_s28 + $0x7a8] sm:$0xff]  ;;  %422 = vst [vmem:[%s2476_s29 + $0x3d8] sm:$0xff] %v421_v59  ;;  %v427_v62 = vld [vmem:[%s2471_s28 + $0x7b0] sm:$0xff] }
  0x51   : > { %424 = vst [vmem:[%s2476_s29 + $0x3e0] sm:$0xff] %v423_v60  ;;  %426 = vst [vmem:[%s2476_s29 + $0x3e8] sm:$0xff] %v425_v61  ;;  %v429_v63 = vld [vmem:[%s2471_s28 + $0x7b8] sm:$0xff]  ;;  %v431_v0 = vld [vmem:[%s2471_s28 + $0x7c0] sm:$0xff] }
  0x52   : > { %428 = vst [vmem:[%s2476_s29 + $0x3f0] sm:$0xff] %v427_v62  ;;  %430 = vst [vmem:[%s2476_s29 + $0x3f8] sm:$0xff] %v429_v63  ;;  %v433_v1 = vld [vmem:[%s2471_s28 + $0x7c8] sm:$0xff]  ;;  %v435_v2 = vld [vmem:[%s2471_s28 + $0x820] sm:$0xff] }
  0x53   : > { %432 = vst [vmem:[%s2476_s29 + $0x400] sm:$0xff] %v431_v0  ;;  %v437_v3 = vld [vmem:[%s2471_s28 + $0x828] sm:$0xff]  ;;  %434 = vst [vmem:[%s2476_s29 + $0x408] sm:$0xff] %v433_v1  ;;  %v439_v4 = vld [vmem:[%s2471_s28 + $0x830] sm:$0xff] }
  0x54   : > { %436 = vst [vmem:[%s2476_s29 + $0x410] sm:$0xff] %v435_v2  ;;  %438 = vst [vmem:[%s2476_s29 + $0x418] sm:$0xff] %v437_v3  ;;  %v441_v5 = vld [vmem:[%s2471_s28 + $0x838] sm:$0xff]  ;;  %v443_v6 = vld [vmem:[%s2471_s28 + $0x840] sm:$0xff] }
  0x55   : > { %440 = vst [vmem:[%s2476_s29 + $0x420] sm:$0xff] %v439_v4  ;;  %442 = vst [vmem:[%s2476_s29 + $0x428] sm:$0xff] %v441_v5  ;;  %v445_v7 = vld [vmem:[%s2471_s28 + $0x848] sm:$0xff]  ;;  %v447_v8 = vld [vmem:[%s2471_s28 + $0x850] sm:$0xff] }
  0x56   : > { %444 = vst [vmem:[%s2476_s29 + $0x430] sm:$0xff] %v443_v6  ;;  %v449_v9 = vld [vmem:[%s2471_s28 + $0x858] sm:$0xff]  ;;  %446 = vst [vmem:[%s2476_s29 + $0x438] sm:$0xff] %v445_v7  ;;  %v451_v10 = vld [vmem:[%s2471_s28 + $0x860] sm:$0xff] }
  0x57   : > { %448 = vst [vmem:[%s2476_s29 + $0x440] sm:$0xff] %v447_v8  ;;  %450 = vst [vmem:[%s2476_s29 + $0x448] sm:$0xff] %v449_v9  ;;  %v453_v11 = vld [vmem:[%s2471_s28 + $0x868] sm:$0xff] }
  0x58   : > { %452 = vst [vmem:[%s2476_s29 + $0x450] sm:$0xff] %v451_v10  ;;  %454 = vst [vmem:[%s2476_s29 + $0x458] sm:$0xff] %v453_v11 }
  0x59 PF: > { %p1984_p5 = scmp.ge.s32.totalorder %s2409_s17, 1  ;;  %p459_p6 = scmp.lt.s32.totalorder %s2409_s17, 3 }
  0x5b   : > { %p460_p7 = pnand %p1984_p5, %p459_p6 }
  0x5c   : > { %s466_s30 = sand.u32 (!%p460_p7), 1, %s2401_s15   ;;  %v2411_v12 = vmov (!%p460_p7), 0   ;;  %v1795_v13 = vld [vmem:[%s3035_s2] sm:$0xf] (!%p460_p7)  ;;  %vm1324_vm0 = vcmask (!%p460_p7), 1045504   ;;  %vm1320_vm1 = vcmask (!%p460_p7), 883712  }
  0x5d   : > { %463 = sbr.rel (%p460_p7) target bundleno = 461 (0x1cd), region = 55  ;;  %1417 = vmatprep.mubr.bf16.mxu0 (!%p460_p7), %v2411_v12  ;;  %1458 = vmatprep.mubr.bf16.mxu1 (!%p460_p7), %v2411_v12  ;;  %v1821_v14 = vld [vmem:[%s3036_s3] sm:$0xf] (!%p460_p7) }
  0x5e   : > { %s2150_s5 = smul.u32 (!%p460_p7), 1120, %s466_s30  ;;  %2176 = vset.pattern.permute.xlu0 (!%p460_p7), %v2411_v12  ;;  %v2806_v47 = vld [vmem:[%s3033_s0] sm:$0x3] (!%p460_p7) }
  0x5f   : > { %1798 = vperm.xlu0 (!%p460_p7), %2176, %v1795_v13   ;;  %s492_s13 = smul.u32 (!%p460_p7), 20, %s1979_s18 }
  0x60   : > { %s2767_s10 = scalar_lea.vmem (!%p460_p7), [#allocation2], %s2150_s5 }
  0x61   : > { %v2177_v15 = vld [vmem:[%s2767_s10 + $0x4] ss:$80 sps:$4 sm:$0xff] (!%p460_p7)   ;;  %v2179_v16 = vld [vmem:[%s2767_s10 + $0xc] ss:$80 sps:$4 sm:$0xff] (!%p460_p7)   ;;  %v2181_v17 = vld [vmem:[%s2767_s10] ss:$80 sps:$4 sm:$0xff] (!%p460_p7)  }
  0x62   : > { %1385 = vmatprep.subr.bf16.mxu0 (!%p460_p7), %v2177_v15  ;;  %v2182_v18 = vld [vmem:[%s2767_s10 + $0x8] ss:$80 sps:$4 sm:$0xff] (!%p460_p7)   ;;  %1426 = vmatprep.subr.bf16.mxu1 (!%p460_p7), %v2179_v16  ;;  %v2183_v19 = vld [vmem:[%s2767_s10 + $0xa4] ss:$80 sps:$4 sm:$0xff] (!%p460_p7)   ;;  %v2185_v20 = vld [vmem:[%s2767_s10 + $0xac] ss:$80 sps:$4 sm:$0xff] (!%p460_p7)  }
  0x63   : > { %1824 = vperm.xlu0 (!%p460_p7), %2176, %v1821_v14   ;;  %1386 = vmatpush1.bf16.msra.mxu0 (!%p460_p7), %v2181_v17  ;;  %v2187_v21 = vld [vmem:[%s2767_s10 + $0xa0] ss:$80 sps:$4 sm:$0xff] (!%p460_p7)   ;;  %v2188_v22 = vld [vmem:[%s2767_s10 + $0xa8] ss:$80 sps:$4 sm:$0xff] (!%p460_p7)   ;;  %v2189_v23 = vld [vmem:[%s2767_s10 + $0x144] ss:$80 sps:$4 sm:$0xff] (!%p460_p7)  }
  0x64   : > { %1427 = vmatpush1.bf16.msra.mxu1 %v2182_v18  ;;  %1387 = vmatprep.subr.bf16.mxu0 %v2183_v19  ;;  %v2191_v24 = vld [vmem:[%s2767_s10 + $0x14c] ss:$80 sps:$4 sm:$0xff]   ;;  %v2193_v25 = vld [vmem:[%s2767_s10 + $0x140] ss:$80 sps:$4 sm:$0xff]   ;;  %v2194_v26 = vld [vmem:[%s2767_s10 + $0x148] ss:$80 sps:$4 sm:$0xff]  }
  0x65   : > { %1428 = vmatprep.subr.bf16.mxu1 %v2185_v20  ;;  %v2195_v27 = vld [vmem:[%s2767_s10 + $0x1e4] ss:$80 sps:$4 sm:$0xff]   ;;  %v2197_v28 = vld [vmem:[%s2767_s10 + $0x1ec] ss:$80 sps:$4 sm:$0xff]   ;;  %v2199_v29 = vld [vmem:[%s2767_s10 + $0x1e0] ss:$80 sps:$4 sm:$0xff]  }
  0x66   : > { %v2200_v30 = vld [vmem:[%s2767_s10 + $0x1e8] ss:$80 sps:$4 sm:$0xff]   ;;  %v2201_v31 = vld [vmem:[%s2767_s10 + $0x284] ss:$80 sps:$4 sm:$0xff]   ;;  %v2203_v32 = vld [vmem:[%s2767_s10 + $0x28c] ss:$80 sps:$4 sm:$0xff]  }
  0x67   : > { %1388 = vmatpush1.bf16.msra.mxu0 %v2187_v21  ;;  %v2205_v33 = vld [vmem:[%s2767_s10 + $0x280] ss:$80 sps:$4 sm:$0xff]   ;;  %v2206_v34 = vld [vmem:[%s2767_s10 + $0x288] ss:$80 sps:$4 sm:$0xff]   ;;  %v2207_v35 = vld [vmem:[%s2767_s10 + $0x324] ss:$80 sps:$4 sm:$0xff]  }
  0x68   : > { %1429 = vmatpush1.bf16.msra.mxu1 %v2188_v22  ;;  %1389 = vmatprep.subr.bf16.mxu0 %v2189_v23  ;;  %v2209_v36 = vld [vmem:[%s2767_s10 + $0x32c] ss:$80 sps:$4 sm:$0xff]   ;;  %v2211_v37 = vld [vmem:[%s2767_s10 + $0x320] ss:$80 sps:$4 sm:$0xff]   ;;  %v2212_v38 = vld [vmem:[%s2767_s10 + $0x328] ss:$80 sps:$4 sm:$0xff]  }
  0x69   : > { %1430 = vmatprep.subr.bf16.mxu1 %v2191_v24  ;;  %v2213_v39 = vld [vmem:[%s2767_s10 + $0x3c4] ss:$80 sps:$4 sm:$0x3f]   ;;  %v2215_v40 = vld [vmem:[%s2767_s10 + $0x3cc] ss:$80 sps:$4 sm:$0x3f]  }
  0x6a   : > { %v2217_v41 = vld [vmem:[%s2767_s10 + $0x3c0] ss:$80 sps:$4 sm:$0x3f]   ;;  %v2218_v42 = vld [vmem:[%s2767_s10 + $0x3c8] ss:$80 sps:$4 sm:$0x3f]  }
  0x6b   : > { %1390 = vmatpush1.bf16.msra.mxu0 %v2193_v25  ;;  %v1326_v43 = vsel %vm1324_vm0, %v2217_v41, 0  ;;  %v1332_v44 = vsel %vm1324_vm0, %v2218_v42, 0  ;;  %v2221_v45 = vld [vmem:[%s2767_s10 + $0x14] ss:$80 sps:$4 sm:$0xff]   ;;  %v2224_v46 = vld [vmem:[%s2767_s10 + $0x1c] ss:$80 sps:$4 sm:$0xff]  }
  0x6c   : > { %1431 = vmatpush1.bf16.msra.mxu1 %v2194_v26  ;;  %1391 = vmatprep.subr.bf16.mxu0 %v2195_v27  ;;  %v2219_v48 = vld [vmem:[%s2767_s10 + $0x10] ss:$80 sps:$4 sm:$0xff]   ;;  %v2222_v49 = vld [vmem:[%s2767_s10 + $0x18] ss:$80 sps:$4 sm:$0xff]   ;;  %v2227_v50 = vld [vmem:[%s2767_s10 + $0xb4] ss:$80 sps:$4 sm:$0xff]  }
  0x6d   : > { %1432 = vmatprep.subr.bf16.mxu1 %v2197_v28  ;;  %v2230_v51 = vld [vmem:[%s2767_s10 + $0xbc] ss:$80 sps:$4 sm:$0xff]   ;;  %v2225_v52 = vld [vmem:[%s2767_s10 + $0xb0] ss:$80 sps:$4 sm:$0xff]   ;;  %v2228_v53 = vld [vmem:[%s2767_s10 + $0xb8] ss:$80 sps:$4 sm:$0xff]  }
  0x6e   : > { %v2233_v54 = vld [vmem:[%s2767_s10 + $0x154] ss:$80 sps:$4 sm:$0xff]   ;;  %v2236_v55 = vld [vmem:[%s2767_s10 + $0x15c] ss:$80 sps:$4 sm:$0xff]   ;;  %v2231_v56 = vld [vmem:[%s2767_s10 + $0x150] ss:$80 sps:$4 sm:$0xff]  }
  0x6f   : > { %1392 = vmatpush1.bf16.msra.mxu0 %v2199_v29  ;;  %v2234_v57 = vld [vmem:[%s2767_s10 + $0x158] ss:$80 sps:$4 sm:$0xff]   ;;  %v2239_v58 = vld [vmem:[%s2767_s10 + $0x1f4] ss:$80 sps:$4 sm:$0xff]   ;;  %v2242_v59 = vld [vmem:[%s2767_s10 + $0x1fc] ss:$80 sps:$4 sm:$0xff]  }
  0x70   : > { %1433 = vmatpush1.bf16.msra.mxu1 %v2200_v30  ;;  %1393 = vmatprep.subr.bf16.mxu0 %v2201_v31  ;;  %v2237_v60 = vld [vmem:[%s2767_s10 + $0x1f0] ss:$80 sps:$4 sm:$0xff]   ;;  %v2240_v61 = vld [vmem:[%s2767_s10 + $0x1f8] ss:$80 sps:$4 sm:$0xff]   ;;  %v2245_v62 = vld [vmem:[%s2767_s10 + $0x294] ss:$80 sps:$4 sm:$0xff]  }
  0x71   : > { %1434 = vmatprep.subr.bf16.mxu1 %v2203_v32  ;;  %v2248_v63 = vld [vmem:[%s2767_s10 + $0x29c] ss:$80 sps:$4 sm:$0xff]   ;;  %v2243_v0 = vld [vmem:[%s2767_s10 + $0x290] ss:$80 sps:$4 sm:$0xff]   ;;  %v2246_v1 = vld [vmem:[%s2767_s10 + $0x298] ss:$80 sps:$4 sm:$0xff]  }
  0x72   : > { %v2251_v2 = vld [vmem:[%s2767_s10 + $0x334] ss:$80 sps:$4 sm:$0xff]   ;;  %v2254_v3 = vld [vmem:[%s2767_s10 + $0x33c] ss:$80 sps:$4 sm:$0xff]   ;;  %v2249_v4 = vld [vmem:[%s2767_s10 + $0x330] ss:$80 sps:$4 sm:$0xff]  }
  0x73   : > { %1394 = vmatpush1.bf16.msra.mxu0 %v2205_v33  ;;  %v2255_v5 = vld [vmem:[%s2767_s10 + $0x3d4] ss:$80 sps:$4 sm:$0x3f]   ;;  %v2257_v6 = vld [vmem:[%s2767_s10 + $0x3dc] ss:$80 sps:$4 sm:$0x3f]  }
  0x74   : > { %1435 = vmatpush1.bf16.msra.mxu1 %v2206_v34  ;;  %1395 = vmatprep.subr.bf16.mxu0 %v2207_v35  ;;  %v2252_v7 = vld [vmem:[%s2767_s10 + $0x338] ss:$80 sps:$4 sm:$0xff]   ;;  %v2259_v8 = vld [vmem:[%s2767_s10 + $0x3d0] ss:$80 sps:$4 sm:$0x3f]   ;;  %p493_p8 = scmp.lt.s32.totalorder %s492_s13, 39 }
  0x75   : > { %1436 = vmatprep.subr.bf16.mxu1 %v2209_v36  ;;  %v2260_v9 = vld [vmem:[%s2767_s10 + $0x3d8] ss:$80 sps:$4 sm:$0x3f]   ;;  %v1338_v10 = vsel %vm1324_vm0, %v2259_v8, 0  ;;  %v2263_v13 = vld [vmem:[%s2767_s10 + $0x24] ss:$80 sps:$4 sm:$0xff]  }
  0x76   : > { %v1344_v11 = vsel %vm1324_vm0, %v2260_v9, 0  ;;  %v2266_v14 = vld [vmem:[%s2767_s10 + $0x2c] ss:$80 sps:$4 sm:$0xff]   ;;  %v2261_v15 = vld [vmem:[%s2767_s10 + $0x20] ss:$80 sps:$4 sm:$0xff]   ;;  %s3042_s13 = smov (!%p493_p8, %s492_s13), 39 }
  0x77   : > { %1396 = vmatpush1.bf16.msra.mxu0 %v2211_v37  ;;  %v2264_v16 = vld [vmem:[%s2767_s10 + $0x28] ss:$80 sps:$4 sm:$0xff]   ;;  %v2269_v17 = vld [vmem:[%s2767_s10 + $0xc4] ss:$80 sps:$4 sm:$0xff]   ;;  %v2272_v18 = vld [vmem:[%s2767_s10 + $0xcc] ss:$80 sps:$4 sm:$0xff]  }
  0x78   : > { %1437 = vmatpush1.bf16.msra.mxu1 %v2212_v38  ;;  %2126 = vmatprep.subr.msk.bf16.mxu0 %vm1324_vm0, %v2213_v39  ;;  %v2267_v19 = vld [vmem:[%s2767_s10 + $0xc0] ss:$80 sps:$4 sm:$0xff]   ;;  %v2270_v20 = vld [vmem:[%s2767_s10 + $0xc8] ss:$80 sps:$4 sm:$0xff]   ;;  %v2275_v21 = vld [vmem:[%s2767_s10 + $0x164] ss:$80 sps:$4 sm:$0xff]  }
  0x79   : > { %2128 = vmatprep.subr.msk.bf16.mxu1 %vm1324_vm0, %v2215_v40  ;;  %v2278_v22 = vld [vmem:[%s2767_s10 + $0x16c] ss:$80 sps:$4 sm:$0xff]   ;;  %v2273_v23 = vld [vmem:[%s2767_s10 + $0x160] ss:$80 sps:$4 sm:$0xff]   ;;  %v2276_v24 = vld [vmem:[%s2767_s10 + $0x168] ss:$80 sps:$4 sm:$0xff]  }
  0x7a   : > { %v2281_v25 = vld [vmem:[%s2767_s10 + $0x204] ss:$80 sps:$4 sm:$0xff]   ;;  %v2284_v26 = vld [vmem:[%s2767_s10 + $0x20c] ss:$80 sps:$4 sm:$0xff]   ;;  %v2279_v27 = vld [vmem:[%s2767_s10 + $0x200] ss:$80 sps:$4 sm:$0xff]  }
  0x7b   : > { %1398 = vmatpush1.bf16.msra.mxu0 %v1326_v43  ;;  %v2282_v28 = vld [vmem:[%s2767_s10 + $0x208] ss:$80 sps:$4 sm:$0xff]   ;;  %v2287_v29 = vld [vmem:[%s2767_s10 + $0x2a4] ss:$80 sps:$4 sm:$0xff]   ;;  %v2290_v30 = vld [vmem:[%s2767_s10 + $0x2ac] ss:$80 sps:$4 sm:$0xff]  }
  0x7c   : > { %1439 = vmatpush1.bf16.msra.mxu1 %v1332_v44  ;;  %1467 = vmatprep.subr.bf16.mxu0 %v2221_v45  ;;  %v2285_v31 = vld [vmem:[%s2767_s10 + $0x2a0] ss:$80 sps:$4 sm:$0xff]   ;;  %v2288_v32 = vld [vmem:[%s2767_s10 + $0x2a8] ss:$80 sps:$4 sm:$0xff]   ;;  %v2293_v33 = vld [vmem:[%s2767_s10 + $0x344] ss:$80 sps:$4 sm:$0xff]  }
  0x7d   : > { %1508 = vmatprep.subr.bf16.mxu1 %v2224_v46  ;;  %v2296_v34 = vld [vmem:[%s2767_s10 + $0x34c] ss:$80 sps:$4 sm:$0xff]   ;;  %v2291_v35 = vld [vmem:[%s2767_s10 + $0x340] ss:$80 sps:$4 sm:$0xff]   ;;  %v2294_v36 = vld [vmem:[%s2767_s10 + $0x348] ss:$80 sps:$4 sm:$0xff]  }
  0x7e   : > { %2127 = vmatmul.mubr.msk.bf16.vlgmr.msra.gmra.mrb[0].mxu0 %vm1320_vm1, %v2806_v47  ;;  %v2297_v37 = vld [vmem:[%s2767_s10 + $0x3e4] ss:$80 sps:$4 sm:$0x3f]   ;;  %v2299_v38 = vld [vmem:[%s2767_s10 + $0x3ec] ss:$80 sps:$4 sm:$0x3f]  }
  0x7f   : > { %2129 = vmatmul.mubr.msk.bf16.vlgmr.msra.gmra.mrb[0].mxu1 %vm1320_vm1, %v2806_v47  ;;  %1468 = vmatpush1.bf16.msra.mxu0 %v2219_v48  ;;  %v2301_v39 = vld [vmem:[%s2767_s10 + $0x3e0] ss:$80 sps:$4 sm:$0x3f]   ;;  %v2302_v40 = vld [vmem:[%s2767_s10 + $0x3e8] ss:$80 sps:$4 sm:$0x3f]  }
  0x80   : > { %1509 = vmatpush1.bf16.msra.mxu1 %v2222_v49  ;;  %1469 = vmatprep.subr.bf16.mxu0 %v2227_v50  ;;  %v2305_v41 = vld [vmem:[%s2767_s10 + $0x34] ss:$80 sps:$4 sm:$0xff]   ;;  %v1350_v42 = vsel %vm1324_vm0, %v2301_v39, 0  ;;  %v1356_v43 = vsel %vm1324_vm0, %v2302_v40, 0  ;;  %v2308_v44 = vld [vmem:[%s2767_s10 + $0x3c] ss:$80 sps:$4 sm:$0xff]  }
  0x81   : > { %1510 = vmatprep.subr.bf16.mxu1 %v2230_v51  ;;  %1499 = vmatprep.mubr.bf16.mxu0 %v2411_v12  ;;  %v2303_v45 = vld [vmem:[%s2767_s10 + $0x30] ss:$80 sps:$4 sm:$0xff]   ;;  %v2306_v46 = vld [vmem:[%s2767_s10 + $0x38] ss:$80 sps:$4 sm:$0xff]   ;;  %v2311_v48 = vld [vmem:[%s2767_s10 + $0xd4] ss:$80 sps:$4 sm:$0xff]  }
  0x82   : > { %1540 = vmatprep.mubr.bf16.mxu1 %v2411_v12  ;;  %v2314_v49 = vld [vmem:[%s2767_s10 + $0xdc] ss:$80 sps:$4 sm:$0xff]   ;;  %v2309_v50 = vld [vmem:[%s2767_s10 + $0xd0] ss:$80 sps:$4 sm:$0xff]   ;;  %v2312_v51 = vld [vmem:[%s2767_s10 + $0xd8] ss:$80 sps:$4 sm:$0xff]  }
  0x83   : > { %1470 = vmatpush1.bf16.msra.mxu0 %v2225_v52  ;;  %v2317_v52 = vld [vmem:[%s2767_s10 + $0x174] ss:$80 sps:$4 sm:$0xff]   ;;  %s1985_s14 = sshll.u32 %s3042_s13, 2 }
  0x84   : > { %1511 = vmatpush1.bf16.msra.mxu1 %v2228_v53  ;;  %1471 = vmatprep.subr.bf16.mxu0 %v2233_v54  ;;  %v2320_v53 = vld [vmem:[%s2767_s10 + $0x17c] ss:$80 sps:$4 sm:$0xff]   ;;  %v2315_v54 = vld [vmem:[%s2767_s10 + $0x170] ss:$80 sps:$4 sm:$0xff]   ;;  %s2979_s18 = scalar_lea.vmem %s3037_s4, %s1985_s14 }
  0x85   : > { %1512 = vmatprep.subr.bf16.mxu1 %v2236_v55  ;;  %v2318_v55 = vld [vmem:[%s2767_s10 + $0x178] ss:$80 sps:$4 sm:$0xff]  }
  0x87   : > { %1472 = vmatpush1.bf16.msra.mxu0 %v2231_v56  ;;  %v2323_v56 = vld [vmem:[%s2767_s10 + $0x214] ss:$80 sps:$4 sm:$0xff]  }
  0x88   : > { %1513 = vmatpush1.bf16.msra.mxu1 %v2234_v57  ;;  %1473 = vmatprep.subr.bf16.mxu0 %v2239_v58  ;;  %v2326_v57 = vld [vmem:[%s2767_s10 + $0x21c] ss:$80 sps:$4 sm:$0xff]   ;;  %v2321_v58 = vld [vmem:[%s2767_s10 + $0x210] ss:$80 sps:$4 sm:$0xff]  }
  0x89   : > { %1514 = vmatprep.subr.bf16.mxu1 %v2242_v59  ;;  %v2324_v59 = vld [vmem:[%s2767_s10 + $0x218] ss:$80 sps:$4 sm:$0xff]  }
  0x8b   : > { %1474 = vmatpush1.bf16.msra.mxu0 %v2237_v60  ;;  %v2329_v60 = vld [vmem:[%s2767_s10 + $0x2b4] ss:$80 sps:$4 sm:$0xff]  }
  0x8c   : > { %1515 = vmatpush1.bf16.msra.mxu1 %v2240_v61  ;;  %1475 = vmatprep.subr.bf16.mxu0 %v2245_v62  ;;  %v2332_v61 = vld [vmem:[%s2767_s10 + $0x2bc] ss:$80 sps:$4 sm:$0xff]   ;;  %v2327_v62 = vld [vmem:[%s2767_s10 + $0x2b0] ss:$80 sps:$4 sm:$0xff]  }
  0x8d   : > { %1516 = vmatprep.subr.bf16.mxu1 %v2248_v63  ;;  %v2330_v63 = vld [vmem:[%s2767_s10 + $0x2b8] ss:$80 sps:$4 sm:$0xff]  }
  0x8f   : > { %1476 = vmatpush1.bf16.msra.mxu0 %v2243_v0  ;;  %v2335_v0 = vld [vmem:[%s2767_s10 + $0x354] ss:$80 sps:$4 sm:$0xff]  }
  0x90   : > { %1517 = vmatpush1.bf16.msra.mxu1 %v2246_v1  ;;  %1477 = vmatprep.subr.bf16.mxu0 %v2251_v2  ;;  %v2338_v1 = vld [vmem:[%s2767_s10 + $0x35c] ss:$80 sps:$4 sm:$0xff]   ;;  %v2333_v2 = vld [vmem:[%s2767_s10 + $0x350] ss:$80 sps:$4 sm:$0xff]  }
  0x91   : > { %1518 = vmatprep.subr.bf16.mxu1 %v2254_v3  ;;  %v2336_v3 = vld [vmem:[%s2767_s10 + $0x358] ss:$80 sps:$4 sm:$0xff]  }
  0x93   : > { %1478 = vmatpush1.bf16.msra.mxu0 %v2249_v4  ;;  %v2339_v4 = vld [vmem:[%s2767_s10 + $0x3f4] ss:$80 sps:$4 sm:$0x3f]  }
  0x94   : > { %1519 = vmatpush1.bf16.msra.mxu1 %v2252_v7  ;;  %2130 = vmatprep.subr.msk.bf16.mxu0 %vm1324_vm0, %v2255_v5  ;;  %v2341_v5 = vld [vmem:[%s2767_s10 + $0x3fc] ss:$80 sps:$4 sm:$0x3f]   ;;  %v2344_v7 = vld [vmem:[%s2767_s10 + $0x3f8] ss:$80 sps:$4 sm:$0x3f]  }
  0x95   : > { %2132 = vmatprep.subr.msk.bf16.mxu1 %vm1324_vm0, %v2257_v6  ;;  %v2343_v6 = vld [vmem:[%s2767_s10 + $0x3f0] ss:$80 sps:$4 sm:$0x3f]   ;;  %v1368_v9 = vsel %vm1324_vm0, %v2344_v7, 0 }
  0x96   : > { %v1362_v8 = vsel %vm1324_vm0, %v2343_v6, 0 }
  0x97   : > { %1480 = vmatpush1.bf16.msra.mxu0 %v1338_v10  ;;  %v2347_v10 = vld [vmem:[%s2767_s10 + $0x44] ss:$80 sps:$4 sm:$0xff]  }
  0x98   : > { %1521 = vmatpush1.bf16.msra.mxu1 %v1344_v11  ;;  %1549 = vmatprep.subr.bf16.mxu0 %v2263_v13  ;;  %v2350_v11 = vld [vmem:[%s2767_s10 + $0x4c] ss:$80 sps:$4 sm:$0xff]   ;;  %v2345_v13 = vld [vmem:[%s2767_s10 + $0x40] ss:$80 sps:$4 sm:$0xff]  }
  0x99   : > { %1590 = vmatprep.subr.bf16.mxu1 %v2266_v14  ;;  %v2348_v14 = vld [vmem:[%s2767_s10 + $0x48] ss:$80 sps:$4 sm:$0xff]  }
  0x9a   : > { %2131 = vmatmul.mubr.msk.bf16.vlgmr.msra.gmra.mrb[4].mxu0 %vm1320_vm1, %v2806_v47 }
  0x9b   : > { %2133 = vmatmul.mubr.msk.bf16.vlgmr.msra.gmra.mrb[4].mxu1 %vm1320_vm1, %v2806_v47  ;;  %1550 = vmatpush1.bf16.msra.mxu0 %v2261_v15  ;;  %v2353_v15 = vld [vmem:[%s2767_s10 + $0xe4] ss:$80 sps:$4 sm:$0xff]  }
  0x9c   : > { %1591 = vmatpush1.bf16.msra.mxu1 %v2264_v16  ;;  %1551 = vmatprep.subr.bf16.mxu0 %v2269_v17  ;;  %v2356_v16 = vld [vmem:[%s2767_s10 + $0xec] ss:$80 sps:$4 sm:$0xff]   ;;  %v2351_v17 = vld [vmem:[%s2767_s10 + $0xe0] ss:$80 sps:$4 sm:$0xff]  }
  0x9d   : > { %1592 = vmatprep.subr.bf16.mxu1 %v2272_v18  ;;  %1581 = vmatprep.mubr.bf16.mxu0 %v2411_v12  ;;  %v2354_v18 = vld [vmem:[%s2767_s10 + $0xe8] ss:$80 sps:$4 sm:$0xff]  }
  0x9e   : > { %1622 = vmatprep.mubr.bf16.mxu1 %v2411_v12 }
  0x9f   : > { %1552 = vmatpush1.bf16.msra.mxu0 %v2267_v19  ;;  %v2359_v19 = vld [vmem:[%s2767_s10 + $0x184] ss:$80 sps:$4 sm:$0xff]  }
  0xa0   : > { %1593 = vmatpush1.bf16.msra.mxu1 %v2270_v20  ;;  %1553 = vmatprep.subr.bf16.mxu0 %v2275_v21  ;;  %v2362_v20 = vld [vmem:[%s2767_s10 + $0x18c] ss:$80 sps:$4 sm:$0xff]   ;;  %v2357_v21 = vld [vmem:[%s2767_s10 + $0x180] ss:$80 sps:$4 sm:$0xff]  }
  0xa1   : > { %1594 = vmatprep.subr.bf16.mxu1 %v2278_v22  ;;  %v2360_v22 = vld [vmem:[%s2767_s10 + $0x188] ss:$80 sps:$4 sm:$0xff]  }
  0xa3   : > { %1554 = vmatpush1.bf16.msra.mxu0 %v2273_v23  ;;  %v2365_v23 = vld [vmem:[%s2767_s10 + $0x224] ss:$80 sps:$4 sm:$0xff]  }
  0xa4   : > { %1595 = vmatpush1.bf16.msra.mxu1 %v2276_v24  ;;  %1555 = vmatprep.subr.bf16.mxu0 %v2281_v25  ;;  %v2368_v24 = vld [vmem:[%s2767_s10 + $0x22c] ss:$80 sps:$4 sm:$0xff]   ;;  %v2363_v25 = vld [vmem:[%s2767_s10 + $0x220] ss:$80 sps:$4 sm:$0xff]  }
  0xa5   : > { %1596 = vmatprep.subr.bf16.mxu1 %v2284_v26  ;;  %v2366_v26 = vld [vmem:[%s2767_s10 + $0x228] ss:$80 sps:$4 sm:$0xff]  }
  0xa7   : > { %1556 = vmatpush1.bf16.msra.mxu0 %v2279_v27  ;;  %v2374_v27 = vld [vmem:[%s2767_s10 + $0x2cc] ss:$80 sps:$4 sm:$0xff]  }
  0xa8   : > { %1597 = vmatpush1.bf16.msra.mxu1 %v2282_v28  ;;  %1557 = vmatprep.subr.bf16.mxu0 %v2287_v29  ;;  %v2369_v28 = vld [vmem:[%s2767_s10 + $0x2c0] ss:$80 sps:$4 sm:$0xff]   ;;  %v2372_v29 = vld [vmem:[%s2767_s10 + $0x2c8] ss:$80 sps:$4 sm:$0xff]  }
  0xa9   : > { %1598 = vmatprep.subr.bf16.mxu1 %v2290_v30  ;;  %v2377_v30 = vld [vmem:[%s2767_s10 + $0x364] ss:$80 sps:$4 sm:$0xff]  }
  0xab   : > { %1558 = vmatpush1.bf16.msra.mxu0 %v2285_v31  ;;  %v2380_v31 = vld [vmem:[%s2767_s10 + $0x36c] ss:$80 sps:$4 sm:$0xff]  }
  0xac   : > { %1599 = vmatpush1.bf16.msra.mxu1 %v2288_v32  ;;  %1559 = vmatprep.subr.bf16.mxu0 %v2293_v33  ;;  %v2375_v32 = vld [vmem:[%s2767_s10 + $0x360] ss:$80 sps:$4 sm:$0xff]   ;;  %v2378_v33 = vld [vmem:[%s2767_s10 + $0x368] ss:$80 sps:$4 sm:$0xff]  }
  0xad   : > { %1600 = vmatprep.subr.bf16.mxu1 %v2296_v34  ;;  %v2381_v34 = vld [vmem:[%s2767_s10 + $0x404] ss:$80 sps:$4 sm:$0x3f]  }
  0xaf   : > { %1560 = vmatpush1.bf16.msra.mxu0 %v2291_v35  ;;  %v2383_v35 = vld [vmem:[%s2767_s10 + $0x40c] ss:$80 sps:$4 sm:$0x3f]  }
  0xb0   : > { %1601 = vmatpush1.bf16.msra.mxu1 %v2294_v36  ;;  %2134 = vmatprep.subr.msk.bf16.mxu0 %vm1324_vm0, %v2297_v37  ;;  %v2385_v36 = vld [vmem:[%s2767_s10 + $0x400] ss:$80 sps:$4 sm:$0x3f]   ;;  %v2386_v37 = vld [vmem:[%s2767_s10 + $0x408] ss:$80 sps:$4 sm:$0x3f]  }
  0xb1   : > { %2136 = vmatprep.subr.msk.bf16.mxu1 %vm1324_vm0, %v2299_v38  ;;  %v1374_v38 = vsel %vm1324_vm0, %v2385_v36, 0  ;;  %v1380_v39 = vsel %vm1324_vm0, %v2386_v37, 0 }
  0xb3   : > { %1562 = vmatpush1.bf16.msra.mxu0 %v1350_v42 }
  0xb4   : > { %1603 = vmatpush1.bf16.msra.mxu1 %v1356_v43  ;;  %1631 = vmatprep.subr.bf16.mxu0 %v2305_v41 }
  0xb5   : > { %1672 = vmatprep.subr.bf16.mxu1 %v2308_v44 }
  0xb6   : > { %2135 = vmatmul.mubr.msk.bf16.vlgmr.msra.gmra.mrb[8].mxu0 %vm1320_vm1, %v2806_v47 }
  0xb7   : > { %2137 = vmatmul.mubr.msk.bf16.vlgmr.msra.gmra.mrb[8].mxu1 %vm1320_vm1, %v2806_v47  ;;  %1632 = vmatpush1.bf16.msra.mxu0 %v2303_v45 }
  0xb8   : > { %1673 = vmatpush1.bf16.msra.mxu1 %v2306_v46  ;;  %1633 = vmatprep.subr.bf16.mxu0 %v2311_v48 }
  0xb9   : > { %1674 = vmatprep.subr.bf16.mxu1 %v2314_v49  ;;  %1663 = vmatprep.mubr.bf16.mxu0 %v2411_v12 }
  0xba   : > { %1704 = vmatprep.mubr.bf16.mxu1 %v2411_v12 }
  0xbb   : > { %1634 = vmatpush1.bf16.msra.mxu0 %v2309_v50 }
  0xbc   : > { %1675 = vmatpush1.bf16.msra.mxu1 %v2312_v51  ;;  %1635 = vmatprep.subr.bf16.mxu0 %v2317_v52 }
  0xbd   : > { %1676 = vmatprep.subr.bf16.mxu1 %v2320_v53 }
  0xbf   : > { %1636 = vmatpush1.bf16.msra.mxu0 %v2315_v54 }
  0xc0   : > { %1677 = vmatpush1.bf16.msra.mxu1 %v2318_v55  ;;  %1637 = vmatprep.subr.bf16.mxu0 %v2323_v56 }
  0xc1   : > { %1678 = vmatprep.subr.bf16.mxu1 %v2326_v57 }
  0xc3   : > { %1638 = vmatpush1.bf16.msra.mxu0 %v2321_v58 }
  0xc4   : > { %1679 = vmatpush1.bf16.msra.mxu1 %v2324_v59  ;;  %1639 = vmatprep.subr.bf16.mxu0 %v2329_v60 }
  0xc5   : > { %1680 = vmatprep.subr.bf16.mxu1 %v2332_v61 }
  0xc7   : > { %1640 = vmatpush1.bf16.msra.mxu0 %v2327_v62 }
  0xc8   : > { %1681 = vmatpush1.bf16.msra.mxu1 %v2330_v63  ;;  %1641 = vmatprep.subr.bf16.mxu0 %v2335_v0 }
  0xc9   : > { %1682 = vmatprep.subr.bf16.mxu1 %v2338_v1 }
  0xcb   : > { %1642 = vmatpush1.bf16.msra.mxu0 %v2333_v2 }
  0xcc   : > { %1683 = vmatpush1.bf16.msra.mxu1 %v2336_v3  ;;  %2138 = vmatprep.subr.msk.bf16.mxu0 %vm1324_vm0, %v2339_v4 }
  0xcd   : > { %2140 = vmatprep.subr.msk.bf16.mxu1 %vm1324_vm0, %v2341_v5 }
  0xcf   : > { %1644 = vmatpush1.bf16.msra.mxu0 %v1362_v8 }
  0xd0   : > { %1685 = vmatpush1.bf16.msra.mxu1 %v1368_v9  ;;  %1713 = vmatprep.subr.bf16.mxu0 %v2347_v10 }
  0xd1   : > { %1754 = vmatprep.subr.bf16.mxu1 %v2350_v11 }
  0xd2   : > { %2139 = vmatmul.mubr.msk.bf16.vlgmr.msra.gmra.mrb[12].mxu0 %vm1320_vm1, %v2806_v47 }
  0xd3   : > { %2141 = vmatmul.mubr.msk.bf16.vlgmr.msra.gmra.mrb[12].mxu1 %vm1320_vm1, %v2806_v47  ;;  %1714 = vmatpush1.bf16.msra.mxu0 %v2345_v13 }
  0xd4   : > { %1755 = vmatpush1.bf16.msra.mxu1 %v2348_v14  ;;  %1715 = vmatprep.subr.bf16.mxu0 %v2353_v15 }
  0xd5   : > { %1756 = vmatprep.subr.bf16.mxu1 %v2356_v16  ;;  %1745 = vmatprep.mubr.bf16.mxu0 %v2411_v12 }
  0xd6   : > { %1786 = vmatprep.mubr.bf16.mxu1 %v2411_v12  ;;  %v2371_v12 = vld [vmem:[%s2767_s10 + $0x2c4] ss:$80 sps:$4 sm:$0xff]  }
  0xd7   : > { %1716 = vmatpush1.bf16.msra.mxu0 %v2351_v17 }
  0xd8   : > { %1757 = vmatpush1.bf16.msra.mxu1 %v2354_v18  ;;  %1717 = vmatprep.subr.bf16.mxu0 %v2359_v19 }
  0xd9   : > { %1758 = vmatprep.subr.bf16.mxu1 %v2362_v20 }
  0xdb   : > { %1718 = vmatpush1.bf16.msra.mxu0 %v2357_v21 }
  0xdc   : > { %1759 = vmatpush1.bf16.msra.mxu1 %v2360_v22  ;;  %1719 = vmatprep.subr.bf16.mxu0 %v2365_v23 }
  0xdd   : > { %1760 = vmatprep.subr.bf16.mxu1 %v2368_v24 }
  0xde   : > { %v2964_v40 = vpop.permute.xlu0 %1798 }
  0xdf   : > { %1720 = vmatpush1.bf16.msra.mxu0 %v2363_v25 }
  0xe0   : > { %1761 = vmatpush1.bf16.msra.mxu1 %v2366_v26  ;;  %1721 = vmatprep.subr.bf16.mxu0 %v2371_v12 }
  0xe1   : > { %1762 = vmatprep.subr.bf16.mxu1 %v2374_v27 }
  0xe2   : > { %v2966_v41 = vpop.permute.xlu0 %1824 }
  0xe3   : > { %1722 = vmatpush1.bf16.msra.mxu0 %v2369_v28 }
  0xe4   : > { %1763 = vmatpush1.bf16.msra.mxu1 %v2372_v29  ;;  %1723 = vmatprep.subr.bf16.mxu0 %v2377_v30 }
  0xe5   : > { %1764 = vmatprep.subr.bf16.mxu1 %v2380_v31 }
  0xe7   : > { %1724 = vmatpush1.bf16.msra.mxu0 %v2375_v32 }
  0xe8   : > { %1765 = vmatpush1.bf16.msra.mxu1 %v2378_v33  ;;  %2142 = vmatprep.subr.msk.bf16.mxu0 %vm1324_vm0, %v2381_v34 }
  0xe9   : > { %2144 = vmatprep.subr.msk.bf16.mxu1 %vm1324_vm0, %v2383_v35 }
  0xeb   : > { %1726 = vmatpush1.bf16.msra.mxu0 %v1374_v38 }
  0xec   : > { %1767 = vmatpush1.bf16.msra.mxu1 %v1380_v39 }
  0xee   : > { %2143 = vmatmul.mubr.msk.bf16.vlgmr.msra.gmra.mrb[16].mxu0 %vm1320_vm1, %v2806_v47 }
  0xef   : > { %2145 = vmatmul.mubr.msk.bf16.vlgmr.msra.gmra.mrb[16].mxu1 %vm1320_vm1, %v2806_v47 }
 0x151   : > { %v1419_v42 = vpop.f32.mrb[0].mxu0 }
 0x152   : > { %v1460_v43 = vpop.f32.mrb[0].mxu1  ;;  %v1801_v44 = vmul.f32 %v2964_v40, %v1419_v42  ;;  %v1421_v46 = vpop.f32.mrb[1].mxu0 }
 0x153   : > { %v1803_v45 = vmul.f32 %v2964_v40, %v1460_v43  ;;  %v1462_v48 = vpop.f32.mrb[1].mxu1  ;;  %v1802_v49 = vmul.f32 %v2964_v40, %v1421_v46  ;;  %v1423_v50 = vpop.f32.mrb[2].mxu0 }
 0x154   : > { %v1804_v47 = vmul.f32 %v2964_v40, %v1462_v48  ;;  %v1464_v51 = vpop.f32.mrb[2].mxu1  ;;  %v1424_v52 = vpop.f32.mrb[3].mxu0  ;;  %v1827_v54 = vadd.f32 %v2966_v41, %v1801_v44 }
 0x155   : > { %v1465_v53 = vpop.f32.mrb[3].mxu1  ;;  %v1829_v55 = vadd.f32 %v2966_v41, %v1803_v45  ;;  %v1828_v56 = vadd.f32 %v2966_v41, %v1802_v49 }
 0x156   : > { %v1830_v57 = vadd.f32 %v2966_v41, %v1804_v47  ;;  %v1847_v58 = vmax.f32 %v1827_v54, 0.0 }
 0x157   : > { %v1849_v59 = vmax.f32 %v1829_v55, 0.0  ;;  %v1848_v60 = vmax.f32 %v1828_v56, 0.0 }
 0x158   : > { %v1850_v61 = vmax.f32 %v1830_v57, 0.0 }
 0x159   : > { %v1887_v62 = vcombine.low %v1847_v58, %v1848_v60 }
 0x15a   : > { %v1888_v63 = vcombine.low %v1849_v59, %v1850_v61 }
 0x15b   : > { %1907 = vst [vmem:[%s2979_s18] sm:$0xff] %v1887_v62 }
 0x15c   : > { %1908 = vst [vmem:[%s2979_s18 + $0x8] sm:$0xff] %v1888_v63 }
 0x16d   : > { %v1501_v0 = vpop.f32.mrb[4].mxu0 }
 0x16e   : > { %v1542_v1 = vpop.f32.mrb[4].mxu1  ;;  %v1805_v2 = vmul.f32 %v2964_v40, %v1501_v0  ;;  %v1503_v4 = vpop.f32.mrb[5].mxu0 }
 0x16f   : > { %v1807_v3 = vmul.f32 %v2964_v40, %v1542_v1  ;;  %v1544_v5 = vpop.f32.mrb[5].mxu1  ;;  %v1806_v6 = vmul.f32 %v2964_v40, %v1503_v4  ;;  %v1505_v8 = vpop.f32.mrb[6].mxu0 }
 0x170   : > { %v1808_v7 = vmul.f32 %v2964_v40, %v1544_v5  ;;  %v1546_v9 = vpop.f32.mrb[6].mxu1  ;;  %v1831_v10 = vadd.f32 %v2966_v41, %v1805_v2  ;;  %v1506_v13 = vpop.f32.mrb[7].mxu0 }
 0x171   : > { %v1833_v11 = vadd.f32 %v2966_v41, %v1807_v3  ;;  %v1547_v14 = vpop.f32.mrb[7].mxu1  ;;  %v1832_v15 = vadd.f32 %v2966_v41, %v1806_v6 }
 0x172   : > { %v1834_v16 = vadd.f32 %v2966_v41, %v1808_v7  ;;  %v1851_v17 = vmax.f32 %v1831_v10, 0.0 }
 0x173   : > { %v1853_v18 = vmax.f32 %v1833_v11, 0.0  ;;  %v1852_v19 = vmax.f32 %v1832_v15, 0.0 }
 0x174   : > { %v1854_v20 = vmax.f32 %v1834_v16, 0.0 }
 0x175   : > { %v1889_v21 = vcombine.low %v1851_v17, %v1852_v19 }
 0x176   : > { %v1890_v22 = vcombine.low %v1853_v18, %v1854_v20 }
 0x177   : > { %1909 = vst [vmem:[%s2979_s18 + $0x10] sm:$0xff] %v1889_v21 }
 0x178   : > { %1910 = vst [vmem:[%s2979_s18 + $0x18] sm:$0xff] %v1890_v22 }
 0x189   : > { %v1583_v23 = vpop.f32.mrb[8].mxu0 }
 0x18a   : > { %v1624_v24 = vpop.f32.mrb[8].mxu1  ;;  %v1809_v25 = vmul.f32 %v2964_v40, %v1583_v23  ;;  %v1585_v12 = vpop.f32.mrb[9].mxu0 }
 0x18b   : > { %v1811_v26 = vmul.f32 %v2964_v40, %v1624_v24  ;;  %v1626_v27 = vpop.f32.mrb[9].mxu1  ;;  %v1810_v28 = vmul.f32 %v2964_v40, %v1585_v12  ;;  %v1587_v30 = vpop.f32.mrb[10].mxu0 }
 0x18c   : > { %v1812_v29 = vmul.f32 %v2964_v40, %v1626_v27  ;;  %v1628_v31 = vpop.f32.mrb[10].mxu1  ;;  %v1835_v32 = vadd.f32 %v2966_v41, %v1809_v25  ;;  %v1588_v34 = vpop.f32.mrb[11].mxu0 }
 0x18d   : > { %v1837_v33 = vadd.f32 %v2966_v41, %v1811_v26  ;;  %v1629_v35 = vpop.f32.mrb[11].mxu1  ;;  %v1836_v36 = vadd.f32 %v2966_v41, %v1810_v28 }
 0x18e   : > { %v1838_v37 = vadd.f32 %v2966_v41, %v1812_v29  ;;  %v1855_v38 = vmax.f32 %v1835_v32, 0.0 }
 0x18f   : > { %v1857_v39 = vmax.f32 %v1837_v33, 0.0  ;;  %v1856_v42 = vmax.f32 %v1836_v36, 0.0 }
 0x190   : > { %v1858_v43 = vmax.f32 %v1838_v37, 0.0 }
 0x191   : > { %v1891_v44 = vcombine.low %v1855_v38, %v1856_v42 }
 0x192   : > { %v1892_v45 = vcombine.low %v1857_v39, %v1858_v43 }
 0x193   : > { %1911 = vst [vmem:[%s2979_s18 + $0x20] sm:$0xff] %v1891_v44 }
 0x194   : > { %1912 = vst [vmem:[%s2979_s18 + $0x28] sm:$0xff] %v1892_v45 }
 0x1a5   : > { %v1665_v46 = vpop.f32.mrb[12].mxu0 }
 0x1a6   : > { %v1706_v48 = vpop.f32.mrb[12].mxu1  ;;  %v1813_v49 = vmul.f32 %v2964_v40, %v1665_v46  ;;  %v1667_v50 = vpop.f32.mrb[13].mxu0 }
 0x1a7   : > { %v1815_v47 = vmul.f32 %v2964_v40, %v1706_v48  ;;  %v1708_v51 = vpop.f32.mrb[13].mxu1  ;;  %v1814_v52 = vmul.f32 %v2964_v40, %v1667_v50  ;;  %v1669_v54 = vpop.f32.mrb[14].mxu0 }
 0x1a8   : > { %v1816_v53 = vmul.f32 %v2964_v40, %v1708_v51  ;;  %v1710_v55 = vpop.f32.mrb[14].mxu1  ;;  %v1839_v56 = vadd.f32 %v2966_v41, %v1813_v49  ;;  %v1670_v58 = vpop.f32.mrb[15].mxu0 }
 0x1a9   : > { %v1841_v57 = vadd.f32 %v2966_v41, %v1815_v47  ;;  %v1711_v59 = vpop.f32.mrb[15].mxu1  ;;  %v1840_v60 = vadd.f32 %v2966_v41, %v1814_v52 }
 0x1aa   : > { %v1842_v61 = vadd.f32 %v2966_v41, %v1816_v53  ;;  %v1859_v62 = vmax.f32 %v1839_v56, 0.0 }
 0x1ab   : > { %v1861_v63 = vmax.f32 %v1841_v57, 0.0  ;;  %v1860_v0 = vmax.f32 %v1840_v60, 0.0 }
 0x1ac   : > { %v1862_v1 = vmax.f32 %v1842_v61, 0.0 }
 0x1ad   : > { %v1893_v2 = vcombine.low %v1859_v62, %v1860_v0 }
 0x1ae   : > { %v1894_v3 = vcombine.low %v1861_v63, %v1862_v1 }
 0x1af   : > { %1913 = vst [vmem:[%s2979_s18 + $0x30] sm:$0xff] %v1893_v2 }
 0x1b0   : > { %1914 = vst [vmem:[%s2979_s18 + $0x38] sm:$0xff] %v1894_v3 }
 0x1c1   : > { %v1747_v4 = vpop.f32.mrb[16].mxu0 }
 0x1c2   : > { %v1788_v5 = vpop.f32.mrb[16].mxu1  ;;  %v1817_v6 = vmul.f32 %v2964_v40, %v1747_v4  ;;  %v1749_v8 = vpop.f32.mrb[17].mxu0 }
 0x1c3   : > { %v1819_v7 = vmul.f32 %v2964_v40, %v1788_v5  ;;  %v1790_v9 = vpop.f32.mrb[17].mxu1  ;;  %v1818_v10 = vmul.f32 %v2964_v40, %v1749_v8  ;;  %v1751_v13 = vpop.f32.mrb[18].mxu0 }
 0x1c4   : > { %v1820_v11 = vmul.f32 %v2964_v40, %v1790_v9  ;;  %v1792_v14 = vpop.f32.mrb[18].mxu1  ;;  %v1843_v15 = vadd.f32 %v2966_v41, %v1817_v6  ;;  %v1752_v17 = vpop.f32.mrb[19].mxu0 }
 0x1c5   : > { %v1845_v16 = vadd.f32 %v2966_v41, %v1819_v7  ;;  %v1793_v18 = vpop.f32.mrb[19].mxu1  ;;  %v1844_v19 = vadd.f32 %v2966_v41, %v1818_v10 }
 0x1c6   : > { %v1846_v20 = vadd.f32 %v2966_v41, %v1820_v11  ;;  %v1863_v21 = vmax.f32 %v1843_v15, 0.0 }
 0x1c7   : > { %v1865_v22 = vmax.f32 %v1845_v16, 0.0  ;;  %v1864_v23 = vmax.f32 %v1844_v19, 0.0 }
 0x1c8   : > { %v1866_v24 = vmax.f32 %v1846_v20, 0.0 }
 0x1c9   : > { %v1895_v25 = vcombine.low %v1863_v21, %v1864_v23 }
 0x1ca   : > { %v1896_v26 = vcombine.low %v1865_v22, %v1866_v24 }
 0x1cb   : > { %1915 = vst [vmem:[%s2979_s18 + $0x40] sm:$0xff] %v1895_v25 }
 0x1cc   : > { %1916 = vst [vmem:[%s2979_s18 + $0x48] sm:$0xff] %v1896_v26 }
 0x1cd PF: > { %p11_p9 = scmp.ge.s32.totalorder %s2454_s19, 4   ;;  %s3038_s15 = smov %s2405_s16 }
 0x1ce   : > { %s3039_s16 = smov %s2463_s22  ;;  %s3040_s17 = smov %s2454_s19 }
 0x1cf   :  { %13 = sbr.rel (!%p11_p9) target bundleno = 2 (0x2), region = 94 }

// kernel: decoder_forward.65
= control target key start
LH: loop header
LB: loop body
LE: loop exit
PB: predicated region body
PF: predicated region fallthrough
CT: control target
= control target key end

     0   :  { %s1031_s15 = smov 0   ;;  %s1165_s0 = inlined_call_operand.vmem [shape: bf16[4,4], index: 0, kind: input, shape index: {}]   ;;  %s1166_s1 = inlined_call_operand.vmem [shape: bf16[4,5120], index: 1, kind: input, shape index: {}]   ;;  %s1167_s2 = inlined_call_operand.vmem [shape: f32[4,1], index: 2, kind: input, shape index: {}]   ;;  %s1168_s3 = inlined_call_operand.vmem [shape: f32[4,1], index: 3, kind: input, shape index: {}]   ;;  %s1169_s4 = inlined_call_operand.vmem [shape: f32[4,5120], index: 4, kind: output, shape index: {}]  }
   0x1 LB: > { %s951_s16 = sadd.s32 4294967295, %s1002_s15   ;;  %p955_p0 = scmp.ge.s32.totalorder %s1002_s15, 1  ;;  %s1002_s15 = sphi %s1031_s15, %s14_s15  }
   0x2   : > { %p163_p1 = scmp.lt.s32.totalorder %s1002_s15, 3 }
   0x4   : > { %p164_p2 = pnand %p955_p0, %p163_p1 }
   0x5   : > { %s189_s17 = smul.u32 (!%p164_p2), 20, %s951_s16  ;;  %v217_v0 = vlaneseq (!%p164_p2)  ;;  %v1004_v1 = vmov (!%p164_p2), 1983009808   ;;  %v1005_v3 = vmov (!%p164_p2), 0   ;;  %v773_v4 = vld [vmem:[%s1167_s2] sm:$0xf] (!%p164_p2) }
   0x6   : > { %167 = sbr.rel (%p164_p2) target bundleno = 281 (0x119), region = 36  ;;  %v215_v2 = vunpack.c.l.s4 (!%p164_p2), %v1004_v1  ;;  %395 = vmatprep.mubr.bf16.mxu0 (!%p164_p2), %v1005_v3  ;;  %436 = vmatprep.mubr.bf16.mxu1 (!%p164_p2), %v1005_v3  ;;  %v799_v7 = vld [vmem:[%s1168_s3] sm:$0xf] (!%p164_p2)  ;;  %vm302_vm0 = vcmask (!%p164_p2), 1041408   ;;  %vm298_vm1 = vcmask (!%p164_p2), 31744  }
   0x7   : > { %p190_p3 = scmp.lt.s32.totalorder (!%p164_p2), %s189_s17, 39  ;;  %v218_v5 = vshrl.u32 (!%p164_p2), %v217_v0, 7  ;;  %990 = vset.pattern.permute.xlu0 (!%p164_p2), %v1005_v3  ;;  %v202_v26 = vld [vmem:[%s1165_s0] sm:$0x3] (!%p164_p2) }
   0x8   : > { %v216_v6 = vunpack.c.0.s8 (!%p164_p2), %v215_v2  ;;  %776 = vperm.xlu0 (!%p164_p2), %990, %v773_v4  }
   0xa   : > { %v219_v8 = vsub.s32 (!%p164_p2), %v216_v6, %v218_v5 }
   0xc   : > { %802 = vperm.xlu0 (!%p164_p2), %990, %v799_v7  }
   0xd   : > { %s1171_s17 = smov (!%p190_p3, %s189_s17), 39 }
   0xe   : > { %s956_s22 = sshll.u32 %s1171_s17, 1  ;;  %s957_s28 = sshll.u32 %s1171_s17, 2 }
   0xf   : > { %s1054_s25 = scalar_lea.vmem %s1166_s1, %s956_s22  ;;  %s1118_s5 = scalar_lea.vmem %s1169_s4, %s957_s28 }
  0x10   : > { %v203_v9 = vld [vmem:[%s1054_s25] sm:$0xff]  ;;  %v204_v10 = vld [vmem:[%s1054_s25 + $0x8] sm:$0xff]  ;;  %v205_v11 = vld [vmem:[%s1054_s25 + $0x10] sm:$0xff] }
  0x11   : > { %v220_v12 = vrot.slane %v203_v9, %v219_v8  ;;  %v213_v13 = vcombine.high %v203_v9, %v203_v9  ;;  %v237_v14 = vrot.slane %v204_v10, %v219_v8  ;;  %v230_v15 = vcombine.high %v204_v10, %v204_v10  ;;  %v206_v28 = vld [vmem:[%s1054_s25 + $0x18] sm:$0xff]  ;;  %v207_v36 = vld [vmem:[%s1054_s25 + $0x20] sm:$0xff] }
  0x12   : > { %v254_v16 = vrot.slane %v205_v11, %v219_v8  ;;  %v247_v17 = vcombine.high %v205_v11, %v205_v11  ;;  %v264_v33 = vcombine.high %v206_v28, %v206_v28  ;;  %v271_v34 = vrot.slane %v206_v28, %v219_v8 }
  0x13   : > { %v228_v18 = vcombine.high %v220_v12, %v220_v12  ;;  %v304_v19 = vsel %vm302_vm0, %v220_v12, 0  ;;  %v227_v20 = vrot.slane %v213_v13, %v219_v8  ;;  %v245_v21 = vcombine.high %v237_v14, %v237_v14 }
  0x14   : > { %v244_v22 = vrot.slane %v230_v15, %v219_v8  ;;  %v261_v25 = vrot.slane %v247_v17, %v219_v8  ;;  %v316_v29 = vsel %vm302_vm0, %v237_v14, 0  ;;  %v262_v30 = vcombine.high %v254_v16, %v254_v16 }
  0x15   : > { %958 = vmatprep.subr.msk.bf16.mxu0 %vm302_vm0, %v228_v18  ;;  %v229_v23 = vcombine.high %v227_v20, %v227_v20  ;;  %v310_v24 = vsel %vm302_vm0, %v227_v20, 0  ;;  %v278_v35 = vrot.slane %v264_v33, %v219_v8  ;;  %v328_v37 = vsel %vm302_vm0, %v254_v16, 0 }
  0x16   : > { %364 = vmatpush1.bf16.msra.mxu0 %v304_v19  ;;  %v246_v27 = vcombine.high %v244_v22, %v244_v22  ;;  %v322_v31 = vsel %vm302_vm0, %v244_v22, 0  ;;  %v263_v32 = vcombine.high %v261_v25, %v261_v25  ;;  %v279_v38 = vcombine.high %v271_v34, %v271_v34 }
  0x17   : > { %960 = vmatprep.subr.msk.bf16.mxu1 %vm302_vm0, %v229_v23  ;;  %962 = vmatprep.subr.msk.bf16.mxu0 %vm302_vm0, %v245_v21  ;;  %v334_v39 = vsel %vm302_vm0, %v261_v25, 0  ;;  %v280_v40 = vcombine.high %v278_v35, %v278_v35  ;;  %v281_v41 = vcombine.high %v207_v36, %v207_v36  ;;  %v288_v42 = vrot.slane %v207_v36, %v219_v8 }
  0x18   : > { %405 = vmatpush1.bf16.msra.mxu1 %v310_v24  ;;  %v340_v44 = vsel %vm302_vm0, %v271_v34, 0  ;;  %v346_v46 = vsel %vm302_vm0, %v278_v35, 0 }
  0x19   : > { %959 = vmatmul.mubr.msk.bf16.vlgmr.msra.gmra.mrb[0].mxu0 %vm298_vm1, %v202_v26  ;;  %964 = vmatprep.subr.msk.bf16.mxu1 %vm302_vm0, %v246_v27  ;;  %v295_v43 = vrot.slane %v281_v41, %v219_v8  ;;  %v296_v45 = vcombine.high %v288_v42, %v288_v42  ;;  %v352_v48 = vsel %vm302_vm0, %v288_v42, 0 }
  0x1a   : > { %446 = vmatpush1.bf16.msra.mxu0 %v316_v29  ;;  %477 = vmatprep.mubr.bf16.mxu0 %v1005_v3 }
  0x1b   : > { %961 = vmatmul.mubr.msk.bf16.vlgmr.msra.gmra.mrb[0].mxu1 %vm298_vm1, %v202_v26  ;;  %966 = vmatprep.subr.msk.bf16.mxu0 %vm302_vm0, %v262_v30  ;;  %v297_v47 = vcombine.high %v295_v43, %v295_v43  ;;  %v358_v49 = vsel %vm302_vm0, %v295_v43, 0 }
  0x1c   : > { %487 = vmatpush1.bf16.msra.mxu1 %v322_v31  ;;  %518 = vmatprep.mubr.bf16.mxu1 %v1005_v3 }
  0x1d   : > { %968 = vmatprep.subr.msk.bf16.mxu1 %vm302_vm0, %v263_v32 }
  0x21   : > { %963 = vmatmul.mubr.msk.bf16.vlgmr.msra.gmra.mrb[4].mxu0 %vm298_vm1, %v202_v26 }
  0x22   : > { %528 = vmatpush1.bf16.msra.mxu0 %v328_v37  ;;  %559 = vmatprep.mubr.bf16.mxu0 %v1005_v3 }
  0x23   : > { %965 = vmatmul.mubr.msk.bf16.vlgmr.msra.gmra.mrb[4].mxu1 %vm298_vm1, %v202_v26  ;;  %970 = vmatprep.subr.msk.bf16.mxu0 %vm302_vm0, %v279_v38 }
  0x24   : > { %569 = vmatpush1.bf16.msra.mxu1 %v334_v39  ;;  %600 = vmatprep.mubr.bf16.mxu1 %v1005_v3 }
  0x25   : > { %972 = vmatprep.subr.msk.bf16.mxu1 %vm302_vm0, %v280_v40 }
  0x29   : > { %967 = vmatmul.mubr.msk.bf16.vlgmr.msra.gmra.mrb[8].mxu0 %vm298_vm1, %v202_v26 }
  0x2a   : > { %610 = vmatpush1.bf16.msra.mxu0 %v340_v44  ;;  %641 = vmatprep.mubr.bf16.mxu0 %v1005_v3 }
  0x2b   : > { %969 = vmatmul.mubr.msk.bf16.vlgmr.msra.gmra.mrb[8].mxu1 %vm298_vm1, %v202_v26  ;;  %974 = vmatprep.subr.msk.bf16.mxu0 %vm302_vm0, %v296_v45 }
  0x2c   : > { %651 = vmatpush1.bf16.msra.mxu1 %v346_v46  ;;  %682 = vmatprep.mubr.bf16.mxu1 %v1005_v3 }
  0x2d   : > { %976 = vmatprep.subr.msk.bf16.mxu1 %vm302_vm0, %v297_v47 }
  0x31   : > { %971 = vmatmul.mubr.msk.bf16.vlgmr.msra.gmra.mrb[12].mxu0 %vm298_vm1, %v202_v26 }
  0x32   : > { %692 = vmatpush1.bf16.msra.mxu0 %v352_v48  ;;  %723 = vmatprep.mubr.bf16.mxu0 %v1005_v3 }
  0x33   : > { %973 = vmatmul.mubr.msk.bf16.vlgmr.msra.gmra.mrb[12].mxu1 %vm298_vm1, %v202_v26 }
  0x34   : > { %733 = vmatpush1.bf16.msra.mxu1 %v358_v49  ;;  %764 = vmatprep.mubr.bf16.mxu1 %v1005_v3 }
  0x39   : > { %975 = vmatmul.mubr.msk.bf16.vlgmr.msra.gmra.mrb[16].mxu0 %vm298_vm1, %v202_v26 }
  0x3b   : > { %977 = vmatmul.mubr.msk.bf16.vlgmr.msra.gmra.mrb[16].mxu1 %vm298_vm1, %v202_v26 }
  0x87   : > { %v1102_v50 = vpop.permute.xlu0 %776 }
  0x8b   : > { %v1104_v52 = vpop.permute.xlu0 %802 }
  0xec   : > { %v397_v51 = vpop.f32.mrb[0].mxu0 }
  0xed   : > { %v399_v53 = vpop.f32.mrb[1].mxu0  ;;  %v779_v54 = vmul.f32 %v1102_v50, %v397_v51 }
  0xee   : > { %v780_v55 = vmul.f32 %v1102_v50, %v399_v53  ;;  %v401_v56 = vpop.f32.mrb[2].mxu0  ;;  %v438_v57 = vpop.f32.mrb[0].mxu1 }
  0xef   : > { %v781_v58 = vmul.f32 %v1102_v50, %v438_v57  ;;  %v402_v59 = vpop.f32.mrb[3].mxu0  ;;  %v440_v60 = vpop.f32.mrb[1].mxu1  ;;  %v805_v61 = vadd.f32 %v1104_v52, %v779_v54 }
  0xf0   : > { %v782_v62 = vmul.f32 %v1102_v50, %v440_v60  ;;  %v442_v63 = vpop.f32.mrb[2].mxu1  ;;  %v806_v0 = vadd.f32 %v1104_v52, %v780_v55 }
  0xf1   : > { %v807_v1 = vadd.f32 %v1104_v52, %v781_v58  ;;  %v825_v2 = vmax.f32 %v805_v61, 0.0  ;;  %v443_v3 = vpop.f32.mrb[3].mxu1 }
  0xf2   : > { %v808_v4 = vadd.f32 %v1104_v52, %v782_v62  ;;  %v826_v5 = vmax.f32 %v806_v0, 0.0 }
  0xf3   : > { %v827_v6 = vmax.f32 %v807_v1, 0.0 }
  0xf4   : > { %v828_v7 = vmax.f32 %v808_v4, 0.0  ;;  %v865_v8 = vcombine.low %v825_v2, %v826_v5  ;;  %v479_v9 = vpop.f32.mrb[4].mxu0 }
  0xf5   : > { %v783_v10 = vmul.f32 %v1102_v50, %v479_v9  ;;  %v481_v11 = vpop.f32.mrb[5].mxu0 }
  0xf6   : > { %v866_v12 = vcombine.low %v827_v6, %v828_v7  ;;  %885 = vst [vmem:[%s1118_s5] sm:$0xff] %v865_v8  ;;  %v784_v13 = vmul.f32 %v1102_v50, %v481_v11  ;;  %v483_v14 = vpop.f32.mrb[6].mxu0  ;;  %v520_v15 = vpop.f32.mrb[4].mxu1 }
  0xf7   : > { %v809_v16 = vadd.f32 %v1104_v52, %v783_v10  ;;  %v785_v17 = vmul.f32 %v1102_v50, %v520_v15  ;;  %v484_v18 = vpop.f32.mrb[7].mxu0  ;;  %v522_v19 = vpop.f32.mrb[5].mxu1 }
  0xf8   : > { %886 = vst [vmem:[%s1118_s5 + $0x8] sm:$0xff] %v866_v12  ;;  %v810_v20 = vadd.f32 %v1104_v52, %v784_v13  ;;  %v786_v21 = vmul.f32 %v1102_v50, %v522_v19  ;;  %v524_v22 = vpop.f32.mrb[6].mxu1 }
  0xf9   : > { %v829_v23 = vmax.f32 %v809_v16, 0.0  ;;  %v811_v24 = vadd.f32 %v1104_v52, %v785_v17  ;;  %v525_v25 = vpop.f32.mrb[7].mxu1 }
  0xfa   : > { %v830_v26 = vmax.f32 %v810_v20, 0.0  ;;  %v812_v27 = vadd.f32 %v1104_v52, %v786_v21 }
  0xfb   : > { %v831_v28 = vmax.f32 %v811_v24, 0.0 }
  0xfc   : > { %v867_v29 = vcombine.low %v829_v23, %v830_v26  ;;  %v832_v30 = vmax.f32 %v812_v27, 0.0  ;;  %v561_v31 = vpop.f32.mrb[8].mxu0 }
  0xfd   : > { %v787_v32 = vmul.f32 %v1102_v50, %v561_v31  ;;  %v563_v33 = vpop.f32.mrb[9].mxu0 }
  0xfe   : > { %887 = vst [vmem:[%s1118_s5 + $0x10] sm:$0xff] %v867_v29  ;;  %v868_v34 = vcombine.low %v831_v28, %v832_v30  ;;  %v788_v35 = vmul.f32 %v1102_v50, %v563_v33  ;;  %v565_v36 = vpop.f32.mrb[10].mxu0  ;;  %v602_v37 = vpop.f32.mrb[8].mxu1 }
  0xff   : > { %v813_v38 = vadd.f32 %v1104_v52, %v787_v32  ;;  %v789_v39 = vmul.f32 %v1102_v50, %v602_v37  ;;  %v566_v40 = vpop.f32.mrb[11].mxu0  ;;  %v604_v41 = vpop.f32.mrb[9].mxu1 }
 0x100   : > { %888 = vst [vmem:[%s1118_s5 + $0x18] sm:$0xff] %v868_v34  ;;  %v814_v42 = vadd.f32 %v1104_v52, %v788_v35  ;;  %v790_v43 = vmul.f32 %v1102_v50, %v604_v41  ;;  %v606_v44 = vpop.f32.mrb[10].mxu1 }
 0x101   : > { %v833_v45 = vmax.f32 %v813_v38, 0.0  ;;  %v815_v46 = vadd.f32 %v1104_v52, %v789_v39  ;;  %v607_v47 = vpop.f32.mrb[11].mxu1 }
 0x102   : > { %v834_v48 = vmax.f32 %v814_v42, 0.0  ;;  %v816_v49 = vadd.f32 %v1104_v52, %v790_v43 }
 0x103   : > { %v835_v51 = vmax.f32 %v815_v46, 0.0 }
 0x104   : > { %v869_v53 = vcombine.low %v833_v45, %v834_v48  ;;  %v836_v54 = vmax.f32 %v816_v49, 0.0  ;;  %v643_v55 = vpop.f32.mrb[12].mxu0 }
 0x105   : > { %v791_v56 = vmul.f32 %v1102_v50, %v643_v55  ;;  %v645_v57 = vpop.f32.mrb[13].mxu0 }
 0x106   : > { %889 = vst [vmem:[%s1118_s5 + $0x20] sm:$0xff] %v869_v53  ;;  %v870_v58 = vcombine.low %v835_v51, %v836_v54  ;;  %v792_v59 = vmul.f32 %v1102_v50, %v645_v57  ;;  %v647_v60 = vpop.f32.mrb[14].mxu0  ;;  %v684_v61 = vpop.f32.mrb[12].mxu1 }
 0x107   : > { %v817_v62 = vadd.f32 %v1104_v52, %v791_v56  ;;  %v793_v63 = vmul.f32 %v1102_v50, %v684_v61  ;;  %v648_v0 = vpop.f32.mrb[15].mxu0  ;;  %v686_v1 = vpop.f32.mrb[13].mxu1 }
 0x108   : > { %890 = vst [vmem:[%s1118_s5 + $0x28] sm:$0xff] %v870_v58  ;;  %v818_v2 = vadd.f32 %v1104_v52, %v792_v59  ;;  %v794_v3 = vmul.f32 %v1102_v50, %v686_v1  ;;  %v688_v4 = vpop.f32.mrb[14].mxu1 }
 0x109   : > { %v837_v5 = vmax.f32 %v817_v62, 0.0  ;;  %v819_v6 = vadd.f32 %v1104_v52, %v793_v63  ;;  %v689_v7 = vpop.f32.mrb[15].mxu1 }
 0x10a   : > { %v838_v8 = vmax.f32 %v818_v2, 0.0  ;;  %v820_v9 = vadd.f32 %v1104_v52, %v794_v3 }
 0x10b   : > { %v839_v10 = vmax.f32 %v819_v6, 0.0 }
 0x10c   : > { %v871_v11 = vcombine.low %v837_v5, %v838_v8  ;;  %v840_v12 = vmax.f32 %v820_v9, 0.0  ;;  %v725_v13 = vpop.f32.mrb[16].mxu0 }
 0x10d   : > { %v795_v14 = vmul.f32 %v1102_v50, %v725_v13  ;;  %v727_v15 = vpop.f32.mrb[17].mxu0 }
 0x10e   : > { %891 = vst [vmem:[%s1118_s5 + $0x30] sm:$0xff] %v871_v11  ;;  %v872_v16 = vcombine.low %v839_v10, %v840_v12  ;;  %v796_v17 = vmul.f32 %v1102_v50, %v727_v15  ;;  %v729_v18 = vpop.f32.mrb[18].mxu0  ;;  %v766_v19 = vpop.f32.mrb[16].mxu1 }
 0x10f   : > { %v821_v20 = vadd.f32 %v1104_v52, %v795_v14  ;;  %v797_v21 = vmul.f32 %v1102_v50, %v766_v19  ;;  %v730_v22 = vpop.f32.mrb[19].mxu0  ;;  %v768_v23 = vpop.f32.mrb[17].mxu1 }
 0x110   : > { %892 = vst [vmem:[%s1118_s5 + $0x38] sm:$0xff] %v872_v16  ;;  %v822_v24 = vadd.f32 %v1104_v52, %v796_v17  ;;  %v798_v25 = vmul.f32 %v1102_v50, %v768_v23  ;;  %v770_v26 = vpop.f32.mrb[18].mxu1 }
 0x111   : > { %v841_v27 = vmax.f32 %v821_v20, 0.0  ;;  %v823_v28 = vadd.f32 %v1104_v52, %v797_v21  ;;  %v771_v29 = vpop.f32.mrb[19].mxu1 }
 0x112   : > { %v842_v30 = vmax.f32 %v822_v24, 0.0  ;;  %v824_v31 = vadd.f32 %v1104_v52, %v798_v25 }
 0x113   : > { %v843_v32 = vmax.f32 %v823_v28, 0.0 }
 0x114   : > { %v873_v33 = vcombine.low %v841_v27, %v842_v30  ;;  %v844_v34 = vmax.f32 %v824_v31, 0.0 }
 0x116   : > { %893 = vst [vmem:[%s1118_s5 + $0x40] sm:$0xff] %v873_v33  ;;  %v874_v35 = vcombine.low %v843_v32, %v844_v34 }
 0x118   : > { %894 = vst [vmem:[%s1118_s5 + $0x48] sm:$0xff] %v874_v35 }
 0x119 PF: > { %s14_s15 = sadd.s32 1, %s1002_s15  }
 0x11a   : > { %p11_p4 = scmp.ge.s32.totalorder %s14_s15, 4  }
 0x11c   :  { %13 = sbr.rel (!%p11_p4) target bundleno = 1 (0x1), region = 66 }

// kernel: decoder_forward.67
= control target key start
LH: loop header
LB: loop body
LE: loop exit
PB: predicated region body
PF: predicated region fallthrough
CT: control target
= control target key end

     0   :  { %s398_s0 = inlined_call_operand.vmem [shape: f32[160,128], index: 0, kind: input, shape index: {}]   ;;  %s399_s1 = inlined_call_operand.vmem [shape: f32[160,128], index: 1, kind: input, shape index: {}]   ;;  %s400_s2 = inlined_call_operand.vmem [shape: f32[160,128], index: 2, kind: input, shape index: {}]   ;;  %s401_s3 = inlined_call_operand.vmem [shape: f32[160,128], index: 3, kind: output, shape index: {}]  }
   0x1   :  { %v14_v0 = vld [vmem:[%s398_s0] sm:$0xff]  ;;  %v15_v4 = vld [vmem:[%s398_s0 + $0x8] sm:$0xff]  ;;  %v16_v8 = vld [vmem:[%s398_s0 + $0x10] sm:$0xff] }
   0x2   :  { %v34_v1 = vld [vmem:[%s399_s1] sm:$0xff]  ;;  %v35_v5 = vld [vmem:[%s399_s1 + $0x8] sm:$0xff]  ;;  %v36_v9 = vld [vmem:[%s399_s1 + $0x10] sm:$0xff] }
   0x3   :  { %v54_v2 = vld [vmem:[%s400_s2] sm:$0xff]  ;;  %v55_v6 = vld [vmem:[%s400_s2 + $0x8] sm:$0xff]  ;;  %v56_v10 = vld [vmem:[%s400_s2 + $0x10] sm:$0xff] }
   0x4   :  { %v74_v3 = vmul.f32 %v54_v2, %v34_v1  ;;  %v75_v7 = vmul.f32 %v55_v6, %v35_v5  ;;  %v76_v12 = vmul.f32 %v56_v10, %v36_v9  ;;  %v17_v13 = vld [vmem:[%s398_s0 + $0x18] sm:$0xff]  ;;  %v18_v18 = vld [vmem:[%s398_s0 + $0x20] sm:$0xff]  ;;  %v19_v23 = vld [vmem:[%s398_s0 + $0x28] sm:$0xff] }
   0x5   :  { %v37_v14 = vld [vmem:[%s399_s1 + $0x18] sm:$0xff]  ;;  %v38_v19 = vld [vmem:[%s399_s1 + $0x20] sm:$0xff]  ;;  %v39_v24 = vld [vmem:[%s399_s1 + $0x28] sm:$0xff] }
   0x6   :  { %v94_v11 = vadd.f32 %v74_v3, %v14_v0  ;;  %v57_v15 = vld [vmem:[%s400_s2 + $0x18] sm:$0xff]  ;;  %v95_v16 = vadd.f32 %v75_v7, %v15_v4  ;;  %v58_v20 = vld [vmem:[%s400_s2 + $0x20] sm:$0xff]  ;;  %v96_v21 = vadd.f32 %v76_v12, %v16_v8  ;;  %v59_v25 = vld [vmem:[%s400_s2 + $0x28] sm:$0xff] }
   0x7   :  { %v77_v17 = vmul.f32 %v57_v15, %v37_v14  ;;  %v78_v22 = vmul.f32 %v58_v20, %v38_v19  ;;  %v79_v27 = vmul.f32 %v59_v25, %v39_v24  ;;  %v20_v28 = vld [vmem:[%s398_s0 + $0x30] sm:$0xff]  ;;  %v21_v33 = vld [vmem:[%s398_s0 + $0x38] sm:$0xff]  ;;  %v22_v38 = vld [vmem:[%s398_s0 + $0x40] sm:$0xff] }
   0x8   :  { %114 = vst [vmem:[%s401_s3] sm:$0xff] %v94_v11  ;;  %115 = vst [vmem:[%s401_s3 + $0x8] sm:$0xff] %v95_v16  ;;  %v40_v29 = vld [vmem:[%s399_s1 + $0x30] sm:$0xff]  ;;  %v41_v34 = vld [vmem:[%s399_s1 + $0x38] sm:$0xff] }
   0x9   :  { %v97_v26 = vadd.f32 %v77_v17, %v17_v13  ;;  %v60_v30 = vld [vmem:[%s400_s2 + $0x30] sm:$0xff]  ;;  %116 = vst [vmem:[%s401_s3 + $0x10] sm:$0xff] %v96_v21  ;;  %v98_v31 = vadd.f32 %v78_v22, %v18_v18  ;;  %v61_v35 = vld [vmem:[%s400_s2 + $0x38] sm:$0xff]  ;;  %v99_v36 = vadd.f32 %v79_v27, %v19_v23  ;;  %v42_v39 = vld [vmem:[%s399_s1 + $0x40] sm:$0xff] }
   0xa   :  { %v80_v32 = vmul.f32 %v60_v30, %v40_v29  ;;  %v81_v37 = vmul.f32 %v61_v35, %v41_v34  ;;  %v62_v40 = vld [vmem:[%s400_s2 + $0x40] sm:$0xff]  ;;  %v23_v43 = vld [vmem:[%s398_s0 + $0x48] sm:$0xff]  ;;  %v24_v48 = vld [vmem:[%s398_s0 + $0x50] sm:$0xff] }
   0xb   :  { %117 = vst [vmem:[%s401_s3 + $0x18] sm:$0xff] %v97_v26  ;;  %118 = vst [vmem:[%s401_s3 + $0x20] sm:$0xff] %v98_v31  ;;  %v82_v42 = vmul.f32 %v62_v40, %v42_v39  ;;  %v43_v44 = vld [vmem:[%s399_s1 + $0x48] sm:$0xff]  ;;  %v44_v49 = vld [vmem:[%s399_s1 + $0x50] sm:$0xff] }
   0xc   :  { %v100_v41 = vadd.f32 %v80_v32, %v20_v28  ;;  %v63_v45 = vld [vmem:[%s400_s2 + $0x48] sm:$0xff]  ;;  %119 = vst [vmem:[%s401_s3 + $0x28] sm:$0xff] %v99_v36  ;;  %v101_v46 = vadd.f32 %v81_v37, %v21_v33  ;;  %v64_v50 = vld [vmem:[%s400_s2 + $0x50] sm:$0xff]  ;;  %v25_v53 = vld [vmem:[%s398_s0 + $0x58] sm:$0xff] }
   0xd   :  { %v83_v47 = vmul.f32 %v63_v45, %v43_v44  ;;  %v102_v51 = vadd.f32 %v82_v42, %v22_v38  ;;  %v84_v52 = vmul.f32 %v64_v50, %v44_v49  ;;  %v45_v54 = vld [vmem:[%s399_s1 + $0x58] sm:$0xff]  ;;  %v26_v58 = vld [vmem:[%s398_s0 + $0x60] sm:$0xff]  ;;  %v27_v63 = vld [vmem:[%s398_s0 + $0x68] sm:$0xff] }
   0xe   :  { %120 = vst [vmem:[%s401_s3 + $0x30] sm:$0xff] %v100_v41  ;;  %v65_v55 = vld [vmem:[%s400_s2 + $0x58] sm:$0xff]  ;;  %121 = vst [vmem:[%s401_s3 + $0x38] sm:$0xff] %v101_v46  ;;  %v46_v59 = vld [vmem:[%s399_s1 + $0x60] sm:$0xff] }
   0xf   :  { %v103_v56 = vadd.f32 %v83_v47, %v23_v43  ;;  %v85_v57 = vmul.f32 %v65_v55, %v45_v54  ;;  %v66_v60 = vld [vmem:[%s400_s2 + $0x60] sm:$0xff]  ;;  %122 = vst [vmem:[%s401_s3 + $0x40] sm:$0xff] %v102_v51  ;;  %v104_v61 = vadd.f32 %v84_v52, %v24_v48  ;;  %v47_v0 = vld [vmem:[%s399_s1 + $0x68] sm:$0xff]  ;;  %v28_v4 = vld [vmem:[%s398_s0 + $0x70] sm:$0xff] }
  0x10   :  { %v86_v62 = vmul.f32 %v66_v60, %v46_v59  ;;  %v67_v1 = vld [vmem:[%s400_s2 + $0x68] sm:$0xff]  ;;  %v48_v5 = vld [vmem:[%s399_s1 + $0x70] sm:$0xff]  ;;  %v29_v9 = vld [vmem:[%s398_s0 + $0x78] sm:$0xff] }
  0x11   :  { %123 = vst [vmem:[%s401_s3 + $0x48] sm:$0xff] %v103_v56  ;;  %v105_v2 = vadd.f32 %v85_v57, %v25_v53  ;;  %v87_v3 = vmul.f32 %v67_v1, %v47_v0  ;;  %v68_v6 = vld [vmem:[%s400_s2 + $0x70] sm:$0xff]  ;;  %124 = vst [vmem:[%s401_s3 + $0x50] sm:$0xff] %v104_v61  ;;  %v49_v10 = vld [vmem:[%s399_s1 + $0x78] sm:$0xff] }
  0x12   :  { %v106_v7 = vadd.f32 %v86_v62, %v26_v58  ;;  %v88_v8 = vmul.f32 %v68_v6, %v48_v5  ;;  %v69_v11 = vld [vmem:[%s400_s2 + $0x78] sm:$0xff]  ;;  %v30_v14 = vld [vmem:[%s398_s0 + $0x80] sm:$0xff]  ;;  %v31_v19 = vld [vmem:[%s398_s0 + $0x88] sm:$0xff] }
  0x13   :  { %125 = vst [vmem:[%s401_s3 + $0x58] sm:$0xff] %v105_v2  ;;  %v107_v12 = vadd.f32 %v87_v3, %v27_v63  ;;  %v89_v13 = vmul.f32 %v69_v11, %v49_v10  ;;  %v50_v15 = vld [vmem:[%s399_s1 + $0x80] sm:$0xff]  ;;  %v51_v20 = vld [vmem:[%s399_s1 + $0x88] sm:$0xff]  ;;  %v32_v24 = vld [vmem:[%s398_s0 + $0x90] sm:$0xff] }
  0x14   :  { %v70_v16 = vld [vmem:[%s400_s2 + $0x80] sm:$0xff]  ;;  %126 = vst [vmem:[%s401_s3 + $0x60] sm:$0xff] %v106_v7  ;;  %v108_v17 = vadd.f32 %v88_v8, %v28_v4  ;;  %v71_v21 = vld [vmem:[%s400_s2 + $0x88] sm:$0xff]  ;;  %v52_v25 = vld [vmem:[%s399_s1 + $0x90] sm:$0xff] }
  0x15   :  { %v90_v18 = vmul.f32 %v70_v16, %v50_v15  ;;  %127 = vst [vmem:[%s401_s3 + $0x68] sm:$0xff] %v107_v12  ;;  %v109_v22 = vadd.f32 %v89_v13, %v29_v9  ;;  %v91_v23 = vmul.f32 %v71_v21, %v51_v20  ;;  %v72_v26 = vld [vmem:[%s400_s2 + $0x90] sm:$0xff]  ;;  %v33_v29 = vld [vmem:[%s398_s0 + $0x98] sm:$0xff] }
  0x16   :  { %128 = vst [vmem:[%s401_s3 + $0x70] sm:$0xff] %v108_v17  ;;  %v92_v28 = vmul.f32 %v72_v26, %v52_v25  ;;  %v53_v30 = vld [vmem:[%s399_s1 + $0x98] sm:$0xff] }
  0x17   :  { %v110_v27 = vadd.f32 %v90_v18, %v30_v14  ;;  %v73_v31 = vld [vmem:[%s400_s2 + $0x98] sm:$0xff]  ;;  %129 = vst [vmem:[%s401_s3 + $0x78] sm:$0xff] %v109_v22  ;;  %v111_v32 = vadd.f32 %v91_v23, %v31_v19 }
  0x18   :  { %v93_v33 = vmul.f32 %v73_v31, %v53_v30  ;;  %v112_v34 = vadd.f32 %v92_v28, %v32_v24 }
  0x19   :  { %130 = vst [vmem:[%s401_s3 + $0x80] sm:$0xff] %v110_v27  ;;  %131 = vst [vmem:[%s401_s3 + $0x88] sm:$0xff] %v111_v32 }
  0x1a   :  { %v113_v35 = vadd.f32 %v93_v33, %v33_v29  ;;  %132 = vst [vmem:[%s401_s3 + $0x90] sm:$0xff] %v112_v34 }
  0x1c   :  { %133 = vst [vmem:[%s401_s3 + $0x98] sm:$0xff] %v113_v35 }

// kernel: decoder_forward.69
= control target key start
LH: loop header
LB: loop body
LE: loop exit
PB: predicated region body
PF: predicated region fallthrough
CT: control target
= control target key end

     0   :  { %s1259_s15 = smov 0   ;;  %s1261_s16 = smov 0   ;;  %s1560_s0 = inlined_call_operand.vmem [shape: bf16[4,144], index: 0, kind: input, shape index: {}]   ;;  %s1561_s1 = inlined_call_operand.vmem [shape: bf16[144,2048], index: 1, kind: input, shape index: {}]   ;;  %s1562_s2 = inlined_call_operand.vmem [shape: f32[4,1], index: 2, kind: input, shape index: {}]   ;;  %s1563_s3 = inlined_call_operand.vmem [shape: f32[4,1], index: 3, kind: input, shape index: {}]   ;;  %s1564_s4 = inlined_call_operand.vmem [shape: f32[4,2048], index: 4, kind: output, shape index: {}]  }
   0x1   :  { %s1263_s17 = smov 0  }
   0x2 LB: > { %s1092_s18 = sadd.s32 4294967295, %s1231_s17   ;;  %s1276_s19 = sadd.s32 1, %s1231_s17   ;;  %s1231_s17 = sphi %s1263_s17, %s1567_s17   ;;  %s1227_s16 = sphi %s1261_s16, %s1566_s16   ;;  %s1223_s15 = sphi %s1259_s15, %s1565_s15  }
   0x3   : > { %s39_s20 = ssub.s32 %s1231_s17, %s1276_s19  ;;  %s42_s21 = sadd.s32 1, %s1227_s16 }
   0x4   : > { %p40_p0 = scmp.eq.s32.totalorder %s39_s20, 0  ;;  %p49_p1 = scmp.ne.s32.totalorder %s1227_s16, %s1223_s15 }
   0x5   : > { %p50_p2 = scmp.eq.s32.totalorder %s1231_s17, 0  ;;  %p1095_p4 = scmp.ge.s32.totalorder %s1231_s17, 2 }
   0x6   : > { %s1285_s22 = scalar_select %p40_p0, %s1227_s16, %s42_s21  }
   0x7   : > { %p51_p3 = por %p50_p2, %p49_p1  ;;  %152 = sbr.rel (%p1095_p4) target bundleno = 55 (0x37), region = 28 }
   0xe   : > { %155 = sbr.rel (!%p51_p3) target bundleno = 55 (0x37), region = 32  ;;  %s157_s23 = sand.u32 (%p51_p3), 1, %s1227_s16  }
   0xf   : > { %s1180_s24 = sshll.u32 (%p51_p3), %s1231_s17, 5  ;;  %s1181_s25 = smul.u32 (%p51_p3), 576, %s157_s23 }
  0x10   : > { %s1293_s28 = scalar_lea.vmem (%p51_p3), %s1561_s1, %s1180_s24 }
  0x11   : > { %v175_v0 = vld [vmem:[%s1293_s28] sm:$0xff] (%p51_p3)  ;;  %v177_v1 = vld [vmem:[%s1293_s28 + $0x8] sm:$0xff] (%p51_p3)  ;;  %v179_v2 = vld [vmem:[%s1293_s28 + $0x10] sm:$0xff] (%p51_p3)  ;;  %s1301_s29 = scalar_lea.vmem (%p51_p3), [#allocation2], %s1181_s25 }
  0x12   : > { %v181_v3 = vld [vmem:[%s1293_s28 + $0x18] sm:$0xff] (%p51_p3)  ;;  %v183_v4 = vld [vmem:[%s1293_s28 + $0x40] sm:$0xff] (%p51_p3)  ;;  %v185_v5 = vld [vmem:[%s1293_s28 + $0x48] sm:$0xff] (%p51_p3)  ;;  %176 = vst [vmem:[%s1301_s29] sm:$0xff] (%p51_p3), %v175_v0 }
  0x13   : > { %178 = vst [vmem:[%s1301_s29 + $0x8] sm:$0xff] (%p51_p3), %v177_v1  ;;  %180 = vst [vmem:[%s1301_s29 + $0x10] sm:$0xff] (%p51_p3), %v179_v2  ;;  %v187_v6 = vld [vmem:[%s1293_s28 + $0x50] sm:$0xff] (%p51_p3)  ;;  %v189_v7 = vld [vmem:[%s1293_s28 + $0x58] sm:$0xff] (%p51_p3) }
  0x14   : > { %182 = vst [vmem:[%s1301_s29 + $0x18] sm:$0xff] (%p51_p3), %v181_v3  ;;  %184 = vst [vmem:[%s1301_s29 + $0x20] sm:$0xff] (%p51_p3), %v183_v4  ;;  %v191_v8 = vld [vmem:[%s1293_s28 + $0x80] sm:$0xff] (%p51_p3)  ;;  %v193_v9 = vld [vmem:[%s1293_s28 + $0x88] sm:$0xff] (%p51_p3) }
  0x15   : > { %186 = vst [vmem:[%s1301_s29 + $0x28] sm:$0xff] %v185_v5  ;;  %188 = vst [vmem:[%s1301_s29 + $0x30] sm:$0xff] %v187_v6  ;;  %v195_v10 = vld [vmem:[%s1293_s28 + $0x90] sm:$0xff]  ;;  %v197_v11 = vld [vmem:[%s1293_s28 + $0x98] sm:$0xff] }
  0x16   : > { %190 = vst [vmem:[%s1301_s29 + $0x38] sm:$0xff] %v189_v7  ;;  %192 = vst [vmem:[%s1301_s29 + $0x40] sm:$0xff] %v191_v8  ;;  %v199_v12 = vld [vmem:[%s1293_s28 + $0xc0] sm:$0xff]  ;;  %v201_v13 = vld [vmem:[%s1293_s28 + $0xc8] sm:$0xff] }
  0x17   : > { %194 = vst [vmem:[%s1301_s29 + $0x48] sm:$0xff] %v193_v9  ;;  %196 = vst [vmem:[%s1301_s29 + $0x50] sm:$0xff] %v195_v10  ;;  %v203_v14 = vld [vmem:[%s1293_s28 + $0xd0] sm:$0xff]  ;;  %v205_v15 = vld [vmem:[%s1293_s28 + $0xd8] sm:$0xff] }
  0x18   : > { %198 = vst [vmem:[%s1301_s29 + $0x58] sm:$0xff] %v197_v11  ;;  %200 = vst [vmem:[%s1301_s29 + $0x60] sm:$0xff] %v199_v12  ;;  %v207_v16 = vld [vmem:[%s1293_s28 + $0x100] sm:$0xff]  ;;  %v209_v17 = vld [vmem:[%s1293_s28 + $0x108] sm:$0xff] }
  0x19   : > { %202 = vst [vmem:[%s1301_s29 + $0x68] sm:$0xff] %v201_v13  ;;  %204 = vst [vmem:[%s1301_s29 + $0x70] sm:$0xff] %v203_v14  ;;  %v211_v18 = vld [vmem:[%s1293_s28 + $0x110] sm:$0xff]  ;;  %v213_v19 = vld [vmem:[%s1293_s28 + $0x118] sm:$0xff] }
  0x1a   : > { %206 = vst [vmem:[%s1301_s29 + $0x78] sm:$0xff] %v205_v15  ;;  %208 = vst [vmem:[%s1301_s29 + $0x80] sm:$0xff] %v207_v16  ;;  %v215_v20 = vld [vmem:[%s1293_s28 + $0x140] sm:$0xff]  ;;  %v217_v21 = vld [vmem:[%s1293_s28 + $0x148] sm:$0xff] }
  0x1b   : > { %210 = vst [vmem:[%s1301_s29 + $0x88] sm:$0xff] %v209_v17  ;;  %212 = vst [vmem:[%s1301_s29 + $0x90] sm:$0xff] %v211_v18  ;;  %v219_v22 = vld [vmem:[%s1293_s28 + $0x150] sm:$0xff]  ;;  %v221_v23 = vld [vmem:[%s1293_s28 + $0x158] sm:$0xff] }
  0x1c   : > { %214 = vst [vmem:[%s1301_s29 + $0x98] sm:$0xff] %v213_v19  ;;  %216 = vst [vmem:[%s1301_s29 + $0xa0] sm:$0xff] %v215_v20  ;;  %v223_v24 = vld [vmem:[%s1293_s28 + $0x180] sm:$0xff]  ;;  %v225_v25 = vld [vmem:[%s1293_s28 + $0x188] sm:$0xff] }
  0x1d   : > { %218 = vst [vmem:[%s1301_s29 + $0xa8] sm:$0xff] %v217_v21  ;;  %220 = vst [vmem:[%s1301_s29 + $0xb0] sm:$0xff] %v219_v22  ;;  %v227_v26 = vld [vmem:[%s1293_s28 + $0x190] sm:$0xff]  ;;  %v229_v27 = vld [vmem:[%s1293_s28 + $0x198] sm:$0xff] }
  0x1e   : > { %222 = vst [vmem:[%s1301_s29 + $0xb8] sm:$0xff] %v221_v23  ;;  %224 = vst [vmem:[%s1301_s29 + $0xc0] sm:$0xff] %v223_v24  ;;  %v231_v28 = vld [vmem:[%s1293_s28 + $0x1c0] sm:$0xff]  ;;  %v233_v29 = vld [vmem:[%s1293_s28 + $0x1c8] sm:$0xff] }
  0x1f   : > { %226 = vst [vmem:[%s1301_s29 + $0xc8] sm:$0xff] %v225_v25  ;;  %228 = vst [vmem:[%s1301_s29 + $0xd0] sm:$0xff] %v227_v26  ;;  %v235_v30 = vld [vmem:[%s1293_s28 + $0x1d0] sm:$0xff]  ;;  %v237_v31 = vld [vmem:[%s1293_s28 + $0x1d8] sm:$0xff] }
  0x20   : > { %230 = vst [vmem:[%s1301_s29 + $0xd8] sm:$0xff] %v229_v27  ;;  %232 = vst [vmem:[%s1301_s29 + $0xe0] sm:$0xff] %v231_v28  ;;  %v239_v32 = vld [vmem:[%s1293_s28 + $0x200] sm:$0xff]  ;;  %v241_v33 = vld [vmem:[%s1293_s28 + $0x208] sm:$0xff] }
  0x21   : > { %234 = vst [vmem:[%s1301_s29 + $0xe8] sm:$0xff] %v233_v29  ;;  %236 = vst [vmem:[%s1301_s29 + $0xf0] sm:$0xff] %v235_v30  ;;  %v243_v34 = vld [vmem:[%s1293_s28 + $0x210] sm:$0xff]  ;;  %v245_v35 = vld [vmem:[%s1293_s28 + $0x218] sm:$0xff] }
  0x22   : > { %238 = vst [vmem:[%s1301_s29 + $0xf8] sm:$0xff] %v237_v31  ;;  %240 = vst [vmem:[%s1301_s29 + $0x100] sm:$0xff] %v239_v32  ;;  %v247_v36 = vld [vmem:[%s1293_s28 + $0x240] sm:$0xff]  ;;  %v249_v37 = vld [vmem:[%s1293_s28 + $0x248] sm:$0xff] }
  0x23   : > { %242 = vst [vmem:[%s1301_s29 + $0x108] sm:$0xff] %v241_v33  ;;  %244 = vst [vmem:[%s1301_s29 + $0x110] sm:$0xff] %v243_v34  ;;  %v251_v38 = vld [vmem:[%s1293_s28 + $0x250] sm:$0xff]  ;;  %v253_v39 = vld [vmem:[%s1293_s28 + $0x258] sm:$0xff] }
  0x24   : > { %246 = vst [vmem:[%s1301_s29 + $0x118] sm:$0xff] %v245_v35  ;;  %248 = vst [vmem:[%s1301_s29 + $0x120] sm:$0xff] %v247_v36  ;;  %v255_v40 = vld [vmem:[%s1293_s28 + $0x280] sm:$0xff]  ;;  %v257_v41 = vld [vmem:[%s1293_s28 + $0x288] sm:$0xff] }
  0x25   : > { %250 = vst [vmem:[%s1301_s29 + $0x128] sm:$0xff] %v249_v37  ;;  %252 = vst [vmem:[%s1301_s29 + $0x130] sm:$0xff] %v251_v38  ;;  %v259_v42 = vld [vmem:[%s1293_s28 + $0x290] sm:$0xff]  ;;  %v261_v43 = vld [vmem:[%s1293_s28 + $0x298] sm:$0xff] }
  0x26   : > { %254 = vst [vmem:[%s1301_s29 + $0x138] sm:$0xff] %v253_v39  ;;  %256 = vst [vmem:[%s1301_s29 + $0x140] sm:$0xff] %v255_v40  ;;  %v263_v44 = vld [vmem:[%s1293_s28 + $0x2c0] sm:$0xff]  ;;  %v265_v45 = vld [vmem:[%s1293_s28 + $0x2c8] sm:$0xff] }
  0x27   : > { %258 = vst [vmem:[%s1301_s29 + $0x148] sm:$0xff] %v257_v41  ;;  %260 = vst [vmem:[%s1301_s29 + $0x150] sm:$0xff] %v259_v42  ;;  %v267_v46 = vld [vmem:[%s1293_s28 + $0x2d0] sm:$0xff]  ;;  %v269_v47 = vld [vmem:[%s1293_s28 + $0x2d8] sm:$0xff] }
  0x28   : > { %262 = vst [vmem:[%s1301_s29 + $0x158] sm:$0xff] %v261_v43  ;;  %264 = vst [vmem:[%s1301_s29 + $0x160] sm:$0xff] %v263_v44  ;;  %v271_v48 = vld [vmem:[%s1293_s28 + $0x300] sm:$0xff]  ;;  %v273_v49 = vld [vmem:[%s1293_s28 + $0x308] sm:$0xff] }
  0x29   : > { %266 = vst [vmem:[%s1301_s29 + $0x168] sm:$0xff] %v265_v45  ;;  %268 = vst [vmem:[%s1301_s29 + $0x170] sm:$0xff] %v267_v46  ;;  %v275_v50 = vld [vmem:[%s1293_s28 + $0x310] sm:$0xff]  ;;  %v277_v51 = vld [vmem:[%s1293_s28 + $0x318] sm:$0xff] }
  0x2a   : > { %270 = vst [vmem:[%s1301_s29 + $0x178] sm:$0xff] %v269_v47  ;;  %272 = vst [vmem:[%s1301_s29 + $0x180] sm:$0xff] %v271_v48  ;;  %v279_v52 = vld [vmem:[%s1293_s28 + $0x340] sm:$0xff]  ;;  %v281_v53 = vld [vmem:[%s1293_s28 + $0x348] sm:$0xff] }
  0x2b   : > { %274 = vst [vmem:[%s1301_s29 + $0x188] sm:$0xff] %v273_v49  ;;  %276 = vst [vmem:[%s1301_s29 + $0x190] sm:$0xff] %v275_v50  ;;  %v283_v54 = vld [vmem:[%s1293_s28 + $0x350] sm:$0xff]  ;;  %v285_v55 = vld [vmem:[%s1293_s28 + $0x358] sm:$0xff] }
  0x2c   : > { %278 = vst [vmem:[%s1301_s29 + $0x198] sm:$0xff] %v277_v51  ;;  %280 = vst [vmem:[%s1301_s29 + $0x1a0] sm:$0xff] %v279_v52  ;;  %v287_v56 = vld [vmem:[%s1293_s28 + $0x380] sm:$0xff]  ;;  %v289_v57 = vld [vmem:[%s1293_s28 + $0x388] sm:$0xff] }
  0x2d   : > { %282 = vst [vmem:[%s1301_s29 + $0x1a8] sm:$0xff] %v281_v53  ;;  %284 = vst [vmem:[%s1301_s29 + $0x1b0] sm:$0xff] %v283_v54  ;;  %v291_v58 = vld [vmem:[%s1293_s28 + $0x390] sm:$0xff]  ;;  %v293_v59 = vld [vmem:[%s1293_s28 + $0x398] sm:$0xff] }
  0x2e   : > { %286 = vst [vmem:[%s1301_s29 + $0x1b8] sm:$0xff] %v285_v55  ;;  %288 = vst [vmem:[%s1301_s29 + $0x1c0] sm:$0xff] %v287_v56  ;;  %v295_v60 = vld [vmem:[%s1293_s28 + $0x3c0] sm:$0xff]  ;;  %v297_v61 = vld [vmem:[%s1293_s28 + $0x3c8] sm:$0xff] }
  0x2f   : > { %290 = vst [vmem:[%s1301_s29 + $0x1c8] sm:$0xff] %v289_v57  ;;  %292 = vst [vmem:[%s1301_s29 + $0x1d0] sm:$0xff] %v291_v58  ;;  %v299_v62 = vld [vmem:[%s1293_s28 + $0x3d0] sm:$0xff]  ;;  %v301_v63 = vld [vmem:[%s1293_s28 + $0x3d8] sm:$0xff] }
  0x30   : > { %294 = vst [vmem:[%s1301_s29 + $0x1d8] sm:$0xff] %v293_v59  ;;  %296 = vst [vmem:[%s1301_s29 + $0x1e0] sm:$0xff] %v295_v60  ;;  %v303_v0 = vld [vmem:[%s1293_s28 + $0x400] sm:$0xff]  ;;  %v305_v1 = vld [vmem:[%s1293_s28 + $0x408] sm:$0xff] }
  0x31   : > { %298 = vst [vmem:[%s1301_s29 + $0x1e8] sm:$0xff] %v297_v61  ;;  %300 = vst [vmem:[%s1301_s29 + $0x1f0] sm:$0xff] %v299_v62  ;;  %v307_v2 = vld [vmem:[%s1293_s28 + $0x410] sm:$0xff]  ;;  %v309_v3 = vld [vmem:[%s1293_s28 + $0x418] sm:$0xff] }
  0x32   : > { %302 = vst [vmem:[%s1301_s29 + $0x1f8] sm:$0xff] %v301_v63  ;;  %304 = vst [vmem:[%s1301_s29 + $0x200] sm:$0xff] %v303_v0  ;;  %v311_v4 = vld [vmem:[%s1293_s28 + $0x440] sm:$0xff]  ;;  %v313_v5 = vld [vmem:[%s1293_s28 + $0x448] sm:$0xff] }
  0x33   : > { %306 = vst [vmem:[%s1301_s29 + $0x208] sm:$0xff] %v305_v1  ;;  %308 = vst [vmem:[%s1301_s29 + $0x210] sm:$0xff] %v307_v2  ;;  %v315_v6 = vld [vmem:[%s1293_s28 + $0x450] sm:$0xff]  ;;  %v317_v7 = vld [vmem:[%s1293_s28 + $0x458] sm:$0xff] }
  0x34   : > { %310 = vst [vmem:[%s1301_s29 + $0x218] sm:$0xff] %v309_v3  ;;  %312 = vst [vmem:[%s1301_s29 + $0x220] sm:$0xff] %v311_v4 }
  0x35   : > { %314 = vst [vmem:[%s1301_s29 + $0x228] sm:$0xff] %v313_v5  ;;  %316 = vst [vmem:[%s1301_s29 + $0x230] sm:$0xff] %v315_v6 }
  0x36   : > { %318 = vst [vmem:[%s1301_s29 + $0x238] sm:$0xff] %v317_v7 }
  0x37 PF: > { %p1098_p5 = scmp.ge.s32.totalorder %s1231_s17, 1  ;;  %p323_p6 = scmp.lt.s32.totalorder %s1231_s17, 3 }
  0x39   : > { %p324_p7 = pnand %p1098_p5, %p323_p6 }
  0x3a   : > { %s330_s30 = sand.u32 (!%p324_p7), 1, %s1223_s15   ;;  %v1447_v8 = vld.sshfl [vmem:[%s1560_s0] sm:$0x33 pattern:$0x76325410] (!%p324_p7)  ;;  %vm806_vm0 = vcmask (!%p324_p7), 130048  }
  0x3b   : > { %327 = sbr.rel (%p324_p7) target bundleno = 361 (0x169), region = 55  ;;  %v1451_v9 = vcombine.high (!%p324_p7), %v1447_v8, %v1447_v8  ;;  %v974_v10 = vld [vmem:[%s1562_s2] sm:$0xf] (!%p324_p7)  ;;  %v1233_v11 = vmov (!%p324_p7), 0   ;;  %s1099_s13 = sshll.u32 (!%p324_p7), %s1092_s18, 3 }
  0x3c   : > { %s1182_s7 = smul.u32 (!%p324_p7), 576, %s330_s30  ;;  %1208 = vset.pattern.permute.xlu0 (!%p324_p7), %v1233_v11  ;;  %v988_v31 = vld [vmem:[%s1563_s3] sm:$0xf] (!%p324_p7)  ;;  %p357_p8 = scmp.lt.s32.totalorder (!%p324_p7), %s1099_s13, 15 }
  0x3d   : > { %1174 = vmatprep.mubr.msk.bf16.mxu0 (!%p324_p7), %vm806_vm0, %v1451_v9  ;;  %1175 = vmatprep.mubr.msk.bf16.mxu1 (!%p324_p7), %vm806_vm0, %v1451_v9 }
  0x3e   : > { %s1460_s10 = scalar_lea.vmem (!%p324_p7), [#allocation2], %s1182_s7  ;;  %977 = vperm.xlu0 (!%p324_p7), %1208, %v974_v10  }
  0x3f   : > { %v364_v12 = vld [vmem:[%s1460_s10] sm:$0xff] (!%p324_p7)  ;;  %v365_v14 = vld [vmem:[%s1460_s10 + $0x8] sm:$0xff] (!%p324_p7) }
  0x40   : > { %v368_v13 = vld [vmem:[%s1460_s10 + $0x20] sm:$0xff] (!%p324_p7)  ;;  %v369_v16 = vld [vmem:[%s1460_s10 + $0x28] sm:$0xff] (!%p324_p7) }
  0x41   : > { %v1103_v15 = vcombine.high (!%p324_p7), %v364_v12, %v368_v13  ;;  %v1102_v17 = vcombine.low (!%p324_p7), %v364_v12, %v368_v13  ;;  %v372_v18 = vld [vmem:[%s1460_s10 + $0x40] sm:$0xff] (!%p324_p7)  ;;  %v1105_v20 = vcombine.high (!%p324_p7), %v365_v14, %v369_v16  ;;  %v1104_v21 = vcombine.low (!%p324_p7), %v365_v14, %v369_v16  ;;  %v373_v23 = vld [vmem:[%s1460_s10 + $0x48] sm:$0xff] (!%p324_p7) }
  0x42   : > { %v376_v19 = vld [vmem:[%s1460_s10 + $0x60] sm:$0xff]  ;;  %v377_v24 = vld [vmem:[%s1460_s10 + $0x68] sm:$0xff]  ;;  %991 = vperm.xlu0 %1208, %v988_v31   ;;  %v375_v31 = vld [vmem:[%s1460_s10 + $0x58] sm:$0xff]  ;;  %s1569_s13 = smov (!%p357_p8, %s1099_s13), 15 }
  0x43   : > { %v1111_v22 = vcombine.high %v372_v18, %v376_v19  ;;  %v380_v25 = vld [vmem:[%s1460_s10 + $0x80] sm:$0xff]  ;;  %810 = vmatprep.subr.bf16.mxu0 %v1103_v15  ;;  %v1113_v26 = vcombine.high %v373_v23, %v377_v24  ;;  %v381_v28 = vld [vmem:[%s1460_s10 + $0x88] sm:$0xff]  ;;  %851 = vmatprep.subr.bf16.mxu1 %v1105_v20  ;;  %v1110_v30 = vcombine.low %v372_v18, %v376_v19  ;;  %s1100_s14 = sshll.u32 %s1569_s13, 2 }
  0x44   : > { %v384_v27 = vld [vmem:[%s1460_s10 + $0xa0] sm:$0xff]  ;;  %v385_v29 = vld [vmem:[%s1460_s10 + $0xa8] sm:$0xff]  ;;  %811 = vmatpush1.bf16.msra.mxu0 %v1102_v17  ;;  %852 = vmatpush1.bf16.msra.mxu1 %v1104_v21  ;;  %v1112_v32 = vcombine.low %v373_v23, %v377_v24  ;;  %v366_v21 = vld [vmem:[%s1460_s10 + $0x10] sm:$0xff]  ;;  %s360_s18 = scalar_lea.vmem %s1564_s4, %s1100_s14 }
  0x45   : > { %812 = vmatprep.subr.bf16.mxu0 %v1111_v22  ;;  %v1119_v33 = vcombine.high %v380_v25, %v384_v27  ;;  %853 = vmatprep.subr.bf16.mxu1 %v1113_v26  ;;  %v1121_v34 = vcombine.high %v381_v28, %v385_v29  ;;  %v388_v35 = vld [vmem:[%s1460_s10 + $0xc0] sm:$0xff]  ;;  %v389_v37 = vld [vmem:[%s1460_s10 + $0xc8] sm:$0xff]  ;;  %v1118_v39 = vcombine.low %v380_v25, %v384_v27  ;;  %v370_v22 = vld [vmem:[%s1460_s10 + $0x30] sm:$0xff] }
  0x46   : > { %v392_v36 = vld [vmem:[%s1460_s10 + $0xe0] sm:$0xff]  ;;  %v393_v38 = vld [vmem:[%s1460_s10 + $0xe8] sm:$0xff]  ;;  %v1120_v40 = vcombine.low %v381_v28, %v385_v29  ;;  %v367_v23 = vld [vmem:[%s1460_s10 + $0x18] sm:$0xff]  ;;  %v1107_v27 = vcombine.high %v366_v21, %v370_v22 }
  0x47   : > { %v1127_v41 = vcombine.high %v388_v35, %v392_v36  ;;  %v1129_v42 = vcombine.high %v389_v37, %v393_v38  ;;  %v396_v43 = vld [vmem:[%s1460_s10 + $0x100] sm:$0xff]  ;;  %v397_v45 = vld [vmem:[%s1460_s10 + $0x108] sm:$0xff]  ;;  %v1126_v47 = vcombine.low %v388_v35, %v392_v36  ;;  %v1128_v48 = vcombine.low %v389_v37, %v393_v38  ;;  %v371_v24 = vld [vmem:[%s1460_s10 + $0x38] sm:$0xff] }
  0x48   : > { %813 = vmatpush1.bf16.msra.mxu0 %v1110_v30  ;;  %854 = vmatpush1.bf16.msra.mxu1 %v1112_v32  ;;  %v400_v44 = vld [vmem:[%s1460_s10 + $0x120] sm:$0xff]  ;;  %v401_v46 = vld [vmem:[%s1460_s10 + $0x128] sm:$0xff]  ;;  %v1109_v28 = vcombine.high %v367_v23, %v371_v24  ;;  %v374_v29 = vld [vmem:[%s1460_s10 + $0x50] sm:$0xff] }
  0x49   : > { %814 = vmatprep.subr.bf16.mxu0 %v1119_v33  ;;  %855 = vmatprep.subr.bf16.mxu1 %v1121_v34  ;;  %v1135_v49 = vcombine.high %v396_v43, %v400_v44  ;;  %v1137_v50 = vcombine.high %v397_v45, %v401_v46  ;;  %v404_v51 = vld [vmem:[%s1460_s10 + $0x140] sm:$0xff]  ;;  %v405_v53 = vld [vmem:[%s1460_s10 + $0x148] sm:$0xff]  ;;  %v1134_v55 = vcombine.low %v396_v43, %v400_v44  ;;  %v378_v30 = vld [vmem:[%s1460_s10 + $0x70] sm:$0xff] }
  0x4a   : > { %v408_v52 = vld [vmem:[%s1460_s10 + $0x160] sm:$0xff]  ;;  %v409_v54 = vld [vmem:[%s1460_s10 + $0x168] sm:$0xff]  ;;  %v1136_v56 = vcombine.low %v397_v45, %v401_v46  ;;  %v379_v32 = vld [vmem:[%s1460_s10 + $0x78] sm:$0xff]  ;;  %v1106_v33 = vcombine.low %v366_v21, %v370_v22  ;;  %v1108_v34 = vcombine.low %v367_v23, %v371_v24  ;;  %v1115_v35 = vcombine.high %v374_v29, %v378_v30 }
  0x4b   : > { %v1143_v57 = vcombine.high %v404_v51, %v408_v52  ;;  %v1145_v58 = vcombine.high %v405_v53, %v409_v54  ;;  %v412_v59 = vld [vmem:[%s1460_s10 + $0x180] sm:$0xff]  ;;  %v413_v61 = vld [vmem:[%s1460_s10 + $0x188] sm:$0xff]  ;;  %v1142_v63 = vcombine.low %v404_v51, %v408_v52  ;;  %v1144_v0 = vcombine.low %v405_v53, %v409_v54  ;;  %v382_v37 = vld [vmem:[%s1460_s10 + $0x90] sm:$0xff] }
  0x4c   : > { %815 = vmatpush1.bf16.msra.mxu0 %v1118_v39  ;;  %856 = vmatpush1.bf16.msra.mxu1 %v1120_v40  ;;  %v416_v60 = vld [vmem:[%s1460_s10 + $0x1a0] sm:$0xff]  ;;  %v417_v62 = vld [vmem:[%s1460_s10 + $0x1a8] sm:$0xff]  ;;  %v1117_v36 = vcombine.high %v375_v31, %v379_v32  ;;  %v386_v38 = vld [vmem:[%s1460_s10 + $0xb0] sm:$0xff] }
  0x4d   : > { %816 = vmatprep.subr.bf16.mxu0 %v1127_v41  ;;  %857 = vmatprep.subr.bf16.mxu1 %v1129_v42  ;;  %v1151_v1 = vcombine.high %v412_v59, %v416_v60  ;;  %v1153_v2 = vcombine.high %v413_v61, %v417_v62  ;;  %v420_v3 = vld [vmem:[%s1460_s10 + $0x1c0] sm:$0xff]  ;;  %v421_v5 = vld [vmem:[%s1460_s10 + $0x1c8] sm:$0xff]  ;;  %v1150_v7 = vcombine.low %v412_v59, %v416_v60  ;;  %v383_v39 = vld [vmem:[%s1460_s10 + $0x98] sm:$0xff] }
  0x4e   : > { %v424_v4 = vld [vmem:[%s1460_s10 + $0x1e0] sm:$0xff]  ;;  %v425_v6 = vld [vmem:[%s1460_s10 + $0x1e8] sm:$0xff]  ;;  %v1152_v10 = vcombine.low %v413_v61, %v417_v62  ;;  %v387_v40 = vld [vmem:[%s1460_s10 + $0xb8] sm:$0xff]  ;;  %v1114_v41 = vcombine.low %v374_v29, %v378_v30  ;;  %v1116_v42 = vcombine.low %v375_v31, %v379_v32  ;;  %v1123_v43 = vcombine.high %v382_v37, %v386_v38 }
  0x4f   : > { %v1159_v11 = vcombine.high %v420_v3, %v424_v4  ;;  %v1161_v12 = vcombine.high %v421_v5, %v425_v6  ;;  %v428_v13 = vld [vmem:[%s1460_s10 + $0x200] sm:$0xff]  ;;  %v429_v15 = vld [vmem:[%s1460_s10 + $0x208] sm:$0xff]  ;;  %v1158_v17 = vcombine.low %v420_v3, %v424_v4  ;;  %v1160_v18 = vcombine.low %v421_v5, %v425_v6  ;;  %v390_v45 = vld [vmem:[%s1460_s10 + $0xd0] sm:$0xff] }
  0x50   : > { %817 = vmatpush1.bf16.msra.mxu0 %v1126_v47  ;;  %858 = vmatpush1.bf16.msra.mxu1 %v1128_v48  ;;  %v432_v14 = vld [vmem:[%s1460_s10 + $0x220] sm:$0xff]  ;;  %v433_v16 = vld [vmem:[%s1460_s10 + $0x228] sm:$0xff]  ;;  %v1125_v44 = vcombine.high %v383_v39, %v387_v40  ;;  %v394_v46 = vld [vmem:[%s1460_s10 + $0xf0] sm:$0xff] }
  0x51   : > { %818 = vmatprep.subr.bf16.mxu0 %v1135_v49  ;;  %859 = vmatprep.subr.bf16.mxu1 %v1137_v50  ;;  %v1167_v19 = vcombine.high %v428_v13, %v432_v14  ;;  %v1169_v20 = vcombine.high %v429_v15, %v433_v16  ;;  %v1166_v25 = vcombine.low %v428_v13, %v432_v14  ;;  %v391_v47 = vld [vmem:[%s1460_s10 + $0xd8] sm:$0xff]  ;;  %v398_v53 = vld [vmem:[%s1460_s10 + $0x110] sm:$0xff] }
  0x52   : > { %v1168_v26 = vcombine.low %v429_v15, %v433_v16  ;;  %v395_v48 = vld [vmem:[%s1460_s10 + $0xf8] sm:$0xff]  ;;  %v1122_v49 = vcombine.low %v382_v37, %v386_v38  ;;  %v1124_v50 = vcombine.low %v383_v39, %v387_v40  ;;  %v1131_v51 = vcombine.high %v390_v45, %v394_v46  ;;  %v402_v54 = vld [vmem:[%s1460_s10 + $0x130] sm:$0xff] }
  0x53   : > { %v1133_v52 = vcombine.high %v391_v47, %v395_v48  ;;  %v406_v60 = vld [vmem:[%s1460_s10 + $0x150] sm:$0xff]  ;;  %v407_v62 = vld [vmem:[%s1460_s10 + $0x158] sm:$0xff] }
  0x54   : > { %819 = vmatpush1.bf16.msra.mxu0 %v1134_v55  ;;  %860 = vmatpush1.bf16.msra.mxu1 %v1136_v56  ;;  %v399_v55 = vld [vmem:[%s1460_s10 + $0x118] sm:$0xff]  ;;  %v410_v61 = vld [vmem:[%s1460_s10 + $0x170] sm:$0xff] }
  0x55   : > { %820 = vmatprep.subr.bf16.mxu0 %v1143_v57  ;;  %861 = vmatprep.subr.bf16.mxu1 %v1145_v58  ;;  %v403_v56 = vld [vmem:[%s1460_s10 + $0x138] sm:$0xff]  ;;  %v1130_v57 = vcombine.low %v390_v45, %v394_v46  ;;  %v1139_v58 = vcombine.high %v398_v53, %v402_v54  ;;  %v414_v4 = vld [vmem:[%s1460_s10 + $0x190] sm:$0xff] }
  0x56   : > { %v1141_v59 = vcombine.high %v399_v55, %v403_v56  ;;  %v418_v5 = vld [vmem:[%s1460_s10 + $0x1b0] sm:$0xff]  ;;  %v415_v6 = vld [vmem:[%s1460_s10 + $0x198] sm:$0xff] }
  0x57   : > { %v422_v14 = vld [vmem:[%s1460_s10 + $0x1d0] sm:$0xff]  ;;  %v423_v16 = vld [vmem:[%s1460_s10 + $0x1d8] sm:$0xff] }
  0x58   : > { %821 = vmatpush1.bf16.msra.mxu0 %v1142_v63  ;;  %862 = vmatpush1.bf16.msra.mxu1 %v1144_v0  ;;  %v411_v63 = vld [vmem:[%s1460_s10 + $0x178] sm:$0xff]  ;;  %v1138_v0 = vcombine.low %v398_v53, %v402_v54  ;;  %v426_v15 = vld [vmem:[%s1460_s10 + $0x1f0] sm:$0xff] }
  0x59   : > { %822 = vmatprep.subr.bf16.mxu0 %v1151_v1  ;;  %863 = vmatprep.subr.bf16.mxu1 %v1153_v2  ;;  %v1140_v1 = vcombine.low %v399_v55, %v403_v56  ;;  %v1147_v2 = vcombine.high %v406_v60, %v410_v61  ;;  %v1149_v3 = vcombine.high %v407_v62, %v411_v63  ;;  %v430_v22 = vld [vmem:[%s1460_s10 + $0x210] sm:$0xff]  ;;  %v431_v24 = vld [vmem:[%s1460_s10 + $0x218] sm:$0xff] }
  0x5a   : > { %v434_v23 = vld [vmem:[%s1460_s10 + $0x230] sm:$0xff] }
  0x5b   : > { %v1170_v30 = vcombine.low %v430_v22, %v434_v23 }
  0x5c   : > { %823 = vmatpush1.bf16.msra.mxu0 %v1150_v7  ;;  %864 = vmatpush1.bf16.msra.mxu1 %v1152_v10  ;;  %v419_v7 = vld [vmem:[%s1460_s10 + $0x1b8] sm:$0xff]  ;;  %v1146_v10 = vcombine.low %v406_v60, %v410_v61 }
  0x5d   : > { %824 = vmatprep.subr.bf16.mxu0 %v1159_v11  ;;  %865 = vmatprep.subr.bf16.mxu1 %v1161_v12  ;;  %v1148_v11 = vcombine.low %v407_v62, %v411_v63  ;;  %v1155_v12 = vcombine.high %v414_v4, %v418_v5  ;;  %v1157_v13 = vcombine.high %v415_v6, %v419_v7 }
  0x60   : > { %825 = vmatpush1.bf16.msra.mxu0 %v1158_v17  ;;  %866 = vmatpush1.bf16.msra.mxu1 %v1160_v18  ;;  %v427_v17 = vld [vmem:[%s1460_s10 + $0x1f8] sm:$0xff]  ;;  %v1154_v18 = vcombine.low %v414_v4, %v418_v5 }
  0x61   : > { %826 = vmatprep.subr.bf16.mxu0 %v1167_v19  ;;  %867 = vmatprep.subr.bf16.mxu1 %v1169_v20  ;;  %v1156_v19 = vcombine.low %v415_v6, %v419_v7  ;;  %v1163_v20 = vcombine.high %v422_v14, %v426_v15  ;;  %v1165_v21 = vcombine.high %v423_v16, %v427_v17 }
  0x64   : > { %827 = vmatpush1.bf16.msra.mxu0 %v1166_v25  ;;  %868 = vmatpush1.bf16.msra.mxu1 %v1168_v26  ;;  %v435_v25 = vld [vmem:[%s1460_s10 + $0x238] sm:$0xff]  ;;  %v1162_v26 = vcombine.low %v422_v14, %v426_v15 }
  0x65   : > { %892 = vmatprep.subr.bf16.mxu0 %v1107_v27  ;;  %933 = vmatprep.subr.bf16.mxu1 %v1109_v28  ;;  %v1164_v27 = vcombine.low %v423_v16, %v427_v17  ;;  %v1171_v28 = vcombine.high %v430_v22, %v434_v23  ;;  %v1173_v29 = vcombine.high %v431_v24, %v435_v25 }
  0x66   : > { %v1172_v31 = vcombine.low %v431_v24, %v435_v25 }
  0x67   : > { %843 = vmatmul.mubr.bf16.vlgmr.msra.gmra.mrb[0].mxu0 %v1447_v8  ;;  %884 = vmatmul.mubr.bf16.vlgmr.msra.gmra.mrb[0].mxu1 %v1447_v8 }
  0x68   : > { %893 = vmatpush1.bf16.msra.mxu0 %v1106_v33  ;;  %934 = vmatpush1.bf16.msra.mxu1 %v1108_v34 }
  0x69   : > { %894 = vmatprep.subr.bf16.mxu0 %v1115_v35  ;;  %935 = vmatprep.subr.bf16.mxu1 %v1117_v36 }
  0x6a   : > { %1176 = vmatprep.mubr.msk.bf16.mxu0 %vm806_vm0, %v1451_v9  ;;  %1177 = vmatprep.mubr.msk.bf16.mxu1 %vm806_vm0, %v1451_v9  ;;  %v1132_v9 = vcombine.low %v391_v47, %v395_v48 }
  0x6c   : > { %895 = vmatpush1.bf16.msra.mxu0 %v1114_v41  ;;  %936 = vmatpush1.bf16.msra.mxu1 %v1116_v42 }
  0x6d   : > { %896 = vmatprep.subr.bf16.mxu0 %v1123_v43  ;;  %937 = vmatprep.subr.bf16.mxu1 %v1125_v44 }
  0x70   : > { %897 = vmatpush1.bf16.msra.mxu0 %v1122_v49  ;;  %938 = vmatpush1.bf16.msra.mxu1 %v1124_v50 }
  0x71   : > { %898 = vmatprep.subr.bf16.mxu0 %v1131_v51  ;;  %939 = vmatprep.subr.bf16.mxu1 %v1133_v52 }
  0x74   : > { %899 = vmatpush1.bf16.msra.mxu0 %v1130_v57  ;;  %940 = vmatpush1.bf16.msra.mxu1 %v1132_v9 }
  0x75   : > { %900 = vmatprep.subr.bf16.mxu0 %v1139_v58  ;;  %941 = vmatprep.subr.bf16.mxu1 %v1141_v59 }
  0x78   : > { %901 = vmatpush1.bf16.msra.mxu0 %v1138_v0  ;;  %942 = vmatpush1.bf16.msra.mxu1 %v1140_v1 }
  0x79   : > { %902 = vmatprep.subr.bf16.mxu0 %v1147_v2  ;;  %943 = vmatprep.subr.bf16.mxu1 %v1149_v3 }
  0x7c   : > { %903 = vmatpush1.bf16.msra.mxu0 %v1146_v10  ;;  %944 = vmatpush1.bf16.msra.mxu1 %v1148_v11 }
  0x7d   : > { %904 = vmatprep.subr.bf16.mxu0 %v1155_v12  ;;  %945 = vmatprep.subr.bf16.mxu1 %v1157_v13 }
  0x80   : > { %905 = vmatpush1.bf16.msra.mxu0 %v1154_v18  ;;  %946 = vmatpush1.bf16.msra.mxu1 %v1156_v19 }
  0x81   : > { %906 = vmatprep.subr.bf16.mxu0 %v1163_v20  ;;  %947 = vmatprep.subr.bf16.mxu1 %v1165_v21 }
  0x84   : > { %907 = vmatpush1.bf16.msra.mxu0 %v1162_v26  ;;  %948 = vmatpush1.bf16.msra.mxu1 %v1164_v27 }
  0x85   : > { %908 = vmatprep.subr.bf16.mxu0 %v1171_v28  ;;  %949 = vmatprep.subr.bf16.mxu1 %v1173_v29 }
  0x88   : > { %909 = vmatpush1.bf16.msra.mxu0 %v1170_v30  ;;  %950 = vmatpush1.bf16.msra.mxu1 %v1172_v31 }
  0x8b   : > { %925 = vmatmul.mubr.bf16.vlgmr.msra.gmra.mrb[4].mxu0 %v1447_v8  ;;  %966 = vmatmul.mubr.bf16.vlgmr.msra.gmra.mrb[4].mxu1 %v1447_v8 }
  0xbd   : > { %v978_v32 = vpop.permute.xlu0 %977 }
  0xc1   : > { %v992_v34 = vpop.permute.xlu0 %991 }
 0x13a   : > { %v844_v33 = vpop.f32.mrb[0].mxu0  ;;  %v885_v36 = vpop.f32.mrb[0].mxu1 }
 0x13b   : > { %v980_v35 = vmul.f32 %v978_v32, %v844_v33  ;;  %v846_v37 = vpop.f32.mrb[1].mxu0  ;;  %v982_v38 = vmul.f32 %v978_v32, %v885_v36  ;;  %v887_v40 = vpop.f32.mrb[1].mxu1 }
 0x13c   : > { %v981_v39 = vmul.f32 %v978_v32, %v846_v37  ;;  %v848_v41 = vpop.f32.mrb[2].mxu0  ;;  %v983_v42 = vmul.f32 %v978_v32, %v887_v40  ;;  %v889_v43 = vpop.f32.mrb[2].mxu1 }
 0x13d   : > { %v994_v44 = vadd.f32 %v992_v34, %v980_v35  ;;  %v849_v45 = vpop.f32.mrb[3].mxu0  ;;  %v996_v8 = vadd.f32 %v992_v34, %v982_v38  ;;  %v890_v47 = vpop.f32.mrb[3].mxu1 }
 0x13e   : > { %v995_v46 = vadd.f32 %v992_v34, %v981_v39  ;;  %v997_v48 = vadd.f32 %v992_v34, %v983_v42 }
 0x13f   : > { %v1002_v49 = vmax.f32 %v994_v44, 0.0  ;;  %v1004_v51 = vmax.f32 %v996_v8, 0.0 }
 0x140   : > { %v1003_v50 = vmax.f32 %v995_v46, 0.0  ;;  %v1005_v52 = vmax.f32 %v997_v48, 0.0 }
 0x142   : > { %v1018_v53 = vcombine.low %v1002_v49, %v1003_v50  ;;  %v1019_v54 = vcombine.low %v1004_v51, %v1005_v52 }
 0x144   : > { %1026 = vst [vmem:[%s360_s18] sm:$0xff] %v1018_v53  ;;  %1027 = vst [vmem:[%s360_s18 + $0x8] sm:$0xff] %v1019_v54 }
 0x15e   : > { %v926_v55 = vpop.f32.mrb[4].mxu0  ;;  %v967_v57 = vpop.f32.mrb[4].mxu1 }
 0x15f   : > { %v984_v56 = vmul.f32 %v978_v32, %v926_v55  ;;  %v928_v9 = vpop.f32.mrb[5].mxu0  ;;  %v986_v58 = vmul.f32 %v978_v32, %v967_v57  ;;  %v969_v60 = vpop.f32.mrb[5].mxu1 }
 0x160   : > { %v985_v59 = vmul.f32 %v978_v32, %v928_v9  ;;  %v930_v61 = vpop.f32.mrb[6].mxu0  ;;  %v987_v63 = vmul.f32 %v978_v32, %v969_v60  ;;  %v971_v0 = vpop.f32.mrb[6].mxu1 }
 0x161   : > { %v998_v62 = vadd.f32 %v992_v34, %v984_v56  ;;  %v931_v1 = vpop.f32.mrb[7].mxu0  ;;  %v1000_v2 = vadd.f32 %v992_v34, %v986_v58  ;;  %v972_v4 = vpop.f32.mrb[7].mxu1 }
 0x162   : > { %v999_v3 = vadd.f32 %v992_v34, %v985_v59  ;;  %v1001_v6 = vadd.f32 %v992_v34, %v987_v63 }
 0x163   : > { %v1006_v5 = vmax.f32 %v998_v62, 0.0  ;;  %v1008_v7 = vmax.f32 %v1000_v2, 0.0 }
 0x164   : > { %v1007_v10 = vmax.f32 %v999_v3, 0.0  ;;  %v1009_v11 = vmax.f32 %v1001_v6, 0.0 }
 0x166   : > { %v1020_v12 = vcombine.low %v1006_v5, %v1007_v10  ;;  %v1021_v13 = vcombine.low %v1008_v7, %v1009_v11 }
 0x168   : > { %1028 = vst [vmem:[%s360_s18 + $0x10] sm:$0xff] %v1020_v12  ;;  %1029 = vst [vmem:[%s360_s18 + $0x18] sm:$0xff] %v1021_v13 }
 0x169 PF: > { %p11_p9 = scmp.ge.s32.totalorder %s1276_s19, 4   ;;  %s1565_s15 = smov %s1227_s16 }
 0x16a   : > { %s1566_s16 = smov %s1285_s22  ;;  %s1567_s17 = smov %s1276_s19 }
 0x16b   :  { %13 = sbr.rel (!%p11_p9) target bundleno = 2 (0x2), region = 94 }

// kernel: decoder_forward.70
= control target key start
LH: loop header
LB: loop body
LE: loop exit
PB: predicated region body
PF: predicated region fallthrough
CT: control target
= control target key end

     0   :  { %v181_v1 = vmov 0   ;;  %vm43_vm0 = vcmask 130048   ;;  %s234_s1 = inlined_call_operand.vmem [shape: bf16[16,512], index: 1, kind: input, shape index: {}]   ;;  %s235_s2 = inlined_call_operand.vmem [shape: f32[4,1], index: 2, kind: input, shape index: {}]   ;;  %s236_s0 = inlined_call_operand.vmem [shape: bf16[4,16], index: 0, kind: input, shape index: {}]   ;;  %s237_s3 = inlined_call_operand.vmem [shape: f32[4,1], index: 3, kind: input, shape index: {}]   ;;  %s238_s4 = inlined_call_operand.vmem [shape: f32[4,512], index: 4, kind: output, shape index: {}]  }
   0x1   :  { %v175_v0 = vld [vmem:[%s234_s1 + $0x4] ss:$16 sps:$4 sm:$0xff]   ;;  %79 = vmatprep.mubr.bf16.mxu0 %v181_v1  ;;  %120 = vmatprep.mubr.bf16.mxu1 %v181_v1  ;;  %v177_v2 = vld [vmem:[%s234_s1 + $0xc] ss:$16 sps:$4 sm:$0xff]   ;;  %v179_v3 = vld [vmem:[%s234_s1] ss:$16 sps:$4 sm:$0xff]  }
   0x2   :  { %174 = vset.pattern.permute.xlu0 %v181_v1  ;;  %47 = vmatprep.subr.bf16.mxu0 %v175_v0  ;;  %v180_v4 = vld [vmem:[%s234_s1 + $0x8] ss:$16 sps:$4 sm:$0xff]   ;;  %v129_v5 = vld [vmem:[%s235_s2] sm:$0xf] }
   0x3   :  { %88 = vmatprep.subr.bf16.mxu1 %v177_v2  ;;  %48 = vmatpush1.bf16.msra.mxu0 %v179_v3  ;;  %v18_v6 = vld [vmem:[%s236_s0] sm:$0x3] }
   0x4   :  { %89 = vmatpush1.bf16.msra.mxu1 %v180_v4  ;;  %132 = vperm.xlu0 %174, %v129_v5   ;;  %v139_v7 = vld [vmem:[%s237_s3] sm:$0xf] }
   0x6   :  { %171 = vmatmul.mubr.msk.bf16.vlgmr.msra.gmra.mrb[0].mxu0 %vm43_vm0, %v18_v6 }
   0x7   :  { %172 = vmatmul.mubr.msk.bf16.vlgmr.msra.gmra.mrb[0].mxu1 %vm43_vm0, %v18_v6 }
   0x8   :  { %142 = vperm.xlu0 %174, %v139_v7  }
  0x83   :  { %v133_v8 = vpop.permute.xlu0 %132 }
  0x87   :  { %v143_v9 = vpop.permute.xlu0 %142 }
  0xd9   :  { %v81_v10 = vpop.f32.mrb[0].mxu0 }
  0xda   :  { %v122_v11 = vpop.f32.mrb[0].mxu1  ;;  %v135_v12 = vmul.f32 %v133_v8, %v81_v10  ;;  %v83_v14 = vpop.f32.mrb[1].mxu0 }
  0xdb   :  { %v137_v13 = vmul.f32 %v133_v8, %v122_v11  ;;  %v124_v15 = vpop.f32.mrb[1].mxu1  ;;  %v136_v16 = vmul.f32 %v133_v8, %v83_v14  ;;  %v85_v18 = vpop.f32.mrb[2].mxu0 }
  0xdc   :  { %v138_v17 = vmul.f32 %v133_v8, %v124_v15  ;;  %v126_v19 = vpop.f32.mrb[2].mxu1  ;;  %v145_v20 = vadd.f32 %v143_v9, %v135_v12  ;;  %v86_v22 = vpop.f32.mrb[3].mxu0 }
  0xdd   :  { %v147_v21 = vadd.f32 %v143_v9, %v137_v13  ;;  %v127_v23 = vpop.f32.mrb[3].mxu1  ;;  %v146_v24 = vadd.f32 %v143_v9, %v136_v16 }
  0xde   :  { %v148_v25 = vadd.f32 %v143_v9, %v138_v17  ;;  %v149_v26 = vmax.f32 %v145_v20, 0.0 }
  0xdf   :  { %v151_v27 = vmax.f32 %v147_v21, 0.0  ;;  %v150_v28 = vmax.f32 %v146_v24, 0.0 }
  0xe0   :  { %v152_v29 = vmax.f32 %v148_v25, 0.0 }
  0xe1   :  { %v157_v30 = vcombine.low %v149_v26, %v150_v28 }
  0xe2   :  { %v158_v31 = vcombine.low %v151_v27, %v152_v29 }
  0xe3   :  { %161 = vst [vmem:[%s238_s4] sm:$0xff] %v157_v30 }
  0xe4   :  { %162 = vst [vmem:[%s238_s4 + $0x8] sm:$0xff] %v158_v31 }

// kernel: decoder_forward.71
= control target key start
LH: loop header
LB: loop body
LE: loop exit
PB: predicated region body
PF: predicated region fallthrough
CT: control target
= control target key end

     0   :  { %v40_v0 = vlaneseq  ;;  %v473_v2 = vmov 1983009808   ;;  %v474_v4 = vmov 0   ;;  %vm57_vm0 = vcmask 1041408   ;;  %s584_s8 = inlined_call_operand.vmem [shape: bf16[4,512], index: 8, kind: input, shape index: {}]   ;;  %s585_s1 = inlined_call_operand.vmem [shape: f32[8,1], index: 1, kind: input, shape index: {}]   ;;  %s586_s2 = inlined_call_operand.vmem [shape: f32[8,1], index: 2, kind: input, shape index: {}]   ;;  %s587_s7 = inlined_call_operand.vmem [shape: f32[8,1], index: 7, kind: input, shape index: {}]   ;;  %s588_s0 = inlined_call_operand.vmem [shape: bf16[8,4], index: 0, kind: input, shape index: {}]   ;;  %s589_s4 = inlined_call_operand.vmem [shape: f32[4,1], index: 4, kind: input, shape index: {}]   ;;  %s590_s5 = inlined_call_operand.vmem [shape: f32[4,1], index: 5, kind: input, shape index: {}]   ;;  %s591_s3 = inlined_call_operand.vmem [shape: bf16[4,8], index: 3, kind: input, shape index: {}]   ;;  %s592_s6 = inlined_call_operand.vmem [shape: bf16[8,4], index: 6, kind: input, shape index: {}]   ;;  %s593_s9 = inlined_call_operand.vmem [shape: f32[8,512], index: 9, kind: output, shape index: {}]  }
   0x1   :  { %v34_v1 = vld [vmem:[%s584_s8] sm:$0xff]  ;;  %v38_v3 = vunpack.c.l.s4 %v473_v2  ;;  %102 = vmatprep.mubr.bf16.mxu0 %v474_v4  ;;  %143 = vmatprep.mubr.bf16.mxu1 %v474_v4  ;;  %vm53_vm1 = vcmask 31744   ;;  %vm181_vm2 = vcmask 1043456   ;;  %vm177_vm3 = vcmask 64512  }
   0x2   :  { %v152_v5 = vld [vmem:[%s585_s1] sm:$0xff]  ;;  %v41_v6 = vshrl.u32 %v40_v0, 7  ;;  %454 = vset.pattern.permute.xlu0 %v474_v4  ;;  %455 = vset.pattern.permute.xlu1 %v474_v4  ;;  %v36_v8 = vcombine.high %v34_v1, %v34_v1 }
   0x3   :  { %v39_v7 = vunpack.c.0.s8 %v38_v3  ;;  %155 = vperm.xlu0 %454, %v152_v5   ;;  %v162_v9 = vld [vmem:[%s586_s2] sm:$0xff] }
   0x4   :  { %v301_v17 = vld [vmem:[%s587_s7] sm:$0xff] }
   0x5   :  { %v42_v10 = vsub.s32 %v39_v7, %v41_v6  ;;  %v33_v18 = vld [vmem:[%s588_s0] sm:$0xf] }
   0x6   :  { %v276_v19 = vld [vmem:[%s589_s4] sm:$0xf] }
   0x7   :  { %v43_v11 = vrot.slane %v34_v1, %v42_v10  ;;  %v50_v12 = vrot.slane %v36_v8, %v42_v10  ;;  %165 = vperm.xlu0 %454, %v162_v9   ;;  %279 = vperm.xlu1 %455, %v276_v19   ;;  %v286_v20 = vld [vmem:[%s590_s5] sm:$0xf] }
   0x8   :  { %v172_v45 = vld [vmem:[%s591_s3] sm:$0x3] }
   0x9   :  { %v51_v13 = vcombine.high %v43_v11, %v43_v11  ;;  %v52_v14 = vcombine.high %v50_v12, %v50_v12  ;;  %v59_v15 = vsel %vm57_vm0, %v43_v11, 0  ;;  %v65_v16 = vsel %vm57_vm0, %v50_v12, 0  ;;  %v296_v6 = vld [vmem:[%s592_s6] sm:$0xf] }
   0xb   :  { %436 = vmatprep.subr.msk.bf16.mxu0 %vm57_vm0, %v51_v13  ;;  %438 = vmatprep.subr.msk.bf16.mxu1 %vm57_vm0, %v52_v14 }
   0xc   :  { %71 = vmatpush1.bf16.msra.mxu0 %v59_v15  ;;  %112 = vmatpush1.bf16.msra.mxu1 %v65_v16 }
   0xd   :  { %304 = vperm.xlu0 %454, %v301_v17   ;;  %289 = vperm.xlu1 %455, %v286_v20  }
   0xf   :  { %437 = vmatmul.mubr.msk.bf16.vlgmr.msra.gmra.mrb[0].mxu0 %vm53_vm1, %v33_v18  ;;  %439 = vmatmul.mubr.msk.bf16.vlgmr.msra.gmra.mrb[0].mxu1 %vm53_vm1, %v33_v18 }
  0x10   :  { %226 = vmatprep.mubr.bf16.mxu0 %v474_v4  ;;  %267 = vmatprep.mubr.bf16.mxu1 %v474_v4 }
  0x82   :  { %v156_v21 = vpop.permute.xlu0 %155 }
  0x86   :  { %v166_v22 = vpop.permute.xlu0 %165  ;;  %v280_v46 = vpop.permute.xlu1 %279 }
  0x8c   :  { %v290_v47 = vpop.permute.xlu1 %289  ;;  %v305_v7 = vpop.permute.xlu0 %304 }
  0xe2   :  { %v104_v23 = vpop.f32.mrb[0].mxu0  ;;  %v145_v24 = vpop.f32.mrb[0].mxu1 }
  0xe3   :  { %v158_v25 = vmul.f32 %v156_v21, %v104_v23  ;;  %v160_v26 = vmul.f32 %v156_v21, %v145_v24  ;;  %v106_v27 = vpop.f32.mrb[1].mxu0  ;;  %v147_v28 = vpop.f32.mrb[1].mxu1 }
  0xe4   :  { %v159_v29 = vmul.f32 %v156_v21, %v106_v27  ;;  %v161_v30 = vmul.f32 %v156_v21, %v147_v28  ;;  %v108_v31 = vpop.f32.mrb[2].mxu0  ;;  %v149_v32 = vpop.f32.mrb[2].mxu1 }
  0xe5   :  { %v168_v33 = vadd.f32 %v166_v22, %v158_v25  ;;  %v170_v34 = vadd.f32 %v166_v22, %v160_v26  ;;  %v109_v35 = vpop.f32.mrb[3].mxu0  ;;  %v150_v36 = vpop.f32.mrb[3].mxu1 }
  0xe6   :  { %v169_v37 = vadd.f32 %v166_v22, %v159_v29  ;;  %v171_v38 = vadd.f32 %v166_v22, %v161_v30 }
  0xe7   :  { %v173_v39 = vpack.c.bf16 %v168_v33, %v168_v33  ;;  %v175_v40 = vpack.c.bf16 %v170_v34, %v170_v34 }
  0xe8   :  { %v174_v41 = vpack.c.bf16 %v169_v37, %v169_v37  ;;  %v176_v42 = vpack.c.bf16 %v171_v38, %v171_v38 }
  0xe9   :  { %v183_v43 = vsel %vm181_vm2, %v173_v39, 0  ;;  %v189_v44 = vsel %vm181_vm2, %v175_v40, 0 }
  0xea   :  { %440 = vmatprep.subr.msk.bf16.mxu0 %vm181_vm2, %v174_v41  ;;  %442 = vmatprep.subr.msk.bf16.mxu1 %vm181_vm2, %v176_v42 }
  0xeb   :  { %195 = vmatpush1.bf16.msra.mxu0 %v183_v43  ;;  %236 = vmatpush1.bf16.msra.mxu1 %v189_v44 }
  0xee   :  { %441 = vmatmul.mubr.msk.bf16.vlgmr.msra.gmra.mrb[4].mxu0 %vm177_vm3, %v172_v45  ;;  %443 = vmatmul.mubr.msk.bf16.vlgmr.msra.gmra.mrb[4].mxu1 %vm177_vm3, %v172_v45 }
  0xef   :  { %354 = vmatprep.mubr.bf16.mxu0 %v474_v4  ;;  %395 = vmatprep.mubr.bf16.mxu1 %v474_v4 }
 0x1c1   :  { %v228_v48 = vpop.f32.mrb[4].mxu0  ;;  %v269_v49 = vpop.f32.mrb[4].mxu1 }
 0x1c2   :  { %v282_v50 = vmul.f32 %v280_v46, %v228_v48  ;;  %v284_v51 = vmul.f32 %v280_v46, %v269_v49  ;;  %v230_v52 = vpop.f32.mrb[5].mxu0  ;;  %v271_v53 = vpop.f32.mrb[5].mxu1 }
 0x1c3   :  { %v283_v54 = vmul.f32 %v280_v46, %v230_v52  ;;  %v285_v55 = vmul.f32 %v280_v46, %v271_v53  ;;  %v232_v56 = vpop.f32.mrb[6].mxu0  ;;  %v273_v57 = vpop.f32.mrb[6].mxu1 }
 0x1c4   :  { %v292_v58 = vadd.f32 %v290_v47, %v282_v50  ;;  %v294_v59 = vadd.f32 %v290_v47, %v284_v51  ;;  %v233_v60 = vpop.f32.mrb[7].mxu0  ;;  %v274_v61 = vpop.f32.mrb[7].mxu1 }
 0x1c5   :  { %v293_v62 = vadd.f32 %v290_v47, %v283_v54  ;;  %v295_v63 = vadd.f32 %v290_v47, %v285_v55 }
 0x1c6   :  { %v297_v0 = vpack.c.bf16 %v292_v58, %v292_v58  ;;  %v299_v1 = vpack.c.bf16 %v294_v59, %v294_v59 }
 0x1c7   :  { %v298_v2 = vpack.c.bf16 %v293_v62, %v293_v62  ;;  %v300_v3 = vpack.c.bf16 %v295_v63, %v295_v63 }
 0x1c8   :  { %v311_v4 = vsel %vm57_vm0, %v297_v0, 0  ;;  %v317_v5 = vsel %vm57_vm0, %v299_v1, 0 }
 0x1c9   :  { %444 = vmatprep.subr.msk.bf16.mxu0 %vm57_vm0, %v298_v2  ;;  %446 = vmatprep.subr.msk.bf16.mxu1 %vm57_vm0, %v300_v3 }
 0x1ca   :  { %323 = vmatpush1.bf16.msra.mxu0 %v311_v4  ;;  %364 = vmatpush1.bf16.msra.mxu1 %v317_v5 }
 0x1cd   :  { %445 = vmatmul.mubr.msk.bf16.vlgmr.msra.gmra.mrb[8].mxu0 %vm53_vm1, %v296_v6  ;;  %447 = vmatmul.mubr.msk.bf16.vlgmr.msra.gmra.mrb[8].mxu1 %vm53_vm1, %v296_v6 }
 0x2a0   :  { %v356_v8 = vpop.f32.mrb[8].mxu0  ;;  %v397_v9 = vpop.f32.mrb[8].mxu1 }
 0x2a1   :  { %v357_v10 = vadd.f32 %v356_v8, %v305_v7  ;;  %v398_v11 = vadd.f32 %v397_v9, %v305_v7  ;;  %v358_v12 = vpop.f32.mrb[9].mxu0  ;;  %v399_v13 = vpop.f32.mrb[9].mxu1 }
 0x2a2   :  { %v359_v14 = vadd.f32 %v358_v12, %v305_v7  ;;  %v400_v15 = vadd.f32 %v399_v13, %v305_v7  ;;  %v360_v16 = vpop.f32.mrb[10].mxu0  ;;  %v401_v17 = vpop.f32.mrb[10].mxu1 }
 0x2a3   :  { %v448_v18 = vmul.f32 -1.442695, %v357_v10  ;;  %v450_v19 = vmul.f32 -1.442695, %v398_v11  ;;  %v361_v20 = vpop.f32.mrb[11].mxu0  ;;  %v402_v21 = vpop.f32.mrb[11].mxu1 }
 0x2a4   :  { %v449_v22 = vmul.f32 -1.442695, %v359_v14  ;;  %v451_v23 = vmul.f32 -1.442695, %v400_v15 }
 0x2a5   :  { %457 = vpow2.f32 %v448_v18 }
 0x2a6   :  { %459 = vpow2.f32 %v450_v19 }
 0x2a7   :  { %461 = vpow2.f32 %v449_v22 }
 0x2a8   :  { %463 = vpow2.f32 %v451_v23 }
 0x2af   :  { %v458_v24 = vpop.eup %457 }
 0x2b0   :  { %v460_v25 = vpop.eup %459  ;;  %v416_v26 = vadd.f32 1.0, %v458_v24 }
 0x2b1   :  { %v462_v27 = vpop.eup %461  ;;  %v418_v28 = vadd.f32 1.0, %v460_v25 }
 0x2b2   :  { %v464_v29 = vpop.eup %463  ;;  %465 = vrcp.f32 %v416_v26  ;;  %v417_v30 = vadd.f32 1.0, %v462_v27 }
 0x2b3   :  { %467 = vrcp.f32 %v418_v28  ;;  %v419_v31 = vadd.f32 1.0, %v464_v29 }
 0x2b4   :  { %469 = vrcp.f32 %v417_v30 }
 0x2b5   :  { %471 = vrcp.f32 %v419_v31 }
 0x2bc   :  { %v466_v32 = vpop.eup %465 }
 0x2bd   :  { %v468_v33 = vpop.eup %467  ;;  %428 = vst [vmem:[%s593_s9] sm:$0xff] %v466_v32 }
 0x2be   :  { %v470_v34 = vpop.eup %469  ;;  %430 = vst [vmem:[%s593_s9 + $0x10] sm:$0xff] %v468_v33 }
 0x2bf   :  { %v472_v35 = vpop.eup %471  ;;  %429 = vst [vmem:[%s593_s9 + $0x8] sm:$0xff] %v470_v34 }
 0x2c0   :  { %431 = vst [vmem:[%s593_s9 + $0x18] sm:$0xff] %v472_v35 }

</bundles_post_ra>
